<compile_context>
chip_gen: v7x
topology: tpu7x:2x2x1
jax: 0.10.0
libtpu: 0.0.40
codegen_flags: <defaults>
</compile_context>

<pallas_src>
import functools
import math

import jax
import jax.numpy as jnp
from jax import lax
from jax.experimental import pallas as pl
from jax.experimental.pallas import tpu as pltpu


def _layer_norm_f32(y, gamma_row, beta_row, eps=1e-5):
    """Two-pass (centered-variance) LayerNorm over the last dim, f32."""
    y = y.astype(jnp.float32)
    mean = jnp.mean(y, axis=-1, keepdims=True)
    c = y - mean
    var = jnp.mean(c * c, axis=-1, keepdims=True)
    return c * lax.rsqrt(var + eps) * gamma_row + beta_row


def _transformer_block_kernel(
    x_ref,            # (TB, S, D)  f32
    wqkv_ref,         # (D, 3D)     bf16
    bqkv_ref,         # (1, 3D)     f32
    wo_ref,           # (D, D)      bf16
    w12_ref,          # (D, 2*dh)   bf16
    b12_ref,          # (1, 2*dh)   f32
    w3_ref,           # (dh, D)     bf16
    vecs_ref,         # (8, D)      f32 rows: bo, ln1g, ln1b, ln2g, ln2b, b3, 0, 0
    o_ref,            # (TB, S, D)
    ctx_scratch,      # VMEM (TB*S, D) f32
    *, num_heads, d_k, tb, seq, masked, attn_type):
    D = wo_ref.shape[1]
    dh = w3_ref.shape[0]
    TS = tb * seq

    bo   = vecs_ref[0:1, :]
    ln1g = vecs_ref[1:2, :]
    ln1b = vecs_ref[2:3, :]
    ln2g = vecs_ref[3:4, :]
    ln2b = vecs_ref[4:5, :]
    b3   = vecs_ref[5:6, :]

    # ---- LayerNorm 1 (do not keep x live past this point) ----
    xn = _layer_norm_f32(x_ref[...].reshape(TS, D), ln1g, ln1b)
    xn_bf = xn.astype(jnp.bfloat16)

    # ---- fused QKV projection: one (TS, D) x (D, 3D) matmul ----
    qkv = jnp.dot(xn_bf, wqkv_ref[...],
                  preferred_element_type=jnp.float32) + bqkv_ref[...]
    scale = 1.0 / math.sqrt(d_k)
    q = (qkv[:, 0:D] * scale).astype(jnp.bfloat16)      # scale folded into q
    k = qkv[:, D:2 * D].astype(jnp.bfloat16)
    v = qkv[:, 2 * D:3 * D].astype(jnp.bfloat16)

    use_causal = bool(masked) and attn_type == 'temporal'
    if use_causal:
        row = lax.broadcasted_iota(jnp.int32, (seq, seq), 0)
        col = lax.broadcasted_iota(jnp.int32, (seq, seq), 1)
        causal_mask = col > row

    # ---- per-(sequence, head) attention; ctx written to lane slices ----
    for t in range(tb):
        r0 = t * seq
        for hh in range(num_heads):
            lo = hh * d_k
            qh = q[r0:r0 + seq, lo:lo + d_k]              # (S, d_k) bf16
            kh = k[r0:r0 + seq, lo:lo + d_k]
            vh = v[r0:r0 + seq, lo:lo + d_k]
            # q @ k^T without materializing an explicit transpose.
            s_h = lax.dot_general(qh, kh, (((1,), (1,)), ((), ())),
                                  preferred_element_type=jnp.float32)
            if use_causal:
                s_h = jnp.where(causal_mask, -1e30, s_h)
            m = jnp.max(s_h, axis=-1, keepdims=True)
            p = jnp.exp(s_h - m)
            a = p * pl.reciprocal(jnp.sum(p, axis=-1, keepdims=True),
                                  approx=True)
            ctx_scratch[r0:r0 + seq, lo:lo + d_k] = jnp.dot(
                a.astype(jnp.bfloat16), vh, preferred_element_type=jnp.float32)

    # ---- output projection + residual 1 (re-read x from VMEM) ----
    attn_out = jnp.dot(ctx_scratch[...].astype(jnp.bfloat16), wo_ref[...],
                       preferred_element_type=jnp.float32) + bo
    x1 = x_ref[...].reshape(TS, D).astype(jnp.float32) + attn_out

    # ---- LayerNorm 2 + GLU feed-forward (fused w1|w2 matmul) ----
    xn2_bf = _layer_norm_f32(x1, ln2g, ln2b).astype(jnp.bfloat16)
    g12 = jnp.dot(xn2_bf, w12_ref[...],
                  preferred_element_type=jnp.float32) + b12_ref[...]
    g1 = g12[:, 0:dh]
    g2 = g12[:, dh:2 * dh]
    silu = g2 * pl.reciprocal(1.0 + jnp.exp(-g2), approx=True)   # SiLU, EUP recip
    gated = (g1 * silu).astype(jnp.bfloat16)
    glu_out = jnp.dot(gated, w3_ref[...],
                      preferred_element_type=jnp.float32) + b3

    o_ref[...] = (x1 + glu_out).reshape(tb, seq, D).astype(o_ref.dtype)


def transformer_block(x, params, *, num_heads, masked=False,
                      attn_type='spatial'):
    """Forward pass of TransformerBlock (eval mode).

    x:      (B, S, d_model) float32
    params: dict of PyTorch-layout parameters:
      wq/wk/wv/wo: (d_model, d_model)   bq/bk/bv/bo: (d_model,)
      ln1_g/ln1_b/ln2_g/ln2_b: (d_model,)
      w1/w2: (d_hidden, d_model)  b1/b2: (d_hidden,)
      w3:    (d_model, d_hidden)  b3:    (d_model,)
    returns (B, S, d_model)
    """
    B, S, D = x.shape
    d_hidden = params['w1'].shape[0]
    assert D % num_heads == 0
    d_k = D // num_heads

    # Keep >=2 grid steps so both v7x TensorCores get work; on single-TC
    # chips the extra step only costs one grid iteration of overhead.
    num_steps = 2 if B >= 2 else 1
    assert B % num_steps == 0, (B, num_steps)
    TB = B // num_steps

    def wmat(name):
        # PyTorch Linear weight is (out, in); kernel wants (in, out).
        # bf16: native MXU input, halves weight DMA traffic.
        return jnp.asarray(params[name], jnp.float32).T.astype(jnp.bfloat16)

    def vec(name):
        return jnp.asarray(params[name], jnp.float32)

    # Fused QKV weight / bias.
    wqkv = jnp.concatenate([wmat('wq'), wmat('wk'), wmat('wv')], axis=1)  # (D,3D)
    bqkv = jnp.concatenate([vec('bq'), vec('bk'), vec('bv')]).reshape(1, 3 * D)
    # Fused FFN stage-1 weight / bias.
    w12 = jnp.concatenate([wmat('w1'), wmat('w2')], axis=1)              # (D,2dh)
    b12 = jnp.concatenate([vec('b1'), vec('b2')]).reshape(1, 2 * d_hidden)
    wo, w3 = wmat('wo'), wmat('w3')                                      # (D,D),(dh,D)
    # Remaining (D,)-sized vectors packed into one (8, D) table.
    zero = jnp.zeros((D,), jnp.float32)
    vecs = jnp.stack([vec('bo'), vec('ln1_g'), vec('ln1_b'),
                      vec('ln2_g'), vec('ln2_b'), vec('b3'),
                      zero, zero], axis=0)                               # (8, D)

    kernel = functools.partial(
        _transformer_block_kernel,
        num_heads=num_heads, d_k=d_k, tb=TB, seq=S,
        masked=masked, attn_type=attn_type)

    def const_spec(shape):
        return pl.BlockSpec(shape, lambda b: (0, 0))

    return pl.pallas_call(
        kernel,
        out_shape=jax.ShapeDtypeStruct((B, S, D), x.dtype),
        grid_spec=pltpu.PrefetchScalarGridSpec(
            num_scalar_prefetch=0,
            grid=(num_steps,),
            in_specs=[
                pl.BlockSpec((TB, S, D), lambda b: (b, 0, 0)),   # x
                const_spec((D, 3 * D)),                          # wqkv
                const_spec((1, 3 * D)),                          # bqkv
                const_spec((D, D)),                              # wo
                const_spec((D, 2 * d_hidden)),                   # w12
                const_spec((1, 2 * d_hidden)),                   # b12
                const_spec((d_hidden, D)),                       # w3
                const_spec((8, D)),                              # packed vectors
            ],
            out_specs=pl.BlockSpec((TB, S, D), lambda b: (b, 0, 0)),
            scratch_shapes=[pltpu.VMEM((TB * S, D), jnp.float32)],
        ),
        compiler_params=pltpu.CompilerParams(
            dimension_semantics=("parallel",),
            vmem_limit_bytes=32 * 1024 * 1024),
    )(x, wqkv, bqkv, wo, w12, b12, w3, vecs)


def _reference(x, params, *, num_heads, masked=False, attn_type='spatial'):
    """Pure-JAX f32 reference matching the PyTorch module (eval mode)."""
    B, S, D = x.shape
    d_k = D // num_heads

    def ln(y, g, b):
        mean = jnp.mean(y, -1, keepdims=True)
        var = jnp.mean((y - mean) ** 2, -1, keepdims=True)
        return (y - mean) / jnp.sqrt(var + 1e-5) * g + b

    def linear(y, w, b):
        return y @ w.T + b

    xn = ln(x, params['ln1_g'], params['ln1_b'])
    q = linear(xn, params['wq'], params['bq'])
    k = linear(xn, params['wk'], params['bk'])
    v = linear(xn, params['wv'], params['bv'])

    def split(t):
        return t.reshape(B, S, num_heads, d_k).transpose(0, 2, 1, 3)

    qh, kh, vh = split(q), split(k), split(v)
    scores = jnp.einsum('bhqd,bhkd->bhqk', qh, kh) / math.sqrt(d_k)
    if masked and attn_type == 'temporal':
        mask = jnp.triu(jnp.ones((S, S), bool), 1)
        scores = jnp.where(mask, -jnp.inf, scores)
    attn = jax.nn.softmax(scores, axis=-1)
    ctx = jnp.einsum('bhqk,bhkd->bhqd', attn, vh).transpose(0, 2, 1, 3).reshape(B, S, D)
    x1 = x + linear(ctx, params['wo'], params['bo'])

    xn2 = ln(x1, params['ln2_g'], params['ln2_b'])
    g1 = linear(xn2, params['w1'], params['b1'])
    g2 = linear(xn2, params['w2'], params['b2'])
    glu = linear(g1 * jax.nn.silu(g2), params['w3'], params['b3'])
    return x1 + glu


if __name__ == "__main__":
    # Small, lane-aligned config: encoder_only (unmasked), spatial attention.
    batch = 4
    num_frames, N = 8, 16
    seq = num_frames * N            # 128
    d_model, d_hidden, heads = 128, 256, 4

    key = jax.random.PRNGKey(0)
    keys = jax.random.split(key, 20)

    def tn(k, shape, std=0.02):
        return (std * jax.random.truncated_normal(k, -2.0, 2.0, shape)).astype(jnp.float32)

    x = jax.random.normal(keys[0], (batch, seq, d_model), dtype=jnp.float32)

    params = dict(
        wq=tn(keys[1], (d_model, d_model)), bq=tn(keys[2], (d_model,)),
        wk=tn(keys[3], (d_model, d_model)), bk=tn(keys[4], (d_model,)),
        wv=tn(keys[5], (d_model, d_model)), bv=tn(keys[6], (d_model,)),
        wo=tn(keys[7], (d_model, d_model)), bo=tn(keys[8], (d_model,)),
        ln1_g=1.0 + tn(keys[9], (d_model,)), ln1_b=tn(keys[10], (d_model,)),
        ln2_g=1.0 + tn(keys[11], (d_model,)), ln2_b=tn(keys[12], (d_model,)),
        w1=tn(keys[13], (d_hidden, d_model)), b1=tn(keys[14], (d_hidden,)),
        w2=tn(keys[15], (d_hidden, d_model)), b2=tn(keys[16], (d_hidden,)),
        w3=tn(keys[17], (d_model, d_hidden)), b3=tn(keys[18], (d_model,)),
    )

    fwd = jax.jit(functools.partial(transformer_block, num_heads=heads,
                                    masked=False, attn_type='spatial'))
    out = fwd(x, params)
    jax.block_until_ready(out)

    assert out.shape == (batch, seq, d_model), out.shape

    ref = _reference(x, params, num_heads=heads, masked=False, attn_type='spatial')
    err = float(jnp.max(jnp.abs(out - ref)))
    # bf16 activations feeding the MXU + approx softmax reciprocal are the
    # dominant error sources; observed error is ~1e-3 scale.
    assert err < 1e-1, f"max abs error vs reference: {err}"
    print("KERNEL_OK")
</pallas_src>

<mosaic_0001>
module attributes {stable_mosaic.version = 11 : i64} {
  func.func @_transformer_block_kernel(%arg0: i32, %arg1: memref<2x128x128xf32, #tpu.memory_space<vmem>>, %arg2: memref<128x384xbf16, #tpu.memory_space<vmem>>, %arg3: memref<1x384xf32, #tpu.memory_space<vmem>>, %arg4: memref<128x128xbf16, #tpu.memory_space<vmem>>, %arg5: memref<128x512xbf16, #tpu.memory_space<vmem>>, %arg6: memref<1x512xf32, #tpu.memory_space<vmem>>, %arg7: memref<256x128xbf16, #tpu.memory_space<vmem>>, %arg8: memref<8x128xf32, #tpu.memory_space<vmem>>, %arg9: memref<2x128x128xf32, #tpu.memory_space<vmem>>, %arg10: memref<256x128xf32, #tpu.memory_space<vmem>>) attributes {dimension_semantics = [#tpu.dimension_semantics<parallel>], iteration_bounds = array<i64: 2>, scalar_prefetch = 0 : i64, scratch_operands = 1 : i64, tpu.core_type = #tpu.core_type<tc>, window_params = [{transform_indices = @transform_0, window_bounds = array<i64: 2, 128, 128>}, {pipeline_mode = #tpu.pipeline_mode<synchronous>, transform_indices = @transform_1, window_bounds = array<i64: 128, 384>}, {pipeline_mode = #tpu.pipeline_mode<synchronous>, transform_indices = @transform_2, window_bounds = array<i64: 1, 384>}, {pipeline_mode = #tpu.pipeline_mode<synchronous>, transform_indices = @transform_3, window_bounds = array<i64: 128, 128>}, {pipeline_mode = #tpu.pipeline_mode<synchronous>, transform_indices = @transform_4, window_bounds = array<i64: 128, 512>}, {pipeline_mode = #tpu.pipeline_mode<synchronous>, transform_indices = @transform_5, window_bounds = array<i64: 1, 512>}, {pipeline_mode = #tpu.pipeline_mode<synchronous>, transform_indices = @transform_6, window_bounds = array<i64: 256, 128>}, {pipeline_mode = #tpu.pipeline_mode<synchronous>, transform_indices = @transform_7, window_bounds = array<i64: 8, 128>}, {transform_indices = @transform_8, window_bounds = array<i64: 2, 128, 128>}]} {
    %c0 = arith.constant 0 : index
    %c0_0 = arith.constant 0 : index
    %0 = vector.load %arg8[%c0, %c0_0] : memref<8x128xf32, #tpu.memory_space<vmem>>, vector<1x128xf32>
    %c1 = arith.constant 1 : index
    %c0_1 = arith.constant 0 : index
    %1 = vector.load %arg8[%c1, %c0_1] : memref<8x128xf32, #tpu.memory_space<vmem>>, vector<1x128xf32>
    %c2 = arith.constant 2 : index
    %c0_2 = arith.constant 0 : index
    %2 = vector.load %arg8[%c2, %c0_2] : memref<8x128xf32, #tpu.memory_space<vmem>>, vector<1x128xf32>
    %c3 = arith.constant 3 : index
    %c0_3 = arith.constant 0 : index
    %3 = vector.load %arg8[%c3, %c0_3] : memref<8x128xf32, #tpu.memory_space<vmem>>, vector<1x128xf32>
    %c4 = arith.constant 4 : index
    %c0_4 = arith.constant 0 : index
    %4 = vector.load %arg8[%c4, %c0_4] : memref<8x128xf32, #tpu.memory_space<vmem>>, vector<1x128xf32>
    %c5 = arith.constant 5 : index
    %c0_5 = arith.constant 0 : index
    %5 = vector.load %arg8[%c5, %c0_5] : memref<8x128xf32, #tpu.memory_space<vmem>>, vector<1x128xf32>
    %c0_6 = arith.constant 0 : index
    %c0_7 = arith.constant 0 : index
    %c0_8 = arith.constant 0 : index
    %6 = vector.load %arg1[%c0_6, %c0_7, %c0_8] : memref<2x128x128xf32, #tpu.memory_space<vmem>>, vector<2x128x128xf32>
    %7 = vector.shape_cast %6 : vector<2x128x128xf32> to vector<256x128xf32>
    %cst = arith.constant dense<0.000000e+00> : vector<256xf32>
    %8 = vector.multi_reduction <add>, %7, %cst [1] : vector<256x128xf32> to vector<256xf32>
    %9 = vector.shape_cast %8 : vector<256xf32> to vector<256x1xf32>
    %cst_9 = arith.constant 1.280000e+02 : f32
    %10 = vector.broadcast %cst_9 : f32 to vector<256x1xf32>
    %11 = arith.divf %9, %10 : vector<256x1xf32>
    %12 = vector.broadcast %11 : vector<256x1xf32> to vector<256x128xf32>
    %13 = arith.subf %7, %12 : vector<256x128xf32>
    %14 = arith.mulf %13, %13 : vector<256x128xf32>
    %cst_10 = arith.constant dense<0.000000e+00> : vector<256xf32>
    %15 = vector.multi_reduction <add>, %14, %cst_10 [1] : vector<256x128xf32> to vector<256xf32>
    %16 = vector.shape_cast %15 : vector<256xf32> to vector<256x1xf32>
    %cst_11 = arith.constant 1.280000e+02 : f32
    %17 = vector.broadcast %cst_11 : f32 to vector<256x1xf32>
    %18 = arith.divf %16, %17 : vector<256x1xf32>
    %cst_12 = arith.constant 9.99999974E-6 : f32
    %19 = vector.broadcast %cst_12 : f32 to vector<256x1xf32>
    %20 = arith.addf %18, %19 : vector<256x1xf32>
    %21 = math.rsqrt %20 : vector<256x1xf32>
    %22 = vector.broadcast %21 : vector<256x1xf32> to vector<256x128xf32>
    %23 = arith.mulf %13, %22 : vector<256x128xf32>
    %24 = vector.broadcast %1 : vector<1x128xf32> to vector<256x128xf32>
    %25 = arith.mulf %23, %24 : vector<256x128xf32>
    %26 = vector.broadcast %2 : vector<1x128xf32> to vector<256x128xf32>
    %27 = arith.addf %25, %26 : vector<256x128xf32>
    %28 = arith.truncf %27 : vector<256x128xf32> to vector<256x128xbf16>
    %c0_13 = arith.constant 0 : index
    %c0_14 = arith.constant 0 : index
    %29 = vector.load %arg2[%c0_13, %c0_14] : memref<128x384xbf16, #tpu.memory_space<vmem>>, vector<128x384xbf16>
    %cst_15 = arith.constant dense<0.000000e+00> : vector<256x384xf32>
    %30 = tpu.matmul %28, %29, %cst_15 {dimension_numbers = #tpu.dot_dimension_numbers<[1], [0], [0], [1], [0, 0, 1, 1], [], []>} : vector<256x128xbf16>, vector<128x384xbf16>, vector<256x384xf32> -> vector<256x384xf32>
    %c0_16 = arith.constant 0 : index
    %c0_17 = arith.constant 0 : index
    %31 = vector.load %arg3[%c0_16, %c0_17] : memref<1x384xf32, #tpu.memory_space<vmem>>, vector<1x384xf32>
    %32 = vector.broadcast %31 : vector<1x384xf32> to vector<256x384xf32>
    %33 = arith.addf %30, %32 : vector<256x384xf32>
    %34 = vector.extract_strided_slice %33 {offsets = [0, 0], sizes = [256, 128], strides = [1, 1]} : vector<256x384xf32> to vector<256x128xf32>
    %cst_18 = arith.constant 0.176776692 : f32
    %35 = vector.broadcast %cst_18 : f32 to vector<256x128xf32>
    %36 = arith.mulf %34, %35 : vector<256x128xf32>
    %37 = arith.truncf %36 : vector<256x128xf32> to vector<256x128xbf16>
    %38 = vector.extract_strided_slice %33 {offsets = [0, 128], sizes = [256, 128], strides = [1, 1]} : vector<256x384xf32> to vector<256x128xf32>
    %39 = arith.truncf %38 : vector<256x128xf32> to vector<256x128xbf16>
    %40 = vector.extract_strided_slice %33 {offsets = [0, 256], sizes = [256, 128], strides = [1, 1]} : vector<256x384xf32> to vector<256x128xf32>
    %41 = arith.truncf %40 : vector<256x128xf32> to vector<256x128xbf16>
    %42 = vector.extract_strided_slice %37 {offsets = [0, 0], sizes = [128, 32], strides = [1, 1]} : vector<256x128xbf16> to vector<128x32xbf16>
    %43 = vector.extract_strided_slice %39 {offsets = [0, 0], sizes = [128, 32], strides = [1, 1]} : vector<256x128xbf16> to vector<128x32xbf16>
    %44 = vector.extract_strided_slice %41 {offsets = [0, 0], sizes = [128, 32], strides = [1, 1]} : vector<256x128xbf16> to vector<128x32xbf16>
    %cst_19 = arith.constant dense<0.000000e+00> : vector<128x128xf32>
    %45 = tpu.matmul %42, %43, %cst_19 {dimension_numbers = #tpu.dot_dimension_numbers<[1], [1], [0], [0], [0, 0, 1, 0], [], []>} : vector<128x32xbf16>, vector<128x32xbf16>, vector<128x128xf32> -> vector<128x128xf32>
    %cst_20 = arith.constant dense<0xFF800000> : vector<128xf32>
    %46 = vector.multi_reduction <maximumf>, %45, %cst_20 [1] : vector<128x128xf32> to vector<128xf32>
    %47 = vector.shape_cast %46 : vector<128xf32> to vector<128x1xf32>
    %48 = vector.broadcast %47 : vector<128x1xf32> to vector<128x128xf32>
    %49 = arith.subf %45, %48 : vector<128x128xf32>
    %50 = math.exp %49 : vector<128x128xf32>
    %cst_21 = arith.constant dense<0.000000e+00> : vector<128xf32>
    %51 = vector.multi_reduction <add>, %50, %cst_21 [1] : vector<128x128xf32> to vector<128xf32>
    %52 = vector.shape_cast %51 : vector<128xf32> to vector<128x1xf32>
    %53 = tpu.reciprocal %52 {approx = true} : vector<128x1xf32> -> vector<128x1xf32>
    %54 = vector.broadcast %53 : vector<128x1xf32> to vector<128x128xf32>
    %55 = arith.mulf %50, %54 : vector<128x128xf32>
    %56 = arith.truncf %55 : vector<128x128xf32> to vector<128x128xbf16>
    %cst_22 = arith.constant dense<0.000000e+00> : vector<128x32xf32>
    %57 = tpu.matmul %56, %44, %cst_22 {dimension_numbers = #tpu.dot_dimension_numbers<[1], [0], [0], [1], [0, 0, 1, 1], [], []>} : vector<128x128xbf16>, vector<128x32xbf16>, vector<128x32xf32> -> vector<128x32xf32>
    %c0_23 = arith.constant 0 : index
    %c0_24 = arith.constant 0 : index
    %58 = vector.load %arg10[%c0_23, %c0_24] : memref<256x128xf32, #tpu.memory_space<vmem>>, vector<128x32xf32>
    tpu.vector_store %arg10[%c0_23, %c0_24], %57 {strides = array<i32>} : memref<256x128xf32, #tpu.memory_space<vmem>>, vector<128x32xf32>,
    %59 = vector.extract_strided_slice %37 {offsets = [0, 32], sizes = [128, 32], strides = [1, 1]} : vector<256x128xbf16> to vector<128x32xbf16>
    %60 = vector.extract_strided_slice %39 {offsets = [0, 32], sizes = [128, 32], strides = [1, 1]} : vector<256x128xbf16> to vector<128x32xbf16>
    %61 = vector.extract_strided_slice %41 {offsets = [0, 32], sizes = [128, 32], strides = [1, 1]} : vector<256x128xbf16> to vector<128x32xbf16>
    %cst_25 = arith.constant dense<0.000000e+00> : vector<128x128xf32>
    %62 = tpu.matmul %59, %60, %cst_25 {dimension_numbers = #tpu.dot_dimension_numbers<[1], [1], [0], [0], [0, 0, 1, 0], [], []>} : vector<128x32xbf16>, vector<128x32xbf16>, vector<128x128xf32> -> vector<128x128xf32>
    %cst_26 = arith.constant dense<0xFF800000> : vector<128xf32>
    %63 = vector.multi_reduction <maximumf>, %62, %cst_26 [1] : vector<128x128xf32> to vector<128xf32>
    %64 = vector.shape_cast %63 : vector<128xf32> to vector<128x1xf32>
    %65 = vector.broadcast %64 : vector<128x1xf32> to vector<128x128xf32>
    %66 = arith.subf %62, %65 : vector<128x128xf32>
    %67 = math.exp %66 : vector<128x128xf32>
    %cst_27 = arith.constant dense<0.000000e+00> : vector<128xf32>
    %68 = vector.multi_reduction <add>, %67, %cst_27 [1] : vector<128x128xf32> to vector<128xf32>
    %69 = vector.shape_cast %68 : vector<128xf32> to vector<128x1xf32>
    %70 = tpu.reciprocal %69 {approx = true} : vector<128x1xf32> -> vector<128x1xf32>
    %71 = vector.broadcast %70 : vector<128x1xf32> to vector<128x128xf32>
    %72 = arith.mulf %67, %71 : vector<128x128xf32>
    %73 = arith.truncf %72 : vector<128x128xf32> to vector<128x128xbf16>
    %cst_28 = arith.constant dense<0.000000e+00> : vector<128x32xf32>
    %74 = tpu.matmul %73, %61, %cst_28 {dimension_numbers = #tpu.dot_dimension_numbers<[1], [0], [0], [1], [0, 0, 1, 1], [], []>} : vector<128x128xbf16>, vector<128x32xbf16>, vector<128x32xf32> -> vector<128x32xf32>
    %c0_29 = arith.constant 0 : index
    %c32 = arith.constant 32 : index
    %75 = vector.load %arg10[%c0_29, %c32] : memref<256x128xf32, #tpu.memory_space<vmem>>, vector<128x32xf32>
    tpu.vector_store %arg10[%c0_29, %c32], %74 {strides = array<i32>} : memref<256x128xf32, #tpu.memory_space<vmem>>, vector<128x32xf32>,
    %76 = vector.extract_strided_slice %37 {offsets = [0, 64], sizes = [128, 32], strides = [1, 1]} : vector<256x128xbf16> to vector<128x32xbf16>
    %77 = vector.extract_strided_slice %39 {offsets = [0, 64], sizes = [128, 32], strides = [1, 1]} : vector<256x128xbf16> to vector<128x32xbf16>
    %78 = vector.extract_strided_slice %41 {offsets = [0, 64], sizes = [128, 32], strides = [1, 1]} : vector<256x128xbf16> to vector<128x32xbf16>
    %cst_30 = arith.constant dense<0.000000e+00> : vector<128x128xf32>
    %79 = tpu.matmul %76, %77, %cst_30 {dimension_numbers = #tpu.dot_dimension_numbers<[1], [1], [0], [0], [0, 0, 1, 0], [], []>} : vector<128x32xbf16>, vector<128x32xbf16>, vector<128x128xf32> -> vector<128x128xf32>
    %cst_31 = arith.constant dense<0xFF800000> : vector<128xf32>
    %80 = vector.multi_reduction <maximumf>, %79, %cst_31 [1] : vector<128x128xf32> to vector<128xf32>
    %81 = vector.shape_cast %80 : vector<128xf32> to vector<128x1xf32>
    %82 = vector.broadcast %81 : vector<128x1xf32> to vector<128x128xf32>
    %83 = arith.subf %79, %82 : vector<128x128xf32>
    %84 = math.exp %83 : vector<128x128xf32>
    %cst_32 = arith.constant dense<0.000000e+00> : vector<128xf32>
    %85 = vector.multi_reduction <add>, %84, %cst_32 [1] : vector<128x128xf32> to vector<128xf32>
    %86 = vector.shape_cast %85 : vector<128xf32> to vector<128x1xf32>
    %87 = tpu.reciprocal %86 {approx = true} : vector<128x1xf32> -> vector<128x1xf32>
    %88 = vector.broadcast %87 : vector<128x1xf32> to vector<128x128xf32>
    %89 = arith.mulf %84, %88 : vector<128x128xf32>
    %90 = arith.truncf %89 : vector<128x128xf32> to vector<128x128xbf16>
    %cst_33 = arith.constant dense<0.000000e+00> : vector<128x32xf32>
    %91 = tpu.matmul %90, %78, %cst_33 {dimension_numbers = #tpu.dot_dimension_numbers<[1], [0], [0], [1], [0, 0, 1, 1], [], []>} : vector<128x128xbf16>, vector<128x32xbf16>, vector<128x32xf32> -> vector<128x32xf32>
    %c0_34 = arith.constant 0 : index
    %c64 = arith.constant 64 : index
    %92 = vector.load %arg10[%c0_34, %c64] : memref<256x128xf32, #tpu.memory_space<vmem>>, vector<128x32xf32>
    tpu.vector_store %arg10[%c0_34, %c64], %91 {strides = array<i32>} : memref<256x128xf32, #tpu.memory_space<vmem>>, vector<128x32xf32>,
    %93 = vector.extract_strided_slice %37 {offsets = [0, 96], sizes = [128, 32], strides = [1, 1]} : vector<256x128xbf16> to vector<128x32xbf16>
    %94 = vector.extract_strided_slice %39 {offsets = [0, 96], sizes = [128, 32], strides = [1, 1]} : vector<256x128xbf16> to vector<128x32xbf16>
    %95 = vector.extract_strided_slice %41 {offsets = [0, 96], sizes = [128, 32], strides = [1, 1]} : vector<256x128xbf16> to vector<128x32xbf16>
    %cst_35 = arith.constant dense<0.000000e+00> : vector<128x128xf32>
    %96 = tpu.matmul %93, %94, %cst_35 {dimension_numbers = #tpu.dot_dimension_numbers<[1], [1], [0], [0], [0, 0, 1, 0], [], []>} : vector<128x32xbf16>, vector<128x32xbf16>, vector<128x128xf32> -> vector<128x128xf32>
    %cst_36 = arith.constant dense<0xFF800000> : vector<128xf32>
    %97 = vector.multi_reduction <maximumf>, %96, %cst_36 [1] : vector<128x128xf32> to vector<128xf32>
    %98 = vector.shape_cast %97 : vector<128xf32> to vector<128x1xf32>
    %99 = vector.broadcast %98 : vector<128x1xf32> to vector<128x128xf32>
    %100 = arith.subf %96, %99 : vector<128x128xf32>
    %101 = math.exp %100 : vector<128x128xf32>
    %cst_37 = arith.constant dense<0.000000e+00> : vector<128xf32>
    %102 = vector.multi_reduction <add>, %101, %cst_37 [1] : vector<128x128xf32> to vector<128xf32>
    %103 = vector.shape_cast %102 : vector<128xf32> to vector<128x1xf32>
    %104 = tpu.reciprocal %103 {approx = true} : vector<128x1xf32> -> vector<128x1xf32>
    %105 = vector.broadcast %104 : vector<128x1xf32> to vector<128x128xf32>
    %106 = arith.mulf %101, %105 : vector<128x128xf32>
    %107 = arith.truncf %106 : vector<128x128xf32> to vector<128x128xbf16>
    %cst_38 = arith.constant dense<0.000000e+00> : vector<128x32xf32>
    %108 = tpu.matmul %107, %95, %cst_38 {dimension_numbers = #tpu.dot_dimension_numbers<[1], [0], [0], [1], [0, 0, 1, 1], [], []>} : vector<128x128xbf16>, vector<128x32xbf16>, vector<128x32xf32> -> vector<128x32xf32>
    %c0_39 = arith.constant 0 : index
    %c96 = arith.constant 96 : index
    %109 = vector.load %arg10[%c0_39, %c96] : memref<256x128xf32, #tpu.memory_space<vmem>>, vector<128x32xf32>
    tpu.vector_store %arg10[%c0_39, %c96], %108 {strides = array<i32>} : memref<256x128xf32, #tpu.memory_space<vmem>>, vector<128x32xf32>,
    %110 = vector.extract_strided_slice %37 {offsets = [128, 0], sizes = [128, 32], strides = [1, 1]} : vector<256x128xbf16> to vector<128x32xbf16>
    %111 = vector.extract_strided_slice %39 {offsets = [128, 0], sizes = [128, 32], strides = [1, 1]} : vector<256x128xbf16> to vector<128x32xbf16>
    %112 = vector.extract_strided_slice %41 {offsets = [128, 0], sizes = [128, 32], strides = [1, 1]} : vector<256x128xbf16> to vector<128x32xbf16>
    %cst_40 = arith.constant dense<0.000000e+00> : vector<128x128xf32>
    %113 = tpu.matmul %110, %111, %cst_40 {dimension_numbers = #tpu.dot_dimension_numbers<[1], [1], [0], [0], [0, 0, 1, 0], [], []>} : vector<128x32xbf16>, vector<128x32xbf16>, vector<128x128xf32> -> vector<128x128xf32>
    %cst_41 = arith.constant dense<0xFF800000> : vector<128xf32>
    %114 = vector.multi_reduction <maximumf>, %113, %cst_41 [1] : vector<128x128xf32> to vector<128xf32>
    %115 = vector.shape_cast %114 : vector<128xf32> to vector<128x1xf32>
    %116 = vector.broadcast %115 : vector<128x1xf32> to vector<128x128xf32>
    %117 = arith.subf %113, %116 : vector<128x128xf32>
    %118 = math.exp %117 : vector<128x128xf32>
    %cst_42 = arith.constant dense<0.000000e+00> : vector<128xf32>
    %119 = vector.multi_reduction <add>, %118, %cst_42 [1] : vector<128x128xf32> to vector<128xf32>
    %120 = vector.shape_cast %119 : vector<128xf32> to vector<128x1xf32>
    %121 = tpu.reciprocal %120 {approx = true} : vector<128x1xf32> -> vector<128x1xf32>
    %122 = vector.broadcast %121 : vector<128x1xf32> to vector<128x128xf32>
    %123 = arith.mulf %118, %122 : vector<128x128xf32>
    %124 = arith.truncf %123 : vector<128x128xf32> to vector<128x128xbf16>
    %cst_43 = arith.constant dense<0.000000e+00> : vector<128x32xf32>
    %125 = tpu.matmul %124, %112, %cst_43 {dimension_numbers = #tpu.dot_dimension_numbers<[1], [0], [0], [1], [0, 0, 1, 1], [], []>} : vector<128x128xbf16>, vector<128x32xbf16>, vector<128x32xf32> -> vector<128x32xf32>
    %c128 = arith.constant 128 : index
    %c0_44 = arith.constant 0 : index
    %126 = vector.load %arg10[%c128, %c0_44] : memref<256x128xf32, #tpu.memory_space<vmem>>, vector<128x32xf32>
    tpu.vector_store %arg10[%c128, %c0_44], %125 {strides = array<i32>} : memref<256x128xf32, #tpu.memory_space<vmem>>, vector<128x32xf32>,
    %127 = vector.extract_strided_slice %37 {offsets = [128, 32], sizes = [128, 32], strides = [1, 1]} : vector<256x128xbf16> to vector<128x32xbf16>
    %128 = vector.extract_strided_slice %39 {offsets = [128, 32], sizes = [128, 32], strides = [1, 1]} : vector<256x128xbf16> to vector<128x32xbf16>
    %129 = vector.extract_strided_slice %41 {offsets = [128, 32], sizes = [128, 32], strides = [1, 1]} : vector<256x128xbf16> to vector<128x32xbf16>
    %cst_45 = arith.constant dense<0.000000e+00> : vector<128x128xf32>
    %130 = tpu.matmul %127, %128, %cst_45 {dimension_numbers = #tpu.dot_dimension_numbers<[1], [1], [0], [0], [0, 0, 1, 0], [], []>} : vector<128x32xbf16>, vector<128x32xbf16>, vector<128x128xf32> -> vector<128x128xf32>
    %cst_46 = arith.constant dense<0xFF800000> : vector<128xf32>
    %131 = vector.multi_reduction <maximumf>, %130, %cst_46 [1] : vector<128x128xf32> to vector<128xf32>
    %132 = vector.shape_cast %131 : vector<128xf32> to vector<128x1xf32>
    %133 = vector.broadcast %132 : vector<128x1xf32> to vector<128x128xf32>
    %134 = arith.subf %130, %133 : vector<128x128xf32>
    %135 = math.exp %134 : vector<128x128xf32>
    %cst_47 = arith.constant dense<0.000000e+00> : vector<128xf32>
    %136 = vector.multi_reduction <add>, %135, %cst_47 [1] : vector<128x128xf32> to vector<128xf32>
    %137 = vector.shape_cast %136 : vector<128xf32> to vector<128x1xf32>
    %138 = tpu.reciprocal %137 {approx = true} : vector<128x1xf32> -> vector<128x1xf32>
    %139 = vector.broadcast %138 : vector<128x1xf32> to vector<128x128xf32>
    %140 = arith.mulf %135, %139 : vector<128x128xf32>
    %141 = arith.truncf %140 : vector<128x128xf32> to vector<128x128xbf16>
    %cst_48 = arith.constant dense<0.000000e+00> : vector<128x32xf32>
    %142 = tpu.matmul %141, %129, %cst_48 {dimension_numbers = #tpu.dot_dimension_numbers<[1], [0], [0], [1], [0, 0, 1, 1], [], []>} : vector<128x128xbf16>, vector<128x32xbf16>, vector<128x32xf32> -> vector<128x32xf32>
    %c128_49 = arith.constant 128 : index
    %c32_50 = arith.constant 32 : index
    %143 = vector.load %arg10[%c128_49, %c32_50] : memref<256x128xf32, #tpu.memory_space<vmem>>, vector<128x32xf32>
    tpu.vector_store %arg10[%c128_49, %c32_50], %142 {strides = array<i32>} : memref<256x128xf32, #tpu.memory_space<vmem>>, vector<128x32xf32>,
    %144 = vector.extract_strided_slice %37 {offsets = [128, 64], sizes = [128, 32], strides = [1, 1]} : vector<256x128xbf16> to vector<128x32xbf16>
    %145 = vector.extract_strided_slice %39 {offsets = [128, 64], sizes = [128, 32], strides = [1, 1]} : vector<256x128xbf16> to vector<128x32xbf16>
    %146 = vector.extract_strided_slice %41 {offsets = [128, 64], sizes = [128, 32], strides = [1, 1]} : vector<256x128xbf16> to vector<128x32xbf16>
    %cst_51 = arith.constant dense<0.000000e+00> : vector<128x128xf32>
    %147 = tpu.matmul %144, %145, %cst_51 {dimension_numbers = #tpu.dot_dimension_numbers<[1], [1], [0], [0], [0, 0, 1, 0], [], []>} : vector<128x32xbf16>, vector<128x32xbf16>, vector<128x128xf32> -> vector<128x128xf32>
    %cst_52 = arith.constant dense<0xFF800000> : vector<128xf32>
    %148 = vector.multi_reduction <maximumf>, %147, %cst_52 [1] : vector<128x128xf32> to vector<128xf32>
    %149 = vector.shape_cast %148 : vector<128xf32> to vector<128x1xf32>
    %150 = vector.broadcast %149 : vector<128x1xf32> to vector<128x128xf32>
    %151 = arith.subf %147, %150 : vector<128x128xf32>
    %152 = math.exp %151 : vector<128x128xf32>
    %cst_53 = arith.constant dense<0.000000e+00> : vector<128xf32>
    %153 = vector.multi_reduction <add>, %152, %cst_53 [1] : vector<128x128xf32> to vector<128xf32>
    %154 = vector.shape_cast %153 : vector<128xf32> to vector<128x1xf32>
    %155 = tpu.reciprocal %154 {approx = true} : vector<128x1xf32> -> vector<128x1xf32>
    %156 = vector.broadcast %155 : vector<128x1xf32> to vector<128x128xf32>
    %157 = arith.mulf %152, %156 : vector<128x128xf32>
    %158 = arith.truncf %157 : vector<128x128xf32> to vector<128x128xbf16>
    %cst_54 = arith.constant dense<0.000000e+00> : vector<128x32xf32>
    %159 = tpu.matmul %158, %146, %cst_54 {dimension_numbers = #tpu.dot_dimension_numbers<[1], [0], [0], [1], [0, 0, 1, 1], [], []>} : vector<128x128xbf16>, vector<128x32xbf16>, vector<128x32xf32> -> vector<128x32xf32>
    %c128_55 = arith.constant 128 : index
    %c64_56 = arith.constant 64 : index
    %160 = vector.load %arg10[%c128_55, %c64_56] : memref<256x128xf32, #tpu.memory_space<vmem>>, vector<128x32xf32>
    tpu.vector_store %arg10[%c128_55, %c64_56], %159 {strides = array<i32>} : memref<256x128xf32, #tpu.memory_space<vmem>>, vector<128x32xf32>,
    %161 = vector.extract_strided_slice %37 {offsets = [128, 96], sizes = [128, 32], strides = [1, 1]} : vector<256x128xbf16> to vector<128x32xbf16>
    %162 = vector.extract_strided_slice %39 {offsets = [128, 96], sizes = [128, 32], strides = [1, 1]} : vector<256x128xbf16> to vector<128x32xbf16>
    %163 = vector.extract_strided_slice %41 {offsets = [128, 96], sizes = [128, 32], strides = [1, 1]} : vector<256x128xbf16> to vector<128x32xbf16>
    %cst_57 = arith.constant dense<0.000000e+00> : vector<128x128xf32>
    %164 = tpu.matmul %161, %162, %cst_57 {dimension_numbers = #tpu.dot_dimension_numbers<[1], [1], [0], [0], [0, 0, 1, 0], [], []>} : vector<128x32xbf16>, vector<128x32xbf16>, vector<128x128xf32> -> vector<128x128xf32>
    %cst_58 = arith.constant dense<0xFF800000> : vector<128xf32>
    %165 = vector.multi_reduction <maximumf>, %164, %cst_58 [1] : vector<128x128xf32> to vector<128xf32>
    %166 = vector.shape_cast %165 : vector<128xf32> to vector<128x1xf32>
    %167 = vector.broadcast %166 : vector<128x1xf32> to vector<128x128xf32>
    %168 = arith.subf %164, %167 : vector<128x128xf32>
    %169 = math.exp %168 : vector<128x128xf32>
    %cst_59 = arith.constant dense<0.000000e+00> : vector<128xf32>
    %170 = vector.multi_reduction <add>, %169, %cst_59 [1] : vector<128x128xf32> to vector<128xf32>
    %171 = vector.shape_cast %170 : vector<128xf32> to vector<128x1xf32>
    %172 = tpu.reciprocal %171 {approx = true} : vector<128x1xf32> -> vector<128x1xf32>
    %173 = vector.broadcast %172 : vector<128x1xf32> to vector<128x128xf32>
    %174 = arith.mulf %169, %173 : vector<128x128xf32>
    %175 = arith.truncf %174 : vector<128x128xf32> to vector<128x128xbf16>
    %cst_60 = arith.constant dense<0.000000e+00> : vector<128x32xf32>
    %176 = tpu.matmul %175, %163, %cst_60 {dimension_numbers = #tpu.dot_dimension_numbers<[1], [0], [0], [1], [0, 0, 1, 1], [], []>} : vector<128x128xbf16>, vector<128x32xbf16>, vector<128x32xf32> -> vector<128x32xf32>
    %c128_61 = arith.constant 128 : index
    %c96_62 = arith.constant 96 : index
    %177 = vector.load %arg10[%c128_61, %c96_62] : memref<256x128xf32, #tpu.memory_space<vmem>>, vector<128x32xf32>
    tpu.vector_store %arg10[%c128_61, %c96_62], %176 {strides = array<i32>} : memref<256x128xf32, #tpu.memory_space<vmem>>, vector<128x32xf32>,
    %c0_63 = arith.constant 0 : index
    %c0_64 = arith.constant 0 : index
    %178 = vector.load %arg10[%c0_63, %c0_64] : memref<256x128xf32, #tpu.memory_space<vmem>>, vector<256x128xf32>
    %179 = arith.truncf %178 : vector<256x128xf32> to vector<256x128xbf16>
    %c0_65 = arith.constant 0 : index
    %c0_66 = arith.constant 0 : index
    %180 = vector.load %arg4[%c0_65, %c0_66] : memref<128x128xbf16, #tpu.memory_space<vmem>>, vector<128x128xbf16>
    %cst_67 = arith.constant dense<0.000000e+00> : vector<256x128xf32>
    %181 = tpu.matmul %179, %180, %cst_67 {dimension_numbers = #tpu.dot_dimension_numbers<[1], [0], [0], [1], [0, 0, 1, 1], [], []>} : vector<256x128xbf16>, vector<128x128xbf16>, vector<256x128xf32> -> vector<256x128xf32>
    %182 = vector.broadcast %0 : vector<1x128xf32> to vector<256x128xf32>
    %183 = arith.addf %181, %182 : vector<256x128xf32>
    %c0_68 = arith.constant 0 : index
    %c0_69 = arith.constant 0 : index
    %c0_70 = arith.constant 0 : index
    %184 = vector.load %arg1[%c0_68, %c0_69, %c0_70] : memref<2x128x128xf32, #tpu.memory_space<vmem>>, vector<2x128x128xf32>
    %185 = vector.shape_cast %184 : vector<2x128x128xf32> to vector<256x128xf32>
    %186 = arith.addf %185, %183 : vector<256x128xf32>
    %cst_71 = arith.constant dense<0.000000e+00> : vector<256xf32>
    %187 = vector.multi_reduction <add>, %186, %cst_71 [1] : vector<256x128xf32> to vector<256xf32>
    %188 = vector.shape_cast %187 : vector<256xf32> to vector<256x1xf32>
    %cst_72 = arith.constant 1.280000e+02 : f32
    %189 = vector.broadcast %cst_72 : f32 to vector<256x1xf32>
    %190 = arith.divf %188, %189 : vector<256x1xf32>
    %191 = vector.broadcast %190 : vector<256x1xf32> to vector<256x128xf32>
    %192 = arith.subf %186, %191 : vector<256x128xf32>
    %193 = arith.mulf %192, %192 : vector<256x128xf32>
    %cst_73 = arith.constant dense<0.000000e+00> : vector<256xf32>
    %194 = vector.multi_reduction <add>, %193, %cst_73 [1] : vector<256x128xf32> to vector<256xf32>
    %195 = vector.shape_cast %194 : vector<256xf32> to vector<256x1xf32>
    %cst_74 = arith.constant 1.280000e+02 : f32
    %196 = vector.broadcast %cst_74 : f32 to vector<256x1xf32>
    %197 = arith.divf %195, %196 : vector<256x1xf32>
    %cst_75 = arith.constant 9.99999974E-6 : f32
    %198 = vector.broadcast %cst_75 : f32 to vector<256x1xf32>
    %199 = arith.addf %197, %198 : vector<256x1xf32>
    %200 = math.rsqrt %199 : vector<256x1xf32>
    %201 = vector.broadcast %200 : vector<256x1xf32> to vector<256x128xf32>
    %202 = arith.mulf %192, %201 : vector<256x128xf32>
    %203 = vector.broadcast %3 : vector<1x128xf32> to vector<256x128xf32>
    %204 = arith.mulf %202, %203 : vector<256x128xf32>
    %205 = vector.broadcast %4 : vector<1x128xf32> to vector<256x128xf32>
    %206 = arith.addf %204, %205 : vector<256x128xf32>
    %207 = arith.truncf %206 : vector<256x128xf32> to vector<256x128xbf16>
    %c0_76 = arith.constant 0 : index
    %c0_77 = arith.constant 0 : index
    %208 = vector.load %arg5[%c0_76, %c0_77] : memref<128x512xbf16, #tpu.memory_space<vmem>>, vector<128x512xbf16>
    %cst_78 = arith.constant dense<0.000000e+00> : vector<256x512xf32>
    %209 = tpu.matmul %207, %208, %cst_78 {dimension_numbers = #tpu.dot_dimension_numbers<[1], [0], [0], [1], [0, 0, 1, 1], [], []>} : vector<256x128xbf16>, vector<128x512xbf16>, vector<256x512xf32> -> vector<256x512xf32>
    %c0_79 = arith.constant 0 : index
    %c0_80 = arith.constant 0 : index
    %210 = vector.load %arg6[%c0_79, %c0_80] : memref<1x512xf32, #tpu.memory_space<vmem>>, vector<1x512xf32>
    %211 = vector.broadcast %210 : vector<1x512xf32> to vector<256x512xf32>
    %212 = arith.addf %209, %211 : vector<256x512xf32>
    %213 = vector.extract_strided_slice %212 {offsets = [0, 0], sizes = [256, 256], strides = [1, 1]} : vector<256x512xf32> to vector<256x256xf32>
    %214 = vector.extract_strided_slice %212 {offsets = [0, 256], sizes = [256, 256], strides = [1, 1]} : vector<256x512xf32> to vector<256x256xf32>
    %cst_81 = arith.constant 0.000000e+00 : f32
    %215 = vector.broadcast %cst_81 : f32 to vector<256x256xf32>
    %216 = arith.subf %215, %214 : vector<256x256xf32>
    %217 = math.exp %216 : vector<256x256xf32>
    %cst_82 = arith.constant 1.000000e+00 : f32
    %218 = vector.broadcast %cst_82 : f32 to vector<256x256xf32>
    %219 = arith.addf %218, %217 : vector<256x256xf32>
    %220 = tpu.reciprocal %219 {approx = true} : vector<256x256xf32> -> vector<256x256xf32>
    %221 = arith.mulf %214, %220 : vector<256x256xf32>
    %222 = arith.mulf %213, %221 : vector<256x256xf32>
    %223 = arith.truncf %222 : vector<256x256xf32> to vector<256x256xbf16>
    %c0_83 = arith.constant 0 : index
    %c0_84 = arith.constant 0 : index
    %224 = vector.load %arg7[%c0_83, %c0_84] : memref<256x128xbf16, #tpu.memory_space<vmem>>, vector<256x128xbf16>
    %cst_85 = arith.constant dense<0.000000e+00> : vector<256x128xf32>
    %225 = tpu.matmul %223, %224, %cst_85 {dimension_numbers = #tpu.dot_dimension_numbers<[1], [0], [0], [1], [0, 0, 1, 1], [], []>} : vector<256x256xbf16>, vector<256x128xbf16>, vector<256x128xf32> -> vector<256x128xf32>
    %226 = vector.broadcast %5 : vector<1x128xf32> to vector<256x128xf32>
    %227 = arith.addf %225, %226 : vector<256x128xf32>
    %228 = arith.addf %186, %227 : vector<256x128xf32>
    %229 = vector.shape_cast %228 : vector<256x128xf32> to vector<2x128x128xf32>
    %c0_86 = arith.constant 0 : index
    %c0_87 = arith.constant 0 : index
    %c0_88 = arith.constant 0 : index
    %230 = vector.load %arg9[%c0_86, %c0_87, %c0_88] : memref<2x128x128xf32, #tpu.memory_space<vmem>>, vector<2x128x128xf32>
    tpu.vector_store %arg9[%c0_86, %c0_87, %c0_88], %229 {strides = array<i32>} : memref<2x128x128xf32, #tpu.memory_space<vmem>>, vector<2x128x128xf32>,
    return
  }
  func.func @transform_0(%arg0: i32) -> (i32, i32, i32) {
    %c0_i32 = arith.constant 0 : i32
    %c0_i32_0 = arith.constant 0 : i32
    %c0_i32_1 = arith.constant 0 : i32
    return %arg0, %c0_i32, %c0_i32_0 : i32, i32, i32
  }
  func.func @transform_1(%arg0: i32) -> (i32, i32) {
    %c0_i32 = arith.constant 0 : i32
    %c0_i32_0 = arith.constant 0 : i32
    %c0_i32_1 = arith.constant 0 : i32
    return %c0_i32, %c0_i32_0 : i32, i32
  }
  func.func @transform_2(%arg0: i32) -> (i32, i32) {
    %c0_i32 = arith.constant 0 : i32
    %c0_i32_0 = arith.constant 0 : i32
    %c0_i32_1 = arith.constant 0 : i32
    return %c0_i32, %c0_i32_0 : i32, i32
  }
  func.func @transform_3(%arg0: i32) -> (i32, i32) {
    %c0_i32 = arith.constant 0 : i32
    %c0_i32_0 = arith.constant 0 : i32
    %c0_i32_1 = arith.constant 0 : i32
    return %c0_i32, %c0_i32_0 : i32, i32
  }
  func.func @transform_4(%arg0: i32) -> (i32, i32) {
    %c0_i32 = arith.constant 0 : i32
    %c0_i32_0 = arith.constant 0 : i32
    %c0_i32_1 = arith.constant 0 : i32
    return %c0_i32, %c0_i32_0 : i32, i32
  }
  func.func @transform_5(%arg0: i32) -> (i32, i32) {
    %c0_i32 = arith.constant 0 : i32
    %c0_i32_0 = arith.constant 0 : i32
    %c0_i32_1 = arith.constant 0 : i32
    return %c0_i32, %c0_i32_0 : i32, i32
  }
  func.func @transform_6(%arg0: i32) -> (i32, i32) {
    %c0_i32 = arith.constant 0 : i32
    %c0_i32_0 = arith.constant 0 : i32
    %c0_i32_1 = arith.constant 0 : i32
    return %c0_i32, %c0_i32_0 : i32, i32
  }
  func.func @transform_7(%arg0: i32) -> (i32, i32) {
    %c0_i32 = arith.constant 0 : i32
    %c0_i32_0 = arith.constant 0 : i32
    %c0_i32_1 = arith.constant 0 : i32
    return %c0_i32, %c0_i32_0 : i32, i32
  }
  func.func @transform_8(%arg0: i32) -> (i32, i32, i32) {
    %c0_i32 = arith.constant 0 : i32
    %c0_i32_0 = arith.constant 0 : i32
    %c0_i32_1 = arith.constant 0 : i32
    return %arg0, %c0_i32, %c0_i32_0 : i32, i32, i32
  }
}

</mosaic_0001>

<bundles_post_ra>
// kernel: transformer_block.1
= control target key start
LH: loop header
LB: loop body
LE: loop exit
PB: predicated region body
PF: predicated region fallthrough
CT: control target
= control target key end

     0   :  { %13 = vsyncpa [#allocation4], 0  ;;  %s14301_s0 = inlined_call_operand.vmem [shape: f32[4,128,128], index: 0, kind: input, shape index: {}]   ;;  %s14302_s1 = inlined_call_operand.vmem [shape: bf16[128,384], index: 1, kind: input, shape index: {}]   ;;  %s14303_s2 = inlined_call_operand.vmem [shape: f32[1,384], index: 2, kind: input, shape index: {}]   ;;  %s14304_s3 = inlined_call_operand.vmem [shape: bf16[128,128], index: 3, kind: input, shape index: {}]   ;;  %s14305_s4 = inlined_call_operand.vmem [shape: bf16[128,512], index: 4, kind: input, shape index: {}]   ;;  %s14306_s5 = inlined_call_operand.vmem [shape: f32[1,512], index: 5, kind: input, shape index: {}]   ;;  %s14307_s6 = inlined_call_operand.vmem [shape: bf16[256,128], index: 6, kind: input, shape index: {}]   ;;  %s14308_s7 = inlined_call_operand.vmem [shape: f32[8,128], index: 7, kind: input, shape index: {}]   ;;  %s14309_s8 = inlined_call_operand.hbm [shape: f32[4,128,128], index: 8, kind: output, shape index: {}]  }
   0x1   :  { %15 = vsyncpa [#allocation4 + $0x1], 0  ;;  %s10166_s27 = smov 0   ;;  %s10168_s28 = smov 0  }
   0x2   :  { %s10170_s29 = smov 0   ;;  %s10172_s30 = smov 0  }
   0x3 LB: > { %s10187_s9 = sadd.s32 4294967295, %s10112_s30   ;;  %s7748_s10 = sadd.s32 4294967294, %s10112_s30   ;;  %s10112_s30 = sphi %s10172_s30, %s14634_s30   ;;  %s10108_s29 = sphi %s10170_s29, %s14633_s29   ;;  %s10104_s28 = sphi %s10168_s28, %s14632_s28   ;;  %s10100_s27 = sphi %s10166_s27, %s14631_s27  }
   0x4   : > { %s10191_s11 = sadd.s32 1, %s10112_s30   ;;  %s201_s12 = sadd.s32 1, %s10108_s29 }
   0x5   : > { %s198_s13 = ssub.s32 %s10112_s30, %s10191_s11  ;;  %p211_p0 = scmp.ne.s32.totalorder %s10108_s29, %s10104_s28 }
   0x6   : > { %p199_p1 = scmp.eq.s32.totalorder %s198_s13, 0  ;;  %p212_p2 = scmp.eq.s32.totalorder %s10187_s9, 1 }
   0x7   : > { %p217_p3 = scmp.ne.s32.totalorder %s10104_s28, %s10100_s27  ;;  %p218_p4 = scmp.eq.s32.totalorder %s7748_s10, 1 }
   0x8   : > { %s10202_s14 = scalar_select %p199_p1, %s10108_s29, %s201_s12  }
   0x9   : > { %p10204_p5 = por %p212_p2, %p211_p0  ;;  %p10208_p6 = por %p218_p4, %p217_p3 }
   0xa   : > { %p7751_p7 = scmp.ge.s32.totalorder %s10112_s30, 1  ;;  %p267_p8 = scmp.lt.s32.totalorder %s10112_s30, 3 }
   0xc   : > { %p268_p9 = pnand %p7751_p7, %p267_p8 }
   0xe   : > { %271 = sbr.rel (%p268_p9) target bundleno = 6514 (0x1972), region = 52 }
  0x15   : > { %s7753_s17 = sshll.u32 %s10187_s9, 1  ;;  %v9048_v16 = vld [vmem:[%s14302_s1 + $0x4] ss:$12 sps:$4 sm:$0xff]   ;;  %v9050_v17 = vld [vmem:[%s14302_s1] ss:$12 sps:$4 sm:$0xff]   ;;  %vm1401_vm0 = vcmask 261120  }
  0x16   : > { %p303_p10 = scmp.lt.s32.totalorder %s7753_s17, 3  ;;  %v9051_v18 = vld [vmem:[%s14302_s1 + $0x1c] ss:$12 sps:$4 sm:$0xff]   ;;  %967 = vmatprep.subr.bf16.mxu0 %v9048_v16  ;;  %v9054_v58 = vld [vmem:[%s14302_s1 + $0x18] ss:$12 sps:$4 sm:$0xff]   ;;  %s10115_s12 = smov 96  }
  0x17   : > { %v9053_v19 = vld [vmem:[%s14302_s1 + $0x8] ss:$12 sps:$4 sm:$0xff]   ;;  %968 = vmatpush1.bf16.msra.mxu0 %v9050_v17  ;;  %s10116_s13 = smov 64   ;;  %s10117_s22 = smov 32   ;;  %vm2350_vm1 = vcmask 523520   ;;  %vm2881_vm2 = vcmask 785920  }
  0x18   : > { %s14636_s17 = smov (!%p303_p10, %s7753_s17), 3  ;;  %8331 = vmatprep.subr.bf16.mxu1 %v9053_v19  ;;  %969 = vmatprep.subr.bf16.mxu0 %v9051_v18  ;;  %v9059_v18 = vld [vmem:[%s14302_s1 + $0x4c] ss:$12 sps:$4 sm:$0xff]   ;;  %vm3412_vm3 = vcmask 1048320   ;;  %s299_s23 = sand.u32 1, %s10104_s28  }
  0x19   : > { %s7912_s18 = sshll.u32 %s14636_s17, 7  ;;  %8332 = vmatpush3.bf16.msra.mxu1 %v9053_v19  ;;  %v9061_v19 = vld [vmem:[%s14302_s1 + $0x38] ss:$12 sps:$4 sm:$0xff]   ;;  %s7752_s25 = sshll.u32 %s299_s23, 8 }
  0x1a   : > { %s10218_s21 = scalar_lea.vmem %s14301_s0, %s7912_s18  ;;  %s14151_s26 = scalar_lea.vmem [#allocation3], %s7752_s25 }
  0x1b   : > { %v317_v0 = vld [vmem:[%s10218_s21] sm:$0xff]  ;;  %v319_v1 = vld [vmem:[%s10218_s21 + $0x10] sm:$0xff]  ;;  %v318_v2 = vld [vmem:[%s10218_s21 + $0x8] sm:$0xff]  ;;  %970 = vmatpush1.bf16.msra.mxu0 %v9054_v58  ;;  %s7914_s10 = sshll.u32 %s10187_s9, 12  ;;  %s7686_s17 = sshll.u32 %s14151_s26, 4  ;;  %s14253_s17 = int_to_ptr.vmem [resolvable:$true] %s7686_s17 }
  0x1c   : > { %349 = vadd.xlane.f32.xlu0 %v317_v0  ;;  %353 = vadd.xlane.f32.xlu1 %v319_v1  ;;  %v320_v3 = vld [vmem:[%s10218_s21 + $0x18] sm:$0xff]  ;;  %v321_v4 = vld [vmem:[%s10218_s21 + $0x20] sm:$0xff]  ;;  %v322_v5 = vld [vmem:[%s10218_s21 + $0x28] sm:$0xff]  ;;  %s14251_s19 = scalar_lea.hbm %s14309_s8, %s7914_s10  ;;  %s14260_s9 = scalar_lea.sflag [#allocation4], %s299_s23 }
  0x1d   : > { %v10227_v6 = vld [vmem:[%s10218_s21 + $0x30] sm:$0xff]  ;;  %v10230_v7 = vld [vmem:[%s10218_s21 + $0x38] sm:$0xff]  ;;  %v10233_v8 = vld [vmem:[%s10218_s21 + $0x40] sm:$0xff] }
  0x1e   : > { %v10236_v9 = vld [vmem:[%s10218_s21 + $0x48] sm:$0xff]  ;;  %v10241_v10 = vld [vmem:[%s10218_s21 + $0x50] sm:$0xff]  ;;  %v10244_v11 = vld [vmem:[%s10218_s21 + $0x58] sm:$0xff] }
  0x1f   : > { %v10249_v12 = vld [vmem:[%s10218_s21 + $0x60] sm:$0xff]  ;;  %v10252_v13 = vld [vmem:[%s10218_s21 + $0x68] sm:$0xff]  ;;  %v10257_v14 = vld [vmem:[%s10218_s21 + $0x70] sm:$0xff] }
  0x20   : > { %351 = vadd.xlane.f32.xlu0 %v318_v2  ;;  %355 = vadd.xlane.f32.xlu1 %v320_v3  ;;  %v10260_v15 = vld [vmem:[%s10218_s21 + $0x78] sm:$0xff] }
  0x21   : > { %v10442_v58 = vld [vmem:[%s10218_s21 + $0xb8] sm:$0xff] }
  0x24   : > { %357 = vadd.xlane.f32.xlu0 %v321_v4  ;;  %359 = vadd.xlane.f32.xlu1 %v322_v5 }
  0x28   : > { %361 = vadd.xlane.f32.xlu0 %v10227_v6  ;;  %363 = vadd.xlane.f32.xlu1 %v10230_v7 }
  0x2c   : > { %365 = vadd.xlane.f32.xlu0 %v10233_v8  ;;  %367 = vadd.xlane.f32.xlu1 %v10236_v9 }
  0x30   : > { %369 = vadd.xlane.f32.xlu0 %v10241_v10  ;;  %371 = vadd.xlane.f32.xlu1 %v10244_v11 }
  0x34   : > { %373 = vadd.xlane.f32.xlu0 %v10249_v12  ;;  %375 = vadd.xlane.f32.xlu1 %v10252_v13 }
  0x38   : > { %377 = vadd.xlane.f32.xlu0 %v10257_v14  ;;  %379 = vadd.xlane.f32.xlu1 %v10260_v15 }
  0xa9   : > { %v350_v20 = vpop.xlane.xlu0 %349  ;;  %v354_v21 = vpop.xlane.xlu1 %353 }
  0xaa   : > { %v414_v22 = vmul.f32 0.0078125, %v350_v20  ;;  %v416_v23 = vmul.f32 0.0078125, %v354_v21 }
  0xac   : > { %v10278_v24 = vsub.f32 %v317_v0, %v414_v22  ;;  %v10280_v25 = vsub.f32 %v319_v1, %v416_v23  ;;  %v9055_v0 = vld [vmem:[%s14302_s1 + $0x34] ss:$12 sps:$4 sm:$0xff]  }
  0xad   : > { %v352_v26 = vpop.xlane.xlu0 %351  ;;  %v356_v27 = vpop.xlane.xlu1 %355  ;;  %v9057_v1 = vld [vmem:[%s14302_s1 + $0x20] ss:$12 sps:$4 sm:$0xff]   ;;  %971 = vmatprep.subr.bf16.mxu0 %v9055_v0  ;;  %v9062_v22 = vld [vmem:[%s14302_s1 + $0x48] ss:$12 sps:$4 sm:$0xff]  }
  0xae   : > { %v415_v28 = vmul.f32 0.0078125, %v352_v26  ;;  %v478_v29 = vmul.f32 %v10278_v24, %v10278_v24  ;;  %v417_v30 = vmul.f32 0.0078125, %v356_v27  ;;  %v480_v31 = vmul.f32 %v10280_v25, %v10280_v25  ;;  %8333 = vmatprep.subr.bf16.mxu1 %v9057_v1  ;;  %v10466_v0 = vld [vmem:[%s10218_s21 + $0xe8] sm:$0xff] }
  0xaf   : > { %8334 = vmatpush3.bf16.msra.mxu1 %v9057_v1  ;;  %v10469_v1 = vld [vmem:[%s10218_s21 + $0xf0] sm:$0xff] }
  0xb0   : > { %510 = vadd.xlane.f32.xlu0 %v478_v29  ;;  %v10286_v32 = vsub.f32 %v318_v2, %v415_v28  ;;  %v10288_v33 = vsub.f32 %v320_v3, %v417_v30  ;;  %8335 = vmatprep.subr.bf16.mxu1 %v9061_v19  ;;  %v9063_v29 = vld [vmem:[%s14302_s1 + $0x64] ss:$12 sps:$4 sm:$0xff]  }
  0xb1   : > { %v358_v34 = vpop.xlane.xlu0 %357  ;;  %v360_v35 = vpop.xlane.xlu1 %359  ;;  %v9065_v30 = vld [vmem:[%s14302_s1 + $0x50] ss:$12 sps:$4 sm:$0xff]  }
  0xb2   : > { %v418_v36 = vmul.f32 0.0078125, %v358_v34  ;;  %v479_v37 = vmul.f32 %v10286_v32, %v10286_v32  ;;  %v419_v38 = vmul.f32 0.0078125, %v360_v35  ;;  %v481_v39 = vmul.f32 %v10288_v33, %v10288_v33  ;;  %v9069_v35 = vld [vmem:[%s14302_s1 + $0x68] ss:$12 sps:$4 sm:$0xff]  }
  0xb3   : > { %8336 = vmatpush3.bf16.msra.mxu1 %v9061_v19 }
  0xb4   : > { %514 = vadd.xlane.f32.xlu0 %v480_v31  ;;  %512 = vadd.xlane.f32.xlu1 %v479_v37  ;;  %v10294_v40 = vsub.f32 %v321_v4, %v418_v36  ;;  %v10296_v41 = vsub.f32 %v322_v5, %v419_v38  ;;  %v9066_v31 = vld [vmem:[%s14302_s1 + $0x60] ss:$12 sps:$4 sm:$0xff]   ;;  %v9070_v37 = vld [vmem:[%s14302_s1 + $0x78] ss:$12 sps:$4 sm:$0xff]  }
  0xb5   : > { %v362_v42 = vpop.xlane.xlu0 %361  ;;  %v364_v43 = vpop.xlane.xlu1 %363  ;;  %8337 = vmatprep.subr.bf16.mxu1 %v9065_v30  ;;  %v10389_v36 = vld [vmem:[%s10218_s21 + $0x80] sm:$0xff] }
  0xb6   : > { %v420_v44 = vmul.f32 0.0078125, %v362_v42  ;;  %v482_v45 = vmul.f32 %v10294_v40, %v10294_v40  ;;  %v421_v46 = vmul.f32 0.0078125, %v364_v43  ;;  %v483_v47 = vmul.f32 %v10296_v41, %v10296_v41  ;;  %v9071_v38 = vld [vmem:[%s14302_s1 + $0x94] ss:$12 sps:$4 sm:$0xff]   ;;  %v10402_v42 = vld [vmem:[%s10218_s21 + $0x88] sm:$0xff] }
  0xb7   : > { %8338 = vmatpush3.bf16.msra.mxu1 %v9065_v30  ;;  %v10405_v43 = vld [vmem:[%s10218_s21 + $0x90] sm:$0xff] }
  0xb8   : > { %516 = vadd.xlane.f32.xlu1 %v481_v39  ;;  %518 = vadd.xlane.f32.xlu0 %v482_v45  ;;  %v10303_v48 = vsub.f32 %v10227_v6, %v420_v44  ;;  %v10306_v49 = vsub.f32 %v10230_v7, %v421_v46  ;;  %v9058_v7 = vld [vmem:[%s14302_s1 + $0x30] ss:$12 sps:$4 sm:$0xff]   ;;  %v9073_v39 = vld [vmem:[%s14302_s1 + $0x80] ss:$12 sps:$4 sm:$0xff]   ;;  %v9077_v46 = vld [vmem:[%s14302_s1 + $0x98] ss:$12 sps:$4 sm:$0xff]  }
  0xb9   : > { %v366_v50 = vpop.xlane.xlu0 %365  ;;  %v368_v51 = vpop.xlane.xlu1 %367  ;;  %972 = vmatpush1.bf16.msra.mxu0 %v9058_v7  ;;  %8339 = vmatprep.subr.bf16.mxu1 %v9069_v35  ;;  %v9074_v44 = vld [vmem:[%s14302_s1 + $0x90] ss:$12 sps:$4 sm:$0xff]   ;;  %v9075_v45 = vld [vmem:[%s14302_s1 + $0xac] ss:$12 sps:$4 sm:$0xff]  }
  0xba   : > { %v422_v52 = vmul.f32 0.0078125, %v366_v50  ;;  %v484_v53 = vmul.f32 %v10303_v48, %v10303_v48  ;;  %v423_v54 = vmul.f32 0.0078125, %v368_v51  ;;  %v485_v55 = vmul.f32 %v10306_v49, %v10306_v49  ;;  %973 = vmatprep.subr.bf16.mxu0 %v9059_v18  ;;  %v10422_v50 = vld [vmem:[%s10218_s21 + $0xa0] sm:$0xff]  ;;  %v9078_v51 = vld [vmem:[%s14302_s1 + $0xa8] ss:$12 sps:$4 sm:$0xff]  }
  0xbb   : > { %8340 = vmatpush3.bf16.msra.mxu1 %v9069_v35 }
  0xbc   : > { %520 = vadd.xlane.f32.xlu1 %v483_v47  ;;  %522 = vadd.xlane.f32.xlu0 %v484_v53  ;;  %v10313_v56 = vsub.f32 %v10233_v8, %v422_v52  ;;  %v10316_v57 = vsub.f32 %v10236_v9, %v423_v54  ;;  %v10419_v47 = vld [vmem:[%s10218_s21 + $0x98] sm:$0xff]  ;;  %v10433_v53 = vld [vmem:[%s10218_s21 + $0xa8] sm:$0xff]  ;;  %v10436_v54 = vld [vmem:[%s10218_s21 + $0xb0] sm:$0xff] }
  0xbd   : > { %v370_v59 = vpop.xlane.xlu0 %369  ;;  %v372_v60 = vpop.xlane.xlu1 %371  ;;  %974 = vmatpush1.bf16.msra.mxu0 %v9062_v22  ;;  %8341 = vmatprep.subr.bf16.mxu1 %v9073_v39  ;;  %v9079_v52 = vld [vmem:[%s14302_s1 + $0xb0] ss:$12 sps:$4 sm:$0xff]  }
  0xbe   : > { %v424_v61 = vmul.f32 0.0078125, %v370_v59  ;;  %v486_v62 = vmul.f32 %v10313_v56, %v10313_v56  ;;  %v425_v63 = vmul.f32 0.0078125, %v372_v60  ;;  %v487_v2 = vmul.f32 %v10316_v57, %v10316_v57  ;;  %975 = vmatprep.subr.bf16.mxu0 %v9063_v29  ;;  %v10445_v59 = vld [vmem:[%s10218_s21 + $0xc0] sm:$0xff]  ;;  %v10450_v60 = vld [vmem:[%s10218_s21 + $0xc8] sm:$0xff] }
  0xbf   : > { %8342 = vmatpush3.bf16.msra.mxu1 %v9073_v39 }
  0xc0   : > { %524 = vadd.xlane.f32.xlu1 %v485_v55  ;;  %526 = vadd.xlane.f32.xlu0 %v486_v62  ;;  %v10332_v3 = vsub.f32 %v10241_v10, %v424_v61  ;;  %v10335_v4 = vsub.f32 %v10244_v11, %v425_v63  ;;  %v14313_v55 = vmov 0   ;;  %v10453_v61 = vld [vmem:[%s10218_s21 + $0xd0] sm:$0xff]  ;;  %v10458_v62 = vld [vmem:[%s10218_s21 + $0xd8] sm:$0xff]  ;;  %v10461_v63 = vld [vmem:[%s10218_s21 + $0xe0] sm:$0xff] }
  0xc1   : > { %v374_v5 = vpop.xlane.xlu0 %373  ;;  %v376_v6 = vpop.xlane.xlu1 %375  ;;  %976 = vmatpush1.bf16.msra.mxu0 %v9066_v31  ;;  %8343 = vmatprep.subr.bf16.mxu1 %v9077_v46 }
  0xc2   : > { %v426_v8 = vmul.f32 0.0078125, %v374_v5  ;;  %v488_v9 = vmul.f32 %v10332_v3, %v10332_v3  ;;  %v427_v16 = vmul.f32 0.0078125, %v376_v6  ;;  %v489_v10 = vmul.f32 %v10335_v4, %v10335_v4  ;;  %999 = vmatprep.mubr.bf16.mxu0 %v14313_v55 }
  0xc3   : > { %8344 = vmatpush3.bf16.msra.mxu1 %v9077_v46 }
  0xc4   : > { %528 = vadd.xlane.f32.xlu1 %v487_v2  ;;  %530 = vadd.xlane.f32.xlu0 %v488_v9  ;;  %v10345_v11 = vsub.f32 %v10249_v12, %v426_v8  ;;  %v10348_v17 = vsub.f32 %v10252_v13, %v427_v16  ;;  %v10474_v2 = vld [vmem:[%s10218_s21 + $0xf8] sm:$0xff] }
  0xc5   : > { %v378_v20 = vpop.xlane.xlu0 %377  ;;  %v380_v21 = vpop.xlane.xlu1 %379  ;;  %8345 = vmatprep.subr.bf16.mxu1 %v9079_v52 }
  0xc6   : > { %v428_v23 = vmul.f32 0.0078125, %v378_v20  ;;  %v490_v12 = vmul.f32 %v10345_v11, %v10345_v11  ;;  %v429_v13 = vmul.f32 0.0078125, %v380_v21  ;;  %v491_v26 = vmul.f32 %v10348_v17, %v10348_v17 }
  0xc7   : > { %8346 = vmatpush3.bf16.msra.mxu1 %v9079_v52 }
  0xc8   : > { %532 = vadd.xlane.f32.xlu1 %v489_v10  ;;  %534 = vadd.xlane.f32.xlu0 %v490_v12  ;;  %v10364_v27 = vsub.f32 %v10257_v14, %v428_v23  ;;  %v10367_v28 = vsub.f32 %v10260_v15, %v429_v13  ;;  %v9067_v15 = vld [vmem:[%s14302_s1 + $0x7c] ss:$12 sps:$4 sm:$0xff]  }
  0xc9   : > { %977 = vmatprep.subr.bf16.mxu0 %v9067_v15 }
  0xca   : > { %v492_v34 = vmul.f32 %v10364_v27, %v10364_v27  ;;  %v493_v14 = vmul.f32 %v10367_v28, %v10367_v28  ;;  %978 = vmatpush1.bf16.msra.mxu0 %v9070_v37 }
  0xcb   : > { %979 = vmatprep.subr.bf16.mxu0 %v9071_v38 }
  0xcc   : > { %536 = vadd.xlane.f32.xlu1 %v491_v26  ;;  %538 = vadd.xlane.f32.xlu0 %v492_v34 }
  0xce   : > { %980 = vmatpush1.bf16.msra.mxu0 %v9074_v44 }
  0xcf   : > { %981 = vmatprep.subr.bf16.mxu0 %v9075_v45  ;;  %v10481_v45 = vld [vmem:[%s14308_s7 + $0x1] ss:$0 sm:$0xff] }
  0xd0   : > { %540 = vadd.xlane.f32.xlu1 %v493_v14  ;;  %381 = vadd.xlane.f32.xlu0 %v10389_v36 }
  0xd2   : > { %982 = vmatpush1.bf16.msra.mxu0 %v9078_v51 }
  0xd4   : > { %383 = vadd.xlane.f32.xlu1 %v10402_v42  ;;  %385 = vadd.xlane.f32.xlu0 %v10405_v43 }
  0xd8   : > { %387 = vadd.xlane.f32.xlu1 %v10419_v47  ;;  %389 = vadd.xlane.f32.xlu0 %v10422_v50 }
  0xdc   : > { %391 = vadd.xlane.f32.xlu1 %v10433_v53  ;;  %393 = vadd.xlane.f32.xlu0 %v10436_v54 }
  0xe0   : > { %395 = vadd.xlane.f32.xlu1 %v10442_v58  ;;  %397 = vadd.xlane.f32.xlu0 %v10445_v59 }
  0xe4   : > { %399 = vadd.xlane.f32.xlu1 %v10450_v60  ;;  %401 = vadd.xlane.f32.xlu0 %v10453_v61 }
  0xe8   : > { %403 = vadd.xlane.f32.xlu1 %v10458_v62  ;;  %405 = vadd.xlane.f32.xlu0 %v10461_v63 }
  0xec   : > { %407 = vadd.xlane.f32.xlu1 %v10466_v0  ;;  %409 = vadd.xlane.f32.xlu0 %v10469_v1 }
  0xf0   : > { %411 = vadd.xlane.f32.xlu1 %v10474_v2 }
 0x13d   : > { %v511_v5 = vpop.xlane.xlu0 %510 }
 0x13e   : > { %v574_v6 = vmul.f32 0.0078125, %v511_v5 }
 0x140   : > { %v606_v7 = vadd.f32 1e-05, %v574_v6 }
 0x141   : > { %v513_v8 = vpop.xlane.xlu1 %512  ;;  %v515_v9 = vpop.xlane.xlu0 %514 }
 0x142   : > { %9152 = vrsqrt.f32 %v606_v7  ;;  %v575_v16 = vmul.f32 0.0078125, %v513_v8  ;;  %v576_v10 = vmul.f32 0.0078125, %v515_v9 }
 0x144   : > { %v607_v18 = vadd.f32 1e-05, %v575_v16  ;;  %v608_v19 = vadd.f32 1e-05, %v576_v10  ;;  %v10488_v10 = vld [vmem:[%s14308_s7 + $0x2] ss:$0 sm:$0xff] }
 0x145   : > { %v517_v20 = vpop.xlane.xlu1 %516  ;;  %v519_v21 = vpop.xlane.xlu0 %518 }
 0x146   : > { %9154 = vrsqrt.f32 %v607_v18  ;;  %v577_v22 = vmul.f32 0.0078125, %v517_v20  ;;  %v578_v23 = vmul.f32 0.0078125, %v519_v21 }
 0x147   : > { %9156 = vrsqrt.f32 %v608_v19 }
 0x148   : > { %v609_v12 = vadd.f32 1e-05, %v577_v22  ;;  %v610_v13 = vadd.f32 1e-05, %v578_v23 }
 0x149   : > { %v521_v26 = vpop.xlane.xlu1 %520  ;;  %v523_v29 = vpop.xlane.xlu0 %522 }
 0x14a   : > { %9158 = vrsqrt.f32 %v609_v12  ;;  %v579_v30 = vmul.f32 0.0078125, %v521_v26  ;;  %v580_v31 = vmul.f32 0.0078125, %v523_v29 }
 0x14b   : > { %9160 = vrsqrt.f32 %v610_v13 }
 0x14c   : > { %v9153_v34 = vpop.eup %9152  ;;  %v611_v14 = vadd.f32 1e-05, %v579_v30  ;;  %v612_v15 = vadd.f32 1e-05, %v580_v31 }
 0x14d   : > { %v525_v35 = vpop.xlane.xlu1 %524  ;;  %v527_v37 = vpop.xlane.xlu0 %526  ;;  %v670_v38 = vmul.f32 %v9153_v34, %v10278_v24 }
 0x14e   : > { %9162 = vrsqrt.f32 %v611_v14  ;;  %v581_v39 = vmul.f32 0.0078125, %v525_v35  ;;  %v582_v44 = vmul.f32 0.0078125, %v527_v37 }
 0x14f   : > { %9164 = vrsqrt.f32 %v612_v15  ;;  %v706_v9 = vmul.f32 %v10481_v45, %v670_v38 }
 0x150   : > { %v9155_v46 = vpop.eup %9154  ;;  %v613_v51 = vadd.f32 1e-05, %v581_v39  ;;  %v614_v52 = vadd.f32 1e-05, %v582_v44 }
 0x151   : > { %v9157_v5 = vpop.eup %9156  ;;  %v529_v6 = vpop.xlane.xlu1 %528  ;;  %v671_v8 = vmul.f32 %v9155_v46, %v10286_v32  ;;  %v742_v26 = vadd.f32 %v10488_v10, %v706_v9 }
 0x152   : > { %v531_v7 = vpop.xlane.xlu0 %530  ;;  %9166 = vrsqrt.f32 %v613_v51  ;;  %v583_v24 = vmul.f32 0.0078125, %v529_v6  ;;  %v672_v18 = vmul.f32 %v9157_v5, %v10280_v25 }
 0x153   : > { %v584_v16 = vmul.f32 0.0078125, %v531_v7  ;;  %9168 = vrsqrt.f32 %v614_v52  ;;  %v707_v19 = vmul.f32 %v10481_v45, %v671_v8 }
 0x154   : > { %v9159_v20 = vpop.eup %9158  ;;  %v615_v21 = vadd.f32 1e-05, %v583_v24  ;;  %v708_v32 = vmul.f32 %v10481_v45, %v672_v18 }
 0x155   : > { %v616_v22 = vadd.f32 1e-05, %v584_v16  ;;  %v9161_v23 = vpop.eup %9160  ;;  %v533_v12 = vpop.xlane.xlu1 %532  ;;  %v743_v29 = vadd.f32 %v10488_v10, %v707_v19  ;;  %v673_v30 = vmul.f32 %v9159_v20, %v10288_v33 }
 0x156   : > { %v535_v13 = vpop.xlane.xlu0 %534  ;;  %9170 = vrsqrt.f32 %v615_v21  ;;  %v585_v31 = vmul.f32 0.0078125, %v533_v12  ;;  %v674_v15 = vmul.f32 %v9161_v23, %v10294_v40  ;;  %v744_v39 = vadd.f32 %v10488_v10, %v708_v32 }
 0x157   : > { %v586_v25 = vmul.f32 0.0078125, %v535_v13  ;;  %9172 = vrsqrt.f32 %v616_v22  ;;  %v774_v34 = vpack.c.bf16 %v743_v29, %v742_v26  ;;  %v709_v14 = vmul.f32 %v10481_v45, %v673_v30 }
 0x158   : > { %v9163_v35 = vpop.eup %9162  ;;  %v617_v37 = vadd.f32 1e-05, %v585_v31  ;;  %v710_v5 = vmul.f32 %v10481_v45, %v674_v15 }
 0x159   : > { %v618_v38 = vadd.f32 1e-05, %v586_v25  ;;  %v9165_v44 = vpop.eup %9164  ;;  %v537_v46 = vpop.xlane.xlu1 %536  ;;  %1000 = vmatmul.mubr.bf16.vlgmr.msra.gmra.mrb[0].mxu0 %v774_v34  ;;  %8347 = vmatprep.mubr.bf16.mxu1 %v774_v34  ;;  %v745_v33 = vadd.f32 %v10488_v10, %v709_v14  ;;  %v675_v52 = vmul.f32 %v9163_v35, %v10296_v41 }
 0x15a   : > { %v539_v51 = vpop.xlane.xlu0 %538  ;;  %9174 = vrsqrt.f32 %v617_v37  ;;  %v587_v6 = vmul.f32 0.0078125, %v537_v46  ;;  %1009 = vmatprep.mubr.bf16.mxu0 %v14313_v55  ;;  %v676_v40 = vmul.f32 %v9165_v44, %v10303_v48  ;;  %v746_v21 = vadd.f32 %v10488_v10, %v710_v5 }
 0x15b   : > { %v588_v7 = vmul.f32 0.0078125, %v539_v51  ;;  %9176 = vrsqrt.f32 %v618_v38  ;;  %v775_v8 = vpack.c.bf16 %v745_v33, %v744_v39  ;;  %v711_v9 = vmul.f32 %v10481_v45, %v675_v52 }
 0x15c   : > { %v9167_v24 = vpop.eup %9166  ;;  %v619_v16 = vadd.f32 1e-05, %v587_v6  ;;  %v712_v19 = vmul.f32 %v10481_v45, %v676_v40 }
 0x15d   : > { %v620_v18 = vadd.f32 1e-05, %v588_v7  ;;  %v9169_v20 = vpop.eup %9168  ;;  %v541_v41 = vpop.xlane.xlu1 %540  ;;  %8348 = vmatmul.mubr.bf16.vlgmr.msra.gmra.mrb[0].mxu1 %v775_v8  ;;  %v747_v22 = vadd.f32 %v10488_v10, %v711_v9  ;;  %v677_v23 = vmul.f32 %v9167_v24, %v10306_v49 }
 0x15e   : > { %v382_v32 = vpop.xlane.xlu0 %381  ;;  %9178 = vrsqrt.f32 %v619_v16  ;;  %v589_v48 = vmul.f32 0.0078125, %v541_v41  ;;  %v678_v29 = vmul.f32 %v9169_v20, %v10313_v56  ;;  %v748_v25 = vadd.f32 %v10488_v10, %v712_v19 }
 0x15f   : > { %v430_v12 = vmul.f32 0.0078125, %v382_v32  ;;  %9180 = vrsqrt.f32 %v620_v18  ;;  %v776_v13 = vpack.c.bf16 %v747_v22, %v746_v21  ;;  %v713_v26 = vmul.f32 %v10481_v45, %v677_v23 }
 0x160   : > { %v9171_v30 = vpop.eup %9170  ;;  %v621_v31 = vadd.f32 1e-05, %v589_v48  ;;  %v714_v38 = vmul.f32 %v10481_v45, %v678_v29 }
 0x161   : > { %v10513_v34 = vsub.f32 %v10389_v36, %v430_v12  ;;  %v9173_v14 = vpop.eup %9172  ;;  %v384_v15 = vpop.xlane.xlu1 %383  ;;  %1010 = vmatmul.mubr.bf16.gmra.mrb[4].mxu0 %v775_v8  ;;  %8351 = vmatprep.mubr.bf16.mxu1 %v776_v13  ;;  %v749_v49 = vadd.f32 %v10488_v10, %v713_v26  ;;  %v679_v37 = vmul.f32 %v9171_v30, %v10316_v57 }
 0x162   : > { %v386_v35 = vpop.xlane.xlu0 %385  ;;  %9182 = vrsqrt.f32 %v621_v31  ;;  %v431_v56 = vmul.f32 0.0078125, %v384_v15  ;;  %1019 = vmatprep.mubr.bf16.mxu0 %v14313_v55  ;;  %v680_v51 = vmul.f32 %v9173_v14, %v10332_v3  ;;  %v750_v7 = vadd.f32 %v10488_v10, %v714_v38 }
 0x163   : > { %v432_v39 = vmul.f32 0.0078125, %v386_v35  ;;  %v494_v36 = vmul.f32 %v10513_v34, %v10513_v34  ;;  %v10521_v44 = vpack.c.bf16 %v749_v49, %v748_v25  ;;  %v715_v46 = vmul.f32 %v10481_v45, %v679_v37 }
 0x164   : > { %v9175_v33 = vpop.eup %9174  ;;  %v10526_v52 = vsub.f32 %v10402_v42, %v431_v56  ;;  %v716_v3 = vmul.f32 %v10481_v45, %v680_v51 }
 0x165   : > { %542 = vadd.xlane.f32.xlu0 %v494_v36  ;;  %v10529_v57 = vsub.f32 %v10405_v43, %v432_v39  ;;  %v9177_v5 = vpop.eup %9176  ;;  %8352 = vmatmul.mubr.bf16.gmra.mrb[4].mxu1 %v10521_v44  ;;  %v388_v6 = vpop.xlane.xlu1 %387  ;;  %v751_v40 = vadd.f32 %v10488_v10, %v715_v46  ;;  %v681_v9 = vmul.f32 %v9175_v33, %v10335_v4 }
 0x166   : > { %v390_v8 = vpop.xlane.xlu0 %389  ;;  %v433_v24 = vmul.f32 0.0078125, %v388_v6  ;;  %v495_v42 = vmul.f32 %v10526_v52, %v10526_v52  ;;  %v682_v20 = vmul.f32 %v9177_v5, %v10345_v11  ;;  %v752_v21 = vadd.f32 %v10488_v10, %v716_v3 }
 0x167   : > { %v434_v16 = vmul.f32 0.0078125, %v390_v8  ;;  %v496_v43 = vmul.f32 %v10529_v57, %v10529_v57  ;;  %v10540_v18 = vpack.c.bf16 %v751_v40, %v750_v7  ;;  %v717_v19 = vmul.f32 %v10481_v45, %v681_v9 }
 0x168   : > { %v9179_v41 = vpop.eup %9178  ;;  %544 = vadd.xlane.f32.xlu1 %v495_v42  ;;  %v10545_v4 = vsub.f32 %v10419_v47, %v433_v24  ;;  %v718_v26 = vmul.f32 %v10481_v45, %v682_v20 }
 0x169   : > { %546 = vadd.xlane.f32.xlu0 %v496_v43  ;;  %v10549_v22 = vsub.f32 %v10422_v50, %v434_v16  ;;  %v9181_v32 = vpop.eup %9180  ;;  %1020 = vmatmul.mubr.bf16.gmra.mrb[8].mxu0 %v776_v13  ;;  %v392_v23 = vpop.xlane.xlu1 %391  ;;  %v753_v48 = vadd.f32 %v10488_v10, %v717_v19  ;;  %v683_v11 = vmul.f32 %v9179_v41, %v10348_v17 }
 0x16a   : > { %8355 = vmatprep.mubr.bf16.mxu1 %v10540_v18  ;;  %v394_v12 = vpop.xlane.xlu0 %393  ;;  %v435_v47 = vmul.f32 0.0078125, %v392_v23  ;;  %v497_v29 = vmul.f32 %v10545_v4, %v10545_v4  ;;  %1029 = vmatprep.mubr.bf16.mxu0 %v14313_v55  ;;  %v684_v50 = vmul.f32 %v9181_v32, %v10364_v27  ;;  %v754_v15 = vadd.f32 %v10488_v10, %v718_v26 }
 0x16b   : > { %v436_v30 = vmul.f32 0.0078125, %v394_v12  ;;  %v779_v13 = vpack.c.bf16 %v753_v48, %v752_v21  ;;  %v719_v31 = vmul.f32 %v10481_v45, %v683_v11  ;;  %v498_v25 = vmul.f32 %v10549_v22, %v10549_v22 }
 0x16c   : > { %v9183_v14 = vpop.eup %9182  ;;  %548 = vadd.xlane.f32.xlu1 %v497_v29  ;;  %v10563_v17 = vsub.f32 %v10433_v53, %v435_v47  ;;  %v720_v56 = vmul.f32 %v10481_v45, %v684_v50 }
 0x16d   : > { %v10567_v49 = vsub.f32 %v10436_v54, %v436_v30  ;;  %8356 = vmatmul.mubr.bf16.gmra.mrb[8].mxu1 %v779_v13  ;;  %v396_v35 = vpop.xlane.xlu1 %395  ;;  %v755_v27 = vadd.f32 %v10488_v10, %v719_v31  ;;  %v685_v38 = vmul.f32 %v9183_v14, %v10367_v28  ;;  %550 = vadd.xlane.f32.xlu0 %v498_v25 }
 0x16e   : > { %v398_v37 = vpop.xlane.xlu0 %397  ;;  %v437_v39 = vmul.f32 0.0078125, %v396_v35  ;;  %v499_v53 = vmul.f32 %v10563_v17, %v10563_v17  ;;  %v756_v6 = vadd.f32 %v10488_v10, %v720_v56 }
 0x16f   : > { %v438_v36 = vmul.f32 0.0078125, %v398_v37  ;;  %v780_v46 = vpack.c.bf16 %v755_v27, %v754_v15  ;;  %v721_v51 = vmul.f32 %v10481_v45, %v685_v38  ;;  %v500_v54 = vmul.f32 %v10567_v49, %v10567_v49 }
 0x170   : > { %552 = vadd.xlane.f32.xlu1 %v499_v53  ;;  %v10578_v33 = vsub.f32 %v10442_v58, %v437_v39 }
 0x171   : > { %v10581_v28 = vsub.f32 %v10445_v59, %v438_v36  ;;  %1030 = vmatmul.mubr.bf16.gmra.mrb[12].mxu0 %v10521_v44  ;;  %8359 = vmatprep.mubr.bf16.mxu1 %v780_v46  ;;  %v400_v5 = vpop.xlane.xlu1 %399  ;;  %v757_v7 = vadd.f32 %v10488_v10, %v721_v51 }
 0x172   : > { %v402_v40 = vpop.xlane.xlu0 %401  ;;  %v439_v8 = vmul.f32 0.0078125, %v400_v5  ;;  %v501_v9 = vmul.f32 %v10578_v33, %v10578_v33  ;;  %1039 = vmatprep.mubr.bf16.mxu0 %v14313_v55  ;;  %554 = vadd.xlane.f32.xlu0 %v500_v54 }
 0x173   : > { %v440_v3 = vmul.f32 0.0078125, %v402_v40  ;;  %v502_v58 = vmul.f32 %v10581_v28, %v10581_v28  ;;  %v781_v59 = vpack.c.bf16 %v757_v7, %v756_v6 }
 0x174   : > { %556 = vadd.xlane.f32.xlu1 %v501_v9  ;;  %v10592_v44 = vsub.f32 %v10450_v60, %v439_v8 }
 0x175   : > { %v10595_v24 = vsub.f32 %v10453_v61, %v440_v3  ;;  %8360 = vmatmul.mubr.bf16.gmra.mrb[12].mxu1 %v781_v59  ;;  %v404_v42 = vpop.xlane.xlu1 %403 }
 0x176   : > { %v503_v16 = vmul.f32 %v10592_v44, %v10592_v44  ;;  %v441_v43 = vmul.f32 0.0078125, %v404_v42  ;;  %558 = vadd.xlane.f32.xlu0 %v502_v58 }
 0x177   : > { %v504_v19 = vmul.f32 %v10595_v24, %v10595_v24 }
 0x178   : > { %560 = vadd.xlane.f32.xlu1 %v503_v16  ;;  %v10602_v20 = vsub.f32 %v10458_v62, %v441_v43  ;;  %v10616_v62 = vpop.xlane.xlu0 %405 }
 0x179   : > { %1040 = vmatmul.mubr.bf16.gmra.mrb[16].mxu0 %v10540_v18  ;;  %v408_v60 = vpop.xlane.xlu1 %407 }
 0x17a   : > { %1049 = vmatprep.mubr.bf16.mxu0 %v14313_v55  ;;  %v443_v61 = vmul.f32 0.0078125, %v408_v60  ;;  %v505_v41 = vmul.f32 %v10602_v20, %v10602_v20 }
 0x17c   : > { %562 = vadd.xlane.f32.xlu1 %v504_v19  ;;  %v10609_v21 = vsub.f32 %v10466_v0, %v443_v61  ;;  %v10618_v18 = vpop.xlane.xlu0 %409 }
 0x17d   : > { %v10620_v0 = vpop.xlane.xlu1 %411 }
 0x17e   : > { %v507_v32 = vmul.f32 %v10609_v21, %v10609_v21 }
 0x180   : > { %564 = vadd.xlane.f32.xlu1 %v505_v41 }
 0x181   : > { %1050 = vmatmul.mubr.bf16.gmra.mrb[20].mxu0 %v779_v13 }
 0x182   : > { %1059 = vmatprep.mubr.bf16.mxu0 %v14313_v55 }
 0x184   : > { %568 = vadd.xlane.f32.xlu1 %v507_v32 }
 0x189   : > { %1060 = vmatmul.mubr.bf16.gmra.mrb[24].mxu0 %v780_v46 }
 0x18a   : > { %1069 = vmatprep.mubr.bf16.mxu0 %v14313_v55 }
 0x191   : > { %1070 = vmatmul.mubr.bf16.gmra.mrb[28].mxu0 %v781_v59 }
 0x192   : > { %1079 = vmatprep.mubr.bf16.mxu0 %v14313_v55 }
 0x1f2   : > { %v543_v23 = vpop.xlane.xlu0 %542 }
 0x1f3   : > { %v590_v48 = vmul.f32 0.0078125, %v543_v23 }
 0x1f5   : > { %v622_v12 = vadd.f32 1e-05, %v590_v48  ;;  %v545_v11 = vpop.xlane.xlu1 %544 }
 0x1f6   : > { %v547_v26 = vpop.xlane.xlu0 %546  ;;  %v591_v47 = vmul.f32 0.0078125, %v545_v11 }
 0x1f7   : > { %9184 = vrsqrt.f32 %v622_v12  ;;  %v592_v29 = vmul.f32 0.0078125, %v547_v26 }
 0x1f8   : > { %v623_v30 = vadd.f32 1e-05, %v591_v47 }
 0x1f9   : > { %v624_v50 = vadd.f32 1e-05, %v592_v29  ;;  %v549_v13 = vpop.xlane.xlu1 %548 }
 0x1fa   : > { %9186 = vrsqrt.f32 %v623_v30  ;;  %v593_v31 = vmul.f32 0.0078125, %v549_v13  ;;  %v551_v25 = vpop.xlane.xlu0 %550 }
 0x1fb   : > { %9188 = vrsqrt.f32 %v624_v50  ;;  %v594_v14 = vmul.f32 0.0078125, %v551_v25 }
 0x1fc   : > { %v625_v15 = vadd.f32 1e-05, %v593_v31 }
 0x1fd   : > { %v553_v35 = vpop.xlane.xlu1 %552  ;;  %v626_v27 = vadd.f32 1e-05, %v594_v14 }
 0x1fe   : > { %9190 = vrsqrt.f32 %v625_v15  ;;  %v595_v37 = vmul.f32 0.0078125, %v553_v35 }
 0x1ff   : > { %9192 = vrsqrt.f32 %v626_v27  ;;  %v555_v38 = vpop.xlane.xlu0 %554 }
 0x200   : > { %v627_v39 = vadd.f32 1e-05, %v595_v37  ;;  %v596_v53 = vmul.f32 0.0078125, %v555_v38 }
 0x201   : > { %v9185_v56 = vpop.eup %9184  ;;  %v557_v36 = vpop.xlane.xlu1 %556 }
 0x202   : > { %v686_v46 = vmul.f32 %v9185_v56, %v10513_v34  ;;  %9194 = vrsqrt.f32 %v627_v39  ;;  %v597_v51 = vmul.f32 0.0078125, %v557_v36  ;;  %v628_v54 = vadd.f32 1e-05, %v596_v53 }
 0x203   : > { %v559_v6 = vpop.xlane.xlu0 %558 }
 0x204   : > { %v722_v5 = vmul.f32 %v10481_v45, %v686_v46  ;;  %v9187_v7 = vpop.eup %9186  ;;  %v629_v40 = vadd.f32 1e-05, %v597_v51  ;;  %9196 = vrsqrt.f32 %v628_v54  ;;  %v598_v8 = vmul.f32 0.0078125, %v559_v6 }
 0x205   : > { %v9189_v9 = vpop.eup %9188  ;;  %v561_v3 = vpop.xlane.xlu1 %560  ;;  %v687_v58 = vmul.f32 %v9187_v7, %v10526_v52 }
 0x206   : > { %9198 = vrsqrt.f32 %v629_v40  ;;  %v599_v59 = vmul.f32 0.0078125, %v561_v3  ;;  %v630_v42 = vadd.f32 1e-05, %v598_v8  ;;  %v688_v16 = vmul.f32 %v9189_v9, %v10529_v57 }
 0x207   : > { %v723_v34 = vmul.f32 %v10481_v45, %v687_v58  ;;  %v758_v43 = vadd.f32 %v10488_v10, %v722_v5 }
 0x208   : > { %v9191_v19 = vpop.eup %9190  ;;  %v631_v60 = vadd.f32 1e-05, %v599_v59  ;;  %9200 = vrsqrt.f32 %v630_v42  ;;  %v724_v61 = vmul.f32 %v10481_v45, %v688_v16  ;;  %v824_v42 = vlaneseq }
 0x209   : > { %v9193_v41 = vpop.eup %9192  ;;  %v563_v32 = vpop.xlane.xlu1 %562  ;;  %v759_v23 = vadd.f32 %v10488_v10, %v723_v34  ;;  %v689_v52 = vmul.f32 %v9191_v19, %v10545_v4 }
 0x20a   : > { %9202 = vrsqrt.f32 %v631_v60  ;;  %v600_v48 = vmul.f32 0.0078125, %v563_v32  ;;  %v690_v12 = vmul.f32 %v9193_v41, %v10549_v22  ;;  %v760_v26 = vadd.f32 %v10488_v10, %v724_v61 }
 0x20b   : > { %v782_v57 = vpack.c.bf16 %v759_v23, %v758_v43  ;;  %v725_v11 = vmul.f32 %v10481_v45, %v689_v52  ;;  %v10661_v19 = vshrl.u32 %v824_v42, 7 }
 0x20c   : > { %v9195_v47 = vpop.eup %9194  ;;  %v632_v29 = vadd.f32 1e-05, %v600_v48  ;;  %v726_v30 = vmul.f32 %v10481_v45, %v690_v12 }
 0x20d   : > { %1080 = vmatmul.mubr.bf16.gmra.mrb[32].mxu0 %v782_v57  ;;  %v565_v50 = vpop.xlane.xlu1 %564  ;;  %v761_v13 = vadd.f32 %v10488_v10, %v725_v11  ;;  %8363 = vmatprep.mubr.bf16.mxu1 %v782_v57  ;;  %v691_v4 = vmul.f32 %v9195_v47, %v10563_v17  ;;  %14389 = vst [vmem:[#allocation6_spill] sm:$0xff] %v10661_v19  ;;  %v14311_v60 = vsub.s32 0, %v10661_v19  ;;  %v14310_v61 = vsub.s32 1, %v10661_v19 }
 0x20e   : > { %v9197_v31 = vpop.eup %9196  ;;  %9204 = vrsqrt.f32 %v632_v29  ;;  %v601_v25 = vmul.f32 0.0078125, %v565_v50  ;;  %1089 = vmatprep.mubr.bf16.mxu0 %v14313_v55  ;;  %v762_v15 = vadd.f32 %v10488_v10, %v726_v30 }
 0x20f   : > { %v783_v22 = vpack.c.bf16 %v761_v13, %v760_v26  ;;  %v727_v14 = vmul.f32 %v10481_v45, %v691_v4  ;;  %v692_v35 = vmul.f32 %v9197_v31, %v10567_v49 }
 0x210   : > { %v9199_v27 = vpop.eup %9198  ;;  %v633_v37 = vadd.f32 1e-05, %v601_v25 }
 0x211   : > { %8364 = vmatmul.mubr.bf16.gmra.mrb[16].mxu1 %v783_v22  ;;  %v763_v38 = vadd.f32 %v10488_v10, %v727_v14  ;;  %v693_v56 = vmul.f32 %v9199_v27, %v10578_v33  ;;  %v728_v17 = vmul.f32 %v10481_v45, %v692_v35 }
 0x212   : > { %v9201_v39 = vpop.eup %9200  ;;  %9206 = vrsqrt.f32 %v633_v37 }
 0x213   : > { %v784_v53 = vpack.c.bf16 %v763_v38, %v762_v15  ;;  %v729_v36 = vmul.f32 %v10481_v45, %v693_v56  ;;  %v764_v46 = vadd.f32 %v10488_v10, %v728_v17  ;;  %v694_v51 = vmul.f32 %v9201_v39, %v10581_v28 }
 0x214   : > { %v9203_v54 = vpop.eup %9202 }
 0x215   : > { %1090 = vmatmul.mubr.bf16.gmra.mrb[36].mxu0 %v783_v22  ;;  %8367 = vmatprep.mubr.bf16.mxu1 %v784_v53  ;;  %v765_v49 = vadd.f32 %v10488_v10, %v729_v36  ;;  %v695_v5 = vmul.f32 %v9203_v54, %v10592_v44  ;;  %v730_v33 = vmul.f32 %v10481_v45, %v694_v51 }
 0x216   : > { %1099 = vmatprep.mubr.bf16.mxu0 %v14313_v55 }
 0x217   : > { %v785_v6 = vpack.c.bf16 %v765_v49, %v764_v46  ;;  %v731_v7 = vmul.f32 %v10481_v45, %v695_v5  ;;  %v766_v40 = vadd.f32 %v10488_v10, %v730_v33 }
 0x218   : > { %v9205_v8 = vpop.eup %9204 }
 0x219   : > { %8368 = vmatmul.mubr.bf16.gmra.mrb[20].mxu1 %v785_v6  ;;  %v767_v28 = vadd.f32 %v10488_v10, %v731_v7  ;;  %v696_v9 = vmul.f32 %v9205_v8, %v10595_v24 }
 0x21b   : > { %v786_v3 = vpack.c.bf16 %v767_v28, %v766_v40  ;;  %v732_v58 = vmul.f32 %v10481_v45, %v696_v9 }
 0x21c   : > { %v9207_v59 = vpop.eup %9206 }
 0x21d   : > { %1100 = vmatmul.mubr.bf16.gmra.mrb[40].mxu0 %v784_v53  ;;  %8371 = vmatprep.mubr.bf16.mxu1 %v786_v3  ;;  %v697_v44 = vmul.f32 %v9207_v59, %v10602_v20  ;;  %v768_v34 = vadd.f32 %v10488_v10, %v732_v58  ;;  %v822_v20 = vld [vmem:[%s14303_s2] sm:$0x7] }
 0x21e   : > { %1109 = vmatprep.mubr.bf16.mxu0 %v14313_v55  ;;  %v10676_v32 = vrot.slane %v822_v20, %v14310_v61 }
 0x21f   : > { %v733_v16 = vmul.f32 %v10481_v45, %v697_v44  ;;  %v10671_v45 = vrot.slane %v822_v20, %v14311_v60 }
 0x221   : > { %v769_v43 = vadd.f32 %v10488_v10, %v733_v16  ;;  %v14312_v10 = vsub.s32 2, %v10661_v19 }
 0x223   : > { %v787_v24 = vpack.c.bf16 %v769_v43, %v768_v34  ;;  %v10683_v11 = vrot.slane %v822_v20, %v14312_v10 }
 0x225   : > { %1110 = vmatmul.mubr.bf16.gmra.mrb[44].mxu0 %v785_v6  ;;  %8372 = vmatmul.mubr.bf16.gmra.mrb[24].mxu1 %v787_v24 }
 0x226   : > { %1119 = vmatprep.mubr.bf16.mxu0 %v14313_v55 }
 0x22c   : > { %v1001_v41 = vpop.f32.mrb[0].mxu0 }
 0x22d   : > { %v1002_v23 = vadd.f32 %v1001_v41, %v10671_v45  ;;  %v1003_v52 = vpop.f32.mrb[1].mxu0  ;;  %1120 = vmatmul.mubr.bf16.gmra.mrb[48].mxu0 %v786_v3 }
 0x22e   : > { %v1005_v48 = vpop.f32.mrb[2].mxu0  ;;  %1129 = vmatprep.mubr.bf16.mxu0 %v14313_v55  ;;  %v1004_v26 = vadd.f32 %v1003_v52, %v10676_v32 }
 0x22f   : > { %v1006_v12 = vadd.f32 %v1005_v48, %v10671_v45  ;;  %v1007_v57 = vpop.f32.mrb[3].mxu0  ;;  %v1321_v30 = vmul.f32 0.17677669, %v1002_v23 }
 0x230   : > { %v1008_v47 = vadd.f32 %v1007_v57, %v10676_v32  ;;  %v8349_v29 = vpop.f32.mrb[0].mxu1 }
 0x231   : > { %v1322_v50 = vmul.f32 0.17677669, %v1006_v12  ;;  %v1194_v13 = vpop.f32.mrb[1].mxu1  ;;  %v1203_v22 = vadd.f32 %v8349_v29, %v10683_v11 }
 0x232   : > { %v10687_v4 = vpack.c.bf16 %v1008_v47, %v1004_v26  ;;  %v8350_v31 = vpop.f32.mrb[2].mxu1  ;;  %v1195_v35 = vadd.f32 %v1194_v13, %v10683_v11 }
 0x233   : > { %v10689_v25 = vpack.c.bf16 %v1322_v50, %v1321_v30  ;;  %v1206_v14 = vadd.f32 %v8350_v31, %v10683_v11  ;;  %v1197_v15 = vpop.f32.mrb[3].mxu1 }
 0x234   : > { %14390 = vst [vmem:[#allocation7_spill] sm:$0xff] %v10687_v4  ;;  %v1198_v27 = vadd.f32 %v1197_v15, %v10683_v11  ;;  %v1011_v37 = vpop.f32.mrb[4].mxu0  ;;  %8939 = vmatprep.subr.msk.bf16.mxu1 %vm1401_vm0, %v10687_v4  ;;  %1844 = vrot.lane.b32.xlu0 %v10687_v4, %s10115_s12  ;;  %v1427_v38 = vsel %vm1401_vm0, %v10687_v4, 0 }
 0x235   : > { %v10701_v56 = vpack.c.bf16 %v1206_v14, %v1203_v22  ;;  %v1012_v17 = vadd.f32 %v1011_v37, %v10671_v45  ;;  %v1013_v39 = vpop.f32.mrb[5].mxu0  ;;  %1130 = vmatmul.mubr.bf16.gmra.mrb[52].mxu0 %v787_v24  ;;  %8380 = vmatpush3.bf16.xpose.msra.mxu1 %v1427_v38 }
 0x236   : > { %v10704_v53 = vpack.c.bf16 %v1198_v27, %v1195_v35  ;;  %v1015_v36 = vpop.f32.mrb[6].mxu0  ;;  %1139 = vmatprep.mubr.bf16.mxu0 %v14313_v55  ;;  %v1014_v54 = vadd.f32 %v1013_v39, %v10676_v32 }
 0x237   : > { %14391 = vst [vmem:[#allocation8_spill] sm:$0xff] %v10701_v56  ;;  %v1016_v46 = vadd.f32 %v1015_v36, %v10671_v45  ;;  %v1017_v51 = vpop.f32.mrb[7].mxu0  ;;  %v1323_v33 = vmul.f32 0.17677669, %v1012_v17 }
 0x238   : > { %v1018_v49 = vadd.f32 %v1017_v51, %v10676_v32  ;;  %v8353_v5 = vpop.f32.mrb[4].mxu1  ;;  %v442_v51 = vmul.f32 0.0078125, %v10616_v62 }
 0x239   : > { %v1324_v6 = vmul.f32 0.17677669, %v1016_v46  ;;  %v1210_v7 = vpop.f32.mrb[5].mxu1  ;;  %v1219_v9 = vadd.f32 %v8353_v5, %v10683_v11 }
 0x23a   : > { %v10710_v40 = vpack.c.bf16 %v1018_v49, %v1014_v54  ;;  %v8354_v8 = vpop.f32.mrb[6].mxu1  ;;  %v1211_v59 = vadd.f32 %v1210_v7, %v10683_v11 }
 0x23b   : > { %v10712_v28 = vpack.c.bf16 %v1324_v6, %v1323_v33  ;;  %v1222_v3 = vadd.f32 %v8354_v8, %v10683_v11  ;;  %v1213_v58 = vpop.f32.mrb[7].mxu1 }
 0x23c   : > { %14392 = vst [vmem:[#allocation9_spill] sm:$0xff] %v10710_v40  ;;  %v1214_v44 = vadd.f32 %v1213_v58, %v10683_v11  ;;  %v1021_v42 = vpop.f32.mrb[8].mxu0  ;;  %8940 = vmatprep.subr.msk.bf16.mxu1 %vm1401_vm0, %v10710_v40  ;;  %1846 = vrot.lane.b32.xlu1 %v10710_v40, %s10115_s12  ;;  %v1430_v16 = vsel %vm1401_vm0, %v10710_v40, 0 }
 0x23d   : > { %v10724_v34 = vpack.c.bf16 %v1222_v3, %v1219_v9  ;;  %v1022_v43 = vadd.f32 %v1021_v42, %v10671_v45  ;;  %v1023_v24 = vpop.f32.mrb[9].mxu0  ;;  %8382 = vmatpush3.bf16.xpose.msra.mxu1 %v1430_v16  ;;  %v10760_v16 = vsub.f32 %v10461_v63, %v442_v51 }
 0x23e   : > { %v10727_v20 = vpack.c.bf16 %v1214_v44, %v1211_v59  ;;  %v1025_v41 = vpop.f32.mrb[10].mxu0  ;;  %v1024_v48 = vadd.f32 %v1023_v24, %v10676_v32 }
 0x23f   : > { %14393 = vst [vmem:[#allocation10_spill] sm:$0xff] %v10724_v34  ;;  %v1026_v23 = vadd.f32 %v1025_v41, %v10671_v45  ;;  %v1027_v52 = vpop.f32.mrb[11].mxu0  ;;  %v1325_v26 = vmul.f32 0.17677669, %v1022_v43 }
 0x240   : > { %v1028_v12 = vadd.f32 %v1027_v52, %v10676_v32  ;;  %v8357_v57 = vpop.f32.mrb[8].mxu1 }
 0x241   : > { %v1326_v47 = vmul.f32 0.17677669, %v1026_v23  ;;  %v1226_v29 = vpop.f32.mrb[9].mxu1  ;;  %v1235_v31 = vadd.f32 %v8357_v57, %v10683_v11 }
 0x242   : > { %v10732_v30 = vpack.c.bf16 %v1028_v12, %v1024_v48  ;;  %v8358_v50 = vpop.f32.mrb[10].mxu1  ;;  %v1227_v15 = vadd.f32 %v1226_v29, %v10683_v11  ;;  %v506_v29 = vmul.f32 %v10760_v16, %v10760_v16 }
 0x243   : > { %v10734_v13 = vpack.c.bf16 %v1326_v47, %v1325_v26  ;;  %v1238_v22 = vadd.f32 %v8358_v50, %v10683_v11  ;;  %v1229_v14 = vpop.f32.mrb[11].mxu1 }
 0x244   : > { %14394 = vst [vmem:[#allocation11_spill] sm:$0xff] %v10732_v30  ;;  %v1230_v35 = vadd.f32 %v1229_v14, %v10683_v11  ;;  %v1031_v27 = vpop.f32.mrb[12].mxu0  ;;  %8941 = vmatprep.subr.msk.bf16.mxu1 %vm1401_vm0, %v10732_v30  ;;  %v1433_v37 = vsel %vm1401_vm0, %v10732_v30, 0 }
 0x245   : > { %v10744_v38 = vpack.c.bf16 %v1238_v22, %v1235_v31  ;;  %v1032_v17 = vadd.f32 %v1031_v27, %v10671_v45  ;;  %v1033_v39 = vpop.f32.mrb[13].mxu0  ;;  %8384 = vmatpush3.bf16.xpose.msra.mxu1 %v1433_v37  ;;  %v444_v27 = vmul.f32 0.0078125, %v10618_v18 }
 0x246   : > { %v10747_v36 = vpack.c.bf16 %v1230_v35, %v1227_v15  ;;  %v1035_v46 = vpop.f32.mrb[14].mxu0  ;;  %v1034_v5 = vadd.f32 %v1033_v39, %v10676_v32 }
 0x247   : > { %14395 = vst [vmem:[#allocation12_spill] sm:$0xff] %v10744_v38  ;;  %v1036_v54 = vadd.f32 %v1035_v46, %v10671_v45  ;;  %v1037_v49 = vpop.f32.mrb[15].mxu0  ;;  %v1327_v7 = vmul.f32 0.17677669, %v1032_v17 }
 0x248   : > { %14396 = vst [vmem:[#allocation13_spill] sm:$0xff] %v10747_v36  ;;  %v1038_v33 = vadd.f32 %v1037_v49, %v10676_v32  ;;  %v8361_v6 = vpop.f32.mrb[12].mxu1 }
 0x249   : > { %v1328_v8 = vmul.f32 0.17677669, %v1036_v54  ;;  %v1242_v9 = vpop.f32.mrb[13].mxu1  ;;  %v1251_v44 = vadd.f32 %v8361_v6, %v10683_v11  ;;  %v10793_v6 = vsub.f32 %v10469_v1, %v444_v27 }
 0x24a   : > { %v10753_v3 = vpack.c.bf16 %v1038_v33, %v1034_v5  ;;  %v8362_v58 = vpop.f32.mrb[14].mxu1  ;;  %v1243_v43 = vadd.f32 %v1242_v9, %v10683_v11  ;;  %v445_v5 = vmul.f32 0.0078125, %v10620_v0 }
 0x24b   : > { %v10755_v59 = vpack.c.bf16 %v1328_v8, %v1327_v7  ;;  %v1254_v62 = vadd.f32 %v8362_v58, %v10683_v11  ;;  %v1245_v42 = vpop.f32.mrb[15].mxu1 }
 0x24c   : > { %14397 = vst [vmem:[#allocation14_spill] sm:$0xff] %v10753_v3  ;;  %v1246_v24 = vadd.f32 %v1245_v42, %v10683_v11  ;;  %v1041_v41 = vpop.f32.mrb[16].mxu0  ;;  %8942 = vmatprep.subr.msk.bf16.mxu1 %vm1401_vm0, %v10753_v3  ;;  %v1436_v23 = vsel %vm1401_vm0, %v10753_v3, 0  ;;  %v10806_v42 = vsub.f32 %v10474_v2, %v445_v5 }
 0x24d   : > { %v10768_v52 = vpack.c.bf16 %v1254_v62, %v1251_v44  ;;  %v1042_v48 = vadd.f32 %v1041_v41, %v10671_v45  ;;  %v1043_v12 = vpop.f32.mrb[17].mxu0  ;;  %8386 = vmatpush3.bf16.xpose.msra.mxu1 %v1436_v23  ;;  %v508_v62 = vmul.f32 %v10793_v6, %v10793_v6 }
 0x24e   : > { %v10771_v57 = vpack.c.bf16 %v1246_v24, %v1243_v43  ;;  %v1045_v63 = vpop.f32.mrb[18].mxu0  ;;  %v1044_v50 = vadd.f32 %v1043_v12, %v10676_v32 }
 0x24f   : > { %14398 = vst [vmem:[#allocation15_spill] sm:$0xff] %v10768_v52  ;;  %v1046_v26 = vadd.f32 %v1045_v63, %v10671_v45  ;;  %v1047_v47 = vpop.f32.mrb[19].mxu0  ;;  %v1329_v22 = vmul.f32 0.17677669, %v1042_v48  ;;  %v509_v63 = vmul.f32 %v10806_v42, %v10806_v42 }
 0x250   : > { %14399 = vst [vmem:[#allocation16_spill] sm:$0xff] %v10771_v57  ;;  %v1048_v31 = vadd.f32 %v1047_v47, %v10676_v32 }
 0x251   : > { %v1330_v14 = vmul.f32 0.17677669, %v1046_v26 }
 0x252   : > { %v10778_v15 = vpack.c.bf16 %v1048_v31, %v1044_v50 }
 0x253   : > { %v10780_v35 = vpack.c.bf16 %v1330_v14, %v1329_v22  ;;  %566 = vadd.xlane.f32.xlu0 %v506_v29 }
 0x254   : > { %14400 = vst [vmem:[#allocation17_spill] sm:$0xff] %v10778_v15  ;;  %v1051_v37 = vpop.f32.mrb[20].mxu0  ;;  %8943 = vmatprep.subr.msk.bf16.mxu1 %vm1401_vm0, %v10778_v15  ;;  %v1439_v17 = vsel %vm1401_vm0, %v10778_v15, 0 }
 0x255   : > { %v1052_v39 = vadd.f32 %v1051_v37, %v10671_v45  ;;  %v1053_v46 = vpop.f32.mrb[21].mxu0  ;;  %8388 = vmatpush3.bf16.xpose.msra.mxu1 %v1439_v17 }
 0x256   : > { %v1055_v51 = vpop.f32.mrb[22].mxu0  ;;  %v1054_v33 = vadd.f32 %v1053_v46, %v10676_v32 }
 0x257   : > { %v1056_v54 = vadd.f32 %v1055_v51, %v10671_v45  ;;  %v1057_v49 = vpop.f32.mrb[23].mxu0  ;;  %v1331_v7 = vmul.f32 0.17677669, %v1052_v39 }
 0x258   : > { %v1058_v18 = vadd.f32 %v1057_v49, %v10676_v32 }
 0x259   : > { %v1332_v8 = vmul.f32 0.17677669, %v1056_v54 }
 0x25a   : > { %v10795_v9 = vpack.c.bf16 %v1058_v18, %v1054_v33 }
 0x25b   : > { %v10797_v58 = vpack.c.bf16 %v1332_v8, %v1331_v7  ;;  %v569_v8 = vpop.xlane.xlu1 %568 }
 0x25c   : > { %14401 = vst [vmem:[#allocation18_spill] sm:$0xff] %v10795_v9  ;;  %v1061_v44 = vpop.f32.mrb[24].mxu0  ;;  %8944 = vmatprep.subr.msk.bf16.mxu1 %vm1401_vm0, %v10795_v9  ;;  %v1442_v0 = vsel %vm1401_vm0, %v10795_v9, 0 }
 0x25d   : > { %v1062_v1 = vadd.f32 %v1061_v44, %v10671_v45  ;;  %v1063_v43 = vpop.f32.mrb[25].mxu0  ;;  %8390 = vmatpush3.bf16.xpose.msra.mxu1 %v1442_v0 }
 0x25e   : > { %v1065_v24 = vpop.f32.mrb[26].mxu0  ;;  %v1064_v48 = vadd.f32 %v1063_v43, %v10676_v32 }
 0x25f   : > { %v1066_v41 = vadd.f32 %v1065_v24, %v10671_v45  ;;  %v1067_v23 = vpop.f32.mrb[27].mxu0  ;;  %v1333_v26 = vmul.f32 0.17677669, %v1062_v1 }
 0x260   : > { %v1068_v12 = vadd.f32 %v1067_v23, %v10676_v32  ;;  %570 = vadd.xlane.f32.xlu1 %v508_v62  ;;  %v603_v62 = vmul.f32 0.0078125, %v569_v8 }
 0x261   : > { %v1334_v47 = vmul.f32 0.17677669, %v1066_v41 }
 0x262   : > { %v10814_v2 = vpack.c.bf16 %v1068_v12, %v1064_v48  ;;  %v635_v1 = vadd.f32 1e-05, %v603_v62 }
 0x263   : > { %v10816_v29 = vpack.c.bf16 %v1334_v47, %v1333_v26 }
 0x264   : > { %v1071_v50 = vpop.f32.mrb[28].mxu0  ;;  %8945 = vmatprep.subr.msk.bf16.mxu1 %vm1401_vm0, %v10814_v2  ;;  %572 = vadd.xlane.f32.xlu1 %v509_v63  ;;  %v1445_v31 = vsel %vm1401_vm0, %v10814_v2, 0  ;;  %9208 = vrsqrt.f32 %v635_v1 }
 0x265   : > { %v1072_v22 = vadd.f32 %v1071_v50, %v10671_v45  ;;  %v1073_v14 = vpop.f32.mrb[29].mxu0  ;;  %8392 = vmatpush3.bf16.xpose.msra.mxu1 %v1445_v31 }
 0x266   : > { %v1075_v27 = vpop.f32.mrb[30].mxu0  ;;  %v1074_v39 = vadd.f32 %v1073_v14, %v10676_v32 }
 0x267   : > { %v1076_v37 = vadd.f32 %v1075_v27, %v10671_v45  ;;  %v1077_v17 = vpop.f32.mrb[31].mxu0  ;;  %v1335_v51 = vmul.f32 0.17677669, %v1072_v22 }
 0x268   : > { %v1078_v46 = vadd.f32 %v1077_v17, %v10676_v32 }
 0x269   : > { %v1336_v54 = vmul.f32 0.17677669, %v1076_v37  ;;  %1848 = vrot.lane.b32.xlu0 %v10732_v30, %s10115_s12 }
 0x26a   : > { %v10828_v49 = vpack.c.bf16 %v1078_v46, %v1074_v39 }
 0x26b   : > { %v10830_v5 = vpack.c.bf16 %v1336_v54, %v1335_v51 }
 0x26c   : > { %8946 = vmatprep.subr.msk.bf16.mxu1 %vm1401_vm0, %v10828_v49  ;;  %v1448_v33 = vsel %vm1401_vm0, %v10828_v49, 0 }
 0x26d   : > { %8394 = vmatpush3.bf16.xpose.msra.mxu1 %v1448_v33  ;;  %1852 = vrot.lane.b32.xlu0 %v10778_v15, %s10115_s12 }
 0x26e   : > { %8411 = vmatprep.subr.bf16.mxu1 %v10704_v53 }
 0x271   : > { %1854 = vrot.lane.b32.xlu0 %v10795_v9, %s10115_s12 }
 0x275   : > { %1856 = vrot.lane.b32.xlu0 %v10814_v2, %s10115_s12  ;;  %1850 = vrot.lane.b32.xlu1 %v10753_v3, %s10115_s12 }
 0x279   : > { %1820 = vrot.lane.b32.xlu0 %v10689_v25, %s10115_s12  ;;  %1858 = vrot.lane.b32.xlu1 %v10828_v49, %s10115_s12 }
 0x27d   : > { %1824 = vrot.lane.b32.xlu0 %v10734_v13, %s10115_s12  ;;  %1822 = vrot.lane.b32.xlu1 %v10712_v28, %s10115_s12 }
 0x281   : > { %1828 = vrot.lane.b32.xlu0 %v10780_v35, %s10115_s12  ;;  %1826 = vrot.lane.b32.xlu1 %v10755_v59, %s10115_s12 }
 0x285   : > { %1832 = vrot.lane.b32.xlu0 %v10816_v29, %s10115_s12  ;;  %1830 = vrot.lane.b32.xlu1 %v10797_v58, %s10115_s12 }
 0x289   : > { %2165 = vrot.lane.b32.xlu0 %v10704_v53, %s10115_s12  ;;  %1834 = vrot.lane.b32.xlu1 %v10830_v5, %s10115_s12 }
 0x28d   : > { %2169 = vrot.lane.b32.xlu0 %v10727_v20, %s10115_s12  ;;  %2167 = vrot.lane.b32.xlu1 %v10701_v56, %s10115_s12 }
 0x291   : > { %2173 = vrot.lane.b32.xlu0 %v10747_v36, %s10115_s12  ;;  %2171 = vrot.lane.b32.xlu1 %v10724_v34, %s10115_s12 }
 0x295   : > { %2177 = vrot.lane.b32.xlu0 %v10771_v57, %s10115_s12  ;;  %2175 = vrot.lane.b32.xlu1 %v10744_v38, %s10115_s12 }
 0x299   : > { %2383 = vrot.lane.b32.xlu0 %v10687_v4, %s10116_s13  ;;  %2179 = vrot.lane.b32.xlu1 %v10768_v52, %s10115_s12 }
 0x29d   : > { %2385 = vrot.lane.b32.xlu1 %v10710_v40, %s10116_s13 }
 0x2a6   : > { %v1845_v18 = vpop.permute.xlu0 %1844 }
 0x2a7   : > { %8947 = vmatprep.subr.msk.bf16.mxu0 %vm1401_vm0, %v1845_v18  ;;  %v1885_v7 = vsel %vm1401_vm0, %v1845_v18, 0 }
 0x2a8   : > { %8444 = vmatpush3.bf16.xpose.msra.mxu0 %v1885_v7 }
 0x2ae   : > { %v1847_v44 = vpop.permute.xlu1 %1846 }
 0x2af   : > { %8948 = vmatprep.subr.msk.bf16.mxu0 %vm1401_vm0, %v1847_v44  ;;  %v1888_v0 = vsel %vm1401_vm0, %v1847_v44, 0 }
 0x2b0   : > { %8446 = vmatpush3.bf16.xpose.msra.mxu0 %v1888_v0 }
 0x2e0   : > { %v567_v43 = vpop.xlane.xlu0 %566  ;;  %v1081_v24 = vpop.f32.mrb[32].mxu0 }
 0x2e1   : > { %v602_v41 = vmul.f32 0.0078125, %v567_v43  ;;  %v1082_v23 = vadd.f32 %v1081_v24, %v10671_v45  ;;  %v1083_v48 = vpop.f32.mrb[33].mxu0  ;;  %v9209_v24 = vpop.eup %9208 }
 0x2e2   : > { %v1084_v12 = vadd.f32 %v1083_v48, %v10676_v32  ;;  %v1085_v63 = vpop.f32.mrb[34].mxu0 }
 0x2e3   : > { %v634_v26 = vadd.f32 1e-05, %v602_v41  ;;  %v1337_v47 = vmul.f32 0.17677669, %v1082_v23  ;;  %v1086_v50 = vadd.f32 %v1085_v63, %v10671_v45  ;;  %v1087_v31 = vpop.f32.mrb[35].mxu0 }
 0x2e4   : > { %v1849_v22 = vpop.permute.xlu0 %1848  ;;  %v1088_v14 = vadd.f32 %v1087_v31, %v10676_v32  ;;  %v8365_v27 = vpop.f32.mrb[16].mxu1 }
 0x2e5   : > { %9210 = vrsqrt.f32 %v634_v26  ;;  %8949 = vmatprep.subr.msk.bf16.mxu0 %vm1401_vm0, %v1849_v22  ;;  %v1891_v37 = vsel %vm1401_vm0, %v1849_v22, 0  ;;  %v1338_v17 = vmul.f32 0.17677669, %v1086_v50  ;;  %v1267_v39 = vadd.f32 %v8365_v27, %v10683_v11  ;;  %v1258_v46 = vpop.f32.mrb[17].mxu1 }
 0x2e6   : > { %8448 = vmatpush3.bf16.xpose.msra.mxu0 %v1891_v37  ;;  %v10894_v51 = vpack.c.bf16 %v1088_v14, %v1084_v12  ;;  %v1259_v54 = vadd.f32 %v1258_v46, %v10683_v11  ;;  %v8366_v33 = vpop.f32.mrb[18].mxu1 }
 0x2e7   : > { %v10897_v18 = vpack.c.bf16 %v1338_v17, %v1337_v47  ;;  %v1270_v7 = vadd.f32 %v8366_v33, %v10683_v11  ;;  %v1261_v8 = vpop.f32.mrb[19].mxu1  ;;  %v699_v17 = vmul.f32 %v9209_v24, %v10609_v21 }
 0x2e8   : > { %14402 = vst [vmem:[#allocation19_spill] sm:$0xff] %v10894_v51  ;;  %v1091_v44 = vpop.f32.mrb[36].mxu0  ;;  %v1262_v0 = vadd.f32 %v1261_v8, %v10683_v11  ;;  %v10908_v47 = vpop.permute.xlu0 %1852 }
 0x2e9   : > { %14403 = vst [vmem:[#allocation20_spill] sm:$0xff] %v10897_v18  ;;  %v1092_v62 = vadd.f32 %v1091_v44, %v10671_v45  ;;  %v1093_v1 = vpop.f32.mrb[37].mxu0  ;;  %v10902_v43 = vpack.c.bf16 %v1270_v7, %v1267_v39 }
 0x2ea   : > { %v1094_v41 = vadd.f32 %v1093_v1, %v10676_v32  ;;  %v1095_v23 = vpop.f32.mrb[38].mxu0  ;;  %v10905_v48 = vpack.c.bf16 %v1262_v0, %v1259_v54 }
 0x2eb   : > { %14404 = vst [vmem:[#allocation21_spill] sm:$0xff] %v10902_v43  ;;  %v1339_v12 = vmul.f32 0.17677669, %v1092_v62  ;;  %v1096_v63 = vadd.f32 %v1095_v23, %v10671_v45  ;;  %v1097_v26 = vpop.f32.mrb[39].mxu0 }
 0x2ec   : > { %14405 = vst [vmem:[#allocation22_spill] sm:$0xff] %v10905_v48  ;;  %v1098_v50 = vadd.f32 %v1097_v26, %v10676_v32  ;;  %v8369_v31 = vpop.f32.mrb[20].mxu1 }
 0x2ed   : > { %v1340_v22 = vmul.f32 0.17677669, %v1096_v63  ;;  %v571_v14 = vpop.xlane.xlu1 %570  ;;  %v1283_v27 = vadd.f32 %v8369_v31, %v10683_v11  ;;  %v1274_v37 = vpop.f32.mrb[21].mxu1 }
 0x2ee   : > { %v10913_v39 = vpack.c.bf16 %v1098_v50, %v1094_v41  ;;  %v604_v46 = vmul.f32 0.0078125, %v571_v14  ;;  %v1275_v54 = vadd.f32 %v1274_v37, %v10683_v11  ;;  %v8370_v33 = vpop.f32.mrb[22].mxu1  ;;  %v10932_v37 = vpop.permute.xlu0 %1854 }
 0x2ef   : > { %v9211_v7 = vpop.eup %9210  ;;  %v10916_v8 = vpack.c.bf16 %v1340_v22, %v1339_v12  ;;  %v1286_v44 = vadd.f32 %v8370_v33, %v10683_v11  ;;  %v1277_v0 = vpop.f32.mrb[23].mxu1  ;;  %v10927_v12 = vld [vmem:[%s14308_s7 + $0x1] ss:$0 sm:$0xff] }
 0x2f0   : > { %14406 = vst [vmem:[#allocation23_spill] sm:$0xff] %v10913_v39  ;;  %v636_v62 = vadd.f32 1e-05, %v604_v46  ;;  %v1101_v1 = vpop.f32.mrb[40].mxu0  ;;  %v1278_v23 = vadd.f32 %v1277_v0, %v10683_v11  ;;  %v698_v63 = vmul.f32 %v9211_v7, %v10760_v16  ;;  %v735_v50 = vmul.f32 %v10927_v12, %v699_v17 }
 0x2f1   : > { %14407 = vst [vmem:[#allocation24_spill] sm:$0xff] %v10916_v8  ;;  %v1102_v21 = vadd.f32 %v1101_v1, %v10671_v45  ;;  %v573_v24 = vpop.xlane.xlu1 %572  ;;  %v1103_v41 = vpop.f32.mrb[41].mxu0  ;;  %v10922_v26 = vpack.c.bf16 %v1286_v44, %v1283_v27 }
 0x2f2   : > { %9212 = vrsqrt.f32 %v636_v62  ;;  %v605_v31 = vmul.f32 0.0078125, %v573_v24  ;;  %v1105_v22 = vpop.f32.mrb[42].mxu0  ;;  %v10930_v14 = vpack.c.bf16 %v1278_v23, %v1275_v54  ;;  %v734_v27 = vmul.f32 %v10927_v12, %v698_v63  ;;  %v10049_v54 = vld [vmem:[%s14308_s7 + $0x2] ss:$0 sm:$0xff] }
 0x2f3   : > { %14408 = vst [vmem:[#allocation25_spill] sm:$0xff] %v10922_v26  ;;  %v1106_v16 = vadd.f32 %v1105_v22, %v10671_v45  ;;  %v1107_v46 = vpop.f32.mrb[43].mxu0  ;;  %v1104_v7 = vadd.f32 %v1103_v41, %v10676_v32  ;;  %v1341_v0 = vmul.f32 0.17677669, %v1102_v21  ;;  %v771_v23 = vadd.f32 %v10049_v54, %v735_v50  ;;  %v10949_v22 = vpop.permute.xlu0 %1856 }
 0x2f4   : > { %14409 = vst [vmem:[#allocation26_spill] sm:$0xff] %v10930_v14  ;;  %v637_v33 = vadd.f32 1e-05, %v605_v31  ;;  %v1108_v44 = vadd.f32 %v1107_v46, %v10676_v32  ;;  %v770_v62 = vadd.f32 %v10049_v54, %v734_v27 }
 0x2f5   : > { %v1342_v1 = vmul.f32 0.17677669, %v1106_v16  ;;  %v1851_v17 = vpop.permute.xlu1 %1850 }
 0x2f6   : > { %9214 = vrsqrt.f32 %v637_v33  ;;  %v10941_v24 = vpack.c.bf16 %v1108_v44, %v1104_v7  ;;  %8950 = vmatprep.subr.msk.bf16.mxu0 %vm1401_vm0, %v1851_v17  ;;  %v1894_v63 = vsel %vm1401_vm0, %v1851_v17, 0  ;;  %v788_v41 = vpack.c.bf16 %v771_v23, %v770_v62 }
 0x2f7   : > { %v10945_v31 = vpack.c.bf16 %v1342_v1, %v1341_v0  ;;  %8450 = vmatpush3.bf16.xpose.msra.mxu0 %v1894_v63 }
 0x2f8   : > { %14410 = vst [vmem:[#allocation27_spill] sm:$0xff] %v10941_v24  ;;  %v1111_v21 = vpop.f32.mrb[44].mxu0  ;;  %8951 = vmatprep.subr.msk.bf16.mxu0 %vm1401_vm0, %v10908_v47  ;;  %1140 = vmatmul.mubr.bf16.gmra.mrb[56].mxu0 %v788_v41  ;;  %v8373_v46 = vpop.f32.mrb[24].mxu1 }
 0x2f9   : > { %14411 = vst [vmem:[#allocation28_spill] sm:$0xff] %v10945_v31  ;;  %v1112_v16 = vadd.f32 %v1111_v21, %v10671_v45  ;;  %8375 = vmatprep.mubr.bf16.mxu1 %v788_v41  ;;  %v1113_v50 = vpop.f32.mrb[45].mxu0  ;;  %1149 = vmatprep.mubr.bf16.mxu0 %v14313_v55  ;;  %v1299_v33 = vadd.f32 %v8373_v46, %v10683_v11  ;;  %v1290_v44 = vpop.f32.mrb[25].mxu1  ;;  %v1897_v55 = vsel %vm1401_vm0, %v10908_v47, 0 }
 0x2fa   : > { %v1115_v27 = vpop.f32.mrb[46].mxu0  ;;  %v1114_v17 = vadd.f32 %v1113_v50, %v10676_v32  ;;  %v1291_v62 = vadd.f32 %v1290_v44, %v10683_v11  ;;  %v8374_v63 = vpop.f32.mrb[26].mxu1 }
 0x2fb   : > { %v1116_v7 = vadd.f32 %v1115_v27, %v10671_v45  ;;  %v1117_v0 = vpop.f32.mrb[47].mxu0  ;;  %v1343_v41 = vmul.f32 0.17677669, %v1112_v16  ;;  %v1302_v61 = vadd.f32 %v8374_v63, %v10683_v11  ;;  %v1293_v60 = vpop.f32.mrb[27].mxu1 }
 0x2fc   : > { %v9213_v1 = vpop.eup %9212  ;;  %v1118_v23 = vadd.f32 %v1117_v0, %v10676_v32  ;;  %v1294_v27 = vadd.f32 %v1293_v60, %v10683_v11  ;;  %v1821_v50 = vpop.permute.xlu0 %1820 }
 0x2fd   : > { %v1344_v21 = vmul.f32 0.17677669, %v1116_v7  ;;  %v700_v10 = vmul.f32 %v9213_v1, %v10793_v6  ;;  %v10967_v44 = vpack.c.bf16 %v1302_v61, %v1299_v33 }
 0x2fe   : > { %v10960_v46 = vpack.c.bf16 %v1118_v23, %v1114_v17  ;;  %v10969_v7 = vpack.c.bf16 %v1294_v27, %v1291_v62  ;;  %v1859_v17 = vpop.permute.xlu1 %1858 }
 0x2ff   : > { %v10965_v19 = vpack.c.bf16 %v1344_v21, %v1343_v41  ;;  %14414 = vst [vmem:[#allocation31_spill] sm:$0xff] %v10967_v44  ;;  %8452 = vmatpush3.bf16.xpose.msra.mxu0 %v1897_v55  ;;  %v736_v47 = vmul.f32 %v10927_v12, %v700_v10  ;;  %v1900_v10 = vsel %vm1401_vm0, %v10932_v37, 0 }
 0x300   : > { %14412 = vst [vmem:[#allocation29_spill] sm:$0xff] %v10960_v46  ;;  %v9215_v16 = vpop.eup %9214  ;;  %14415 = vst [vmem:[#allocation32_spill] sm:$0xff] %v10969_v7  ;;  %v1121_v0 = vpop.f32.mrb[48].mxu0  ;;  %8952 = vmatprep.subr.msk.bf16.mxu0 %vm1401_vm0, %v10932_v37 }
 0x301   : > { %14413 = vst [vmem:[#allocation30_spill] sm:$0xff] %v10965_v19  ;;  %v1122_v6 = vadd.f32 %v1121_v0, %v10671_v45  ;;  %v1123_v1 = vpop.f32.mrb[49].mxu0  ;;  %v701_v60 = vmul.f32 %v9215_v16, %v10806_v42  ;;  %v1825_v41 = vpop.permute.xlu0 %1824  ;;  %v772_v0 = vadd.f32 %v10049_v54, %v736_v47 }
 0x302   : > { %v1125_v23 = vpop.f32.mrb[50].mxu0  ;;  %v1124_v62 = vadd.f32 %v1123_v1, %v10676_v32 }
 0x303   : > { %v1126_v61 = vadd.f32 %v1125_v23, %v10671_v45  ;;  %v1127_v33 = vpop.f32.mrb[51].mxu0  ;;  %v737_v55 = vmul.f32 %v10927_v12, %v701_v60  ;;  %v1345_v21 = vmul.f32 0.17677669, %v1122_v6  ;;  %v1823_v23 = vpop.permute.xlu1 %1822 }
 0x304   : > { %v1128_v63 = vadd.f32 %v1127_v33, %v10676_v32 }
 0x305   : > { %v1346_v27 = vmul.f32 0.17677669, %v1126_v61  ;;  %v773_v19 = vadd.f32 %v10049_v54, %v737_v55  ;;  %v1829_v37 = vpop.permute.xlu0 %1828 }
 0x306   : > { %v10980_v31 = vpack.c.bf16 %v1128_v63, %v1124_v62 }
 0x307   : > { %v10984_v42 = vpack.c.bf16 %v1346_v27, %v1345_v21  ;;  %8454 = vmatpush3.bf16.xpose.msra.mxu0 %v1900_v10  ;;  %v789_v16 = vpack.c.bf16 %v773_v19, %v772_v0  ;;  %v1827_v62 = vpop.permute.xlu1 %1826  ;;  %v1903_v21 = vsel %vm1401_vm0, %v10949_v22, 0 }
 0x308   : > { %14416 = vst [vmem:[#allocation33_spill] sm:$0xff] %v10980_v31  ;;  %v1131_v12 = vpop.f32.mrb[52].mxu0  ;;  %8953 = vmatprep.subr.msk.bf16.mxu0 %vm1401_vm0, %v10949_v22  ;;  %v1906_v22 = vsel %vm1401_vm0, %v1859_v17, 0 }
 0x309   : > { %14417 = vst [vmem:[#allocation34_spill] sm:$0xff] %v10984_v42  ;;  %v1132_v1 = vadd.f32 %v1131_v12, %v10671_v45  ;;  %v1133_v6 = vpop.f32.mrb[53].mxu0  ;;  %1150 = vmatmul.mubr.bf16.gmra.mrb[60].mxu0 %v789_v16  ;;  %8376 = vmatmul.mubr.bf16.gmra.mrb[28].mxu1 %v789_v16 }
 0x30a   : > { %v1135_v54 = vpop.f32.mrb[54].mxu0  ;;  %8395 = vmatprep.mubr.msk.bf16.mxu1 %vm1401_vm0, %v10689_v25  ;;  %8459 = vmatprep.mubr.msk.bf16.mxu0 %vm1401_vm0, %v1821_v50  ;;  %v1134_v47 = vadd.f32 %v1133_v6, %v10676_v32  ;;  %v1833_v50 = vpop.permute.xlu0 %1832 }
 0x30b   : > { %v1136_v60 = vadd.f32 %v1135_v54, %v10671_v45  ;;  %v1137_v19 = vpop.f32.mrb[55].mxu0  ;;  %v1347_v33 = vmul.f32 0.17677669, %v1132_v1  ;;  %v1831_v0 = vpop.permute.xlu1 %1830 }
 0x30c   : > { %v1138_v61 = vadd.f32 %v1137_v19, %v10676_v32 }
 0x30d   : > { %v1348_v55 = vmul.f32 0.17677669, %v1136_v60 }
 0x30e   : > { %v10995_v63 = vpack.c.bf16 %v1138_v61, %v1134_v47  ;;  %v2166_v10 = vpop.permute.xlu0 %2165 }
 0x30f   : > { %v10999_v27 = vpack.c.bf16 %v1348_v55, %v1347_v33  ;;  %8456 = vmatpush3.bf16.xpose.msra.mxu0 %v1903_v21  ;;  %v1835_v16 = vpop.permute.xlu1 %1834 }
 0x310   : > { %14418 = vst [vmem:[#allocation35_spill] sm:$0xff] %v10995_v63  ;;  %8954 = vmatprep.subr.msk.bf16.mxu0 %vm1401_vm0, %v1859_v17 }
 0x311   : > { %14419 = vst [vmem:[#allocation36_spill] sm:$0xff] %v10999_v27  ;;  %8396 = vmatmul.mubr.msk.bf16.vlgmr.msra.gmra.mrb[32].mxu1 %vm1401_vm0, %v10712_v28 }
 0x312   : > { %8412 = vmatpush3.bf16.msra.mxu1 %v10704_v53  ;;  %8399 = vmatprep.mubr.msk.bf16.mxu1 %vm1401_vm0, %v10734_v13  ;;  %v2170_v12 = vpop.permute.xlu0 %2169 }
 0x313   : > { %8413 = vmatprep.subr.bf16.mxu1 %v10701_v56  ;;  %v2168_v17 = vpop.permute.xlu1 %2167 }
 0x316   : > { %8414 = vmatpush3.bf16.msra.mxu1 %v10701_v56 }
 0x317   : > { %8415 = vmatprep.subr.bf16.mxu1 %v10727_v20  ;;  %8458 = vmatpush3.bf16.xpose.msra.mxu0 %v1906_v22 }
 0x318   : > { %8475 = vmatprep.subr.bf16.mxu0 %v2166_v10 }
 0x319   : > { %8400 = vmatmul.mubr.msk.bf16.gmra.mrb[36].mxu1 %vm1401_vm0, %v10755_v59 }
 0x31a   : > { %8416 = vmatpush3.bf16.msra.mxu1 %v10727_v20  ;;  %8403 = vmatprep.mubr.msk.bf16.mxu1 %vm1401_vm0, %v10780_v35 }
 0x31b   : > { %8417 = vmatprep.subr.bf16.mxu1 %v10724_v34 }
 0x31e   : > { %8418 = vmatpush3.bf16.msra.mxu1 %v10724_v34  ;;  %8460 = vmatmul.mubr.msk.bf16.vlgmr.msra.gmra.mrb[64].mxu0 %vm1401_vm0, %v1823_v23  ;;  %v2174_v23 = vpop.permute.xlu0 %2173 }
 0x31f   : > { %8419 = vmatprep.subr.bf16.mxu1 %v10747_v36  ;;  %8463 = vmatprep.mubr.msk.bf16.mxu0 %vm1401_vm0, %v1825_v41  ;;  %v2172_v41 = vpop.permute.xlu1 %2171 }
 0x320   : > { %8476 = vmatpush3.bf16.msra.mxu0 %v2166_v10 }
 0x321   : > { %8477 = vmatprep.subr.bf16.mxu0 %v2168_v17  ;;  %8404 = vmatmul.mubr.msk.bf16.gmra.mrb[40].mxu1 %vm1401_vm0, %v10797_v58 }
 0x322   : > { %8420 = vmatpush3.bf16.msra.mxu1 %v10747_v36  ;;  %8407 = vmatprep.mubr.msk.bf16.mxu1 %vm1401_vm0, %v10816_v29  ;;  %v2178_v6 = vpop.permute.xlu0 %2177 }
 0x323   : > { %8421 = vmatprep.subr.bf16.mxu1 %v10744_v38  ;;  %v2176_v1 = vpop.permute.xlu1 %2175 }
 0x324   : > { %8478 = vmatpush3.bf16.msra.mxu0 %v2168_v17 }
 0x325   : > { %8479 = vmatprep.subr.bf16.mxu0 %v2170_v12 }
 0x326   : > { %8422 = vmatpush3.bf16.msra.mxu1 %v10744_v38  ;;  %8464 = vmatmul.mubr.msk.bf16.gmra.mrb[68].mxu0 %vm1401_vm0, %v1827_v62 }
 0x327   : > { %8423 = vmatprep.subr.bf16.mxu1 %v10771_v57  ;;  %8467 = vmatprep.mubr.msk.bf16.mxu0 %vm1401_vm0, %v1829_v37  ;;  %v2180_v54 = vpop.permute.xlu1 %2179  ;;  %v11039_v37 = vpop.permute.xlu0 %2383 }
 0x328   : > { %8480 = vmatpush3.bf16.msra.mxu0 %v2170_v12 }
 0x329   : > { %8481 = vmatprep.subr.bf16.mxu0 %v2172_v41  ;;  %8408 = vmatmul.mubr.msk.bf16.gmra.mrb[44].mxu1 %vm1401_vm0, %v10830_v5 }
 0x32a   : > { %8424 = vmatpush3.bf16.msra.mxu1 %v10771_v57 }
 0x32b   : > { %8425 = vmatprep.subr.bf16.mxu1 %v10768_v52 }
 0x32c   : > { %8482 = vmatpush3.bf16.msra.mxu0 %v2172_v41 }
 0x32d   : > { %8483 = vmatprep.subr.bf16.mxu0 %v2174_v23 }
 0x32e   : > { %8426 = vmatpush3.bf16.msra.mxu1 %v10768_v52  ;;  %8468 = vmatmul.mubr.msk.bf16.gmra.mrb[72].mxu0 %vm1401_vm0, %v1831_v0 }
 0x32f   : > { %8471 = vmatprep.mubr.msk.bf16.mxu0 %vm1401_vm0, %v1833_v50 }
 0x330   : > { %8484 = vmatpush3.bf16.msra.mxu0 %v2174_v23 }
 0x331   : > { %8485 = vmatprep.subr.bf16.mxu0 %v2176_v1 }
 0x334   : > { %8486 = vmatpush3.bf16.msra.mxu0 %v2176_v1 }
 0x335   : > { %8487 = vmatprep.subr.bf16.mxu0 %v2178_v6 }
 0x336   : > { %8472 = vmatmul.mubr.msk.bf16.gmra.mrb[76].mxu0 %vm1401_vm0, %v1835_v16 }
 0x338   : > { %8488 = vmatpush3.bf16.msra.mxu0 %v2178_v6 }
 0x339   : > { %8489 = vmatprep.subr.bf16.mxu0 %v2180_v54 }
 0x33c   : > { %8490 = vmatpush3.bf16.msra.mxu0 %v2180_v54 }
 0x33d   : > { %8955 = vmatprep.subr.msk.bf16.mxu0 %vm1401_vm0, %v11039_v37 }
 0x3cb   : > { %v1141_v60 = vpop.f32.mrb[56].mxu0 }
 0x3cc   : > { %v1142_v19 = vadd.f32 %v1141_v60, %v10671_v45  ;;  %v1143_v47 = vpop.f32.mrb[57].mxu0 }
 0x3cd   : > { %v1145_v61 = vpop.f32.mrb[58].mxu0  ;;  %v1144_v62 = vadd.f32 %v1143_v47, %v10676_v32 }
 0x3ce   : > { %v1146_v33 = vadd.f32 %v1145_v61, %v10671_v45  ;;  %v1147_v55 = vpop.f32.mrb[59].mxu0  ;;  %v1349_v50 = vmul.f32 0.17677669, %v1142_v19 }
 0x3cf   : > { %v1148_v21 = vadd.f32 %v1147_v55, %v10676_v32 }
 0x3d0   : > { %v1350_v0 = vmul.f32 0.17677669, %v1146_v33 }
 0x3d1   : > { %v11047_v22 = vpack.c.bf16 %v1148_v21, %v1144_v62 }
 0x3d2   : > { %v11049_v10 = vpack.c.bf16 %v1350_v0, %v1349_v50 }
 0x3d3   : > { %14420 = vst [vmem:[#allocation37_spill] sm:$0xff] %v11047_v22 }
 0x3d4   : > { %14421 = vst [vmem:[#allocation38_spill] sm:$0xff] %v11049_v10 }
 0x3dc   : > { %v1151_v16 = vpop.f32.mrb[60].mxu0  ;;  %v8377_v17 = vpop.f32.mrb[28].mxu1 }
 0x3dd   : > { %v1152_v12 = vadd.f32 %v1151_v16, %v10671_v45  ;;  %v1153_v41 = vpop.f32.mrb[61].mxu0  ;;  %v1306_v23 = vpop.f32.mrb[29].mxu1  ;;  %v1315_v54 = vadd.f32 %v8377_v17, %v10683_v11 }
 0x3de   : > { %v1155_v1 = vpop.f32.mrb[62].mxu0  ;;  %v8378_v6 = vpop.f32.mrb[30].mxu1  ;;  %v1154_v33 = vadd.f32 %v1153_v41, %v10676_v32  ;;  %v1307_v55 = vadd.f32 %v1306_v23, %v10683_v11 }
 0x3df   : > { %v1156_v60 = vadd.f32 %v1155_v1, %v10671_v45  ;;  %v1318_v47 = vadd.f32 %v8378_v6, %v10683_v11  ;;  %v1157_v19 = vpop.f32.mrb[63].mxu0  ;;  %v1309_v61 = vpop.f32.mrb[31].mxu1  ;;  %v1351_v50 = vmul.f32 0.17677669, %v1152_v12 }
 0x3e0   : > { %v1158_v62 = vadd.f32 %v1157_v19, %v10676_v32  ;;  %v1310_v21 = vadd.f32 %v1309_v61, %v10683_v11 }
 0x3e1   : > { %v1352_v0 = vmul.f32 0.17677669, %v1156_v60  ;;  %v11059_v16 = vpack.c.bf16 %v1318_v47, %v1315_v54 }
 0x3e2   : > { %v11061_v10 = vpack.c.bf16 %v1158_v62, %v1154_v33  ;;  %v11063_v17 = vpack.c.bf16 %v1310_v21, %v1307_v55 }
 0x3e3   : > { %14422 = vst [vmem:[#allocation39_spill] sm:$0xff] %v11059_v16  ;;  %v11065_v45 = vpack.c.bf16 %v1352_v0, %v1351_v50 }
 0x3e4   : > { %14423 = vst [vmem:[#allocation40_spill] sm:$0xff] %v11061_v10  ;;  %14424 = vst [vmem:[#allocation41_spill] sm:$0xff] %v11063_v17  ;;  %v11067_v1 = vpop.f32.mrb[32].mxu1  ;;  %v11139_v17 = vpop.permute.xlu1 %2385 }
 0x3e5   : > { %14425 = vst [vmem:[#allocation42_spill] sm:$0xff] %v11065_v45  ;;  %v11069_v6 = vpop.f32.mrb[33].mxu1 }
 0x3e6   : > { %v11071_v41 = vpop.f32.mrb[34].mxu1 }
 0x3e7   : > { %v11073_v23 = vpop.f32.mrb[35].mxu1 }
 0x3ec   : > { %v11075_v32 = vpop.f32.mrb[36].mxu1 }
 0x3ed   : > { %v11077_v11 = vpop.f32.mrb[37].mxu1 }
 0x3ee   : > { %v11079_v12 = vpop.f32.mrb[38].mxu1 }
 0x3ef   : > { %v11081_v54 = vpop.f32.mrb[39].mxu1 }
 0x3f1   : > { %v8461_v60 = vpop.f32.mrb[64].mxu0 }
 0x3f2   : > { %2009 = vmax.xlane.f32.xlu0 %v8461_v60  ;;  %v1942_v47 = vpop.f32.mrb[65].mxu0 }
 0x3f3   : > { %v8462_v19 = vpop.f32.mrb[66].mxu0 }
 0x3f4   : > { %v11083_v61 = vpop.f32.mrb[40].mxu1  ;;  %v1945_v33 = vpop.f32.mrb[67].mxu0 }
 0x3f5   : > { %v11085_v55 = vpop.f32.mrb[41].mxu1  ;;  %2007 = vmax.xlane.f32.xlu1 %v1945_v33 }
 0x3f6   : > { %v11087_v62 = vpop.f32.mrb[42].mxu1  ;;  %2005 = vmax.xlane.f32.xlu0 %v1942_v47 }
 0x3f7   : > { %v11089_v21 = vpop.f32.mrb[43].mxu1 }
 0x3f9   : > { %v11091_v50 = vpop.f32.mrb[68].mxu0 }
 0x3fa   : > { %2011 = vmax.xlane.f32.xlu0 %v8462_v19  ;;  %v11093_v0 = vpop.f32.mrb[69].mxu0 }
 0x3fb   : > { %v11095_v45 = vpop.f32.mrb[70].mxu0 }
 0x3fc   : > { %v11097_v27 = vpop.f32.mrb[44].mxu1  ;;  %2019 = vmax.xlane.f32.xlu1 %v11095_v45  ;;  %v11100_v42 = vpop.f32.mrb[71].mxu0 }
 0x3fd   : > { %v11102_v8 = vpop.f32.mrb[45].mxu1 }
 0x3fe   : > { %v11104_v18 = vpop.f32.mrb[46].mxu1  ;;  %2017 = vmax.xlane.f32.xlu0 %v11091_v50 }
 0x3ff   : > { %v11107_v10 = vpop.f32.mrb[47].mxu1 }
 0x400   : > { %2015 = vmax.xlane.f32.xlu1 %v11100_v42 }
 0x401   : > { %v11110_v22 = vpop.f32.mrb[72].mxu0 }
 0x402   : > { %2013 = vmax.xlane.f32.xlu0 %v11093_v0  ;;  %v11113_v63 = vpop.f32.mrb[73].mxu0 }
 0x403   : > { %v11115_v31 = vpop.f32.mrb[74].mxu0 }
 0x404   : > { %2027 = vmax.xlane.f32.xlu1 %v11115_v31  ;;  %v11118_v46 = vpop.f32.mrb[75].mxu0 }
 0x406   : > { %2025 = vmax.xlane.f32.xlu0 %v11110_v22 }
 0x408   : > { %2023 = vmax.xlane.f32.xlu1 %v11118_v46 }
 0x409   : > { %v11122_v24 = vpop.f32.mrb[76].mxu0 }
 0x40a   : > { %2021 = vmax.xlane.f32.xlu0 %v11113_v63  ;;  %v11125_v51 = vpop.f32.mrb[77].mxu0 }
 0x40b   : > { %v11127_v39 = vpop.f32.mrb[78].mxu0 }
 0x40c   : > { %v11129_v16 = vpop.f32.mrb[79].mxu0 }
 0x40e   : > { %2033 = vmax.xlane.f32.xlu0 %v11122_v24 }
 0x412   : > { %2029 = vmax.xlane.f32.xlu0 %v11125_v51 }
 0x419   : > { %2389 = vrot.lane.b32.xlu1 %v10753_v3, %s10116_s13 }
 0x428   : > { %2387 = vrot.lane.b32.xlu0 %v10732_v30, %s10116_s13 }
 0x43d   : > { %2035 = vmax.xlane.f32.xlu1 %v11127_v39 }
 0x441   : > { %2031 = vmax.xlane.f32.xlu1 %v11129_v16 }
 0x47f   : > { %v2010_v44 = vpop.xlane.xlu0 %2009 }
 0x480   : > { %v2039_v7 = vsub.f32 %v8461_v60, %v2010_v44 }
 0x482   : > { %v2057_v26 = vmul.f32 1.442695, %v2039_v7  ;;  %v2008_v14 = vpop.xlane.xlu1 %2007 }
 0x483   : > { %v2038_v43 = vsub.f32 %v1945_v33, %v2008_v14  ;;  %v2006_v48 = vpop.xlane.xlu0 %2005 }
 0x484   : > { %9216 = vpow2.f32 %v2057_v26  ;;  %v2037_v4 = vsub.f32 %v1942_v47, %v2006_v48 }
 0x485   : > { %v2055_v40 = vmul.f32 1.442695, %v2038_v43 }
 0x486   : > { %v2053_v57 = vmul.f32 1.442695, %v2037_v4 }
 0x487   : > { %9218 = vpow2.f32 %v2055_v40  ;;  %v2012_v3 = vpop.xlane.xlu0 %2011 }
 0x488   : > { %9220 = vpow2.f32 %v2053_v57  ;;  %v2040_v30 = vsub.f32 %v8462_v19, %v2012_v3 }
 0x48a   : > { %v2059_v52 = vmul.f32 1.442695, %v2040_v30  ;;  %v2020_v30 = vpop.xlane.xlu1 %2019 }
 0x48b   : > { %v2018_v4 = vpop.xlane.xlu0 %2017  ;;  %v2044_v19 = vsub.f32 %v11095_v45, %v2020_v30 }
 0x48c   : > { %9222 = vpow2.f32 %v2059_v52  ;;  %v2043_v52 = vsub.f32 %v11091_v50, %v2018_v4 }
 0x48d   : > { %v2067_v36 = vmul.f32 1.442695, %v2044_v19 }
 0x48e   : > { %v11141_v38 = vpop.eup %9216  ;;  %v2016_v57 = vpop.xlane.xlu1 %2015  ;;  %v2065_v26 = vmul.f32 1.442695, %v2043_v52 }
 0x48f   : > { %2089 = vadd.xlane.f32.xlu1 %v11141_v38  ;;  %v2014_v40 = vpop.xlane.xlu0 %2013  ;;  %v2042_v7 = vsub.f32 %v11100_v42, %v2016_v57 }
 0x490   : > { %v2041_v14 = vsub.f32 %v11093_v0, %v2014_v40  ;;  %9224 = vpow2.f32 %v2065_v26 }
 0x491   : > { %v11144_v34 = vpop.eup %9218 }
 0x492   : > { %v11146_v44 = vpop.eup %9220  ;;  %2087 = vadd.xlane.f32.xlu0 %v11144_v34  ;;  %v2028_v60 = vpop.xlane.xlu1 %2027  ;;  %v2061_v33 = vmul.f32 1.442695, %v2041_v14 }
 0x493   : > { %2085 = vadd.xlane.f32.xlu1 %v11146_v44  ;;  %v2026_v3 = vpop.xlane.xlu0 %2025  ;;  %v2048_v45 = vsub.f32 %v11115_v31, %v2028_v60 }
 0x494   : > { %9226 = vpow2.f32 %v2061_v33 }
 0x496   : > { %v11150_v43 = vpop.eup %9222  ;;  %v2024_v56 = vpop.xlane.xlu1 %2023 }
 0x497   : > { %2091 = vadd.xlane.f32.xlu1 %v11150_v43  ;;  %v2022_v48 = vpop.xlane.xlu0 %2021 }
 0x498   : > { %v2045_v0 = vsub.f32 %v11113_v63, %v2022_v48 }
 0x49a   : > { %v2069_v30 = vmul.f32 1.442695, %v2045_v0  ;;  %v11166_v57 = vpop.eup %9224 }
 0x49b   : > { %v2034_v47 = vpop.xlane.xlu0 %2033 }
 0x49c   : > { %v2051_v50 = vsub.f32 %v11122_v24, %v2034_v47  ;;  %v2046_v24 = vsub.f32 %v11118_v46, %v2024_v56 }
 0x49e   : > { %v2081_v42 = vmul.f32 1.442695, %v2051_v50 }
 0x49f   : > { %v2030_v40 = vpop.xlane.xlu0 %2029 }
 0x4a0   : > { %v2049_v52 = vsub.f32 %v11125_v51, %v2030_v40 }
 0x4a8   : > { %2391 = vrot.lane.b32.xlu0 %v10778_v15, %s10116_s13  ;;  %2393 = vrot.lane.b32.xlu1 %v10795_v9, %s10116_s13  ;;  %v2063_v15 = vmul.f32 1.442695, %v2042_v7  ;;  %v2047_v9 = vsub.f32 %v11110_v22, %v2026_v3  ;;  %v11168_v22 = vpop.permute.xlu1 %2389  ;;  %v2071_v3 = vmul.f32 1.442695, %v2046_v24 }
 0x4aa   : > { %9228 = vpow2.f32 %v2063_v15  ;;  %v2073_v4 = vmul.f32 1.442695, %v2047_v9  ;;  %v2077_v15 = vmul.f32 1.442695, %v2049_v52  ;;  %v2075_v9 = vmul.f32 1.442695, %v2048_v45 }
 0x4ab   : > { %9230 = vpow2.f32 %v2067_v36  ;;  %v11172_v36 = vpop.eup %9226 }
 0x4ac   : > { %9232 = vpow2.f32 %v2073_v4  ;;  %v2388_v4 = vpop.permute.xlu0 %2387 }
 0x4ad   : > { %9234 = vpow2.f32 %v2081_v42 }
 0x4ae   : > { %9236 = vpow2.f32 %v2069_v30 }
 0x4af   : > { %9238 = vpow2.f32 %v2077_v15 }
 0x4b0   : > { %9240 = vpow2.f32 %v2075_v9 }
 0x4b4   : > { %v11174_v51 = vpop.eup %9228 }
 0x4b5   : > { %v11179_v26 = vpop.eup %9230 }
 0x4b6   : > { %v11181_v56 = vpop.eup %9232 }
 0x4b7   : > { %v11186_v7 = vpop.eup %9234 }
 0x4b8   : > { %v11188_v60 = vpop.eup %9236 }
 0x4b9   : > { %v11192_v47 = vpop.eup %9238 }
 0x4ba   : > { %v11194_v19 = vpop.eup %9240 }
 0x4c7   : > { %2097 = vadd.xlane.f32.xlu0 %v11166_v57 }
 0x4ca   : > { %v2036_v63 = vpop.xlane.xlu1 %2035 }
 0x4cb   : > { %v2052_v31 = vsub.f32 %v11127_v39, %v2036_v63  ;;  %2093 = vadd.xlane.f32.xlu0 %v11172_v36 }
 0x4cc   : > { %2095 = vadd.xlane.f32.xlu1 %v11174_v51 }
 0x4cd   : > { %v2083_v48 = vmul.f32 1.442695, %v2052_v31 }
 0x4ce   : > { %v2032_v14 = vpop.xlane.xlu1 %2031 }
 0x4cf   : > { %9242 = vpow2.f32 %v2083_v48  ;;  %v2050_v46 = vsub.f32 %v11129_v16, %v2032_v14  ;;  %2099 = vadd.xlane.f32.xlu0 %v11179_v26 }
 0x4d0   : > { %2105 = vadd.xlane.f32.xlu1 %v11181_v56  ;;  %9244 = vpow2.f32 %v2071_v3 }
 0x4d1   : > { %v2079_v39 = vmul.f32 1.442695, %v2050_v46 }
 0x4d3   : > { %2113 = vadd.xlane.f32.xlu0 %v11186_v7  ;;  %9246 = vpow2.f32 %v2079_v39 }
 0x4d4   : > { %2101 = vadd.xlane.f32.xlu1 %v11188_v60 }
 0x4d7   : > { %2109 = vadd.xlane.f32.xlu0 %v11192_v47 }
 0x4d8   : > { %2107 = vadd.xlane.f32.xlu1 %v11194_v19 }
 0x4d9   : > { %v11198_v16 = vpop.eup %9242 }
 0x4da   : > { %v11200_v33 = vpop.eup %9244 }
 0x4db   : > { %2115 = vadd.xlane.f32.xlu0 %v11198_v16 }
 0x4dc   : > { %2103 = vadd.xlane.f32.xlu1 %v11200_v33 }
 0x4dd   : > { %v11204_v50 = vpop.eup %9246 }
 0x4e0   : > { %2111 = vadd.xlane.f32.xlu1 %v11204_v50 }
 0x4f1   : > { %2397 = vrot.lane.b32.xlu1 %v10828_v49, %s10116_s13  ;;  %2395 = vrot.lane.b32.xlu0 %v10814_v2, %s10116_s13 }
 0x4f5   : > { %2369 = vrot.lane.b32.xlu1 %v10712_v28, %s10116_s13  ;;  %2367 = vrot.lane.b32.xlu0 %v10689_v25, %s10116_s13 }
 0x4f9   : > { %2373 = vrot.lane.b32.xlu1 %v10755_v59, %s10116_s13  ;;  %2371 = vrot.lane.b32.xlu0 %v10734_v13, %s10116_s13 }
 0x4fd   : > { %2377 = vrot.lane.b32.xlu1 %v10797_v58, %s10116_s13  ;;  %2375 = vrot.lane.b32.xlu0 %v10780_v35, %s10116_s13 }
 0x501   : > { %2381 = vrot.lane.b32.xlu1 %v10830_v5, %s10116_s13  ;;  %2379 = vrot.lane.b32.xlu0 %v10816_v29, %s10116_s13 }
 0x51c   : > { %v2090_v0 = vpop.xlane.xlu1 %2089 }
 0x51f   : > { %v2088_v40 = vpop.xlane.xlu0 %2087 }
 0x520   : > { %9248 = vrcp.f32 %v2088_v40  ;;  %v2086_v42 = vpop.xlane.xlu1 %2085  ;;  %1547 = vmax.xlane.f32.xlu0 %v11069_v6 }
 0x521   : > { %9250 = vrcp.f32 %v2086_v42 }
 0x522   : > { %9252 = vrcp.f32 %v2090_v0 }
 0x524   : > { %v2092_v52 = vpop.xlane.xlu1 %2091  ;;  %1551 = vmax.xlane.f32.xlu0 %v11067_v1 }
 0x525   : > { %9254 = vrcp.f32 %v2092_v52  ;;  %1549 = vmax.xlane.f32.xlu1 %v11073_v23 }
 0x528   : > { %1553 = vmax.xlane.f32.xlu0 %v11071_v41  ;;  %v2394_v39 = vpop.permute.xlu1 %2393 }
 0x529   : > { %1557 = vmax.xlane.f32.xlu1 %v11081_v54  ;;  %v2439_v40 = vsel %vm1401_vm0, %v2394_v39, 0 }
 0x52a   : > { %v9249_v45 = vpop.eup %9248 }
 0x52b   : > { %v9251_v30 = vpop.eup %9250  ;;  %v2134_v15 = vmul.f32 %v9249_v45, %v11144_v34  ;;  %v2424_v34 = vsel %vm1401_vm0, %v11039_v37, 0  ;;  %v2430_v37 = vsel %vm1401_vm0, %v2388_v4, 0 }
 0x52c   : > { %1555 = vmax.xlane.f32.xlu0 %v11077_v11  ;;  %v2133_v9 = vmul.f32 %v9251_v30, %v11146_v44  ;;  %v9253_v24 = vpop.eup %9252  ;;  %v2433_v44 = vsel %vm1401_vm0, %v11168_v22, 0 }
 0x52d   : > { %1561 = vmax.xlane.f32.xlu1 %v11079_v12  ;;  %v2135_v3 = vmul.f32 %v9253_v24, %v11141_v38  ;;  %v2427_v38 = vsel %vm1401_vm0, %v11139_v17, 0 }
 0x52e   : > { %v2149_v63 = vpack.c.bf16 %v2134_v15, %v2133_v9 }
 0x52f   : > { %v9255_v31 = vpop.eup %9254 }
 0x530   : > { %v2136_v48 = vmul.f32 %v9255_v31, %v11150_v43  ;;  %1559 = vmax.xlane.f32.xlu0 %v11075_v32  ;;  %8491 = vmatprep.mubr.bf16.mxu0 %v2149_v63  ;;  %v2392_v43 = vpop.permute.xlu0 %2391 }
 0x531   : > { %1565 = vmax.xlane.f32.xlu1 %v11089_v21 }
 0x532   : > { %v2150_v14 = vpack.c.bf16 %v2136_v48, %v2135_v3 }
 0x534   : > { %1563 = vmax.xlane.f32.xlu0 %v11085_v55  ;;  %8492 = vmatmul.mubr.bf16.vlgmr.msra.gmra.mrb[80].mxu0 %v2150_v14 }
 0x535   : > { %8508 = vmatpush3.bf16.xpose.msra.mxu0 %v2424_v34  ;;  %1569 = vmax.xlane.f32.xlu1 %v11087_v62 }
 0x536   : > { %8956 = vmatprep.subr.msk.bf16.mxu0 %vm1401_vm0, %v11139_v17  ;;  %v2436_v17 = vsel %vm1401_vm0, %v2392_v43, 0 }
 0x538   : > { %1567 = vmax.xlane.f32.xlu0 %v11083_v61 }
 0x539   : > { %1573 = vmax.xlane.f32.xlu1 %v11107_v10 }
 0x53c   : > { %1571 = vmax.xlane.f32.xlu0 %v11102_v8 }
 0x53d   : > { %8510 = vmatpush3.bf16.xpose.msra.mxu0 %v2427_v38  ;;  %1577 = vmax.xlane.f32.xlu1 %v11104_v18 }
 0x53e   : > { %8957 = vmatprep.subr.msk.bf16.mxu0 %vm1401_vm0, %v2388_v4 }
 0x540   : > { %1575 = vmax.xlane.f32.xlu0 %v11097_v27 }
 0x545   : > { %8512 = vmatpush3.bf16.xpose.msra.mxu0 %v2430_v37 }
 0x546   : > { %8958 = vmatprep.subr.msk.bf16.mxu0 %vm1401_vm0, %v11168_v22 }
 0x54d   : > { %8514 = vmatpush3.bf16.xpose.msra.mxu0 %v2433_v44 }
 0x54e   : > { %8959 = vmatprep.subr.msk.bf16.mxu0 %vm1401_vm0, %v2392_v43 }
 0x554   : > { %v2098_v46 = vpop.xlane.xlu0 %2097 }
 0x555   : > { %8516 = vmatpush3.bf16.xpose.msra.mxu0 %v2436_v17 }
 0x556   : > { %8960 = vmatprep.subr.msk.bf16.mxu0 %vm1401_vm0, %v2394_v39 }
 0x558   : > { %v2094_v0 = vpop.xlane.xlu0 %2093 }
 0x559   : > { %9256 = vrcp.f32 %v2094_v0  ;;  %v2096_v4 = vpop.xlane.xlu1 %2095 }
 0x55a   : > { %9258 = vrcp.f32 %v2096_v4 }
 0x55b   : > { %9260 = vrcp.f32 %v2098_v46 }
 0x55c   : > { %v2100_v42 = vpop.xlane.xlu0 %2099 }
 0x55d   : > { %8518 = vmatpush3.bf16.xpose.msra.mxu0 %v2439_v40  ;;  %9262 = vrcp.f32 %v2100_v42  ;;  %v2106_v22 = vpop.xlane.xlu1 %2105 }
 0x560   : > { %v2114_v52 = vpop.xlane.xlu0 %2113 }
 0x561   : > { %v2102_v45 = vpop.xlane.xlu1 %2101 }
 0x563   : > { %v9257_v30 = vpop.eup %9256 }
 0x564   : > { %v9259_v15 = vpop.eup %9258  ;;  %v2110_v9 = vpop.xlane.xlu0 %2109  ;;  %v2137_v24 = vmul.f32 %v9257_v30, %v11172_v36 }
 0x565   : > { %v9261_v63 = vpop.eup %9260  ;;  %v2108_v31 = vpop.xlane.xlu1 %2107  ;;  %v2138_v3 = vmul.f32 %v9259_v15, %v11174_v51 }
 0x566   : > { %9264 = vrcp.f32 %v2108_v31  ;;  %v2139_v38 = vmul.f32 %v9261_v63, %v11166_v57 }
 0x567   : > { %v9263_v48 = vpop.eup %9262  ;;  %v2151_v14 = vpack.c.bf16 %v2138_v3, %v2137_v24  ;;  %9266 = vrcp.f32 %v2102_v45 }
 0x568   : > { %v2116_v34 = vpop.xlane.xlu0 %2115  ;;  %v2140_v37 = vmul.f32 %v9263_v48, %v11179_v26  ;;  %9268 = vrcp.f32 %v2106_v22 }
 0x569   : > { %v2104_v44 = vpop.xlane.xlu1 %2103  ;;  %8495 = vmatprep.mubr.bf16.mxu0 %v2151_v14 }
 0x56a   : > { %9270 = vrcp.f32 %v2104_v44  ;;  %v2152_v43 = vpack.c.bf16 %v2140_v37, %v2139_v38 }
 0x56b   : > { %9272 = vrcp.f32 %v2110_v9 }
 0x56c   : > { %8496 = vmatmul.mubr.bf16.gmra.mrb[84].mxu0 %v2152_v43  ;;  %v2396_v36 = vpop.permute.xlu0 %2395 }
 0x56d   : > { %v2112_v17 = vpop.xlane.xlu1 %2111  ;;  %8961 = vmatprep.subr.msk.bf16.mxu0 %vm1401_vm0, %v2396_v36  ;;  %v2442_v51 = vsel %vm1401_vm0, %v2396_v36, 0 }
 0x56e   : > { %9274 = vrcp.f32 %v2112_v17  ;;  %8520 = vmatpush3.bf16.xpose.msra.mxu0 %v2442_v51 }
 0x56f   : > { %9276 = vrcp.f32 %v2116_v34 }
 0x570   : > { %v9265_v46 = vpop.eup %9264  ;;  %9278 = vrcp.f32 %v2114_v52  ;;  %v2368_v14 = vpop.permute.xlu0 %2367 }
 0x571   : > { %v2398_v57 = vpop.permute.xlu1 %2397  ;;  %v9267_v26 = vpop.eup %9266  ;;  %v2144_v4 = vmul.f32 %v9265_v46, %v11194_v19 }
 0x572   : > { %8962 = vmatprep.subr.msk.bf16.mxu0 %vm1401_vm0, %v2398_v57  ;;  %v9269_v39 = vpop.eup %9268  ;;  %v2445_v40 = vsel %vm1401_vm0, %v2398_v57, 0  ;;  %v2141_v42 = vmul.f32 %v9267_v26, %v11188_v60 }
 0x573   : > { %v2143_v30 = vmul.f32 %v9269_v39, %v11181_v56 }
 0x574   : > { %v9271_v0 = vpop.eup %9270  ;;  %v2372_v34 = vpop.permute.xlu0 %2371 }
 0x575   : > { %v2142_v22 = vmul.f32 %v9271_v0, %v11200_v33  ;;  %v9273_v45 = vpop.eup %9272  ;;  %v2154_v9 = vpack.c.bf16 %v2144_v4, %v2143_v30  ;;  %v2370_v56 = vpop.permute.xlu1 %2369 }
 0x576   : > { %8522 = vmatpush3.bf16.xpose.msra.mxu0 %v2445_v40  ;;  %v2145_v63 = vmul.f32 %v9273_v45, %v11192_v47 }
 0x577   : > { %v2153_v15 = vpack.c.bf16 %v2142_v22, %v2141_v42 }
 0x578   : > { %v9275_v52 = vpop.eup %9274 }
 0x579   : > { %v9277_v24 = vpop.eup %9276  ;;  %8499 = vmatprep.mubr.bf16.mxu0 %v2153_v15  ;;  %v2146_v31 = vmul.f32 %v9275_v52, %v11204_v50  ;;  %v2374_v47 = vpop.permute.xlu1 %2373 }
 0x57a   : > { %8500 = vmatmul.mubr.bf16.gmra.mrb[88].mxu0 %v2154_v9  ;;  %v9279_v19 = vpop.eup %9278  ;;  %v2148_v60 = vmul.f32 %v9277_v24, %v11198_v16  ;;  %v2376_v50 = vpop.permute.xlu0 %2375 }
 0x57b   : > { %v2155_v3 = vpack.c.bf16 %v2146_v31, %v2145_v63  ;;  %v2147_v33 = vmul.f32 %v9279_v19, %v11186_v7 }
 0x57d   : > { %8503 = vmatprep.mubr.bf16.mxu0 %v2155_v3  ;;  %v2156_v48 = vpack.c.bf16 %v2148_v60, %v2147_v33  ;;  %v2378_v16 = vpop.permute.xlu1 %2377 }
 0x57e   : > { %v2380_v38 = vpop.permute.xlu0 %2379 }
 0x581   : > { %v2382_v7 = vpop.permute.xlu1 %2381 }
 0x582   : > { %8504 = vmatmul.mubr.bf16.gmra.mrb[92].mxu0 %v2156_v48 }
 0x583   : > { %8523 = vmatprep.mubr.msk.bf16.mxu0 %vm1401_vm0, %v2368_v14 }
 0x58a   : > { %8524 = vmatmul.mubr.msk.bf16.vlgmr.msra.gmra.mrb[96].mxu0 %vm1401_vm0, %v2370_v56 }
 0x58b   : > { %8527 = vmatprep.mubr.msk.bf16.mxu0 %vm1401_vm0, %v2372_v34 }
 0x592   : > { %8528 = vmatmul.mubr.msk.bf16.gmra.mrb[100].mxu0 %vm1401_vm0, %v2374_v47 }
 0x593   : > { %8531 = vmatprep.mubr.msk.bf16.mxu0 %vm1401_vm0, %v2376_v50 }
 0x59a   : > { %8532 = vmatmul.mubr.msk.bf16.gmra.mrb[104].mxu0 %vm1401_vm0, %v2378_v16 }
 0x59b   : > { %8535 = vmatprep.mubr.msk.bf16.mxu0 %vm1401_vm0, %v2380_v38 }
 0x5a2   : > { %8536 = vmatmul.mubr.msk.bf16.gmra.mrb[108].mxu0 %vm1401_vm0, %v2382_v7 }
 0x5ad   : > { %v1548_v37 = vpop.xlane.xlu0 %1547 }
 0x5ae   : > { %v1579_v44 = vsub.f32 %v11069_v6, %v1548_v37 }
 0x5b0   : > { %v1595_v43 = vmul.f32 1.442695, %v1579_v44 }
 0x5b1   : > { %v1552_v36 = vpop.xlane.xlu0 %1551 }
 0x5b2   : > { %9280 = vpow2.f32 %v1595_v43  ;;  %v1581_v17 = vsub.f32 %v11067_v1, %v1552_v36  ;;  %v1550_v51 = vpop.xlane.xlu1 %1549 }
 0x5b3   : > { %v1580_v46 = vsub.f32 %v11073_v23, %v1550_v51 }
 0x5b4   : > { %v1599_v57 = vmul.f32 1.442695, %v1581_v17 }
 0x5b5   : > { %v1597_v26 = vmul.f32 1.442695, %v1580_v46  ;;  %v1554_v39 = vpop.xlane.xlu0 %1553 }
 0x5b6   : > { %9282 = vpow2.f32 %v1599_v57  ;;  %v1582_v0 = vsub.f32 %v11071_v41, %v1554_v39  ;;  %v1558_v4 = vpop.xlane.xlu1 %1557 }
 0x5b7   : > { %9284 = vpow2.f32 %v1597_v26  ;;  %v1584_v40 = vsub.f32 %v11081_v54, %v1558_v4 }
 0x5b8   : > { %v1601_v42 = vmul.f32 1.442695, %v1582_v0 }
 0x5b9   : > { %v1556_v6 = vpop.xlane.xlu0 %1555  ;;  %v1605_v1 = vmul.f32 1.442695, %v1584_v40  ;;  %v14426_v40 = vld [vmem:[#allocation8_spill] sm:$0xff] }
 0x5ba   : > { %9286 = vpow2.f32 %v1601_v42  ;;  %v1583_v22 = vsub.f32 %v11077_v11, %v1556_v6  ;;  %v1562_v45 = vpop.xlane.xlu1 %1561  ;;  %v14427_v42 = vld [vmem:[#allocation13_spill] sm:$0xff]  ;;  %v14428_v6 = vld [vmem:[#allocation10_spill] sm:$0xff] }
 0x5bb   : > { %v1586_v30 = vsub.f32 %v11079_v12, %v1562_v45  ;;  %v14430_v45 = vld [vmem:[#allocation15_spill] sm:$0xff] }
 0x5bc   : > { %v11294_v23 = vpop.eup %9280  ;;  %v1603_v15 = vmul.f32 1.442695, %v1583_v22  ;;  %v14429_v22 = vld [vmem:[#allocation12_spill] sm:$0xff] }
 0x5bd   : > { %1627 = vadd.xlane.f32.xlu0 %v11294_v23  ;;  %v1560_v52 = vpop.xlane.xlu0 %1559  ;;  %v1609_v54 = vmul.f32 1.442695, %v1586_v30  ;;  %v14432_v30 = vld [vmem:[#allocation9_spill] sm:$0xff] }
 0x5be   : > { %9288 = vpow2.f32 %v1603_v15  ;;  %v1585_v41 = vsub.f32 %v11075_v32, %v1560_v52  ;;  %v1566_v9 = vpop.xlane.xlu1 %1565  ;;  %v14433_v15 = vld [vmem:[#allocation7_spill] sm:$0xff] }
 0x5bf   : > { %9290 = vpow2.f32 %v1605_v1  ;;  %v1588_v24 = vsub.f32 %v11089_v21, %v1566_v9  ;;  %v14431_v1 = vld [vmem:[#allocation16_spill] sm:$0xff] }
 0x5c0   : > { %v11299_v63 = vpop.eup %9282  ;;  %v1607_v11 = vmul.f32 1.442695, %v1585_v41 }
 0x5c1   : > { %v11301_v31 = vpop.eup %9284  ;;  %1631 = vadd.xlane.f32.xlu0 %v11299_v63  ;;  %v1564_v12 = vpop.xlane.xlu0 %1563  ;;  %v1613_v32 = vmul.f32 1.442695, %v1588_v24 }
 0x5c2   : > { %9292 = vpow2.f32 %v1607_v11  ;;  %v1587_v19 = vsub.f32 %v11085_v55, %v1564_v12  ;;  %1629 = vadd.xlane.f32.xlu1 %v11301_v31  ;;  %v1570_v3 = vpop.xlane.xlu1 %1569 }
 0x5c3   : > { %9294 = vpow2.f32 %v1609_v54  ;;  %v1590_v60 = vsub.f32 %v11087_v62, %v1570_v3 }
 0x5c4   : > { %v11307_v33 = vpop.eup %9286  ;;  %v1611_v21 = vmul.f32 1.442695, %v1587_v19 }
 0x5c5   : > { %v1568_v48 = vpop.xlane.xlu0 %1567  ;;  %v1617_v34 = vmul.f32 1.442695, %v1590_v60 }
 0x5c6   : > { %9296 = vpow2.f32 %v1611_v21  ;;  %v1589_v14 = vsub.f32 %v11083_v61, %v1568_v48  ;;  %v1574_v56 = vpop.xlane.xlu1 %1573  ;;  %1633 = vadd.xlane.f32.xlu1 %v11307_v33 }
 0x5c7   : > { %9298 = vpow2.f32 %v1613_v32  ;;  %v1592_v55 = vsub.f32 %v11107_v10, %v1574_v56 }
 0x5c8   : > { %v11312_v47 = vpop.eup %9288  ;;  %v1615_v50 = vmul.f32 1.442695, %v1589_v14 }
 0x5c9   : > { %v11314_v16 = vpop.eup %9290  ;;  %1635 = vadd.xlane.f32.xlu0 %v11312_v47  ;;  %v1572_v62 = vpop.xlane.xlu0 %1571  ;;  %v1621_v61 = vmul.f32 1.442695, %v1592_v55 }
 0x5ca   : > { %9300 = vpow2.f32 %v1615_v50  ;;  %v1591_v38 = vsub.f32 %v11102_v8, %v1572_v62  ;;  %1637 = vadd.xlane.f32.xlu1 %v11314_v16  ;;  %v1578_v44 = vpop.xlane.xlu1 %1577 }
 0x5cb   : > { %9302 = vpow2.f32 %v1617_v34  ;;  %v1594_v8 = vsub.f32 %v11104_v18, %v1578_v44 }
 0x5cc   : > { %v11319_v7 = vpop.eup %9292  ;;  %v1619_v37 = vmul.f32 1.442695, %v1591_v38 }
 0x5cd   : > { %v11321_v10 = vpop.eup %9294  ;;  %1639 = vadd.xlane.f32.xlu0 %v11319_v7  ;;  %v1576_v43 = vpop.xlane.xlu0 %1575  ;;  %v1625_v57 = vmul.f32 1.442695, %v1594_v8 }
 0x5ce   : > { %9304 = vpow2.f32 %v1619_v37  ;;  %v1593_v36 = vsub.f32 %v11097_v27, %v1576_v43  ;;  %1641 = vadd.xlane.f32.xlu1 %v11321_v10 }
 0x5cf   : > { %9306 = vpow2.f32 %v1621_v61 }
 0x5d0   : > { %v11327_v17 = vpop.eup %9296  ;;  %v1623_v51 = vmul.f32 1.442695, %v1593_v36 }
 0x5d1   : > { %v11329_v46 = vpop.eup %9298  ;;  %1643 = vadd.xlane.f32.xlu0 %v11327_v17 }
 0x5d2   : > { %9308 = vpow2.f32 %v1623_v51  ;;  %1645 = vadd.xlane.f32.xlu1 %v11329_v46 }
 0x5d3   : > { %9310 = vpow2.f32 %v1625_v57 }
 0x5d4   : > { %v11333_v26 = vpop.eup %9300 }
 0x5d5   : > { %v11335_v39 = vpop.eup %9302  ;;  %1647 = vadd.xlane.f32.xlu0 %v11333_v26 }
 0x5d6   : > { %1649 = vadd.xlane.f32.xlu1 %v11335_v39 }
 0x5d8   : > { %v11339_v18 = vpop.eup %9304 }
 0x5d9   : > { %v11341_v27 = vpop.eup %9306  ;;  %1651 = vadd.xlane.f32.xlu0 %v11339_v18 }
 0x5da   : > { %1653 = vadd.xlane.f32.xlu1 %v11341_v27 }
 0x5dc   : > { %v11345_v0 = vpop.eup %9308 }
 0x5dd   : > { %v11348_v4 = vpop.eup %9310 }
 0x5de   : > { %1655 = vadd.xlane.f32.xlu1 %v11345_v0 }
 0x5e2   : > { %1657 = vadd.xlane.f32.xlu1 %v11348_v4 }
 0x5ef   : > { %2696 = vrot.lane.b32.xlu0 %v10704_v53, %s10116_s13 }
 0x5f3   : > { %2700 = vrot.lane.b32.xlu0 %v10727_v20, %s10116_s13  ;;  %2698 = vrot.lane.b32.xlu1 %v14426_v40, %s10116_s13 }
 0x5f7   : > { %2704 = vrot.lane.b32.xlu0 %v14427_v42, %s10116_s13  ;;  %2702 = vrot.lane.b32.xlu1 %v14428_v6, %s10116_s13 }
 0x5fb   : > { %2706 = vrot.lane.b32.xlu0 %v14429_v22, %s10116_s13  ;;  %2710 = vrot.lane.b32.xlu1 %v14430_v45, %s10116_s13 }
 0x5ff   : > { %2708 = vrot.lane.b32.xlu0 %v14431_v1, %s10116_s13  ;;  %2916 = vrot.lane.b32.xlu1 %v14432_v30, %s10117_s22 }
 0x603   : > { %2914 = vrot.lane.b32.xlu0 %v14433_v15, %s10117_s22 }
 0x607   : > { %v11371_v52 = vpop.f32.mrb[80].mxu0 }
 0x608   : > { %v11373_v41 = vpop.f32.mrb[81].mxu0 }
 0x609   : > { %14434 = vst [vmem:[#allocation8_spill] sm:$0xff] %v11373_v41  ;;  %v11375_v9 = vpop.f32.mrb[82].mxu0 }
 0x60a   : > { %14435 = vst [vmem:[#allocation13_spill] sm:$0xff] %v11375_v9  ;;  %v11377_v54 = vpop.f32.mrb[83].mxu0 }
 0x63f   : > { %v11379_v24 = vpop.f32.mrb[84].mxu0 }
 0x640   : > { %14436 = vst [vmem:[#allocation10_spill] sm:$0xff] %v11379_v24  ;;  %v11381_v11 = vpop.f32.mrb[85].mxu0 }
 0x641   : > { %14437 = vst [vmem:[#allocation12_spill] sm:$0xff] %v11381_v11  ;;  %v11383_v12 = vpop.f32.mrb[86].mxu0 }
 0x642   : > { %14438 = vst [vmem:[#allocation15_spill] sm:$0xff] %v11383_v12  ;;  %v11385_v19 = vpop.f32.mrb[87].mxu0 }
 0x643   : > { %14439 = vst [vmem:[#allocation16_spill] sm:$0xff] %v11385_v19 }
 0x64a   : > { %v1628_v3 = vpop.xlane.xlu0 %1627 }
 0x64b   : > { %9312 = vrcp.f32 %v1628_v3 }
 0x64d   : > { %v11387_v32 = vpop.f32.mrb[88].mxu0 }
 0x64e   : > { %14440 = vst [vmem:[#allocation9_spill] sm:$0xff] %v11387_v32  ;;  %v11389_v60 = vpop.f32.mrb[89].mxu0  ;;  %v1632_v21 = vpop.xlane.xlu0 %1631 }
 0x64f   : > { %14441 = vst [vmem:[#allocation7_spill] sm:$0xff] %v11389_v60  ;;  %v1630_v48 = vpop.xlane.xlu1 %1629  ;;  %v11391_v14 = vpop.f32.mrb[90].mxu0 }
 0x650   : > { %14442 = vst [vmem:[#allocation43_spill] sm:$0xff] %v11391_v14  ;;  %9314 = vrcp.f32 %v1630_v48  ;;  %v11393_v56 = vpop.f32.mrb[91].mxu0 }
 0x651   : > { %14443 = vst [vmem:[#allocation44_spill] sm:$0xff] %v11393_v56  ;;  %9316 = vrcp.f32 %v1632_v21 }
 0x653   : > { %v1634_v34 = vpop.xlane.xlu1 %1633 }
 0x654   : > { %9318 = vrcp.f32 %v1634_v34 }
 0x655   : > { %v11395_v55 = vpop.f32.mrb[92].mxu0  ;;  %v9313_v37 = vpop.eup %9312 }
 0x656   : > { %14444 = vst [vmem:[#allocation45_spill] sm:$0xff] %v11395_v55  ;;  %v11397_v50 = vpop.f32.mrb[93].mxu0  ;;  %v1636_v62 = vpop.xlane.xlu0 %1635  ;;  %v1675_v51 = vmul.f32 %v9313_v37, %v11294_v23 }
 0x657   : > { %14445 = vst [vmem:[#allocation46_spill] sm:$0xff] %v11397_v50  ;;  %9320 = vrcp.f32 %v1636_v62  ;;  %v11399_v38 = vpop.f32.mrb[94].mxu0  ;;  %v1638_v61 = vpop.xlane.xlu1 %1637 }
 0x658   : > { %14446 = vst [vmem:[#allocation47_spill] sm:$0xff] %v11399_v38  ;;  %9322 = vrcp.f32 %v1638_v61  ;;  %v11401_v44 = vpop.f32.mrb[95].mxu0 }
 0x659   : > { %14447 = vst [vmem:[#allocation48_spill] sm:$0xff] %v11401_v44 }
 0x65a   : > { %v9315_v43 = vpop.eup %9314  ;;  %v1640_v36 = vpop.xlane.xlu0 %1639 }
 0x65b   : > { %9324 = vrcp.f32 %v1640_v36  ;;  %v1642_v8 = vpop.xlane.xlu1 %1641  ;;  %v1676_v57 = vmul.f32 %v9315_v43, %v11301_v31  ;;  %v9317_v30 = vpop.eup %9316 }
 0x65c   : > { %9326 = vrcp.f32 %v1642_v8  ;;  %v1677_v62 = vmul.f32 %v9317_v30, %v11299_v63 }
 0x65d   : > { %v11405_v15 = vpop.f32.mrb[96].mxu0  ;;  %v1691_v3 = vpack.c.bf16 %v1676_v57, %v1675_v51 }
 0x65e   : > { %v9319_v21 = vpop.eup %9318  ;;  %v11407_v48 = vpop.f32.mrb[97].mxu0  ;;  %2548 = vmax.xlane.f32.xlu0 %v11405_v15 }
 0x65f   : > { %v1644_v34 = vpop.xlane.xlu0 %1643  ;;  %v1678_v61 = vmul.f32 %v9319_v21, %v11307_v33  ;;  %v11412_v36 = vpop.f32.mrb[98].mxu0  ;;  %8427 = vmatprep.mubr.bf16.mxu1 %v1691_v3 }
 0x660   : > { %9328 = vrcp.f32 %v1644_v34  ;;  %v1646_v23 = vpop.xlane.xlu1 %1645  ;;  %v11414_v31 = vpop.f32.mrb[99].mxu0  ;;  %2550 = vmax.xlane.f32.xlu1 %v11412_v36 }
 0x661   : > { %9330 = vrcp.f32 %v1646_v23  ;;  %v9321_v37 = vpop.eup %9320  ;;  %v1692_v43 = vpack.c.bf16 %v1678_v61, %v1677_v62 }
 0x662   : > { %v9323_v8 = vpop.eup %9322  ;;  %2544 = vmax.xlane.f32.xlu0 %v11407_v48  ;;  %v1679_v63 = vmul.f32 %v9321_v37, %v11312_v47 }
 0x663   : > { %v1648_v51 = vpop.xlane.xlu0 %1647  ;;  %8428 = vmatmul.mubr.bf16.vlgmr.msra.gmra.mrb[48].mxu1 %v1692_v43  ;;  %v1680_v57 = vmul.f32 %v9323_v8, %v11314_v16 }
 0x664   : > { %9332 = vrcp.f32 %v1648_v51  ;;  %v1650_v33 = vpop.xlane.xlu1 %1649  ;;  %2546 = vmax.xlane.f32.xlu1 %v11414_v31 }
 0x665   : > { %9334 = vrcp.f32 %v1650_v33  ;;  %v9325_v30 = vpop.eup %9324  ;;  %v11421_v3 = vpop.f32.mrb[100].mxu0  ;;  %v1693_v21 = vpack.c.bf16 %v1680_v57, %v1679_v63 }
 0x666   : > { %v9327_v34 = vpop.eup %9326  ;;  %v11423_v62 = vpop.f32.mrb[101].mxu0  ;;  %2556 = vmax.xlane.f32.xlu0 %v11421_v3  ;;  %v1681_v47 = vmul.f32 %v9325_v30, %v11319_v7 }
 0x667   : > { %v1652_v61 = vpop.xlane.xlu0 %1651  ;;  %v11427_v23 = vpop.f32.mrb[102].mxu0  ;;  %8431 = vmatprep.mubr.bf16.mxu1 %v1693_v21  ;;  %v1682_v16 = vmul.f32 %v9327_v34, %v11321_v10 }
 0x668   : > { %9336 = vrcp.f32 %v1652_v61  ;;  %v1654_v37 = vpop.xlane.xlu1 %1653  ;;  %v11430_v43 = vpop.f32.mrb[103].mxu0  ;;  %2558 = vmax.xlane.f32.xlu1 %v11427_v23 }
 0x669   : > { %9338 = vrcp.f32 %v1654_v37  ;;  %v1694_v51 = vpack.c.bf16 %v1682_v16, %v1681_v47 }
 0x66a   : > { %v9329_v8 = vpop.eup %9328  ;;  %2552 = vmax.xlane.f32.xlu0 %v11423_v62 }
 0x66b   : > { %v9331_v63 = vpop.eup %9330  ;;  %v2697_v33 = vpop.permute.xlu0 %2696  ;;  %v1683_v7 = vmul.f32 %v9329_v8, %v11327_v17  ;;  %8432 = vmatmul.mubr.bf16.gmra.mrb[52].mxu1 %v1694_v51 }
 0x66c   : > { %v1656_v57 = vpop.xlane.xlu1 %1655  ;;  %8539 = vmatprep.subr.bf16.mxu1 %v2697_v33  ;;  %v1684_v30 = vmul.f32 %v9331_v63, %v11329_v46  ;;  %2554 = vmax.xlane.f32.xlu1 %v11430_v43 }
 0x66d   : > { %8540 = vmatpush3.bf16.msra.mxu1 %v2697_v33  ;;  %v11437_v21 = vpop.f32.mrb[104].mxu0  ;;  %9340 = vrcp.f32 %v1656_v57 }
 0x66e   : > { %v9333_v10 = vpop.eup %9332  ;;  %v1695_v34 = vpack.c.bf16 %v1684_v30, %v1683_v7  ;;  %v11439_v47 = vpop.f32.mrb[105].mxu0  ;;  %2564 = vmax.xlane.f32.xlu0 %v11437_v21 }
 0x66f   : > { %v9335_v61 = vpop.eup %9334  ;;  %v1685_v17 = vmul.f32 %v9333_v10, %v11333_v26  ;;  %v11443_v37 = vpop.f32.mrb[106].mxu0 }
 0x670   : > { %v1658_v16 = vpop.xlane.xlu1 %1657  ;;  %8435 = vmatprep.mubr.bf16.mxu1 %v1695_v34  ;;  %v1686_v46 = vmul.f32 %v9335_v61, %v11335_v39  ;;  %v11446_v8 = vpop.f32.mrb[107].mxu0  ;;  %2566 = vmax.xlane.f32.xlu1 %v11443_v37 }
 0x671   : > { %9342 = vrcp.f32 %v1658_v16  ;;  %v2701_v57 = vpop.permute.xlu0 %2700 }
 0x672   : > { %v9337_v51 = vpop.eup %9336  ;;  %v1696_v63 = vpack.c.bf16 %v1686_v46, %v1685_v17  ;;  %2560 = vmax.xlane.f32.xlu0 %v11439_v47 }
 0x673   : > { %v9339_v33 = vpop.eup %9338  ;;  %v1687_v7 = vmul.f32 %v9337_v51, %v11339_v18 }
 0x674   : > { %v2699_v26 = vpop.permute.xlu1 %2698  ;;  %8436 = vmatmul.mubr.bf16.gmra.mrb[56].mxu1 %v1696_v63  ;;  %v1688_v30 = vmul.f32 %v9339_v33, %v11341_v27  ;;  %2562 = vmax.xlane.f32.xlu1 %v11446_v8 }
 0x675   : > { %8541 = vmatprep.subr.bf16.mxu1 %v2699_v26  ;;  %v11453_v39 = vpop.f32.mrb[108].mxu0  ;;  %v2705_v16 = vpop.permute.xlu0 %2704 }
 0x676   : > { %8542 = vmatpush3.bf16.msra.mxu1 %v2699_v26  ;;  %v1697_v10 = vpack.c.bf16 %v1688_v30, %v1687_v7  ;;  %v11455_v34 = vpop.f32.mrb[109].mxu0  ;;  %2572 = vmax.xlane.f32.xlu0 %v11453_v39  ;;  %v14448_v30 = vld [vmem:[#allocation14_spill] sm:$0xff] }
 0x677   : > { %8543 = vmatprep.subr.bf16.mxu1 %v2701_v57  ;;  %v11458_v61 = vpop.f32.mrb[110].mxu0  ;;  %v9341_v18 = vpop.eup %9340 }
 0x678   : > { %8439 = vmatprep.mubr.bf16.mxu1 %v1697_v10  ;;  %v11460_v17 = vpop.f32.mrb[111].mxu0  ;;  %v2703_v27 = vpop.permute.xlu1 %2702  ;;  %v1689_v51 = vmul.f32 %v9341_v18, %v11345_v0  ;;  %v14449_v0 = vld [vmem:[#allocation11_spill] sm:$0xff] }
 0x679   : > { %v2707_v7 = vpop.permute.xlu0 %2706 }
 0x67a   : > { %8544 = vmatpush3.bf16.msra.mxu1 %v2701_v57  ;;  %2568 = vmax.xlane.f32.xlu0 %v11455_v34 }
 0x67b   : > { %v9343_v46 = vpop.eup %9342  ;;  %8545 = vmatprep.subr.bf16.mxu1 %v2703_v27 }
 0x67c   : > { %v1690_v63 = vmul.f32 %v9343_v46, %v11348_v4  ;;  %v2711_v57 = vpop.permute.xlu1 %2710 }
 0x67d   : > { %v2709_v26 = vpop.permute.xlu0 %2708 }
 0x67e   : > { %8546 = vmatpush3.bf16.msra.mxu1 %v2703_v27  ;;  %v1698_v33 = vpack.c.bf16 %v1690_v63, %v1689_v51 }
 0x67f   : > { %8547 = vmatprep.subr.bf16.mxu1 %v2705_v16 }
 0x680   : > { %8440 = vmatmul.mubr.bf16.gmra.mrb[60].mxu1 %v1698_v33  ;;  %v11475_v4 = vpop.permute.xlu1 %2916 }
 0x681   : > { %v11467_v10 = vpop.permute.xlu0 %2914 }
 0x682   : > { %8548 = vmatpush3.bf16.msra.mxu1 %v2705_v16 }
 0x683   : > { %8549 = vmatprep.subr.bf16.mxu1 %v2707_v7 }
 0x685   : > { %2920 = vrot.lane.b32.xlu1 %v14448_v30, %s10117_s22 }
 0x686   : > { %8550 = vmatpush3.bf16.msra.mxu1 %v2707_v7 }
 0x687   : > { %8551 = vmatprep.subr.bf16.mxu1 %v2709_v26 }
 0x68a   : > { %8552 = vmatpush3.bf16.msra.mxu1 %v2709_v26 }
 0x68b   : > { %8553 = vmatprep.subr.bf16.mxu1 %v2711_v57 }
 0x68e   : > { %8554 = vmatpush3.bf16.msra.mxu1 %v2711_v57 }
 0x68f   : > { %8963 = vmatprep.subr.msk.bf16.mxu1 %vm1401_vm0, %v11467_v10 }
 0x690   : > { %2918 = vrot.lane.b32.xlu0 %v14449_v0, %s10117_s22 }
 0x6a9   : > { %2574 = vmax.xlane.f32.xlu1 %v11458_v61 }
 0x6ad   : > { %2570 = vmax.xlane.f32.xlu1 %v11460_v17 }
 0x6eb   : > { %v2549_v18 = vpop.xlane.xlu0 %2548 }
 0x6ec   : > { %v2578_v16 = vsub.f32 %v11405_v15, %v2549_v18  ;;  %v14450_v18 = vld [vmem:[#allocation18_spill] sm:$0xff] }
 0x6ed   : > { %v2551_v27 = vpop.xlane.xlu1 %2550 }
 0x6ee   : > { %v2596_v46 = vmul.f32 1.442695, %v2578_v16  ;;  %v2579_v51 = vsub.f32 %v11412_v36, %v2551_v27  ;;  %v14451_v16 = vld [vmem:[#allocation17_spill] sm:$0xff] }
 0x6ef   : > { %v2545_v63 = vpop.xlane.xlu0 %2544 }
 0x6f0   : > { %9344 = vpow2.f32 %v2596_v46  ;;  %v2598_v33 = vmul.f32 1.442695, %v2579_v51  ;;  %v2576_v7 = vsub.f32 %v11407_v48, %v2545_v63 }
 0x6f1   : > { %v2547_v26 = vpop.xlane.xlu1 %2546 }
 0x6f2   : > { %v2592_v30 = vmul.f32 1.442695, %v2576_v7  ;;  %v2577_v57 = vsub.f32 %v11414_v31, %v2547_v26  ;;  %9346 = vpow2.f32 %v2598_v33 }
 0x6f3   : > { %v2557_v31 = vpop.xlane.xlu0 %2556 }
 0x6f4   : > { %9348 = vpow2.f32 %v2592_v30  ;;  %v2594_v0 = vmul.f32 1.442695, %v2577_v57  ;;  %v2582_v33 = vsub.f32 %v11421_v3, %v2557_v31 }
 0x6f5   : > { %v2559_v46 = vpop.xlane.xlu1 %2558 }
 0x6f6   : > { %9350 = vpow2.f32 %v2594_v0  ;;  %v2604_v30 = vmul.f32 1.442695, %v2582_v33  ;;  %v2583_v55 = vsub.f32 %v11427_v23, %v2559_v46 }
 0x6f7   : > { %v2553_v27 = vpop.xlane.xlu0 %2552 }
 0x6f8   : > { %v2580_v26 = vsub.f32 %v11423_v62, %v2553_v27  ;;  %9352 = vpow2.f32 %v2604_v30  ;;  %v2606_v14 = vmul.f32 1.442695, %v2583_v55 }
 0x6f9   : > { %v2555_v63 = vpop.xlane.xlu1 %2554 }
 0x6fa   : > { %v11481_v38 = vpop.eup %9344  ;;  %v2581_v57 = vsub.f32 %v11430_v43, %v2555_v63  ;;  %v2600_v44 = vmul.f32 1.442695, %v2580_v26 }
 0x6fb   : > { %2628 = vadd.xlane.f32.xlu1 %v11481_v38  ;;  %v2565_v51 = vpop.xlane.xlu0 %2564 }
 0x6fc   : > { %v11484_v15 = vpop.eup %9346  ;;  %v2602_v50 = vmul.f32 1.442695, %v2581_v57  ;;  %9354 = vpow2.f32 %v2600_v44 }
 0x6fd   : > { %v2567_v0 = vpop.xlane.xlu1 %2566 }
 0x6fe   : > { %v11486_v36 = vpop.eup %9348  ;;  %9356 = vpow2.f32 %v2602_v50  ;;  %v2587_v43 = vsub.f32 %v11443_v37, %v2567_v0 }
 0x6ff   : > { %2630 = vadd.xlane.f32.xlu1 %v11484_v15  ;;  %2624 = vadd.xlane.f32.xlu0 %v11486_v36  ;;  %v2561_v7 = vpop.xlane.xlu0 %2560  ;;  %9358 = vpow2.f32 %v2606_v14 }
 0x700   : > { %v11490_v48 = vpop.eup %9350  ;;  %v2584_v32 = vsub.f32 %v11439_v47, %v2561_v7  ;;  %v2614_v44 = vmul.f32 1.442695, %v2587_v43 }
 0x701   : > { %v2563_v3 = vpop.xlane.xlu1 %2562 }
 0x702   : > { %v2608_v23 = vmul.f32 1.442695, %v2584_v32  ;;  %v11508_v55 = vpop.eup %9352  ;;  %v2585_v50 = vsub.f32 %v11446_v8, %v2563_v3 }
 0x703   : > { %2626 = vadd.xlane.f32.xlu1 %v11490_v48 }
 0x705   : > { %v11506_v33 = vpop.permute.xlu1 %2920 }
 0x706   : > { %v11512_v14 = vpop.eup %9354 }
 0x708   : > { %v11514_v37 = vpop.eup %9356 }
 0x709   : > { %v11522_v30 = vpop.eup %9358 }
 0x714   : > { %2924 = vrot.lane.b32.xlu1 %v14450_v18, %s10117_s22  ;;  %v2573_v18 = vpop.xlane.xlu0 %2572 }
 0x715   : > { %2922 = vrot.lane.b32.xlu0 %v14451_v16, %s10117_s22  ;;  %v2586_v16 = vsub.f32 %v11437_v21, %v2565_v51  ;;  %v2590_v62 = vsub.f32 %v11453_v39, %v2573_v18  ;;  %v2610_v51 = vmul.f32 1.442695, %v2585_v50 }
 0x717   : > { %v2612_v31 = vmul.f32 1.442695, %v2586_v16  ;;  %v2620_v46 = vmul.f32 1.442695, %v2590_v62 }
 0x718   : > { %v2569_v27 = vpop.xlane.xlu0 %2568 }
 0x719   : > { %9360 = vpow2.f32 %v2612_v31  ;;  %v2588_v63 = vsub.f32 %v11455_v34, %v2569_v27 }
 0x71a   : > { %9362 = vpow2.f32 %v2608_v23 }
 0x71b   : > { %9364 = vpow2.f32 %v2620_v46  ;;  %v2616_v21 = vmul.f32 1.442695, %v2588_v63 }
 0x71c   : > { %9366 = vpow2.f32 %v2614_v44 }
 0x71d   : > { %9368 = vpow2.f32 %v2616_v21 }
 0x71e   : > { %9370 = vpow2.f32 %v2610_v51 }
 0x723   : > { %v11525_v57 = vpop.eup %9360 }
 0x724   : > { %v11530_v16 = vpop.eup %9362 }
 0x725   : > { %v11532_v31 = vpop.eup %9364 }
 0x726   : > { %v11539_v43 = vpop.eup %9366 }
 0x727   : > { %v11542_v23 = vpop.eup %9368 }
 0x728   : > { %v11546_v46 = vpop.eup %9370 }
 0x734   : > { %2636 = vadd.xlane.f32.xlu0 %v11508_v55 }
 0x736   : > { %v2575_v47 = vpop.xlane.xlu1 %2574  ;;  %v8429_v32 = vpop.f32.mrb[48].mxu1 }
 0x737   : > { %v2591_v39 = vsub.f32 %v11458_v61, %v2575_v47  ;;  %1798 = vst.msk [vmem:[#allocation2 + $0x10] sm:$0xff] %vm1401_vm0, %v8429_v32  ;;  %v1733_v34 = vpop.f32.mrb[49].mxu1 }
 0x738   : > { %1796 = vst.msk [vmem:[#allocation2] sm:$0xff] %vm1401_vm0, %v1733_v34  ;;  %v8430_v8 = vpop.f32.mrb[50].mxu1  ;;  %2634 = vadd.xlane.f32.xlu1 %v11514_v37  ;;  %2632 = vadd.xlane.f32.xlu0 %v11512_v14 }
 0x739   : > { %v2622_v7 = vmul.f32 1.442695, %v2591_v39  ;;  %1799 = vst.msk [vmem:[#allocation2 + $0x18] sm:$0xff] %vm1401_vm0, %v8430_v8  ;;  %v1736_v26 = vpop.f32.mrb[51].mxu1 }
 0x73a   : > { %1797 = vst.msk [vmem:[#allocation2 + $0x8] sm:$0xff] %vm1401_vm0, %v1736_v26  ;;  %v2571_v61 = vpop.xlane.xlu1 %2570  ;;  %v2955_v26 = vsel %vm1401_vm0, %v11467_v10, 0 }
 0x73b   : > { %v2589_v0 = vsub.f32 %v11460_v17, %v2571_v61  ;;  %9372 = vpow2.f32 %v2622_v7 }
 0x73c   : > { %2638 = vadd.xlane.f32.xlu0 %v11522_v30  ;;  %2644 = vadd.xlane.f32.xlu1 %v11525_v57 }
 0x73d   : > { %v2618_v18 = vmul.f32 1.442695, %v2589_v0 }
 0x73e   : > { %v8433_v3 = vpop.f32.mrb[52].mxu1 }
 0x73f   : > { %1802 = vst.msk [vmem:[#allocation2 + $0x30] sm:$0xff] %vm1401_vm0, %v8433_v3  ;;  %v1749_v62 = vpop.f32.mrb[53].mxu1  ;;  %9374 = vpow2.f32 %v2618_v18 }
 0x740   : > { %1800 = vst.msk [vmem:[#allocation2 + $0x20] sm:$0xff] %vm1401_vm0, %v1749_v62  ;;  %v8434_v27 = vpop.f32.mrb[54].mxu1  ;;  %2640 = vadd.xlane.f32.xlu1 %v11530_v16  ;;  %2652 = vadd.xlane.f32.xlu0 %v11532_v31 }
 0x741   : > { %1803 = vst.msk [vmem:[#allocation2 + $0x38] sm:$0xff] %vm1401_vm0, %v8434_v27  ;;  %v1752_v17 = vpop.f32.mrb[55].mxu1 }
 0x742   : > { %1801 = vst.msk [vmem:[#allocation2 + $0x28] sm:$0xff] %vm1401_vm0, %v1752_v17 }
 0x744   : > { %2646 = vadd.xlane.f32.xlu1 %v11539_v43  ;;  %2648 = vadd.xlane.f32.xlu0 %v11542_v23 }
 0x745   : > { %v11548_v44 = vpop.eup %9372 }
 0x747   : > { %v8437_v63 = vpop.f32.mrb[56].mxu1 }
 0x748   : > { %1806 = vst.msk [vmem:[#allocation2 + $0x50] sm:$0xff] %vm1401_vm0, %v8437_v63  ;;  %v1765_v50 = vpop.f32.mrb[57].mxu1  ;;  %2642 = vadd.xlane.f32.xlu1 %v11546_v46  ;;  %2654 = vadd.xlane.f32.xlu0 %v11548_v44 }
 0x749   : > { %1804 = vst.msk [vmem:[#allocation2 + $0x40] sm:$0xff] %vm1401_vm0, %v1765_v50  ;;  %v8438_v21 = vpop.f32.mrb[58].mxu1  ;;  %v11556_v32 = vpop.eup %9374 }
 0x74a   : > { %1807 = vst.msk [vmem:[#allocation2 + $0x58] sm:$0xff] %vm1401_vm0, %v8438_v21  ;;  %v1768_v47 = vpop.f32.mrb[59].mxu1 }
 0x74b   : > { %1805 = vst.msk [vmem:[#allocation2 + $0x48] sm:$0xff] %vm1401_vm0, %v1768_v47 }
 0x74c   : > { %2650 = vadd.xlane.f32.xlu1 %v11556_v32 }
 0x753   : > { %v8441_v39 = vpop.f32.mrb[60].mxu1 }
 0x754   : > { %1810 = vst.msk [vmem:[#allocation2 + $0x70] sm:$0xff] %vm1401_vm0, %v8441_v39  ;;  %v1781_v34 = vpop.f32.mrb[61].mxu1 }
 0x755   : > { %1808 = vst.msk [vmem:[#allocation2 + $0x60] sm:$0xff] %vm1401_vm0, %v1781_v34  ;;  %v8442_v51 = vpop.f32.mrb[62].mxu1 }
 0x756   : > { %1811 = vst.msk [vmem:[#allocation2 + $0x78] sm:$0xff] %vm1401_vm0, %v8442_v51  ;;  %v1784_v8 = vpop.f32.mrb[63].mxu1 }
 0x757   : > { %1809 = vst.msk [vmem:[#allocation2 + $0x68] sm:$0xff] %vm1401_vm0, %v1784_v8 }
 0x75d   : > { %2928 = vrot.lane.b32.xlu1 %v10828_v49, %s10117_s22 }
 0x75e   : > { %2926 = vrot.lane.b32.xlu0 %v10814_v2, %s10117_s22 }
 0x761   : > { %2900 = vrot.lane.b32.xlu1 %v10712_v28, %s10117_s22 }
 0x762   : > { %2898 = vrot.lane.b32.xlu0 %v10689_v25, %s10117_s22  ;;  %v2919_v25 = vpop.permute.xlu0 %2918 }
 0x765   : > { %2904 = vrot.lane.b32.xlu1 %v10755_v59, %s10117_s22 }
 0x766   : > { %2902 = vrot.lane.b32.xlu0 %v10734_v13, %s10117_s22 }
 0x769   : > { %2908 = vrot.lane.b32.xlu1 %v10797_v58, %s10117_s22 }
 0x76a   : > { %2906 = vrot.lane.b32.xlu0 %v10780_v35, %s10117_s22 }
 0x76d   : > { %2912 = vrot.lane.b32.xlu1 %v10830_v5, %s10117_s22 }
 0x76e   : > { %2910 = vrot.lane.b32.xlu0 %v10816_v29, %s10117_s22 }
 0x771   : > { %3229 = vrot.lane.b32.xlu1 %v14426_v40, %s10117_s22 }
 0x772   : > { %3227 = vrot.lane.b32.xlu0 %v10704_v53, %s10117_s22 }
 0x775   : > { %3233 = vrot.lane.b32.xlu1 %v14428_v6, %s10117_s22 }
 0x776   : > { %3231 = vrot.lane.b32.xlu0 %v10727_v20, %s10117_s22 }
 0x788   : > { %v2629_v28 = vpop.xlane.xlu1 %2628 }
 0x78c   : > { %v2631_v13 = vpop.xlane.xlu1 %2630  ;;  %v2625_v59 = vpop.xlane.xlu0 %2624 }
 0x78d   : > { %9376 = vrcp.f32 %v2631_v13 }
 0x78e   : > { %9378 = vrcp.f32 %v2625_v59 }
 0x78f   : > { %9380 = vrcp.f32 %v2629_v28 }
 0x790   : > { %v2627_v35 = vpop.xlane.xlu1 %2626  ;;  %v2923_v10 = vpop.permute.xlu0 %2922 }
 0x791   : > { %9382 = vrcp.f32 %v2627_v35  ;;  %v2967_v61 = vsel %vm1401_vm0, %v2923_v10, 0 }
 0x797   : > { %v9377_v58 = vpop.eup %9376 }
 0x798   : > { %v9379_v2 = vpop.eup %9378  ;;  %v2675_v53 = vmul.f32 %v9377_v58, %v11484_v15  ;;  %v2958_v15 = vsel %vm1401_vm0, %v11475_v4, 0 }
 0x799   : > { %v9381_v29 = vpop.eup %9380  ;;  %v2672_v5 = vmul.f32 %v9379_v2, %v11486_v36  ;;  %v2961_v36 = vsel %vm1401_vm0, %v2919_v25, 0 }
 0x79a   : > { %v2674_v20 = vmul.f32 %v9381_v29, %v11481_v38  ;;  %v2964_v38 = vsel %vm1401_vm0, %v11506_v33, 0 }
 0x79b   : > { %v9383_v49 = vpop.eup %9382 }
 0x79c   : > { %v2673_v40 = vmul.f32 %v9383_v49, %v11490_v48  ;;  %v2689_v7 = vpack.c.bf16 %v2675_v53, %v2674_v20  ;;  %v2925_v48 = vpop.permute.xlu1 %2924 }
 0x79d   : > { %v2970_v62 = vsel %vm1401_vm0, %v2925_v48, 0 }
 0x79e   : > { %v2688_v6 = vpack.c.bf16 %v2673_v40, %v2672_v5 }
 0x7a0   : > { %8555 = vmatprep.mubr.bf16.mxu1 %v2688_v6 }
 0x7a1   : > { %8556 = vmatmul.mubr.bf16.vlgmr.msra.gmra.mrb[64].mxu1 %v2689_v7 }
 0x7a2   : > { %8572 = vmatpush3.bf16.xpose.msra.mxu1 %v2955_v26 }
 0x7a3   : > { %8964 = vmatprep.subr.msk.bf16.mxu1 %vm1401_vm0, %v11475_v4 }
 0x7aa   : > { %8574 = vmatpush3.bf16.xpose.msra.mxu1 %v2958_v15 }
 0x7ab   : > { %8965 = vmatprep.subr.msk.bf16.mxu1 %vm1401_vm0, %v2919_v25 }
 0x7b2   : > { %8576 = vmatpush3.bf16.xpose.msra.mxu1 %v2961_v36 }
 0x7b3   : > { %8966 = vmatprep.subr.msk.bf16.mxu1 %vm1401_vm0, %v11506_v33 }
 0x7ba   : > { %8578 = vmatpush3.bf16.xpose.msra.mxu1 %v2964_v38 }
 0x7bb   : > { %8967 = vmatprep.subr.msk.bf16.mxu1 %vm1401_vm0, %v2923_v10 }
 0x7c1   : > { %v2637_v4 = vpop.xlane.xlu0 %2636 }
 0x7c2   : > { %8580 = vmatpush3.bf16.xpose.msra.mxu1 %v2967_v61  ;;  %v14452_v61 = vld [vmem:[#allocation22_spill] sm:$0xff] }
 0x7c3   : > { %8968 = vmatprep.subr.msk.bf16.mxu1 %vm1401_vm0, %v2925_v48 }
 0x7c5   : > { %v2635_v0 = vpop.xlane.xlu1 %2634  ;;  %v2633_v18 = vpop.xlane.xlu0 %2632 }
 0x7c6   : > { %9384 = vrcp.f32 %v2635_v0 }
 0x7c7   : > { %9386 = vrcp.f32 %v2633_v18 }
 0x7c8   : > { %9388 = vrcp.f32 %v2637_v4 }
 0x7c9   : > { %v2645_v3 = vpop.xlane.xlu1 %2644  ;;  %v2639_v33 = vpop.xlane.xlu0 %2638 }
 0x7ca   : > { %8582 = vmatpush3.bf16.xpose.msra.mxu1 %v2970_v62  ;;  %9390 = vrcp.f32 %v2639_v33 }
 0x7cd   : > { %v2641_v27 = vpop.xlane.xlu1 %2640  ;;  %v2653_v17 = vpop.xlane.xlu0 %2652 }
 0x7d0   : > { %v9385_v63 = vpop.eup %9384 }
 0x7d1   : > { %v9387_v50 = vpop.eup %9386  ;;  %v2647_v21 = vpop.xlane.xlu1 %2646  ;;  %v2677_v39 = vmul.f32 %v9385_v63, %v11514_v37 }
 0x7d2   : > { %v2649_v47 = vpop.xlane.xlu0 %2648  ;;  %v2676_v34 = vmul.f32 %v9387_v50, %v11512_v14  ;;  %v9389_v51 = vpop.eup %9388  ;;  %9392 = vrcp.f32 %v2647_v21 }
 0x7d3   : > { %9394 = vrcp.f32 %v2641_v27  ;;  %v2678_v59 = vmul.f32 %v9389_v51, %v11508_v55  ;;  %v14457_v51 = vld [vmem:[#allocation31_spill] sm:$0xff] }
 0x7d4   : > { %v2690_v8 = vpack.c.bf16 %v2677_v39, %v2676_v34  ;;  %v9391_v25 = vpop.eup %9390  ;;  %9396 = vrcp.f32 %v2645_v3  ;;  %v14455_v39 = vld [vmem:[#allocation25_spill] sm:$0xff]  ;;  %v14456_v34 = vld [vmem:[#allocation32_spill] sm:$0xff] }
 0x7d5   : > { %v2643_v28 = vpop.xlane.xlu1 %2642  ;;  %v2679_v35 = vmul.f32 %v9391_v25, %v11522_v30  ;;  %v14459_v25 = vld [vmem:[#allocation39_spill] sm:$0xff] }
 0x7d6   : > { %v2655_v13 = vpop.xlane.xlu0 %2654  ;;  %9398 = vrcp.f32 %v2643_v28  ;;  %8559 = vmatprep.mubr.bf16.mxu1 %v2690_v8  ;;  %v14458_v8 = vld [vmem:[#allocation41_spill] sm:$0xff] }
 0x7d7   : > { %9400 = vrcp.f32 %v2649_v47  ;;  %v2691_v58 = vpack.c.bf16 %v2679_v35, %v2678_v59  ;;  %v14454_v47 = vld [vmem:[#allocation26_spill] sm:$0xff] }
 0x7d9   : > { %v2651_v2 = vpop.xlane.xlu1 %2650  ;;  %8560 = vmatmul.mubr.bf16.gmra.mrb[68].mxu1 %v2691_v58 }
 0x7da   : > { %v2927_v37 = vpop.permute.xlu0 %2926  ;;  %9402 = vrcp.f32 %v2651_v2 }
 0x7db   : > { %8969 = vmatprep.subr.msk.bf16.mxu1 %vm1401_vm0, %v2927_v37  ;;  %v2973_v14 = vsel %vm1401_vm0, %v2927_v37, 0  ;;  %9404 = vrcp.f32 %v2655_v13 }
 0x7dc   : > { %8584 = vmatpush3.bf16.xpose.msra.mxu1 %v2973_v14  ;;  %v9393_v29 = vpop.eup %9392  ;;  %9406 = vrcp.f32 %v2653_v17 }
 0x7dd   : > { %v2929_v49 = vpop.permute.xlu1 %2928  ;;  %v9395_v5 = vpop.eup %9394  ;;  %v2683_v40 = vmul.f32 %v9393_v29, %v11539_v43 }
 0x7de   : > { %v2899_v53 = vpop.permute.xlu0 %2898  ;;  %8970 = vmatprep.subr.msk.bf16.mxu1 %vm1401_vm0, %v2929_v49  ;;  %v9397_v55 = vpop.eup %9396  ;;  %v2680_v7 = vmul.f32 %v9395_v5, %v11530_v16  ;;  %v2976_v36 = vsel %vm1401_vm0, %v2929_v49, 0 }
 0x7df   : > { %v2682_v38 = vmul.f32 %v9397_v55, %v11525_v57 }
 0x7e0   : > { %v9399_v30 = vpop.eup %9398 }
 0x7e1   : > { %v2901_v20 = vpop.permute.xlu1 %2900  ;;  %v2681_v26 = vmul.f32 %v9399_v30, %v11546_v46  ;;  %v9401_v15 = vpop.eup %9400  ;;  %v2693_v4 = vpack.c.bf16 %v2683_v40, %v2682_v38 }
 0x7e2   : > { %v2903_v6 = vpop.permute.xlu0 %2902  ;;  %v2684_v3 = vmul.f32 %v9401_v15, %v11542_v23 }
 0x7e3   : > { %v2692_v10 = vpack.c.bf16 %v2681_v26, %v2680_v7 }
 0x7e4   : > { %8586 = vmatpush3.bf16.xpose.msra.mxu1 %v2976_v36  ;;  %v9403_v48 = vpop.eup %9402 }
 0x7e5   : > { %8667 = vmatprep.subr.bf16.mxu1 %v14452_v61  ;;  %v9405_v0 = vpop.eup %9404  ;;  %v2905_v18 = vpop.permute.xlu1 %2904  ;;  %8563 = vmatprep.mubr.bf16.mxu1 %v2692_v10  ;;  %v2685_v16 = vmul.f32 %v9403_v48, %v11556_v32 }
 0x7e6   : > { %v2907_v43 = vpop.permute.xlu0 %2906  ;;  %8564 = vmatmul.mubr.bf16.gmra.mrb[72].mxu1 %v2693_v4  ;;  %v9407_v46 = vpop.eup %9406  ;;  %v2687_v33 = vmul.f32 %v9405_v0, %v11548_v44  ;;  %v14453_v44 = vld [vmem:[#allocation21_spill] sm:$0xff] }
 0x7e7   : > { %v2694_v62 = vpack.c.bf16 %v2685_v16, %v2684_v3  ;;  %v2686_v17 = vmul.f32 %v9407_v46, %v11532_v31 }
 0x7e9   : > { %v2909_v57 = vpop.permute.xlu1 %2908  ;;  %8567 = vmatprep.mubr.bf16.mxu1 %v2694_v62  ;;  %v2695_v63 = vpack.c.bf16 %v2687_v33, %v2686_v17 }
 0x7ea   : > { %v2911_v27 = vpop.permute.xlu0 %2910 }
 0x7ed   : > { %v2913_v50 = vpop.permute.xlu1 %2912 }
 0x7ee   : > { %v3228_v21 = vpop.permute.xlu0 %3227  ;;  %8568 = vmatmul.mubr.bf16.gmra.mrb[76].mxu1 %v2695_v63 }
 0x7ef   : > { %8603 = vmatprep.subr.bf16.mxu0 %v3228_v21  ;;  %8587 = vmatprep.mubr.msk.bf16.mxu1 %vm1401_vm0, %v2899_v53 }
 0x7f0   : > { %8604 = vmatpush3.bf16.msra.mxu0 %v3228_v21 }
 0x7f1   : > { %v3230_v23 = vpop.permute.xlu1 %3229 }
 0x7f2   : > { %8605 = vmatprep.subr.bf16.mxu0 %v3230_v23  ;;  %v3232_v32 = vpop.permute.xlu0 %3231 }
 0x7f4   : > { %8606 = vmatpush3.bf16.msra.mxu0 %v3230_v23 }
 0x7f5   : > { %8607 = vmatprep.subr.bf16.mxu0 %v3232_v32  ;;  %v3234_v31 = vpop.permute.xlu1 %3233 }
 0x7f6   : > { %8588 = vmatmul.mubr.msk.bf16.vlgmr.msra.gmra.mrb[80].mxu1 %vm1401_vm0, %v2901_v20 }
 0x7f7   : > { %8668 = vmatpush3.bf16.msra.mxu1 %v14452_v61  ;;  %8591 = vmatprep.mubr.msk.bf16.mxu1 %vm1401_vm0, %v2903_v6 }
 0x7f8   : > { %8608 = vmatpush3.bf16.msra.mxu0 %v3232_v32  ;;  %8669 = vmatprep.subr.bf16.mxu1 %v14453_v44 }
 0x7f9   : > { %8609 = vmatprep.subr.bf16.mxu0 %v3234_v31 }
 0x7fb   : > { %8670 = vmatpush3.bf16.msra.mxu1 %v14453_v44 }
 0x7fc   : > { %8610 = vmatpush3.bf16.msra.mxu0 %v3234_v31  ;;  %8671 = vmatprep.subr.bf16.mxu1 %v14454_v47 }
 0x7fe   : > { %8592 = vmatmul.mubr.msk.bf16.gmra.mrb[84].mxu1 %vm1401_vm0, %v2905_v18 }
 0x7ff   : > { %8672 = vmatpush3.bf16.msra.mxu1 %v14454_v47  ;;  %8595 = vmatprep.mubr.msk.bf16.mxu1 %vm1401_vm0, %v2907_v43 }
 0x800   : > { %8673 = vmatprep.subr.bf16.mxu1 %v14455_v39 }
 0x803   : > { %8674 = vmatpush3.bf16.msra.mxu1 %v14455_v39 }
 0x804   : > { %8675 = vmatprep.subr.bf16.mxu1 %v14456_v34 }
 0x806   : > { %8596 = vmatmul.mubr.msk.bf16.gmra.mrb[88].mxu1 %vm1401_vm0, %v2909_v57 }
 0x807   : > { %8676 = vmatpush3.bf16.msra.mxu1 %v14456_v34  ;;  %8599 = vmatprep.mubr.msk.bf16.mxu1 %vm1401_vm0, %v2911_v27 }
 0x808   : > { %8677 = vmatprep.subr.bf16.mxu1 %v14457_v51 }
 0x80b   : > { %8678 = vmatpush3.bf16.msra.mxu1 %v14457_v51 }
 0x80c   : > { %8679 = vmatprep.subr.bf16.mxu1 %v14458_v8 }
 0x80e   : > { %8600 = vmatmul.mubr.msk.bf16.gmra.mrb[92].mxu1 %vm1401_vm0, %v2913_v50 }
 0x80f   : > { %8680 = vmatpush3.bf16.msra.mxu1 %v14458_v8 }
 0x810   : > { %8681 = vmatprep.subr.bf16.mxu1 %v14459_v25 }
 0x813   : > { %8682 = vmatpush3.bf16.msra.mxu1 %v14459_v25 }
 0x874   : > { %v11651_v28 = vpop.f32.mrb[64].mxu1 }
 0x875   : > { %14460 = vst [vmem:[#allocation14_spill] sm:$0xff] %v11651_v28  ;;  %v11653_v13 = vpop.f32.mrb[65].mxu1 }
 0x876   : > { %14461 = vst [vmem:[#allocation11_spill] sm:$0xff] %v11653_v13  ;;  %v11655_v59 = vpop.f32.mrb[66].mxu1 }
 0x877   : > { %14462 = vst [vmem:[#allocation18_spill] sm:$0xff] %v11655_v59  ;;  %v11657_v35 = vpop.f32.mrb[67].mxu1 }
 0x878   : > { %14463 = vst [vmem:[#allocation17_spill] sm:$0xff] %v11657_v35 }
 0x8ac   : > { %v11659_v58 = vpop.f32.mrb[68].mxu1 }
 0x8ad   : > { %14464 = vst [vmem:[#allocation22_spill] sm:$0xff] %v11659_v58  ;;  %v11661_v2 = vpop.f32.mrb[69].mxu1 }
 0x8ae   : > { %14465 = vst [vmem:[#allocation21_spill] sm:$0xff] %v11661_v2  ;;  %v11663_v37 = vpop.f32.mrb[70].mxu1 }
 0x8af   : > { %14466 = vst [vmem:[#allocation26_spill] sm:$0xff] %v11663_v37  ;;  %v11665_v14 = vpop.f32.mrb[71].mxu1 }
 0x8b0   : > { %14467 = vst [vmem:[#allocation25_spill] sm:$0xff] %v11665_v14 }
 0x8b9   : > { %v11667_v29 = vpop.f32.mrb[72].mxu1 }
 0x8ba   : > { %14468 = vst [vmem:[#allocation32_spill] sm:$0xff] %v11667_v29  ;;  %v11669_v49 = vpop.f32.mrb[73].mxu1 }
 0x8bb   : > { %14469 = vst [vmem:[#allocation31_spill] sm:$0xff] %v11669_v49  ;;  %v11671_v53 = vpop.f32.mrb[74].mxu1 }
 0x8bc   : > { %14470 = vst [vmem:[#allocation41_spill] sm:$0xff] %v11671_v53  ;;  %v11673_v5 = vpop.f32.mrb[75].mxu1 }
 0x8bd   : > { %14471 = vst [vmem:[#allocation39_spill] sm:$0xff] %v11673_v5 }
 0x8c1   : > { %v11675_v55 = vpop.f32.mrb[76].mxu1 }
 0x8c2   : > { %14472 = vst [vmem:[#allocation49_spill] sm:$0xff] %v11675_v55  ;;  %v11677_v30 = vpop.f32.mrb[77].mxu1 }
 0x8c3   : > { %14473 = vst [vmem:[#allocation50_spill] sm:$0xff] %v11677_v30  ;;  %v11679_v40 = vpop.f32.mrb[78].mxu1 }
 0x8c4   : > { %14474 = vst [vmem:[#allocation51_spill] sm:$0xff] %v11679_v40  ;;  %v11681_v20 = vpop.f32.mrb[79].mxu1 }
 0x8c5   : > { %14475 = vst [vmem:[#allocation52_spill] sm:$0xff] %v11681_v20 }
 0x8c9   : > { %v8589_v6 = vpop.f32.mrb[80].mxu1 }
 0x8ca   : > { %3079 = vmax.xlane.f32.xlu0 %v8589_v6  ;;  %v3012_v7 = vpop.f32.mrb[81].mxu1 }
 0x8cb   : > { %v8590_v26 = vpop.f32.mrb[82].mxu1 }
 0x8cc   : > { %v3015_v15 = vpop.f32.mrb[83].mxu1 }
 0x8cd   : > { %3077 = vmax.xlane.f32.xlu1 %v3015_v15 }
 0x8ce   : > { %3075 = vmax.xlane.f32.xlu0 %v3012_v7 }
 0x8d1   : > { %v11683_v36 = vpop.f32.mrb[84].mxu1 }
 0x8d2   : > { %3081 = vmax.xlane.f32.xlu0 %v8590_v26  ;;  %v11685_v38 = vpop.f32.mrb[85].mxu1 }
 0x8d3   : > { %v11687_v10 = vpop.f32.mrb[86].mxu1 }
 0x8d4   : > { %3089 = vmax.xlane.f32.xlu1 %v11687_v10  ;;  %v11690_v48 = vpop.f32.mrb[87].mxu1 }
 0x8d6   : > { %3087 = vmax.xlane.f32.xlu0 %v11683_v36 }
 0x8d8   : > { %3085 = vmax.xlane.f32.xlu1 %v11690_v48 }
 0x8d9   : > { %v11694_v4 = vpop.f32.mrb[88].mxu1 }
 0x8da   : > { %3083 = vmax.xlane.f32.xlu0 %v11685_v38  ;;  %v11697_v0 = vpop.f32.mrb[89].mxu1 }
 0x8db   : > { %v11699_v18 = vpop.f32.mrb[90].mxu1 }
 0x8dc   : > { %3097 = vmax.xlane.f32.xlu1 %v11699_v18  ;;  %v11702_v43 = vpop.f32.mrb[91].mxu1 }
 0x8de   : > { %3095 = vmax.xlane.f32.xlu0 %v11694_v4 }
 0x8e0   : > { %3093 = vmax.xlane.f32.xlu1 %v11702_v43 }
 0x8e1   : > { %v11706_v3 = vpop.f32.mrb[92].mxu1 }
 0x8e2   : > { %3091 = vmax.xlane.f32.xlu0 %v11697_v0  ;;  %v11709_v16 = vpop.f32.mrb[93].mxu1 }
 0x8e3   : > { %v11711_v46 = vpop.f32.mrb[94].mxu1 }
 0x8e4   : > { %3105 = vmax.xlane.f32.xlu1 %v11711_v46  ;;  %v11714_v62 = vpop.f32.mrb[95].mxu1 }
 0x8e6   : > { %3103 = vmax.xlane.f32.xlu0 %v11706_v3 }
 0x8e8   : > { %3101 = vmax.xlane.f32.xlu1 %v11714_v62 }
 0x8ea   : > { %3099 = vmax.xlane.f32.xlu0 %v11709_v16 }
 0x8f9   : > { %3237 = vrot.lane.b32.xlu1 %v14429_v22, %s10117_s22 }
 0x900   : > { %3235 = vrot.lane.b32.xlu0 %v14427_v42, %s10117_s22 }
 0x957   : > { %v3080_v33 = vpop.xlane.xlu0 %3079 }
 0x958   : > { %v3109_v57 = vsub.f32 %v8589_v6, %v3080_v33 }
 0x95a   : > { %v3127_v27 = vmul.f32 1.442695, %v3109_v57  ;;  %v3078_v17 = vpop.xlane.xlu1 %3077 }
 0x95b   : > { %v3108_v63 = vsub.f32 %v3015_v15, %v3078_v17  ;;  %v3076_v50 = vpop.xlane.xlu0 %3075 }
 0x95c   : > { %9408 = vpow2.f32 %v3127_v27  ;;  %v3107_v21 = vsub.f32 %v3012_v7, %v3076_v50 }
 0x95d   : > { %v3125_v23 = vmul.f32 1.442695, %v3108_v63 }
 0x95e   : > { %v3123_v32 = vmul.f32 1.442695, %v3107_v21 }
 0x95f   : > { %9410 = vpow2.f32 %v3125_v23  ;;  %v3082_v31 = vpop.xlane.xlu0 %3081 }
 0x960   : > { %9412 = vpow2.f32 %v3123_v32  ;;  %v3110_v40 = vsub.f32 %v8590_v26, %v3082_v31 }
 0x961   : > { %v3090_v55 = vpop.xlane.xlu1 %3089 }
 0x962   : > { %v3129_v20 = vmul.f32 1.442695, %v3110_v40  ;;  %v3114_v5 = vsub.f32 %v11687_v10, %v3090_v55 }
 0x963   : > { %v3088_v22 = vpop.xlane.xlu0 %3087 }
 0x964   : > { %9414 = vpow2.f32 %v3129_v20  ;;  %v3113_v31 = vsub.f32 %v11683_v36, %v3088_v22  ;;  %v3137_v60 = vmul.f32 1.442695, %v3114_v5 }
 0x965   : > { %v3086_v30 = vpop.xlane.xlu1 %3085 }
 0x966   : > { %v11723_v42 = vpop.eup %9408  ;;  %v3112_v29 = vsub.f32 %v11690_v48, %v3086_v30  ;;  %v3135_v49 = vmul.f32 1.442695, %v3113_v31 }
 0x967   : > { %3159 = vadd.xlane.f32.xlu1 %v11723_v42  ;;  %v3084_v6 = vpop.xlane.xlu0 %3083 }
 0x968   : > { %v3111_v32 = vsub.f32 %v11685_v38, %v3084_v6 }
 0x969   : > { %v11726_v15 = vpop.eup %9410  ;;  %v3098_v33 = vpop.xlane.xlu1 %3097 }
 0x96a   : > { %v11728_v7 = vpop.eup %9412  ;;  %3157 = vadd.xlane.f32.xlu0 %v11726_v15  ;;  %v3131_v53 = vmul.f32 1.442695, %v3111_v32 }
 0x96b   : > { %3155 = vadd.xlane.f32.xlu1 %v11728_v7  ;;  %v3096_v26 = vpop.xlane.xlu0 %3095 }
 0x96c   : > { %9416 = vpow2.f32 %v3131_v53  ;;  %v3117_v36 = vsub.f32 %v11694_v4, %v3096_v26 }
 0x96d   : > { %v3094_v57 = vpop.xlane.xlu1 %3093  ;;  %9418 = vpow2.f32 %v3135_v49 }
 0x96e   : > { %v11732_v40 = vpop.eup %9414  ;;  %v3116_v56 = vsub.f32 %v11702_v43, %v3094_v57 }
 0x96f   : > { %3161 = vadd.xlane.f32.xlu1 %v11732_v40  ;;  %v3092_v20 = vpop.xlane.xlu0 %3091 }
 0x970   : > { %v3141_v38 = vmul.f32 1.442695, %v3116_v56 }
 0x971   : > { %v3106_v27 = vpop.xlane.xlu1 %3105 }
 0x972   : > { %v3122_v5 = vsub.f32 %v11711_v46, %v3106_v27  ;;  %v14477_v27 = vld [vmem:[#allocation19_spill] sm:$0xff] }
 0x973   : > { %v3104_v17 = vpop.xlane.xlu0 %3103 }
 0x974   : > { %v3121_v48 = vsub.f32 %v11706_v3, %v3104_v17 }
 0x975   : > { %v3102_v63 = vpop.xlane.xlu1 %3101 }
 0x976   : > { %v3120_v55 = vsub.f32 %v11714_v62, %v3102_v63  ;;  %v11748_v53 = vpop.eup %9416 }
 0x977   : > { %v3100_v50 = vpop.xlane.xlu0 %3099 }
 0x978   : > { %v3119_v49 = vsub.f32 %v11709_v16, %v3100_v50  ;;  %v3149_v56 = vmul.f32 1.442695, %v3120_v55  ;;  %v3151_v16 = vmul.f32 1.442695, %v3121_v48  ;;  %v14480_v48 = vld [vmem:[#allocation33_spill] sm:$0xff] }
 0x979   : > { %v3238_v23 = vpop.permute.xlu1 %3237 }
 0x97a   : > { %v3147_v4 = vmul.f32 1.442695, %v3119_v49 }
 0x97b   : > { %v3236_v21 = vpop.permute.xlu0 %3235 }
 0x97c   : > { %8611 = vmatprep.subr.bf16.mxu0 %v3236_v21 }
 0x97d   : > { %8612 = vmatpush3.bf16.msra.mxu0 %v3236_v21  ;;  %v3133_v21 = vmul.f32 1.442695, %v3112_v29  ;;  %v3143_v29 = vmul.f32 1.442695, %v3117_v36 }
 0x97e   : > { %8613 = vmatprep.subr.bf16.mxu0 %v3238_v23 }
 0x97f   : > { %9420 = vpow2.f32 %v3133_v21 }
 0x980   : > { %3239 = vrot.lane.b32.xlu0 %v14431_v1, %s10117_s22  ;;  %3241 = vrot.lane.b32.xlu1 %v14430_v45, %s10117_s22  ;;  %v3115_v1 = vsub.f32 %v11697_v0, %v3092_v20  ;;  %v3118_v45 = vsub.f32 %v11699_v18, %v3098_v33  ;;  %9422 = vpow2.f32 %v3137_v60  ;;  %v11753_v60 = vpop.eup %9418  ;;  %v3153_v0 = vmul.f32 1.442695, %v3122_v5  ;;  %v14476_v20 = vld [vmem:[#allocation23_spill] sm:$0xff] }
 0x981   : > { %8614 = vmatpush3.bf16.msra.mxu0 %v3238_v23  ;;  %9424 = vpow2.f32 %v3141_v38  ;;  %v3454_v5 = vsel %vm1401_vm0, %v14477_v27, 0 }
 0x982   : > { %v3139_v22 = vmul.f32 1.442695, %v3115_v1  ;;  %v3145_v30 = vmul.f32 1.442695, %v3118_v45 }
 0x984   : > { %9426 = vpow2.f32 %v3139_v22 }
 0x985   : > { %9428 = vpow2.f32 %v3145_v30 }
 0x986   : > { %9430 = vpow2.f32 %v3143_v29 }
 0x987   : > { %9432 = vpow2.f32 %v3149_v56 }
 0x988   : > { %9434 = vpow2.f32 %v3147_v4  ;;  %v3466_v4 = vsel %vm1401_vm0, %v14480_v48, 0 }
 0x989   : > { %v11755_v10 = vpop.eup %9420  ;;  %9436 = vpow2.f32 %v3153_v0 }
 0x98a   : > { %v11760_v18 = vpop.eup %9422  ;;  %9438 = vpow2.f32 %v3151_v16  ;;  %v14481_v16 = vld [vmem:[#allocation35_spill] sm:$0xff] }
 0x98b   : > { %v11762_v43 = vpop.eup %9424 }
 0x98e   : > { %v11766_v46 = vpop.eup %9426 }
 0x98f   : > { %v11768_v62 = vpop.eup %9428 }
 0x990   : > { %v11772_v3 = vpop.eup %9430 }
 0x991   : > { %v11774_v6 = vpop.eup %9432 }
 0x992   : > { %v11778_v33 = vpop.eup %9434 }
 0x993   : > { %v11780_v26 = vpop.eup %9436 }
 0x994   : > { %v11784_v57 = vpop.eup %9438 }
 0x99f   : > { %3163 = vadd.xlane.f32.xlu0 %v11748_v53 }
 0x9a3   : > { %3167 = vadd.xlane.f32.xlu0 %v11753_v60 }
 0x9a4   : > { %3165 = vadd.xlane.f32.xlu1 %v11755_v10 }
 0x9a7   : > { %3169 = vadd.xlane.f32.xlu0 %v11760_v18 }
 0x9a8   : > { %3173 = vadd.xlane.f32.xlu1 %v11762_v43 }
 0x9ab   : > { %3171 = vadd.xlane.f32.xlu0 %v11766_v46 }
 0x9ac   : > { %3177 = vadd.xlane.f32.xlu1 %v11768_v62 }
 0x9af   : > { %3175 = vadd.xlane.f32.xlu0 %v11772_v3 }
 0x9b0   : > { %3181 = vadd.xlane.f32.xlu1 %v11774_v6 }
 0x9b3   : > { %3179 = vadd.xlane.f32.xlu0 %v11778_v33 }
 0x9b4   : > { %3185 = vadd.xlane.f32.xlu1 %v11780_v26 }
 0x9b7   : > { %3183 = vadd.xlane.f32.xlu0 %v11784_v57 }
 0x9c5   : > { %3873 = vrot.lane.b32.xlu1 %v14476_v20, %s10115_s12 }
 0x9cd   : > { %3871 = vrot.lane.b32.xlu0 %v14477_v27, %s10115_s12 }
 0x9f4   : > { %v3160_v17 = vpop.xlane.xlu1 %3159 }
 0x9f7   : > { %v3158_v63 = vpop.xlane.xlu0 %3157 }
 0x9f8   : > { %9440 = vrcp.f32 %v3158_v63  ;;  %v3156_v50 = vpop.xlane.xlu1 %3155 }
 0x9f9   : > { %9442 = vrcp.f32 %v3156_v50  ;;  %v3469_v50 = vsel %vm1401_vm0, %v14481_v16, 0 }
 0x9fa   : > { %9444 = vrcp.f32 %v3160_v17 }
 0x9fb   : > { %v3240_v23 = vpop.permute.xlu0 %3239 }
 0x9fc   : > { %v3162_v32 = vpop.xlane.xlu1 %3161  ;;  %8615 = vmatprep.subr.bf16.mxu0 %v3240_v23 }
 0x9fd   : > { %9446 = vrcp.f32 %v3162_v32  ;;  %8616 = vmatpush3.bf16.msra.mxu0 %v3240_v23 }
 0xa00   : > { %v3242_v31 = vpop.permute.xlu1 %3241 }
 0xa01   : > { %8617 = vmatprep.subr.bf16.mxu0 %v3242_v31 }
 0xa02   : > { %v9441_v21 = vpop.eup %9440  ;;  %8618 = vmatpush3.bf16.msra.mxu0 %v3242_v31  ;;  %v14482_v31 = vld [vmem:[#allocation37_spill] sm:$0xff] }
 0xa03   : > { %v9443_v1 = vpop.eup %9442  ;;  %8971 = vmatprep.subr.msk.bf16.mxu0 %vm1401_vm0, %v14477_v27  ;;  %v3204_v45 = vmul.f32 %v9441_v21, %v11726_v15  ;;  %v3457_v15 = vsel %vm1401_vm0, %v14476_v20, 0 }
 0xa04   : > { %v3203_v38 = vmul.f32 %v9443_v1, %v11728_v7  ;;  %v9445_v36 = vpop.eup %9444  ;;  %v14478_v7 = vld [vmem:[#allocation27_spill] sm:$0xff] }
 0xa05   : > { %v3205_v55 = vmul.f32 %v9445_v36, %v11723_v42  ;;  %v3460_v42 = vsel %vm1401_vm0, %v14478_v7, 0  ;;  %v3472_v36 = vsel %vm1401_vm0, %v14482_v31, 0 }
 0xa06   : > { %v3219_v22 = vpack.c.bf16 %v3204_v45, %v3203_v38 }
 0xa07   : > { %v9447_v30 = vpop.eup %9446 }
 0xa08   : > { %v3206_v29 = vmul.f32 %v9447_v30, %v11732_v40  ;;  %8619 = vmatprep.mubr.bf16.mxu0 %v3219_v22  ;;  %v14479_v40 = vld [vmem:[#allocation29_spill] sm:$0xff] }
 0xa09   : > { %v3463_v56 = vsel %vm1401_vm0, %v14479_v40, 0 }
 0xa0a   : > { %v3220_v49 = vpack.c.bf16 %v3206_v29, %v3205_v55 }
 0xa0c   : > { %8620 = vmatmul.mubr.bf16.vlgmr.msra.gmra.mrb[112].mxu0 %v3220_v49 }
 0xa0d   : > { %8636 = vmatpush3.bf16.xpose.msra.mxu0 %v3454_v5  ;;  %v14483_v5 = vld [vmem:[#allocation40_spill] sm:$0xff] }
 0xa0e   : > { %8972 = vmatprep.subr.msk.bf16.mxu0 %vm1401_vm0, %v14476_v20 }
 0xa15   : > { %8638 = vmatpush3.bf16.xpose.msra.mxu0 %v3457_v15 }
 0xa16   : > { %8973 = vmatprep.subr.msk.bf16.mxu0 %vm1401_vm0, %v14478_v7 }
 0xa1d   : > { %8640 = vmatpush3.bf16.xpose.msra.mxu0 %v3460_v42 }
 0xa1e   : > { %8974 = vmatprep.subr.msk.bf16.mxu0 %vm1401_vm0, %v14479_v40 }
 0xa25   : > { %8642 = vmatpush3.bf16.xpose.msra.mxu0 %v3463_v56 }
 0xa26   : > { %8975 = vmatprep.subr.msk.bf16.mxu0 %vm1401_vm0, %v14480_v48 }
 0xa2c   : > { %v3164_v0 = vpop.xlane.xlu0 %3163 }
 0xa2d   : > { %8644 = vmatpush3.bf16.xpose.msra.mxu0 %v3466_v4  ;;  %9448 = vrcp.f32 %v3164_v0 }
 0xa2e   : > { %8976 = vmatprep.subr.msk.bf16.mxu0 %vm1401_vm0, %v14481_v16 }
 0xa30   : > { %v3168_v17 = vpop.xlane.xlu0 %3167 }
 0xa31   : > { %v3166_v63 = vpop.xlane.xlu1 %3165 }
 0xa32   : > { %9450 = vrcp.f32 %v3166_v63 }
 0xa33   : > { %9452 = vrcp.f32 %v3168_v17 }
 0xa34   : > { %v3170_v23 = vpop.xlane.xlu0 %3169 }
 0xa35   : > { %8646 = vmatpush3.bf16.xpose.msra.mxu0 %v3469_v50  ;;  %9454 = vrcp.f32 %v3170_v23  ;;  %v3174_v32 = vpop.xlane.xlu1 %3173 }
 0xa36   : > { %8977 = vmatprep.subr.msk.bf16.mxu0 %vm1401_vm0, %v14482_v31  ;;  %9456 = vrcp.f32 %v3174_v32 }
 0xa37   : > { %v9449_v45 = vpop.eup %9448 }
 0xa38   : > { %v3172_v21 = vpop.xlane.xlu0 %3171  ;;  %v3207_v29 = vmul.f32 %v9449_v45, %v11748_v53  ;;  %v3475_v53 = vsel %vm1401_vm0, %v14483_v5, 0 }
 0xa39   : > { %9458 = vrcp.f32 %v3172_v21  ;;  %v3178_v1 = vpop.xlane.xlu1 %3177 }
 0xa3a   : > { %9460 = vrcp.f32 %v3178_v1 }
 0xa3c   : > { %v9451_v38 = vpop.eup %9450  ;;  %v3176_v22 = vpop.xlane.xlu0 %3175 }
 0xa3d   : > { %v9453_v30 = vpop.eup %9452  ;;  %8648 = vmatpush3.bf16.xpose.msra.mxu0 %v3472_v36  ;;  %9462 = vrcp.f32 %v3176_v22  ;;  %v3182_v55 = vpop.xlane.xlu1 %3181  ;;  %v3208_v49 = vmul.f32 %v9451_v38, %v11755_v10 }
 0xa3e   : > { %8978 = vmatprep.subr.msk.bf16.mxu0 %vm1401_vm0, %v14483_v5  ;;  %9464 = vrcp.f32 %v3182_v55  ;;  %v3209_v4 = vmul.f32 %v9453_v30, %v11753_v60 }
 0xa3f   : > { %v9455_v15 = vpop.eup %9454  ;;  %v3221_v42 = vpack.c.bf16 %v3208_v49, %v3207_v29 }
 0xa40   : > { %v3180_v56 = vpop.xlane.xlu0 %3179  ;;  %v3210_v0 = vmul.f32 %v9455_v15, %v11760_v18  ;;  %v9457_v17 = vpop.eup %9456 }
 0xa41   : > { %9466 = vrcp.f32 %v3180_v56  ;;  %v3186_v63 = vpop.xlane.xlu1 %3185  ;;  %8623 = vmatprep.mubr.bf16.mxu0 %v3221_v42  ;;  %v3212_v21 = vmul.f32 %v9457_v17, %v11762_v43  ;;  %v14484_v56 = vld [vmem:[#allocation20_spill] sm:$0xff]  ;;  %v14491_v17 = vld [vmem:[#allocation42_spill] sm:$0xff] }
 0xa42   : > { %v3222_v50 = vpack.c.bf16 %v3210_v0, %v3209_v4  ;;  %9468 = vrcp.f32 %v3186_v63  ;;  %v14485_v4 = vld [vmem:[#allocation24_spill] sm:$0xff] }
 0xa43   : > { %v9459_v23 = vpop.eup %9458  ;;  %v14486_v0 = vld [vmem:[#allocation28_spill] sm:$0xff] }
 0xa44   : > { %8624 = vmatmul.mubr.bf16.gmra.mrb[116].mxu0 %v3222_v50  ;;  %v3184_v10 = vpop.xlane.xlu0 %3183  ;;  %v3211_v32 = vmul.f32 %v9459_v23, %v11766_v46  ;;  %v9461_v1 = vpop.eup %9460 }
 0xa45   : > { %8650 = vmatpush3.bf16.xpose.msra.mxu0 %v3475_v53  ;;  %9470 = vrcp.f32 %v3184_v10  ;;  %v3214_v36 = vmul.f32 %v9461_v1, %v11768_v62 }
 0xa46   : > { %v3223_v60 = vpack.c.bf16 %v3212_v21, %v3211_v32 }
 0xa47   : > { %v9463_v18 = vpop.eup %9462 }
 0xa48   : > { %8627 = vmatprep.mubr.bf16.mxu0 %v3223_v60  ;;  %v11833_v45 = vpop.permute.xlu0 %3871  ;;  %v3213_v38 = vmul.f32 %v9463_v18, %v11772_v3  ;;  %v9465_v22 = vpop.eup %9464 }
 0xa49   : > { %8979 = vmatprep.subr.msk.bf16.mxu1 %vm1401_vm0, %v11833_v45  ;;  %v3216_v55 = vmul.f32 %v9465_v22, %v11774_v6  ;;  %v14487_v6 = vld [vmem:[#allocation30_spill] sm:$0xff] }
 0xa4a   : > { %v3224_v30 = vpack.c.bf16 %v3214_v36, %v3213_v38 }
 0xa4b   : > { %v9467_v46 = vpop.eup %9466 }
 0xa4c   : > { %8628 = vmatmul.mubr.bf16.gmra.mrb[120].mxu0 %v3224_v30  ;;  %v3215_v43 = vmul.f32 %v9467_v46, %v11778_v33  ;;  %v9469_v29 = vpop.eup %9468  ;;  %v14488_v33 = vld [vmem:[#allocation34_spill] sm:$0xff] }
 0xa4d   : > { %v3218_v3 = vmul.f32 %v9469_v29, %v11780_v26  ;;  %v14490_v26 = vld [vmem:[#allocation38_spill] sm:$0xff] }
 0xa4e   : > { %v3225_v49 = vpack.c.bf16 %v3216_v55, %v3215_v43 }
 0xa4f   : > { %v9471_v15 = vpop.eup %9470 }
 0xa50   : > { %8631 = vmatprep.mubr.bf16.mxu0 %v3225_v49  ;;  %v3217_v42 = vmul.f32 %v9471_v15, %v11784_v57  ;;  %v14489_v57 = vld [vmem:[#allocation36_spill] sm:$0xff] }
 0xa52   : > { %v3226_v62 = vpack.c.bf16 %v3218_v3, %v3217_v42 }
 0xa54   : > { %8632 = vmatmul.mubr.bf16.gmra.mrb[124].mxu0 %v3226_v62 }
 0xa55   : > { %8651 = vmatprep.mubr.msk.bf16.mxu0 %vm1401_vm0, %v14484_v56 }
 0xa5c   : > { %8652 = vmatmul.mubr.msk.bf16.vlgmr.msra.gmra.mrb[128].mxu0 %vm1401_vm0, %v14485_v4 }
 0xa5d   : > { %8655 = vmatprep.mubr.msk.bf16.mxu0 %vm1401_vm0, %v14486_v0 }
 0xa64   : > { %8656 = vmatmul.mubr.msk.bf16.gmra.mrb[132].mxu0 %vm1401_vm0, %v14487_v6 }
 0xa65   : > { %8659 = vmatprep.mubr.msk.bf16.mxu0 %vm1401_vm0, %v14488_v33 }
 0xa6c   : > { %8660 = vmatmul.mubr.msk.bf16.gmra.mrb[136].mxu0 %vm1401_vm0, %v14489_v57 }
 0xa6d   : > { %8663 = vmatprep.mubr.msk.bf16.mxu0 %vm1401_vm0, %v14490_v26 }
 0xa74   : > { %8664 = vmatmul.mubr.msk.bf16.gmra.mrb[140].mxu0 %vm1401_vm0, %v14491_v17 }
 0xadf   : > { %v11859_v63 = vpop.f32.mrb[112].mxu0 }
 0xae0   : > { %14492 = vst [vmem:[#allocation23_spill] sm:$0xff] %v11859_v63  ;;  %v11861_v50 = vpop.f32.mrb[113].mxu0 }
 0xae1   : > { %14493 = vst [vmem:[#allocation19_spill] sm:$0xff] %v11861_v50  ;;  %v11863_v23 = vpop.f32.mrb[114].mxu0 }
 0xae2   : > { %14494 = vst [vmem:[#allocation27_spill] sm:$0xff] %v11863_v23  ;;  %v11865_v53 = vpop.f32.mrb[115].mxu0 }
 0xae3   : > { %14495 = vst [vmem:[#allocation29_spill] sm:$0xff] %v11865_v53 }
 0xb17   : > { %v11867_v10 = vpop.f32.mrb[116].mxu0 }
 0xb18   : > { %14496 = vst [vmem:[#allocation33_spill] sm:$0xff] %v11867_v10  ;;  %v11869_v32 = vpop.f32.mrb[117].mxu0  ;;  %v11925_v10 = vpop.permute.xlu1 %3873 }
 0xb19   : > { %14497 = vst [vmem:[#allocation35_spill] sm:$0xff] %v11869_v32  ;;  %v11871_v21 = vpop.f32.mrb[118].mxu0 }
 0xb1a   : > { %14498 = vst [vmem:[#allocation37_spill] sm:$0xff] %v11871_v21  ;;  %v11873_v1 = vpop.f32.mrb[119].mxu0 }
 0xb1b   : > { %14499 = vst [vmem:[#allocation40_spill] sm:$0xff] %v11873_v1 }
 0xb1f   : > { %v11875_v60 = vpop.f32.mrb[120].mxu0 }
 0xb20   : > { %14500 = vst [vmem:[#allocation20_spill] sm:$0xff] %v11875_v60  ;;  %v11877_v18 = vpop.f32.mrb[121].mxu0 }
 0xb21   : > { %14501 = vst [vmem:[#allocation24_spill] sm:$0xff] %v11877_v18  ;;  %v11879_v38 = vpop.f32.mrb[122].mxu0 }
 0xb22   : > { %14502 = vst [vmem:[#allocation28_spill] sm:$0xff] %v11879_v38  ;;  %v11881_v36 = vpop.f32.mrb[123].mxu0 }
 0xb23   : > { %14503 = vst [vmem:[#allocation30_spill] sm:$0xff] %v11881_v36 }
 0xb27   : > { %v11883_v22 = vpop.f32.mrb[124].mxu0 }
 0xb28   : > { %14504 = vst [vmem:[#allocation34_spill] sm:$0xff] %v11883_v22  ;;  %v11885_v30 = vpop.f32.mrb[125].mxu0 }
 0xb29   : > { %14505 = vst [vmem:[#allocation36_spill] sm:$0xff] %v11885_v30  ;;  %v11887_v46 = vpop.f32.mrb[126].mxu0 }
 0xb2a   : > { %14506 = vst [vmem:[#allocation38_spill] sm:$0xff] %v11887_v46  ;;  %v11889_v43 = vpop.f32.mrb[127].mxu0 }
 0xb2b   : > { %14507 = vst [vmem:[#allocation42_spill] sm:$0xff] %v11889_v43 }
 0xb2f   : > { %v8653_v55 = vpop.f32.mrb[128].mxu0 }
 0xb30   : > { %3578 = vmax.xlane.f32.xlu0 %v8653_v55  ;;  %v3511_v29 = vpop.f32.mrb[129].mxu0 }
 0xb31   : > { %v8654_v49 = vpop.f32.mrb[130].mxu0 }
 0xb32   : > { %3580 = vmax.xlane.f32.xlu1 %v8654_v49  ;;  %v3514_v15 = vpop.f32.mrb[131].mxu0 }
 0xb34   : > { %3574 = vmax.xlane.f32.xlu0 %v3511_v29 }
 0xb36   : > { %3576 = vmax.xlane.f32.xlu1 %v3514_v15 }
 0xb37   : > { %v8657_v42 = vpop.f32.mrb[132].mxu0 }
 0xb38   : > { %3586 = vmax.xlane.f32.xlu0 %v8657_v42  ;;  %v11891_v3 = vpop.f32.mrb[133].mxu0 }
 0xb39   : > { %v11893_v62 = vpop.f32.mrb[134].mxu0 }
 0xb3a   : > { %3588 = vmax.xlane.f32.xlu1 %v11893_v62  ;;  %v11896_v22 = vpop.f32.mrb[135].mxu0 }
 0xb3c   : > { %3582 = vmax.xlane.f32.xlu0 %v11891_v3 }
 0xb3e   : > { %3584 = vmax.xlane.f32.xlu1 %v11896_v22 }
 0xb3f   : > { %v11900_v46 = vpop.f32.mrb[136].mxu0 }
 0xb40   : > { %3594 = vmax.xlane.f32.xlu0 %v11900_v46  ;;  %v11903_v43 = vpop.f32.mrb[137].mxu0 }
 0xb41   : > { %v11905_v30 = vpop.f32.mrb[138].mxu0 }
 0xb42   : > { %3596 = vmax.xlane.f32.xlu1 %v11905_v30  ;;  %v11908_v38 = vpop.f32.mrb[139].mxu0 }
 0xb44   : > { %3590 = vmax.xlane.f32.xlu0 %v11903_v43 }
 0xb46   : > { %3592 = vmax.xlane.f32.xlu1 %v11908_v38 }
 0xb47   : > { %v8665_v60 = vpop.f32.mrb[140].mxu0 }
 0xb48   : > { %3602 = vmax.xlane.f32.xlu0 %v8665_v60  ;;  %v11912_v36 = vpop.f32.mrb[141].mxu0 }
 0xb49   : > { %v11914_v18 = vpop.f32.mrb[142].mxu0 }
 0xb4a   : > { %v11916_v21 = vpop.f32.mrb[143].mxu0 }
 0xb4c   : > { %3598 = vmax.xlane.f32.xlu0 %v11912_v36 }
 0xb57   : > { %3877 = vrot.lane.b32.xlu1 %v14479_v40, %s10115_s12 }
 0xb62   : > { %3875 = vrot.lane.b32.xlu0 %v14478_v7, %s10115_s12 }
 0xb7b   : > { %3604 = vmax.xlane.f32.xlu1 %v11914_v18 }
 0xb7f   : > { %3600 = vmax.xlane.f32.xlu1 %v11916_v21 }
 0xbbd   : > { %v3579_v1 = vpop.xlane.xlu0 %3578 }
 0xbbe   : > { %v3608_v32 = vsub.f32 %v8653_v55, %v3579_v1 }
 0xbbf   : > { %v3581_v37 = vpop.xlane.xlu1 %3580 }
 0xbc0   : > { %v3626_v58 = vmul.f32 1.442695, %v3608_v32  ;;  %v3609_v14 = vsub.f32 %v8654_v49, %v3581_v37 }
 0xbc1   : > { %v3575_v2 = vpop.xlane.xlu0 %3574 }
 0xbc2   : > { %9472 = vpow2.f32 %v3626_v58  ;;  %v3628_v12 = vmul.f32 1.442695, %v3609_v14  ;;  %v3606_v24 = vsub.f32 %v3511_v29, %v3575_v2 }
 0xbc3   : > { %v3577_v19 = vpop.xlane.xlu1 %3576 }
 0xbc4   : > { %9474 = vpow2.f32 %v3628_v12  ;;  %v3622_v11 = vmul.f32 1.442695, %v3606_v24  ;;  %v3607_v23 = vsub.f32 %v3514_v15, %v3577_v19 }
 0xbc5   : > { %v3587_v24 = vpop.xlane.xlu0 %3586 }
 0xbc6   : > { %9476 = vpow2.f32 %v3622_v11  ;;  %v3624_v63 = vmul.f32 1.442695, %v3607_v23 }
 0xbc7   : > { %v3589_v19 = vpop.xlane.xlu1 %3588 }
 0xbc8   : > { %9478 = vpow2.f32 %v3624_v63  ;;  %v3612_v63 = vsub.f32 %v8657_v42, %v3587_v24  ;;  %v3613_v49 = vsub.f32 %v11893_v62, %v3589_v19 }
 0xbc9   : > { %v3583_v11 = vpop.xlane.xlu0 %3582 }
 0xbca   : > { %v3610_v23 = vsub.f32 %v11891_v3, %v3583_v11  ;;  %v3634_v1 = vmul.f32 1.442695, %v3612_v63  ;;  %v3636_v13 = vmul.f32 1.442695, %v3613_v49 }
 0xbcb   : > { %v3585_v14 = vpop.xlane.xlu1 %3584 }
 0xbcc   : > { %v11927_v53 = vpop.eup %9472  ;;  %v3611_v55 = vsub.f32 %v11896_v22, %v3585_v14  ;;  %v3630_v15 = vmul.f32 1.442695, %v3610_v23  ;;  %9480 = vpow2.f32 %v3634_v1 }
 0xbcd   : > { %3658 = vadd.xlane.f32.xlu0 %v11927_v53  ;;  %v3595_v12 = vpop.xlane.xlu0 %3594 }
 0xbce   : > { %v11930_v50 = vpop.eup %9474  ;;  %v3632_v59 = vmul.f32 1.442695, %v3611_v55  ;;  %9482 = vpow2.f32 %v3630_v15  ;;  %v3616_v9 = vsub.f32 %v11900_v46, %v3595_v12 }
 0xbcf   : > { %3660 = vadd.xlane.f32.xlu1 %v11930_v50  ;;  %v3597_v29 = vpop.xlane.xlu1 %3596 }
 0xbd0   : > { %v11933_v37 = vpop.eup %9476  ;;  %9484 = vpow2.f32 %v3632_v59  ;;  %v3642_v24 = vmul.f32 1.442695, %v3616_v9  ;;  %v3617_v11 = vsub.f32 %v11905_v30, %v3597_v29 }
 0xbd1   : > { %3654 = vadd.xlane.f32.xlu0 %v11933_v37  ;;  %v3591_v2 = vpop.xlane.xlu0 %3590  ;;  %9486 = vpow2.f32 %v3636_v13 }
 0xbd2   : > { %v11936_v58 = vpop.eup %9478  ;;  %v3614_v22 = vsub.f32 %v11903_v43, %v3591_v2 }
 0xbd3   : > { %3656 = vadd.xlane.f32.xlu1 %v11936_v58  ;;  %v3593_v41 = vpop.xlane.xlu1 %3592 }
 0xbd4   : > { %v3638_v14 = vmul.f32 1.442695, %v3614_v22 }
 0xbd5   : > { %v3603_v32 = vpop.xlane.xlu0 %3602 }
 0xbd6   : > { %v3620_v28 = vsub.f32 %v8665_v60, %v3603_v32  ;;  %v11952_v60 = vpop.eup %9480 }
 0xbd7   : > { %v11950_v19 = vpop.permute.xlu1 %3877 }
 0xbd8   : > { %v3650_v42 = vmul.f32 1.442695, %v3620_v28  ;;  %v11955_v59 = vpop.eup %9482  ;;  %v3644_v28 = vmul.f32 1.442695, %v3617_v11 }
 0xbd9   : > { %v3599_v35 = vpop.xlane.xlu0 %3598 }
 0xbda   : > { %v3618_v3 = vsub.f32 %v11912_v36, %v3599_v35  ;;  %9488 = vpow2.f32 %v3650_v42  ;;  %v11958_v9 = vpop.eup %9484  ;;  %v3615_v35 = vsub.f32 %v11908_v38, %v3593_v41 }
 0xbdb   : > { %9490 = vpow2.f32 %v3642_v24  ;;  %v11963_v30 = vpop.eup %9486 }
 0xbdc   : > { %v3646_v62 = vmul.f32 1.442695, %v3618_v3  ;;  %v3640_v2 = vmul.f32 1.442695, %v3615_v35 }
 0xbdd   : > { %v3876_v29 = vpop.permute.xlu0 %3875 }
 0xbde   : > { %9492 = vpow2.f32 %v3646_v62 }
 0xbdf   : > { %9494 = vpow2.f32 %v3638_v14 }
 0xbe0   : > { %9496 = vpow2.f32 %v3644_v28 }
 0xbe4   : > { %3881 = vrot.lane.b32.xlu1 %v14481_v16, %s10115_s12  ;;  %v11966_v12 = vpop.eup %9488 }
 0xbe5   : > { %v11970_v41 = vpop.eup %9490 }
 0xbe7   : > { %3879 = vrot.lane.b32.xlu0 %v14480_v48, %s10115_s12 }
 0xc06   : > { %3666 = vadd.xlane.f32.xlu0 %v11952_v60 }
 0xc08   : > { %v3605_v13 = vpop.xlane.xlu1 %3604  ;;  %3662 = vadd.xlane.f32.xlu1 %v11955_v59 }
 0xc09   : > { %v3621_v36 = vsub.f32 %v11914_v18, %v3605_v13  ;;  %v11973_v18 = vpop.eup %9492 }
 0xc0a   : > { %3664 = vadd.xlane.f32.xlu0 %v11958_v9  ;;  %v11976_v23 = vpop.eup %9494 }
 0xc0b   : > { %v3652_v46 = vmul.f32 1.442695, %v3621_v36  ;;  %v11979_v32 = vpop.eup %9496 }
 0xc0c   : > { %v3601_v43 = vpop.xlane.xlu1 %3600  ;;  %3668 = vadd.xlane.f32.xlu1 %v11963_v30 }
 0xc0d   : > { %9498 = vpow2.f32 %v3652_v46  ;;  %v3619_v63 = vsub.f32 %v11916_v21, %v3601_v43  ;;  %v3912_v43 = vsel %vm1401_vm0, %v11833_v45, 0 }
 0xc0e   : > { %3682 = vadd.xlane.f32.xlu0 %v11966_v12  ;;  %9500 = vpow2.f32 %v3640_v2 }
 0xc0f   : > { %v3648_v38 = vmul.f32 1.442695, %v3619_v63 }
 0xc10   : > { %3674 = vadd.xlane.f32.xlu1 %v11970_v41 }
 0xc11   : > { %9502 = vpow2.f32 %v3648_v38 }
 0xc12   : > { %3678 = vadd.xlane.f32.xlu0 %v11973_v18 }
 0xc14   : > { %3670 = vadd.xlane.f32.xlu1 %v11976_v23 }
 0xc17   : > { %v11981_v21 = vpop.eup %9498 }
 0xc18   : > { %3676 = vadd.xlane.f32.xlu1 %v11979_v32  ;;  %3684 = vadd.xlane.f32.xlu0 %v11981_v21  ;;  %v11985_v1 = vpop.eup %9500 }
 0xc1b   : > { %v11988_v55 = vpop.eup %9502 }
 0xc1c   : > { %3672 = vadd.xlane.f32.xlu1 %v11985_v1 }
 0xc20   : > { %3680 = vadd.xlane.f32.xlu1 %v11988_v55 }
 0xc2e   : > { %3883 = vrot.lane.b32.xlu0 %v14482_v31, %s10115_s12 }
 0xc31   : > { %3885 = vrot.lane.b32.xlu1 %v14483_v5, %s10115_s12 }
 0xc32   : > { %3847 = vrot.lane.b32.xlu0 %v14484_v56, %s10115_s12 }
 0xc35   : > { %3849 = vrot.lane.b32.xlu1 %v14485_v4, %s10115_s12 }
 0xc36   : > { %3851 = vrot.lane.b32.xlu0 %v14486_v0, %s10115_s12 }
 0xc39   : > { %3853 = vrot.lane.b32.xlu1 %v14487_v6, %s10115_s12 }
 0xc3a   : > { %3855 = vrot.lane.b32.xlu0 %v14488_v33, %s10115_s12 }
 0xc3d   : > { %3857 = vrot.lane.b32.xlu1 %v14489_v57, %s10115_s12 }
 0xc3e   : > { %3859 = vrot.lane.b32.xlu0 %v14490_v26, %s10115_s12 }
 0xc41   : > { %3861 = vrot.lane.b32.xlu1 %v14491_v17, %s10115_s12 }
 0xc42   : > { %4192 = vrot.lane.b32.xlu0 %v14452_v61, %s10115_s12 }
 0xc45   : > { %4194 = vrot.lane.b32.xlu1 %v14453_v44, %s10115_s12 }
 0xc46   : > { %4196 = vrot.lane.b32.xlu0 %v14454_v47, %s10115_s12 }
 0xc49   : > { %4198 = vrot.lane.b32.xlu1 %v14455_v39, %s10115_s12 }
 0xc4a   : > { %4200 = vrot.lane.b32.xlu0 %v14456_v34, %s10115_s12 }
 0xc4d   : > { %4202 = vrot.lane.b32.xlu1 %v14457_v51, %s10115_s12 }
 0xc4e   : > { %4204 = vrot.lane.b32.xlu0 %v14458_v8, %s10115_s12 }
 0xc51   : > { %4206 = vrot.lane.b32.xlu1 %v14459_v25, %s10115_s12 }
 0xc52   : > { %4409 = vrot.lane.b32.xlu0 %v14477_v27, %s10116_s13 }
 0xc55   : > { %4411 = vrot.lane.b32.xlu1 %v14476_v20, %s10116_s13 }
 0xc5a   : > { %v3659_v49 = vpop.xlane.xlu0 %3658 }
 0xc5c   : > { %v3661_v15 = vpop.xlane.xlu1 %3660 }
 0xc5d   : > { %9504 = vrcp.f32 %v3661_v15 }
 0xc5e   : > { %v3655_v42 = vpop.xlane.xlu0 %3654 }
 0xc5f   : > { %9506 = vrcp.f32 %v3655_v42 }
 0xc60   : > { %9508 = vrcp.f32 %v3659_v49  ;;  %v3657_v3 = vpop.xlane.xlu1 %3656 }
 0xc61   : > { %9510 = vrcp.f32 %v3657_v3 }
 0xc62   : > { %v3880_v45 = vpop.permute.xlu0 %3879 }
 0xc63   : > { %v3924_v2 = vsel %vm1401_vm0, %v3880_v45, 0 }
 0xc67   : > { %v9505_v24 = vpop.eup %9504 }
 0xc68   : > { %v3705_v14 = vmul.f32 %v9505_v24, %v11930_v50  ;;  %v3915_v50 = vsel %vm1401_vm0, %v11925_v10, 0 }
 0xc69   : > { %v9507_v22 = vpop.eup %9506 }
 0xc6a   : > { %v9509_v62 = vpop.eup %9508  ;;  %v3702_v28 = vmul.f32 %v9507_v22, %v11933_v37  ;;  %v3918_v37 = vsel %vm1401_vm0, %v3876_v29, 0 }
 0xc6b   : > { %v9511_v11 = vpop.eup %9510  ;;  %v3704_v35 = vmul.f32 %v9509_v62, %v11927_v53  ;;  %v3921_v53 = vsel %vm1401_vm0, %v11950_v19, 0 }
 0xc6c   : > { %v3703_v13 = vmul.f32 %v9511_v11, %v11936_v58  ;;  %v3882_v58 = vpop.permute.xlu1 %3881 }
 0xc6d   : > { %v3719_v46 = vpack.c.bf16 %v3705_v14, %v3704_v35  ;;  %v3927_v49 = vsel %vm1401_vm0, %v3882_v58, 0 }
 0xc6e   : > { %v3718_v36 = vpack.c.bf16 %v3703_v13, %v3702_v28 }
 0xc70   : > { %8683 = vmatprep.mubr.bf16.mxu1 %v3718_v36 }
 0xc71   : > { %8684 = vmatmul.mubr.bf16.vlgmr.msra.gmra.mrb[96].mxu1 %v3719_v46 }
 0xc72   : > { %8700 = vmatpush3.bf16.xpose.msra.mxu1 %v3912_v43 }
 0xc73   : > { %8980 = vmatprep.subr.msk.bf16.mxu1 %vm1401_vm0, %v11925_v10 }
 0xc7a   : > { %8702 = vmatpush3.bf16.xpose.msra.mxu1 %v3915_v50 }
 0xc7b   : > { %8981 = vmatprep.subr.msk.bf16.mxu1 %vm1401_vm0, %v3876_v29 }
 0xc82   : > { %8704 = vmatpush3.bf16.xpose.msra.mxu1 %v3918_v37 }
 0xc83   : > { %8982 = vmatprep.subr.msk.bf16.mxu1 %vm1401_vm0, %v11950_v19 }
 0xc8a   : > { %8706 = vmatpush3.bf16.xpose.msra.mxu1 %v3921_v53 }
 0xc8b   : > { %8983 = vmatprep.subr.msk.bf16.mxu1 %vm1401_vm0, %v3880_v45 }
 0xc92   : > { %8708 = vmatpush3.bf16.xpose.msra.mxu1 %v3924_v2 }
 0xc93   : > { %8984 = vmatprep.subr.msk.bf16.mxu1 %vm1401_vm0, %v3882_v58  ;;  %v3667_v10 = vpop.xlane.xlu0 %3666 }
 0xc95   : > { %v3663_v63 = vpop.xlane.xlu1 %3662 }
 0xc96   : > { %9512 = vrcp.f32 %v3663_v63 }
 0xc97   : > { %9514 = vrcp.f32 %v3667_v10  ;;  %v3665_v38 = vpop.xlane.xlu0 %3664 }
 0xc98   : > { %9516 = vrcp.f32 %v3665_v38 }
 0xc99   : > { %v3669_v29 = vpop.xlane.xlu1 %3668 }
 0xc9a   : > { %9518 = vrcp.f32 %v3669_v29  ;;  %8710 = vmatpush3.bf16.xpose.msra.mxu1 %v3927_v49 }
 0xc9b   : > { %v3683_v19 = vpop.xlane.xlu0 %3682 }
 0xc9d   : > { %v3675_v15 = vpop.xlane.xlu1 %3674 }
 0xc9f   : > { %v3679_v24 = vpop.xlane.xlu0 %3678 }
 0xca0   : > { %v9513_v42 = vpop.eup %9512 }
 0xca1   : > { %v9515_v3 = vpop.eup %9514  ;;  %v3671_v22 = vpop.xlane.xlu1 %3670  ;;  %v3706_v11 = vmul.f32 %v9513_v42, %v11955_v59 }
 0xca2   : > { %v9517_v62 = vpop.eup %9516  ;;  %v3708_v46 = vmul.f32 %v9515_v3, %v11952_v60 }
 0xca3   : > { %v3707_v14 = vmul.f32 %v9517_v62, %v11958_v9 }
 0xca4   : > { %v9519_v28 = vpop.eup %9518 }
 0xca5   : > { %v3677_v13 = vpop.xlane.xlu1 %3676  ;;  %v3685_v35 = vpop.xlane.xlu0 %3684  ;;  %v3720_v36 = vpack.c.bf16 %v3707_v14, %v3706_v11  ;;  %v3709_v43 = vmul.f32 %v9519_v28, %v11963_v30 }
 0xca6   : > { %9520 = vrcp.f32 %v3677_v13 }
 0xca7   : > { %8687 = vmatprep.mubr.bf16.mxu1 %v3720_v36  ;;  %v3721_v50 = vpack.c.bf16 %v3709_v43, %v3708_v46  ;;  %9522 = vrcp.f32 %v3671_v22 }
 0xca8   : > { %9524 = vrcp.f32 %v3675_v15 }
 0xca9   : > { %v3673_v37 = vpop.xlane.xlu1 %3672  ;;  %8688 = vmatmul.mubr.bf16.gmra.mrb[100].mxu1 %v3721_v50  ;;  %v3884_v53 = vpop.permute.xlu0 %3883 }
 0xcaa   : > { %9526 = vrcp.f32 %v3673_v37  ;;  %8985 = vmatprep.subr.msk.bf16.mxu1 %vm1401_vm0, %v3884_v53  ;;  %v3930_v59 = vsel %vm1401_vm0, %v3884_v53, 0 }
 0xcab   : > { %8712 = vmatpush3.bf16.xpose.msra.mxu1 %v3930_v59  ;;  %9528 = vrcp.f32 %v3679_v24 }
 0xcad   : > { %v3681_v9 = vpop.xlane.xlu1 %3680  ;;  %v3848_v45 = vpop.permute.xlu0 %3847 }
 0xcae   : > { %9530 = vrcp.f32 %v3681_v9 }
 0xcaf   : > { %9532 = vrcp.f32 %v3685_v35 }
 0xcb0   : > { %v9521_v60 = vpop.eup %9520  ;;  %9534 = vrcp.f32 %v3683_v19 }
 0xcb1   : > { %v3886_v30 = vpop.permute.xlu1 %3885  ;;  %v3852_v58 = vpop.permute.xlu0 %3851  ;;  %v3713_v29 = vmul.f32 %v9521_v60, %v11979_v32 }
 0xcb2   : > { %v9523_v2 = vpop.eup %9522  ;;  %8986 = vmatprep.subr.msk.bf16.mxu1 %vm1401_vm0, %v3886_v30  ;;  %v3933_v10 = vsel %vm1401_vm0, %v3886_v30, 0 }
 0xcb3   : > { %v9525_v63 = vpop.eup %9524  ;;  %8714 = vmatpush3.bf16.xpose.msra.mxu1 %v3933_v10  ;;  %v3710_v42 = vmul.f32 %v9523_v2, %v11976_v23 }
 0xcb4   : > { %v9527_v38 = vpop.eup %9526  ;;  %v3712_v19 = vmul.f32 %v9525_v63, %v11970_v41 }
 0xcb5   : > { %v3850_v49 = vpop.permute.xlu1 %3849  ;;  %v3856_v15 = vpop.permute.xlu0 %3855  ;;  %v3711_v3 = vmul.f32 %v9527_v38, %v11985_v1 }
 0xcb6   : > { %v9529_v24 = vpop.eup %9528  ;;  %v3723_v11 = vpack.c.bf16 %v3713_v29, %v3712_v19 }
 0xcb7   : > { %v3722_v22 = vpack.c.bf16 %v3711_v3, %v3710_v42  ;;  %v3714_v35 = vmul.f32 %v9529_v24, %v11973_v18 }
 0xcb8   : > { %v9531_v62 = vpop.eup %9530 }
 0xcb9   : > { %v9533_v14 = vpop.eup %9532  ;;  %v3854_v28 = vpop.permute.xlu1 %3853  ;;  %8691 = vmatprep.mubr.bf16.mxu1 %v3722_v22  ;;  %v3715_v32 = vmul.f32 %v9531_v62, %v11988_v55 }
 0xcba   : > { %v3860_v13 = vpop.permute.xlu0 %3859  ;;  %8692 = vmatmul.mubr.bf16.gmra.mrb[104].mxu1 %v3723_v11  ;;  %v9535_v36 = vpop.eup %9534  ;;  %v3717_v23 = vmul.f32 %v9533_v14, %v11981_v21 }
 0xcbb   : > { %v3724_v46 = vpack.c.bf16 %v3715_v32, %v3714_v35  ;;  %v3716_v41 = vmul.f32 %v9535_v36, %v11966_v12 }
 0xcbd   : > { %v3858_v1 = vpop.permute.xlu1 %3857  ;;  %8695 = vmatprep.mubr.bf16.mxu1 %v3724_v46  ;;  %v3725_v50 = vpack.c.bf16 %v3717_v23, %v3716_v41 }
 0xcbe   : > { %v4193_v43 = vpop.permute.xlu0 %4192 }
 0xcbf   : > { %8731 = vmatprep.subr.bf16.mxu0 %v4193_v43 }
 0xcc0   : > { %8732 = vmatpush3.bf16.msra.mxu0 %v4193_v43 }
 0xcc1   : > { %v3862_v37 = vpop.permute.xlu1 %3861 }
 0xcc2   : > { %8696 = vmatmul.mubr.bf16.gmra.mrb[108].mxu1 %v3725_v50  ;;  %v4197_v55 = vpop.permute.xlu0 %4196 }
 0xcc3   : > { %8715 = vmatprep.mubr.msk.bf16.mxu1 %vm1401_vm0, %v3848_v45 }
 0xcc5   : > { %v4195_v18 = vpop.permute.xlu1 %4194 }
 0xcc6   : > { %8733 = vmatprep.subr.bf16.mxu0 %v4195_v18  ;;  %v4201_v53 = vpop.permute.xlu0 %4200 }
 0xcc7   : > { %8734 = vmatpush3.bf16.msra.mxu0 %v4195_v18 }
 0xcc8   : > { %8735 = vmatprep.subr.bf16.mxu0 %v4197_v55 }
 0xcc9   : > { %v4199_v21 = vpop.permute.xlu1 %4198 }
 0xcca   : > { %8716 = vmatmul.mubr.msk.bf16.vlgmr.msra.gmra.mrb[112].mxu1 %vm1401_vm0, %v3850_v49  ;;  %v4205_v59 = vpop.permute.xlu0 %4204 }
 0xccb   : > { %8719 = vmatprep.mubr.msk.bf16.mxu1 %vm1401_vm0, %v3852_v58  ;;  %8736 = vmatpush3.bf16.msra.mxu0 %v4197_v55 }
 0xccc   : > { %8737 = vmatprep.subr.bf16.mxu0 %v4199_v21 }
 0xccd   : > { %v4203_v12 = vpop.permute.xlu1 %4202 }
 0xcce   : > { %v12074_v45 = vpop.permute.xlu0 %4409 }
 0xccf   : > { %8738 = vmatpush3.bf16.msra.mxu0 %v4199_v21 }
 0xcd0   : > { %8739 = vmatprep.subr.bf16.mxu0 %v4201_v53 }
 0xcd1   : > { %v4207_v9 = vpop.permute.xlu1 %4206 }
 0xcd2   : > { %8720 = vmatmul.mubr.msk.bf16.gmra.mrb[116].mxu1 %vm1401_vm0, %v3854_v28 }
 0xcd3   : > { %8723 = vmatprep.mubr.msk.bf16.mxu1 %vm1401_vm0, %v3856_v15  ;;  %8740 = vmatpush3.bf16.msra.mxu0 %v4201_v53 }
 0xcd4   : > { %8741 = vmatprep.subr.bf16.mxu0 %v4203_v12 }
 0xcd5   : > { %v12132_v21 = vpop.permute.xlu1 %4411 }
 0xcd7   : > { %8742 = vmatpush3.bf16.msra.mxu0 %v4203_v12 }
 0xcd8   : > { %8743 = vmatprep.subr.bf16.mxu0 %v4205_v59 }
 0xcda   : > { %8724 = vmatmul.mubr.msk.bf16.gmra.mrb[120].mxu1 %vm1401_vm0, %v3858_v1 }
 0xcdb   : > { %8727 = vmatprep.mubr.msk.bf16.mxu1 %vm1401_vm0, %v3860_v13  ;;  %8744 = vmatpush3.bf16.msra.mxu0 %v4205_v59 }
 0xcdc   : > { %8745 = vmatprep.subr.bf16.mxu0 %v4207_v9 }
 0xcdf   : > { %8746 = vmatpush3.bf16.msra.mxu0 %v4207_v9 }
 0xce0   : > { %8987 = vmatprep.subr.msk.bf16.mxu0 %vm1401_vm0, %v12074_v45 }
 0xce2   : > { %8728 = vmatmul.mubr.msk.bf16.gmra.mrb[124].mxu1 %vm1401_vm0, %v3862_v37 }
 0xd44   : > { %v8685_v60 = vpop.f32.mrb[96].mxu1 }
 0xd45   : > { %3825 = vst.msk [vmem:[#allocation2 + $0x90] sm:$0xff] %vm1401_vm0, %v8685_v60  ;;  %v3760_v30 = vpop.f32.mrb[97].mxu1 }
 0xd46   : > { %3823 = vst.msk [vmem:[#allocation2 + $0x80] sm:$0xff] %vm1401_vm0, %v3760_v30  ;;  %v8686_v58 = vpop.f32.mrb[98].mxu1 }
 0xd47   : > { %3826 = vst.msk [vmem:[#allocation2 + $0x98] sm:$0xff] %vm1401_vm0, %v8686_v58  ;;  %v3763_v2 = vpop.f32.mrb[99].mxu1 }
 0xd48   : > { %3824 = vst.msk [vmem:[#allocation2 + $0x88] sm:$0xff] %vm1401_vm0, %v3763_v2 }
 0xd7c   : > { %v8689_v10 = vpop.f32.mrb[100].mxu1 }
 0xd7d   : > { %3829 = vst.msk [vmem:[#allocation2 + $0xb0] sm:$0xff] %vm1401_vm0, %v8689_v10  ;;  %v3776_v63 = vpop.f32.mrb[101].mxu1 }
 0xd7e   : > { %3827 = vst.msk [vmem:[#allocation2 + $0xa0] sm:$0xff] %vm1401_vm0, %v3776_v63  ;;  %v8690_v38 = vpop.f32.mrb[102].mxu1 }
 0xd7f   : > { %3830 = vst.msk [vmem:[#allocation2 + $0xb8] sm:$0xff] %vm1401_vm0, %v8690_v38  ;;  %v3779_v29 = vpop.f32.mrb[103].mxu1 }
 0xd80   : > { %3828 = vst.msk [vmem:[#allocation2 + $0xa8] sm:$0xff] %vm1401_vm0, %v3779_v29 }
 0xd8d   : > { %v8693_v49 = vpop.f32.mrb[104].mxu1 }
 0xd8e   : > { %3833 = vst.msk [vmem:[#allocation2 + $0xd0] sm:$0xff] %vm1401_vm0, %v8693_v49  ;;  %v3792_v15 = vpop.f32.mrb[105].mxu1 }
 0xd8f   : > { %3831 = vst.msk [vmem:[#allocation2 + $0xc0] sm:$0xff] %vm1401_vm0, %v3792_v15  ;;  %v8694_v42 = vpop.f32.mrb[106].mxu1 }
 0xd90   : > { %3834 = vst.msk [vmem:[#allocation2 + $0xd8] sm:$0xff] %vm1401_vm0, %v8694_v42  ;;  %v3795_v3 = vpop.f32.mrb[107].mxu1 }
 0xd91   : > { %3832 = vst.msk [vmem:[#allocation2 + $0xc8] sm:$0xff] %vm1401_vm0, %v3795_v3 }
 0xd95   : > { %v8697_v24 = vpop.f32.mrb[108].mxu1 }
 0xd96   : > { %3837 = vst.msk [vmem:[#allocation2 + $0xf0] sm:$0xff] %vm1401_vm0, %v8697_v24  ;;  %v3808_v19 = vpop.f32.mrb[109].mxu1 }
 0xd97   : > { %3835 = vst.msk [vmem:[#allocation2 + $0xe0] sm:$0xff] %vm1401_vm0, %v3808_v19  ;;  %v8698_v22 = vpop.f32.mrb[110].mxu1 }
 0xd98   : > { %3838 = vst.msk [vmem:[#allocation2 + $0xf8] sm:$0xff] %vm1401_vm0, %v8698_v22  ;;  %v3811_v62 = vpop.f32.mrb[111].mxu1 }
 0xd99   : > { %3836 = vst.msk [vmem:[#allocation2 + $0xe8] sm:$0xff] %vm1401_vm0, %v3811_v62 }
 0xd9d   : > { %v8717_v11 = vpop.f32.mrb[112].mxu1 }
 0xd9e   : > { %4036 = vmax.xlane.f32.xlu0 %v8717_v11  ;;  %v3969_v14 = vpop.f32.mrb[113].mxu1 }
 0xd9f   : > { %v8718_v28 = vpop.f32.mrb[114].mxu1 }
 0xda0   : > { %v3972_v13 = vpop.f32.mrb[115].mxu1 }
 0xda1   : > { %4034 = vmax.xlane.f32.xlu1 %v3972_v13 }
 0xda2   : > { %4032 = vmax.xlane.f32.xlu0 %v3969_v14 }
 0xda5   : > { %v8721_v35 = vpop.f32.mrb[116].mxu1 }
 0xda6   : > { %4038 = vmax.xlane.f32.xlu0 %v8718_v28  ;;  %v12095_v32 = vpop.f32.mrb[117].mxu1 }
 0xda7   : > { %v12097_v36 = vpop.f32.mrb[118].mxu1 }
 0xda8   : > { %4046 = vmax.xlane.f32.xlu1 %v12097_v36  ;;  %v12100_v46 = vpop.f32.mrb[119].mxu1 }
 0xdaa   : > { %4044 = vmax.xlane.f32.xlu0 %v8721_v35 }
 0xdac   : > { %4042 = vmax.xlane.f32.xlu1 %v12100_v46 }
 0xdad   : > { %v12103_v23 = vpop.f32.mrb[120].mxu1 }
 0xdae   : > { %4040 = vmax.xlane.f32.xlu0 %v12095_v32  ;;  %v12106_v1 = vpop.f32.mrb[121].mxu1 }
 0xdaf   : > { %v12108_v43 = vpop.f32.mrb[122].mxu1 }
 0xdb0   : > { %4054 = vmax.xlane.f32.xlu1 %v12108_v43  ;;  %v12111_v41 = vpop.f32.mrb[123].mxu1 }
 0xdb2   : > { %4052 = vmax.xlane.f32.xlu0 %v12103_v23 }
 0xdb4   : > { %4050 = vmax.xlane.f32.xlu1 %v12111_v41 }
 0xdb5   : > { %v12115_v50 = vpop.f32.mrb[124].mxu1 }
 0xdb6   : > { %4048 = vmax.xlane.f32.xlu0 %v12106_v1  ;;  %v12118_v37 = vpop.f32.mrb[125].mxu1 }
 0xdb7   : > { %v12120_v18 = vpop.f32.mrb[126].mxu1 }
 0xdb8   : > { %v12122_v55 = vpop.f32.mrb[127].mxu1 }
 0xdba   : > { %4060 = vmax.xlane.f32.xlu0 %v12115_v50 }
 0xdbe   : > { %4056 = vmax.xlane.f32.xlu0 %v12118_v37 }
 0xdc5   : > { %4415 = vrot.lane.b32.xlu1 %v14479_v40, %s10116_s13 }
 0xdd4   : > { %4413 = vrot.lane.b32.xlu0 %v14478_v7, %s10116_s13 }
 0xde9   : > { %4062 = vmax.xlane.f32.xlu1 %v12120_v18 }
 0xded   : > { %4058 = vmax.xlane.f32.xlu1 %v12122_v55 }
 0xe2b   : > { %v4037_v53 = vpop.xlane.xlu0 %4036 }
 0xe2c   : > { %v4066_v12 = vsub.f32 %v8717_v11, %v4037_v53 }
 0xe2e   : > { %v4084_v59 = vmul.f32 1.442695, %v4066_v12  ;;  %v4035_v9 = vpop.xlane.xlu1 %4034 }
 0xe2f   : > { %v4065_v60 = vsub.f32 %v3972_v13, %v4035_v9  ;;  %v4033_v30 = vpop.xlane.xlu0 %4032 }
 0xe30   : > { %9536 = vpow2.f32 %v4084_v59  ;;  %v4064_v58 = vsub.f32 %v3969_v14, %v4033_v30 }
 0xe31   : > { %v4082_v2 = vmul.f32 1.442695, %v4065_v60 }
 0xe32   : > { %v4080_v10 = vmul.f32 1.442695, %v4064_v58 }
 0xe33   : > { %9538 = vpow2.f32 %v4082_v2  ;;  %v4039_v63 = vpop.xlane.xlu0 %4038 }
 0xe34   : > { %9540 = vpow2.f32 %v4080_v10  ;;  %v4067_v38 = vsub.f32 %v8718_v28, %v4039_v63 }
 0xe35   : > { %v4047_v22 = vpop.xlane.xlu1 %4046 }
 0xe36   : > { %v4086_v29 = vmul.f32 1.442695, %v4067_v38  ;;  %v4071_v60 = vsub.f32 %v12097_v36, %v4047_v22 }
 0xe37   : > { %v4045_v24 = vpop.xlane.xlu0 %4044 }
 0xe38   : > { %9542 = vpow2.f32 %v4086_v29  ;;  %v4070_v11 = vsub.f32 %v8721_v35, %v4045_v24  ;;  %v4094_v10 = vmul.f32 1.442695, %v4071_v60 }
 0xe39   : > { %v4043_v14 = vpop.xlane.xlu1 %4042 }
 0xe3a   : > { %v12134_v49 = vpop.eup %9536  ;;  %v4092_v13 = vmul.f32 1.442695, %v4070_v11  ;;  %v4069_v12 = vsub.f32 %v12100_v46, %v4043_v14 }
 0xe3b   : > { %4116 = vadd.xlane.f32.xlu1 %v12134_v49  ;;  %v4041_v19 = vpop.xlane.xlu0 %4040 }
 0xe3c   : > { %v4068_v53 = vsub.f32 %v12095_v32, %v4041_v19  ;;  %9544 = vpow2.f32 %v4092_v13  ;;  %v4090_v58 = vmul.f32 1.442695, %v4069_v12 }
 0xe3d   : > { %v12137_v15 = vpop.eup %9538  ;;  %v4055_v59 = vpop.xlane.xlu1 %4054 }
 0xe3e   : > { %v12139_v42 = vpop.eup %9540  ;;  %4114 = vadd.xlane.f32.xlu0 %v12137_v15  ;;  %v4088_v30 = vmul.f32 1.442695, %v4068_v53  ;;  %v4075_v36 = vsub.f32 %v12108_v43, %v4055_v59 }
 0xe3f   : > { %4112 = vadd.xlane.f32.xlu1 %v12139_v42  ;;  %v4053_v62 = vpop.xlane.xlu0 %4052 }
 0xe40   : > { %v4074_v2 = vsub.f32 %v12103_v23, %v4053_v62  ;;  %9546 = vpow2.f32 %v4088_v30  ;;  %v4102_v62 = vmul.f32 1.442695, %v4075_v36 }
 0xe41   : > { %v4051_v63 = vpop.xlane.xlu1 %4050  ;;  %9548 = vpow2.f32 %v4090_v58 }
 0xe42   : > { %v12143_v3 = vpop.eup %9542  ;;  %v4100_v38 = vmul.f32 1.442695, %v4074_v2  ;;  %9550 = vpow2.f32 %v4094_v10 }
 0xe43   : > { %4118 = vadd.xlane.f32.xlu1 %v12143_v3  ;;  %v4049_v28 = vpop.xlane.xlu0 %4048 }
 0xe44   : > { %v4072_v32 = vsub.f32 %v12106_v1, %v4049_v28  ;;  %9552 = vpow2.f32 %v4100_v38  ;;  %v4073_v1 = vsub.f32 %v12111_v41, %v4051_v63 }
 0xe45   : > { %v12160_v23 = vpop.permute.xlu1 %4415 }
 0xe46   : > { %v4096_v19 = vmul.f32 1.442695, %v4072_v32  ;;  %v12158_v22 = vpop.eup %9544  ;;  %v4098_v28 = vmul.f32 1.442695, %v4073_v1 }
 0xe47   : > { %v4061_v9 = vpop.xlane.xlu0 %4060 }
 0xe48   : > { %v4078_v35 = vsub.f32 %v12115_v50, %v4061_v9 }
 0xe4a   : > { %v4108_v46 = vmul.f32 1.442695, %v4078_v35  ;;  %v12164_v11 = vpop.eup %9546 }
 0xe4b   : > { %v4057_v29 = vpop.xlane.xlu0 %4056 }
 0xe4c   : > { %v4076_v24 = vsub.f32 %v12118_v37, %v4057_v29  ;;  %9554 = vpow2.f32 %v4108_v46  ;;  %v12166_v37 = vpop.eup %9548 }
 0xe4d   : > { %9556 = vpow2.f32 %v4096_v19  ;;  %v12171_v53 = vpop.eup %9550 }
 0xe4e   : > { %v4104_v50 = vmul.f32 1.442695, %v4076_v24  ;;  %v12173_v41 = vpop.eup %9552 }
 0xe4f   : > { %v4414_v63 = vpop.permute.xlu0 %4413 }
 0xe50   : > { %9558 = vpow2.f32 %v4104_v50 }
 0xe51   : > { %9560 = vpow2.f32 %v4102_v62 }
 0xe54   : > { %4417 = vrot.lane.b32.xlu0 %v14480_v48, %s10116_s13  ;;  %4419 = vrot.lane.b32.xlu1 %v14481_v16, %s10116_s13 }
 0xe56   : > { %v12178_v9 = vpop.eup %9554 }
 0xe57   : > { %v12180_v60 = vpop.eup %9556 }
 0xe5a   : > { %v12184_v30 = vpop.eup %9558 }
 0xe5b   : > { %v12186_v58 = vpop.eup %9560 }
 0xe73   : > { %4124 = vadd.xlane.f32.xlu0 %v12158_v22 }
 0xe76   : > { %v4063_v14 = vpop.xlane.xlu1 %4062 }
 0xe77   : > { %v4079_v43 = vsub.f32 %v12120_v18, %v4063_v14  ;;  %4120 = vadd.xlane.f32.xlu0 %v12164_v11 }
 0xe78   : > { %4122 = vadd.xlane.f32.xlu1 %v12166_v37 }
 0xe79   : > { %v4110_v13 = vmul.f32 1.442695, %v4079_v43  ;;  %v4450_v43 = vsel %vm1401_vm0, %v12074_v45, 0 }
 0xe7a   : > { %v4059_v12 = vpop.xlane.xlu1 %4058 }
 0xe7b   : > { %9562 = vpow2.f32 %v4110_v13  ;;  %v4077_v59 = vsub.f32 %v12122_v55, %v4059_v12  ;;  %4126 = vadd.xlane.f32.xlu0 %v12171_v53 }
 0xe7c   : > { %4132 = vadd.xlane.f32.xlu1 %v12173_v41  ;;  %9564 = vpow2.f32 %v4098_v28 }
 0xe7d   : > { %v4106_v18 = vmul.f32 1.442695, %v4077_v59 }
 0xe7f   : > { %4140 = vadd.xlane.f32.xlu0 %v12178_v9  ;;  %9566 = vpow2.f32 %v4106_v18 }
 0xe80   : > { %4128 = vadd.xlane.f32.xlu1 %v12180_v60 }
 0xe83   : > { %4136 = vadd.xlane.f32.xlu0 %v12184_v30 }
 0xe84   : > { %4134 = vadd.xlane.f32.xlu1 %v12186_v58 }
 0xe85   : > { %v12190_v55 = vpop.eup %9562 }
 0xe86   : > { %v12192_v2 = vpop.eup %9564 }
 0xe87   : > { %4142 = vadd.xlane.f32.xlu0 %v12190_v55 }
 0xe88   : > { %4130 = vadd.xlane.f32.xlu1 %v12192_v2 }
 0xe89   : > { %v12196_v10 = vpop.eup %9566 }
 0xe8c   : > { %4138 = vadd.xlane.f32.xlu1 %v12196_v10 }
 0xe9d   : > { %4423 = vrot.lane.b32.xlu1 %v14483_v5, %s10116_s13  ;;  %4421 = vrot.lane.b32.xlu0 %v14482_v31, %s10116_s13 }
 0xea1   : > { %4395 = vrot.lane.b32.xlu1 %v14485_v4, %s10116_s13  ;;  %4393 = vrot.lane.b32.xlu0 %v14484_v56, %s10116_s13 }
 0xea5   : > { %4399 = vrot.lane.b32.xlu1 %v14487_v6, %s10116_s13  ;;  %4397 = vrot.lane.b32.xlu0 %v14486_v0, %s10116_s13 }
 0xea9   : > { %4403 = vrot.lane.b32.xlu1 %v14489_v57, %s10116_s13  ;;  %4401 = vrot.lane.b32.xlu0 %v14488_v33, %s10116_s13 }
 0xead   : > { %4407 = vrot.lane.b32.xlu1 %v14491_v17, %s10116_s13  ;;  %4405 = vrot.lane.b32.xlu0 %v14490_v26, %s10116_s13 }
 0xeb1   : > { %4724 = vrot.lane.b32.xlu1 %v14453_v44, %s10116_s13  ;;  %4722 = vrot.lane.b32.xlu0 %v14452_v61, %s10116_s13 }
 0xeb5   : > { %4728 = vrot.lane.b32.xlu1 %v14455_v39, %s10116_s13  ;;  %4726 = vrot.lane.b32.xlu0 %v14454_v47, %s10116_s13 }
 0xeb9   : > { %4732 = vrot.lane.b32.xlu1 %v14457_v51, %s10116_s13  ;;  %4730 = vrot.lane.b32.xlu0 %v14456_v34, %s10116_s13 }
 0xebd   : > { %4736 = vrot.lane.b32.xlu1 %v14459_v25, %s10116_s13  ;;  %4734 = vrot.lane.b32.xlu0 %v14458_v8, %s10116_s13 }
 0xec1   : > { %4941 = vrot.lane.b32.xlu1 %v14476_v20, %s10117_s22  ;;  %4939 = vrot.lane.b32.xlu0 %v14477_v27, %s10117_s22 }
 0xec8   : > { %v4117_v35 = vpop.xlane.xlu1 %4116 }
 0xecb   : > { %v4115_v38 = vpop.xlane.xlu0 %4114 }
 0xecc   : > { %9568 = vrcp.f32 %v4115_v38  ;;  %v4113_v32 = vpop.xlane.xlu1 %4112 }
 0xecd   : > { %9570 = vrcp.f32 %v4113_v32 }
 0xece   : > { %9572 = vrcp.f32 %v4117_v35 }
 0xecf   : > { %v4418_v45 = vpop.permute.xlu0 %4417 }
 0xed0   : > { %v4119_v29 = vpop.xlane.xlu1 %4118 }
 0xed1   : > { %9574 = vrcp.f32 %v4119_v29 }
 0xed6   : > { %v9569_v46 = vpop.eup %9568 }
 0xed7   : > { %v9571_v24 = vpop.eup %9570  ;;  %v4161_v36 = vmul.f32 %v9569_v46, %v12137_v15  ;;  %v4453_v15 = vsel %vm1401_vm0, %v12132_v21, 0 }
 0xed8   : > { %v4160_v19 = vmul.f32 %v9571_v24, %v12139_v42  ;;  %v9573_v50 = vpop.eup %9572  ;;  %v4459_v42 = vsel %vm1401_vm0, %v12160_v23, 0 }
 0xed9   : > { %v4162_v27 = vmul.f32 %v9573_v50, %v12134_v49  ;;  %v4456_v49 = vsel %vm1401_vm0, %v4414_v63, 0 }
 0xeda   : > { %v4176_v20 = vpack.c.bf16 %v4161_v36, %v4160_v19 }
 0xedb   : > { %v9575_v62 = vpop.eup %9574 }
 0xedc   : > { %v4163_v1 = vmul.f32 %v9575_v62, %v12143_v3  ;;  %8747 = vmatprep.mubr.bf16.mxu0 %v4176_v20  ;;  %v4462_v3 = vsel %vm1401_vm0, %v4418_v45, 0 }
 0xede   : > { %v4177_v14 = vpack.c.bf16 %v4163_v1, %v4162_v27 }
 0xee0   : > { %8748 = vmatmul.mubr.bf16.vlgmr.msra.gmra.mrb[144].mxu0 %v4177_v14 }
 0xee1   : > { %8764 = vmatpush3.bf16.xpose.msra.mxu0 %v4450_v43 }
 0xee2   : > { %8988 = vmatprep.subr.msk.bf16.mxu0 %vm1401_vm0, %v12132_v21  ;;  %v4420_v21 = vpop.permute.xlu1 %4419 }
 0xee3   : > { %v4465_v59 = vsel %vm1401_vm0, %v4420_v21, 0 }
 0xee9   : > { %8766 = vmatpush3.bf16.xpose.msra.mxu0 %v4453_v15 }
 0xeea   : > { %8989 = vmatprep.subr.msk.bf16.mxu0 %vm1401_vm0, %v4414_v63 }
 0xef1   : > { %8768 = vmatpush3.bf16.xpose.msra.mxu0 %v4456_v49 }
 0xef2   : > { %8990 = vmatprep.subr.msk.bf16.mxu0 %vm1401_vm0, %v12160_v23 }
 0xef9   : > { %8770 = vmatpush3.bf16.xpose.msra.mxu0 %v4459_v42 }
 0xefa   : > { %8991 = vmatprep.subr.msk.bf16.mxu0 %vm1401_vm0, %v4418_v45 }
 0xf00   : > { %v4125_v28 = vpop.xlane.xlu0 %4124 }
 0xf01   : > { %8772 = vmatpush3.bf16.xpose.msra.mxu0 %v4462_v3 }
 0xf02   : > { %8992 = vmatprep.subr.msk.bf16.mxu0 %vm1401_vm0, %v4420_v21 }
 0xf04   : > { %v4121_v13 = vpop.xlane.xlu0 %4120 }
 0xf05   : > { %9576 = vrcp.f32 %v4121_v13  ;;  %v4123_v12 = vpop.xlane.xlu1 %4122 }
 0xf06   : > { %9578 = vrcp.f32 %v4123_v12 }
 0xf07   : > { %9580 = vrcp.f32 %v4125_v28 }
 0xf08   : > { %v4127_v18 = vpop.xlane.xlu0 %4126 }
 0xf09   : > { %8774 = vmatpush3.bf16.xpose.msra.mxu0 %v4465_v59  ;;  %9582 = vrcp.f32 %v4127_v18  ;;  %v4133_v23 = vpop.xlane.xlu1 %4132 }
 0xf0c   : > { %v4141_v63 = vpop.xlane.xlu0 %4140 }
 0xf0d   : > { %v4129_v35 = vpop.xlane.xlu1 %4128 }
 0xf0f   : > { %v9577_v38 = vpop.eup %9576 }
 0xf10   : > { %v9579_v32 = vpop.eup %9578  ;;  %v4137_v29 = vpop.xlane.xlu0 %4136  ;;  %v4164_v46 = vmul.f32 %v9577_v38, %v12164_v11 }
 0xf11   : > { %v9581_v24 = vpop.eup %9580  ;;  %v4135_v36 = vpop.xlane.xlu1 %4134  ;;  %v4165_v19 = vmul.f32 %v9579_v32, %v12166_v37 }
 0xf12   : > { %9584 = vrcp.f32 %v4135_v36  ;;  %v4166_v27 = vmul.f32 %v9581_v24, %v12158_v22 }
 0xf13   : > { %v9583_v50 = vpop.eup %9582  ;;  %v4178_v20 = vpack.c.bf16 %v4165_v19, %v4164_v46  ;;  %9586 = vrcp.f32 %v4129_v35 }
 0xf14   : > { %v4143_v62 = vpop.xlane.xlu0 %4142  ;;  %v4167_v1 = vmul.f32 %v9583_v50, %v12171_v53  ;;  %9588 = vrcp.f32 %v4133_v23 }
 0xf15   : > { %v4131_v14 = vpop.xlane.xlu1 %4130  ;;  %8751 = vmatprep.mubr.bf16.mxu0 %v4178_v20 }
 0xf16   : > { %9590 = vrcp.f32 %v4131_v14  ;;  %v4179_v43 = vpack.c.bf16 %v4167_v1, %v4166_v27 }
 0xf17   : > { %9592 = vrcp.f32 %v4137_v29 }
 0xf18   : > { %8752 = vmatmul.mubr.bf16.gmra.mrb[148].mxu0 %v4179_v43  ;;  %v4422_v11 = vpop.permute.xlu0 %4421 }
 0xf19   : > { %v4139_v15 = vpop.xlane.xlu1 %4138  ;;  %8993 = vmatprep.subr.msk.bf16.mxu0 %vm1401_vm0, %v4422_v11  ;;  %v4468_v37 = vsel %vm1401_vm0, %v4422_v11, 0 }
 0xf1a   : > { %9594 = vrcp.f32 %v4139_v15  ;;  %8776 = vmatpush3.bf16.xpose.msra.mxu0 %v4468_v37 }
 0xf1b   : > { %9596 = vrcp.f32 %v4143_v62 }
 0xf1c   : > { %v4394_v49 = vpop.permute.xlu0 %4393  ;;  %v9585_v22 = vpop.eup %9584  ;;  %9598 = vrcp.f32 %v4141_v63 }
 0xf1d   : > { %v4424_v53 = vpop.permute.xlu1 %4423  ;;  %v9587_v42 = vpop.eup %9586  ;;  %v4171_v21 = vmul.f32 %v9585_v22, %v12186_v58 }
 0xf1e   : > { %8994 = vmatprep.subr.msk.bf16.mxu0 %vm1401_vm0, %v4424_v53  ;;  %v9589_v45 = vpop.eup %9588  ;;  %v4471_v12 = vsel %vm1401_vm0, %v4424_v53, 0  ;;  %v4168_v59 = vmul.f32 %v9587_v42, %v12180_v60 }
 0xf1f   : > { %v4170_v63 = vmul.f32 %v9589_v45, %v12173_v41 }
 0xf20   : > { %v9591_v3 = vpop.eup %9590  ;;  %v4398_v28 = vpop.permute.xlu0 %4397 }
 0xf21   : > { %v4396_v13 = vpop.permute.xlu1 %4395  ;;  %v4169_v18 = vmul.f32 %v9591_v3, %v12192_v2  ;;  %v9593_v23 = vpop.eup %9592  ;;  %v4181_v29 = vpack.c.bf16 %v4171_v21, %v4170_v63 }
 0xf22   : > { %8778 = vmatpush3.bf16.xpose.msra.mxu0 %v4471_v12  ;;  %v4172_v58 = vmul.f32 %v9593_v23, %v12184_v30 }
 0xf23   : > { %v4180_v35 = vpack.c.bf16 %v4169_v18, %v4168_v59 }
 0xf24   : > { %v9595_v38 = vpop.eup %9594  ;;  %v4402_v32 = vpop.permute.xlu0 %4401 }
 0xf25   : > { %v9597_v46 = vpop.eup %9596  ;;  %v4400_v24 = vpop.permute.xlu1 %4399  ;;  %8755 = vmatprep.mubr.bf16.mxu0 %v4180_v35  ;;  %v4173_v36 = vmul.f32 %v9595_v38, %v12196_v10 }
 0xf26   : > { %8756 = vmatmul.mubr.bf16.gmra.mrb[152].mxu0 %v4181_v29  ;;  %v9599_v19 = vpop.eup %9598  ;;  %v4175_v2 = vmul.f32 %v9597_v46, %v12190_v55 }
 0xf27   : > { %v4182_v60 = vpack.c.bf16 %v4173_v36, %v4172_v58  ;;  %v4174_v41 = vmul.f32 %v9599_v19, %v12178_v9 }
 0xf28   : > { %v4406_v50 = vpop.permute.xlu0 %4405 }
 0xf29   : > { %v4404_v20 = vpop.permute.xlu1 %4403  ;;  %8759 = vmatprep.mubr.bf16.mxu0 %v4182_v60  ;;  %v4183_v27 = vpack.c.bf16 %v4175_v2, %v4174_v41 }
 0xf2c   : > { %v4723_v62 = vpop.permute.xlu0 %4722 }
 0xf2d   : > { %v4408_v1 = vpop.permute.xlu1 %4407  ;;  %8795 = vmatprep.subr.bf16.mxu1 %v4723_v62 }
 0xf2e   : > { %8760 = vmatmul.mubr.bf16.gmra.mrb[156].mxu0 %v4183_v27  ;;  %8796 = vmatpush3.bf16.msra.mxu1 %v4723_v62 }
 0xf2f   : > { %8779 = vmatprep.mubr.msk.bf16.mxu0 %vm1401_vm0, %v4394_v49 }
 0xf30   : > { %v4727_v10 = vpop.permute.xlu0 %4726 }
 0xf31   : > { %v4725_v30 = vpop.permute.xlu1 %4724 }
 0xf32   : > { %8797 = vmatprep.subr.bf16.mxu1 %v4725_v30 }
 0xf33   : > { %8798 = vmatpush3.bf16.msra.mxu1 %v4725_v30 }
 0xf34   : > { %8799 = vmatprep.subr.bf16.mxu1 %v4727_v10  ;;  %v4731_v9 = vpop.permute.xlu0 %4730 }
 0xf35   : > { %v4729_v55 = vpop.permute.xlu1 %4728 }
 0xf36   : > { %8780 = vmatmul.mubr.msk.bf16.vlgmr.msra.gmra.mrb[160].mxu0 %vm1401_vm0, %v4396_v13 }
 0xf37   : > { %8783 = vmatprep.mubr.msk.bf16.mxu0 %vm1401_vm0, %v4398_v28  ;;  %8800 = vmatpush3.bf16.msra.mxu1 %v4727_v10 }
 0xf38   : > { %8801 = vmatprep.subr.bf16.mxu1 %v4729_v55  ;;  %v4735_v43 = vpop.permute.xlu0 %4734 }
 0xf39   : > { %v4733_v14 = vpop.permute.xlu1 %4732 }
 0xf3b   : > { %8802 = vmatpush3.bf16.msra.mxu1 %v4729_v55 }
 0xf3c   : > { %8803 = vmatprep.subr.bf16.mxu1 %v4731_v9  ;;  %v12282_v15 = vpop.permute.xlu0 %4939 }
 0xf3d   : > { %v4737_v11 = vpop.permute.xlu1 %4736 }
 0xf3e   : > { %8784 = vmatmul.mubr.msk.bf16.gmra.mrb[164].mxu0 %vm1401_vm0, %v4400_v24 }
 0xf3f   : > { %8787 = vmatprep.mubr.msk.bf16.mxu0 %vm1401_vm0, %v4402_v32  ;;  %8804 = vmatpush3.bf16.msra.mxu1 %v4731_v9 }
 0xf40   : > { %8805 = vmatprep.subr.bf16.mxu1 %v4733_v14 }
 0xf41   : > { %v12356_v30 = vpop.permute.xlu1 %4941 }
 0xf43   : > { %8806 = vmatpush3.bf16.msra.mxu1 %v4733_v14 }
 0xf44   : > { %8807 = vmatprep.subr.bf16.mxu1 %v4735_v43 }
 0xf46   : > { %8788 = vmatmul.mubr.msk.bf16.gmra.mrb[168].mxu0 %vm1401_vm0, %v4404_v20 }
 0xf47   : > { %8791 = vmatprep.mubr.msk.bf16.mxu0 %vm1401_vm0, %v4406_v50  ;;  %8808 = vmatpush3.bf16.msra.mxu1 %v4735_v43 }
 0xf48   : > { %8809 = vmatprep.subr.bf16.mxu1 %v4737_v11 }
 0xf4b   : > { %8810 = vmatpush3.bf16.msra.mxu1 %v4737_v11 }
 0xf4c   : > { %8995 = vmatprep.subr.msk.bf16.mxu1 %vm1401_vm0, %v12282_v15 }
 0xf4e   : > { %8792 = vmatmul.mubr.msk.bf16.gmra.mrb[172].mxu0 %vm1401_vm0, %v4408_v1 }
 0xfb3   : > { %v12287_v37 = vpop.f32.mrb[144].mxu0 }
 0xfb4   : > { %v12289_v49 = vpop.f32.mrb[145].mxu0 }
 0xfb5   : > { %v12291_v22 = vpop.f32.mrb[146].mxu0 }
 0xfb6   : > { %v12293_v53 = vpop.f32.mrb[147].mxu0 }
 0xfeb   : > { %v12295_v42 = vpop.f32.mrb[148].mxu0 }
 0xfec   : > { %v12297_v45 = vpop.f32.mrb[149].mxu0 }
 0xfed   : > { %v12299_v3 = vpop.f32.mrb[150].mxu0 }
 0xfee   : > { %v12301_v28 = vpop.f32.mrb[151].mxu0 }
 0xff9   : > { %v12303_v21 = vpop.f32.mrb[152].mxu0 }
 0xffa   : > { %14508 = vst [vmem:[#allocation53_spill] sm:$0xff] %v12303_v21  ;;  %v12305_v13 = vpop.f32.mrb[153].mxu0 }
 0xffb   : > { %14509 = vst [vmem:[#allocation54_spill] sm:$0xff] %v12305_v13  ;;  %v12307_v12 = vpop.f32.mrb[154].mxu0 }
 0xffc   : > { %14510 = vst [vmem:[#allocation55_spill] sm:$0xff] %v12307_v12  ;;  %v12309_v59 = vpop.f32.mrb[155].mxu0 }
 0xffd   : > { %14511 = vst [vmem:[#allocation56_spill] sm:$0xff] %v12309_v59 }
0x1001   : > { %v12311_v18 = vpop.f32.mrb[156].mxu0 }
0x1002   : > { %14512 = vst [vmem:[#allocation57_spill] sm:$0xff] %v12311_v18  ;;  %v12313_v23 = vpop.f32.mrb[157].mxu0 }
0x1003   : > { %14513 = vst [vmem:[#allocation58_spill] sm:$0xff] %v12313_v23  ;;  %v12315_v63 = vpop.f32.mrb[158].mxu0 }
0x1004   : > { %14514 = vst [vmem:[#allocation59_spill] sm:$0xff] %v12315_v63  ;;  %v12317_v35 = vpop.f32.mrb[159].mxu0 }
0x1005   : > { %14515 = vst [vmem:[#allocation60_spill] sm:$0xff] %v12317_v35 }
0x1009   : > { %v8781_v38 = vpop.f32.mrb[160].mxu0 }
0x100a   : > { %4574 = vmax.xlane.f32.xlu0 %v8781_v38  ;;  %v4507_v32 = vpop.f32.mrb[161].mxu0 }
0x100b   : > { %v8782_v29 = vpop.f32.mrb[162].mxu0 }
0x100c   : > { %v4510_v46 = vpop.f32.mrb[163].mxu0 }
0x100d   : > { %4572 = vmax.xlane.f32.xlu1 %v4510_v46 }
0x100e   : > { %4570 = vmax.xlane.f32.xlu0 %v4507_v32 }
0x1011   : > { %v8785_v24 = vpop.f32.mrb[164].mxu0 }
0x1012   : > { %4576 = vmax.xlane.f32.xlu0 %v8782_v29  ;;  %v12319_v58 = vpop.f32.mrb[165].mxu0 }
0x1013   : > { %v12321_v36 = vpop.f32.mrb[166].mxu0 }
0x1014   : > { %4584 = vmax.xlane.f32.xlu1 %v12321_v36  ;;  %v12324_v19 = vpop.f32.mrb[167].mxu0 }
0x1016   : > { %4582 = vmax.xlane.f32.xlu0 %v8785_v24 }
0x1018   : > { %4580 = vmax.xlane.f32.xlu1 %v12324_v19 }
0x1019   : > { %v12327_v60 = vpop.f32.mrb[168].mxu0 }
0x101a   : > { %4578 = vmax.xlane.f32.xlu0 %v12319_v58  ;;  %v12330_v50 = vpop.f32.mrb[169].mxu0 }
0x101b   : > { %v12332_v2 = vpop.f32.mrb[170].mxu0 }
0x101c   : > { %4592 = vmax.xlane.f32.xlu1 %v12332_v2  ;;  %v12335_v20 = vpop.f32.mrb[171].mxu0 }
0x101e   : > { %4590 = vmax.xlane.f32.xlu0 %v12327_v60 }
0x1020   : > { %4588 = vmax.xlane.f32.xlu1 %v12335_v20 }
0x1021   : > { %v12339_v41 = vpop.f32.mrb[172].mxu0 }
0x1022   : > { %4586 = vmax.xlane.f32.xlu0 %v12330_v50  ;;  %v12342_v62 = vpop.f32.mrb[173].mxu0 }
0x1023   : > { %v12344_v27 = vpop.f32.mrb[174].mxu0 }
0x1024   : > { %v12346_v1 = vpop.f32.mrb[175].mxu0 }
0x1026   : > { %4598 = vmax.xlane.f32.xlu0 %v12339_v41 }
0x102a   : > { %4594 = vmax.xlane.f32.xlu0 %v12342_v62 }
0x1031   : > { %4945 = vrot.lane.b32.xlu1 %v14479_v40, %s10117_s22 }
0x1040   : > { %4943 = vrot.lane.b32.xlu0 %v14478_v7, %s10117_s22 }
0x1055   : > { %4600 = vmax.xlane.f32.xlu1 %v12344_v27 }
0x1059   : > { %4596 = vmax.xlane.f32.xlu1 %v12346_v1 }
0x1097   : > { %v4575_v10 = vpop.xlane.xlu0 %4574 }
0x1098   : > { %v4604_v55 = vsub.f32 %v8781_v38, %v4575_v10 }
0x109a   : > { %v4622_v9 = vmul.f32 1.442695, %v4604_v55  ;;  %v4573_v14 = vpop.xlane.xlu1 %4572 }
0x109b   : > { %v4603_v43 = vsub.f32 %v4510_v46, %v4573_v14  ;;  %v4571_v11 = vpop.xlane.xlu0 %4570 }
0x109c   : > { %9600 = vpow2.f32 %v4622_v9  ;;  %v4602_v63 = vsub.f32 %v4507_v32, %v4571_v11 }
0x109d   : > { %v4620_v18 = vmul.f32 1.442695, %v4603_v43 }
0x109e   : > { %v4618_v35 = vmul.f32 1.442695, %v4602_v63 }
0x109f   : > { %9602 = vpow2.f32 %v4620_v18  ;;  %v4577_v40 = vpop.xlane.xlu0 %4576 }
0x10a0   : > { %9604 = vpow2.f32 %v4618_v35  ;;  %v4605_v7 = vsub.f32 %v8782_v29, %v4577_v40 }
0x10a1   : > { %v4585_v63 = vpop.xlane.xlu1 %4584 }
0x10a2   : > { %v4624_v23 = vmul.f32 1.442695, %v4605_v7  ;;  %v4609_v40 = vsub.f32 %v12321_v36, %v4585_v63 }
0x10a3   : > { %v4583_v18 = vpop.xlane.xlu0 %4582 }
0x10a4   : > { %9606 = vpow2.f32 %v4624_v23  ;;  %v4608_v29 = vsub.f32 %v8785_v24, %v4583_v18  ;;  %v4632_v59 = vmul.f32 1.442695, %v4609_v40 }
0x10a5   : > { %v4581_v46 = vpop.xlane.xlu1 %4580 }
0x10a6   : > { %v12358_v12 = vpop.eup %9600  ;;  %v4630_v55 = vmul.f32 1.442695, %v4608_v29  ;;  %v4607_v14 = vsub.f32 %v12324_v19, %v4581_v46 }
0x10a7   : > { %4654 = vadd.xlane.f32.xlu1 %v12358_v12  ;;  %v4579_v23 = vpop.xlane.xlu0 %4578 }
0x10a8   : > { %v4606_v9 = vsub.f32 %v12319_v58, %v4579_v23  ;;  %9608 = vpow2.f32 %v4630_v55  ;;  %v4628_v7 = vmul.f32 1.442695, %v4607_v14 }
0x10a9   : > { %v12361_v21 = vpop.eup %9602  ;;  %v4593_v43 = vpop.xlane.xlu1 %4592 }
0x10aa   : > { %v12363_v38 = vpop.eup %9604  ;;  %4652 = vadd.xlane.f32.xlu0 %v12361_v21  ;;  %v4613_v36 = vsub.f32 %v12332_v2, %v4593_v43 }
0x10ab   : > { %4650 = vadd.xlane.f32.xlu1 %v12363_v38  ;;  %v4591_v35 = vpop.xlane.xlu0 %4590 }
0x10ad   : > { %v4589_v13 = vpop.xlane.xlu1 %4588 }
0x10ae   : > { %v12367_v32 = vpop.eup %9606 }
0x10af   : > { %4656 = vadd.xlane.f32.xlu1 %v12367_v32  ;;  %v4587_v10 = vpop.xlane.xlu0 %4586 }
0x10b0   : > { %v4610_v58 = vsub.f32 %v12330_v50, %v4587_v10  ;;  %v4611_v50 = vsub.f32 %v12335_v20, %v4589_v13 }
0x10b2   : > { %v4634_v63 = vmul.f32 1.442695, %v4610_v58  ;;  %v12382_v46 = vpop.eup %9608  ;;  %v4636_v55 = vmul.f32 1.442695, %v4611_v50  ;;  %v4980_v58 = vsel %vm1401_vm0, %v12282_v15, 0 }
0x10b3   : > { %v4599_v11 = vpop.xlane.xlu0 %4598 }
0x10b4   : > { %v4616_v24 = vsub.f32 %v12339_v41, %v4599_v11 }
0x10b6   : > { %v4646_v19 = vmul.f32 1.442695, %v4616_v24 }
0x10b7   : > { %v4595_v23 = vpop.xlane.xlu0 %4594 }
0x10b8   : > { %v4614_v29 = vsub.f32 %v12342_v62, %v4595_v23 }
0x10ba   : > { %v4642_v41 = vmul.f32 1.442695, %v4614_v29 }
0x10c0   : > { %4947 = vrot.lane.b32.xlu0 %v14480_v48, %s10117_s22  ;;  %4949 = vrot.lane.b32.xlu1 %v14481_v16, %s10117_s22  ;;  %v4626_v48 = vmul.f32 1.442695, %v4606_v9  ;;  %v4612_v16 = vsub.f32 %v12327_v60, %v4591_v35  ;;  %v12384_v60 = vpop.permute.xlu1 %4945  ;;  %v4640_v35 = vmul.f32 1.442695, %v4613_v36 }
0x10c2   : > { %9610 = vpow2.f32 %v4626_v48  ;;  %v4638_v18 = vmul.f32 1.442695, %v4612_v16 }
0x10c3   : > { %9612 = vpow2.f32 %v4628_v7 }
0x10c4   : > { %9614 = vpow2.f32 %v4632_v59 }
0x10c5   : > { %9616 = vpow2.f32 %v4638_v18 }
0x10c6   : > { %9618 = vpow2.f32 %v4646_v19 }
0x10c7   : > { %9620 = vpow2.f32 %v4634_v63 }
0x10c8   : > { %9622 = vpow2.f32 %v4642_v41 }
0x10c9   : > { %9624 = vpow2.f32 %v4640_v35 }
0x10cc   : > { %v12388_v59 = vpop.eup %9610 }
0x10cd   : > { %v12390_v62 = vpop.eup %9612 }
0x10ce   : > { %v12395_v14 = vpop.eup %9614 }
0x10cf   : > { %v12397_v13 = vpop.eup %9616 }
0x10d0   : > { %v12402_v11 = vpop.eup %9618 }
0x10d1   : > { %v12404_v40 = vpop.eup %9620 }
0x10d2   : > { %v12408_v48 = vpop.eup %9622 }
0x10d3   : > { %v12410_v7 = vpop.eup %9624 }
0x10df   : > { %4662 = vadd.xlane.f32.xlu0 %v12382_v46 }
0x10e2   : > { %v4601_v10 = vpop.xlane.xlu1 %4600 }
0x10e3   : > { %v4617_v2 = vsub.f32 %v12344_v27, %v4601_v10  ;;  %4658 = vadd.xlane.f32.xlu0 %v12388_v59 }
0x10e4   : > { %4660 = vadd.xlane.f32.xlu1 %v12390_v62 }
0x10e5   : > { %v4648_v9 = vmul.f32 1.442695, %v4617_v2 }
0x10e6   : > { %v4597_v43 = vpop.xlane.xlu1 %4596 }
0x10e7   : > { %9626 = vpow2.f32 %v4648_v9  ;;  %v4615_v20 = vsub.f32 %v12346_v1, %v4597_v43  ;;  %4664 = vadd.xlane.f32.xlu0 %v12395_v14 }
0x10e8   : > { %4670 = vadd.xlane.f32.xlu1 %v12397_v13  ;;  %9628 = vpow2.f32 %v4636_v55 }
0x10e9   : > { %v4644_v27 = vmul.f32 1.442695, %v4615_v20 }
0x10eb   : > { %4678 = vadd.xlane.f32.xlu0 %v12402_v11  ;;  %9630 = vpow2.f32 %v4644_v27 }
0x10ec   : > { %4666 = vadd.xlane.f32.xlu1 %v12404_v40 }
0x10ef   : > { %4674 = vadd.xlane.f32.xlu0 %v12408_v48 }
0x10f0   : > { %4672 = vadd.xlane.f32.xlu1 %v12410_v7 }
0x10f1   : > { %v12414_v1 = vpop.eup %9626 }
0x10f2   : > { %v12416_v16 = vpop.eup %9628 }
0x10f3   : > { %4680 = vadd.xlane.f32.xlu0 %v12414_v1 }
0x10f4   : > { %4668 = vadd.xlane.f32.xlu1 %v12416_v16 }
0x10f5   : > { %v12420_v24 = vpop.eup %9630 }
0x10f8   : > { %4676 = vadd.xlane.f32.xlu1 %v12420_v24 }
0x1109   : > { %4953 = vrot.lane.b32.xlu1 %v14483_v5, %s10117_s22  ;;  %4951 = vrot.lane.b32.xlu0 %v14482_v31, %s10117_s22  ;;  %v4944_v31 = vpop.permute.xlu0 %4943 }
0x110d   : > { %4925 = vrot.lane.b32.xlu1 %v14485_v4, %s10117_s22  ;;  %4923 = vrot.lane.b32.xlu0 %v14484_v56, %s10117_s22 }
0x1111   : > { %4929 = vrot.lane.b32.xlu1 %v14487_v6, %s10117_s22  ;;  %4927 = vrot.lane.b32.xlu0 %v14486_v0, %s10117_s22 }
0x1115   : > { %4933 = vrot.lane.b32.xlu1 %v14489_v57, %s10117_s22  ;;  %4931 = vrot.lane.b32.xlu0 %v14488_v33, %s10117_s22 }
0x1119   : > { %4937 = vrot.lane.b32.xlu1 %v14491_v17, %s10117_s22  ;;  %4935 = vrot.lane.b32.xlu0 %v14490_v26, %s10117_s22 }
0x111d   : > { %5254 = vrot.lane.b32.xlu1 %v14453_v44, %s10117_s22  ;;  %5252 = vrot.lane.b32.xlu0 %v14452_v61, %s10117_s22 }
0x1121   : > { %5256 = vrot.lane.b32.xlu0 %v14454_v47, %s10117_s22 }
0x1125   : > { %5258 = vrot.lane.b32.xlu0 %v14455_v39, %s10117_s22 }
0x1134   : > { %v4655_v5 = vpop.xlane.xlu1 %4654 }
0x1137   : > { %v4653_v56 = vpop.xlane.xlu0 %4652 }
0x1138   : > { %9632 = vrcp.f32 %v4653_v56  ;;  %v4651_v4 = vpop.xlane.xlu1 %4650 }
0x1139   : > { %9634 = vrcp.f32 %v4651_v4 }
0x113a   : > { %9636 = vrcp.f32 %v4655_v5 }
0x113b   : > { %v4948_v15 = vpop.permute.xlu0 %4947 }
0x113c   : > { %v4657_v0 = vpop.xlane.xlu1 %4656 }
0x113d   : > { %9638 = vrcp.f32 %v4657_v0 }
0x1142   : > { %v9633_v6 = vpop.eup %9632 }
0x1143   : > { %v9635_v44 = vpop.eup %9634  ;;  %v4699_v33 = vmul.f32 %v9633_v6, %v12361_v21  ;;  %v4983_v21 = vsel %vm1401_vm0, %v12356_v30, 0 }
0x1144   : > { %v4698_v61 = vmul.f32 %v9635_v44, %v12363_v38  ;;  %v9637_v57 = vpop.eup %9636  ;;  %v4989_v38 = vsel %vm1401_vm0, %v12384_v60, 0 }
0x1145   : > { %v4700_v39 = vmul.f32 %v9637_v57, %v12358_v12  ;;  %v4986_v12 = vsel %vm1401_vm0, %v4944_v31, 0 }
0x1146   : > { %v4714_v47 = vpack.c.bf16 %v4699_v33, %v4698_v61 }
0x1147   : > { %v9639_v26 = vpop.eup %9638 }
0x1148   : > { %v4701_v17 = vmul.f32 %v9639_v26, %v12367_v32  ;;  %8811 = vmatprep.mubr.bf16.mxu1 %v4714_v47  ;;  %v4992_v32 = vsel %vm1401_vm0, %v4948_v15, 0 }
0x114a   : > { %v4715_v18 = vpack.c.bf16 %v4701_v17, %v4700_v39 }
0x114c   : > { %8812 = vmatmul.mubr.bf16.vlgmr.msra.gmra.mrb[128].mxu1 %v4715_v18 }
0x114d   : > { %8828 = vmatpush3.bf16.xpose.msra.mxu1 %v4980_v58 }
0x114e   : > { %8996 = vmatprep.subr.msk.bf16.mxu1 %vm1401_vm0, %v12356_v30  ;;  %v4950_v30 = vpop.permute.xlu1 %4949 }
0x114f   : > { %v4995_v36 = vsel %vm1401_vm0, %v4950_v30, 0 }
0x1155   : > { %8830 = vmatpush3.bf16.xpose.msra.mxu1 %v4983_v21 }
0x1156   : > { %8997 = vmatprep.subr.msk.bf16.mxu1 %vm1401_vm0, %v4944_v31 }
0x115d   : > { %8832 = vmatpush3.bf16.xpose.msra.mxu1 %v4986_v12 }
0x115e   : > { %8998 = vmatprep.subr.msk.bf16.mxu1 %vm1401_vm0, %v12384_v60 }
0x1165   : > { %8834 = vmatpush3.bf16.xpose.msra.mxu1 %v4989_v38 }
0x1166   : > { %8999 = vmatprep.subr.msk.bf16.mxu1 %vm1401_vm0, %v4948_v15 }
0x116c   : > { %v4663_v23 = vpop.xlane.xlu0 %4662 }
0x116d   : > { %8836 = vmatpush3.bf16.xpose.msra.mxu1 %v4992_v32 }
0x116e   : > { %9000 = vmatprep.subr.msk.bf16.mxu1 %vm1401_vm0, %v4950_v30 }
0x1170   : > { %v4659_v19 = vpop.xlane.xlu0 %4658 }
0x1171   : > { %9640 = vrcp.f32 %v4659_v19  ;;  %v4661_v29 = vpop.xlane.xlu1 %4660 }
0x1172   : > { %9642 = vrcp.f32 %v4661_v29 }
0x1173   : > { %9644 = vrcp.f32 %v4663_v23 }
0x1174   : > { %v4665_v63 = vpop.xlane.xlu0 %4664 }
0x1175   : > { %8838 = vmatpush3.bf16.xpose.msra.mxu1 %v4995_v36  ;;  %9646 = vrcp.f32 %v4665_v63  ;;  %v4671_v60 = vpop.xlane.xlu1 %4670 }
0x1178   : > { %v4679_v41 = vpop.xlane.xlu0 %4678 }
0x1179   : > { %v4667_v35 = vpop.xlane.xlu1 %4666 }
0x117b   : > { %v9641_v50 = vpop.eup %9640 }
0x117c   : > { %v9643_v10 = vpop.eup %9642  ;;  %v4675_v2 = vpop.xlane.xlu0 %4674  ;;  %v4702_v55 = vmul.f32 %v9641_v50, %v12388_v59 }
0x117d   : > { %v9645_v9 = vpop.eup %9644  ;;  %v4673_v43 = vpop.xlane.xlu1 %4672  ;;  %v4703_v20 = vmul.f32 %v9643_v10, %v12390_v62 }
0x117e   : > { %9648 = vrcp.f32 %v4673_v43  ;;  %v4704_v56 = vmul.f32 %v9645_v9, %v12382_v46 }
0x117f   : > { %v9647_v27 = vpop.eup %9646  ;;  %v4716_v31 = vpack.c.bf16 %v4703_v20, %v4702_v55  ;;  %9650 = vrcp.f32 %v4667_v35 }
0x1180   : > { %v4681_v5 = vpop.xlane.xlu0 %4680  ;;  %v4705_v4 = vmul.f32 %v9647_v27, %v12395_v14  ;;  %9652 = vrcp.f32 %v4671_v60 }
0x1181   : > { %v4669_v0 = vpop.xlane.xlu1 %4668  ;;  %8815 = vmatprep.mubr.bf16.mxu1 %v4716_v31 }
0x1182   : > { %9654 = vrcp.f32 %v4669_v0  ;;  %v4717_v6 = vpack.c.bf16 %v4705_v4, %v4704_v56 }
0x1183   : > { %9656 = vrcp.f32 %v4675_v2 }
0x1184   : > { %8816 = vmatmul.mubr.bf16.gmra.mrb[132].mxu1 %v4717_v6  ;;  %v4952_v59 = vpop.permute.xlu0 %4951 }
0x1185   : > { %v4677_v44 = vpop.xlane.xlu1 %4676  ;;  %9001 = vmatprep.subr.msk.bf16.mxu1 %vm1401_vm0, %v4952_v59  ;;  %v4998_v62 = vsel %vm1401_vm0, %v4952_v59, 0 }
0x1186   : > { %9658 = vrcp.f32 %v4677_v44  ;;  %8840 = vmatpush3.bf16.xpose.msra.mxu1 %v4998_v62 }
0x1187   : > { %9660 = vrcp.f32 %v4681_v5 }
0x1188   : > { %v4924_v33 = vpop.permute.xlu0 %4923  ;;  %v9649_v46 = vpop.eup %9648  ;;  %9662 = vrcp.f32 %v4679_v41 }
0x1189   : > { %v4954_v14 = vpop.permute.xlu1 %4953  ;;  %v9651_v61 = vpop.eup %9650  ;;  %v4709_v39 = vmul.f32 %v9649_v46, %v12410_v7 }
0x118a   : > { %9002 = vmatprep.subr.msk.bf16.mxu1 %vm1401_vm0, %v4954_v14  ;;  %v9653_v57 = vpop.eup %9652  ;;  %v5001_v18 = vsel %vm1401_vm0, %v4954_v14, 0  ;;  %v4706_v58 = vmul.f32 %v9651_v61, %v12404_v40 }
0x118b   : > { %v4708_v38 = vmul.f32 %v9653_v57, %v12397_v13 }
0x118c   : > { %v9655_v47 = vpop.eup %9654  ;;  %v4928_v26 = vpop.permute.xlu0 %4927 }
0x118d   : > { %v4926_v17 = vpop.permute.xlu1 %4925  ;;  %v4707_v21 = vmul.f32 %v9655_v47, %v12416_v16  ;;  %v9657_v12 = vpop.eup %9656  ;;  %v4719_v30 = vpack.c.bf16 %v4709_v39, %v4708_v38 }
0x118e   : > { %8842 = vmatpush3.bf16.xpose.msra.mxu1 %v5001_v18  ;;  %v4710_v7 = vmul.f32 %v9657_v12, %v12408_v48 }
0x118f   : > { %v4718_v15 = vpack.c.bf16 %v4707_v21, %v4706_v58 }
0x1190   : > { %v9659_v32 = vpop.eup %9658  ;;  %v4932_v23 = vpop.permute.xlu0 %4931 }
0x1191   : > { %v9661_v19 = vpop.eup %9660  ;;  %v4930_v29 = vpop.permute.xlu1 %4929  ;;  %8819 = vmatprep.mubr.bf16.mxu1 %v4718_v15  ;;  %v4711_v36 = vmul.f32 %v9659_v32, %v12420_v24 }
0x1192   : > { %8820 = vmatmul.mubr.bf16.gmra.mrb[136].mxu1 %v4719_v30  ;;  %v9663_v63 = vpop.eup %9662  ;;  %v4713_v16 = vmul.f32 %v9661_v19, %v12414_v1 }
0x1193   : > { %v4720_v40 = vpack.c.bf16 %v4711_v36, %v4710_v7  ;;  %v4712_v13 = vmul.f32 %v9663_v63, %v12402_v11  ;;  %v14516_v11 = vmov 0  }
0x1194   : > { %v4936_v60 = vpop.permute.xlu0 %4935 }
0x1195   : > { %v4934_v41 = vpop.permute.xlu1 %4933  ;;  %8823 = vmatprep.mubr.bf16.mxu1 %v4720_v40  ;;  %v4721_v50 = vpack.c.bf16 %v4713_v16, %v4712_v13 }
0x1198   : > { %v5253_v35 = vpop.permute.xlu0 %5252 }
0x1199   : > { %v4938_v10 = vpop.permute.xlu1 %4937  ;;  %8859 = vmatprep.subr.bf16.mxu0 %v5253_v35 }
0x119a   : > { %8824 = vmatmul.mubr.bf16.gmra.mrb[140].mxu1 %v4721_v50  ;;  %8860 = vmatpush3.bf16.msra.mxu0 %v5253_v35 }
0x119b   : > { %8843 = vmatprep.mubr.msk.bf16.mxu1 %vm1401_vm0, %v4924_v33 }
0x119c   : > { %v5257_v48 = vpop.permute.xlu0 %5256 }
0x119d   : > { %v5255_v24 = vpop.permute.xlu1 %5254 }
0x119e   : > { %8861 = vmatprep.subr.bf16.mxu0 %v5255_v24 }
0x119f   : > { %8862 = vmatpush3.bf16.msra.mxu0 %v5255_v24 }
0x11a0   : > { %8863 = vmatprep.subr.bf16.mxu0 %v5257_v48  ;;  %v5259_v1 = vpop.permute.xlu0 %5258 }
0x11a2   : > { %8844 = vmatmul.mubr.msk.bf16.vlgmr.msra.gmra.mrb[144].mxu1 %vm1401_vm0, %v4926_v17 }
0x11a3   : > { %8847 = vmatprep.mubr.msk.bf16.mxu1 %vm1401_vm0, %v4928_v26  ;;  %8864 = vmatpush3.bf16.msra.mxu0 %v5257_v48 }
0x11a4   : > { %8865 = vmatprep.subr.bf16.mxu0 %v5259_v1 }
0x11a7   : > { %8866 = vmatpush3.bf16.msra.mxu0 %v5259_v1 }
0x11aa   : > { %8848 = vmatmul.mubr.msk.bf16.gmra.mrb[148].mxu1 %vm1401_vm0, %v4930_v29 }
0x11ab   : > { %8851 = vmatprep.mubr.msk.bf16.mxu1 %vm1401_vm0, %v4932_v23 }
0x11b2   : > { %8852 = vmatmul.mubr.msk.bf16.gmra.mrb[152].mxu1 %vm1401_vm0, %v4934_v41 }
0x11b3   : > { %8855 = vmatprep.mubr.msk.bf16.mxu1 %vm1401_vm0, %v4936_v60 }
0x11ba   : > { %8856 = vmatmul.mubr.msk.bf16.gmra.mrb[156].mxu1 %vm1401_vm0, %v4938_v10 }
0x11bb   : > { %6480 = vmatprep.mubr.bf16.mxu1 %v14516_v11 }
0x121f   : > { %v12496_v2 = vpop.f32.mrb[128].mxu1 }
0x1220   : > { %v12498_v55 = vpop.f32.mrb[129].mxu1 }
0x1221   : > { %v12500_v9 = vpop.f32.mrb[130].mxu1 }
0x1222   : > { %v12502_v43 = vpop.f32.mrb[131].mxu1 }
0x1257   : > { %v12504_v20 = vpop.f32.mrb[132].mxu1 }
0x1258   : > { %v12506_v27 = vpop.f32.mrb[133].mxu1 }
0x1259   : > { %v12508_v31 = vpop.f32.mrb[134].mxu1 }
0x125a   : > { %v12510_v5 = vpop.f32.mrb[135].mxu1 }
0x1265   : > { %v12512_v56 = vpop.f32.mrb[136].mxu1 }
0x1266   : > { %v12514_v4 = vpop.f32.mrb[137].mxu1 }
0x1267   : > { %v12516_v0 = vpop.f32.mrb[138].mxu1 }
0x1268   : > { %v12518_v6 = vpop.f32.mrb[139].mxu1 }
0x126d   : > { %v12520_v59 = vpop.f32.mrb[140].mxu1 }
0x126e   : > { %v12522_v44 = vpop.f32.mrb[141].mxu1 }
0x126f   : > { %v12524_v62 = vpop.f32.mrb[142].mxu1 }
0x1270   : > { %v12526_v33 = vpop.f32.mrb[143].mxu1 }
0x1275   : > { %v8845_v46 = vpop.f32.mrb[144].mxu1 }
0x1276   : > { %5104 = vmax.xlane.f32.xlu0 %v8845_v46  ;;  %v5037_v14 = vpop.f32.mrb[145].mxu1 }
0x1277   : > { %v8846_v61 = vpop.f32.mrb[146].mxu1 }
0x1278   : > { %v5040_v57 = vpop.f32.mrb[147].mxu1 }
0x1279   : > { %5102 = vmax.xlane.f32.xlu1 %v5040_v57 }
0x127a   : > { %5100 = vmax.xlane.f32.xlu0 %v5037_v14 }
0x127d   : > { %v8849_v47 = vpop.f32.mrb[148].mxu1 }
0x127e   : > { %5106 = vmax.xlane.f32.xlu0 %v8846_v61  ;;  %v5053_v26 = vpop.f32.mrb[149].mxu1 }
0x127f   : > { %v8850_v39 = vpop.f32.mrb[150].mxu1 }
0x1280   : > { %5114 = vmax.xlane.f32.xlu1 %v8850_v39  ;;  %v5056_v17 = vpop.f32.mrb[151].mxu1 }
0x1282   : > { %5112 = vmax.xlane.f32.xlu0 %v8849_v47 }
0x1284   : > { %5110 = vmax.xlane.f32.xlu1 %v5056_v17 }
0x1285   : > { %v12528_v18 = vpop.f32.mrb[152].mxu1 }
0x1286   : > { %5108 = vmax.xlane.f32.xlu0 %v5053_v26  ;;  %v12530_v58 = vpop.f32.mrb[153].mxu1 }
0x1287   : > { %v12532_v21 = vpop.f32.mrb[154].mxu1 }
0x1288   : > { %5122 = vmax.xlane.f32.xlu1 %v12532_v21  ;;  %v12535_v12 = vpop.f32.mrb[155].mxu1 }
0x128a   : > { %5120 = vmax.xlane.f32.xlu0 %v12528_v18 }
0x128c   : > { %5118 = vmax.xlane.f32.xlu1 %v12535_v12 }
0x128d   : > { %v12539_v38 = vpop.f32.mrb[156].mxu1 }
0x128e   : > { %5116 = vmax.xlane.f32.xlu0 %v12530_v58  ;;  %v12542_v15 = vpop.f32.mrb[157].mxu1 }
0x128f   : > { %v12544_v32 = vpop.f32.mrb[158].mxu1 }
0x1290   : > { %v12546_v23 = vpop.f32.mrb[159].mxu1 }
0x1292   : > { %5128 = vmax.xlane.f32.xlu0 %v12539_v38 }
0x1296   : > { %5124 = vmax.xlane.f32.xlu0 %v12542_v15 }
0x129d   : > { %5262 = vrot.lane.b32.xlu1 %v14457_v51, %s10117_s22 }
0x12ac   : > { %5260 = vrot.lane.b32.xlu0 %v14456_v34, %s10117_s22 }
0x12c1   : > { %5130 = vmax.xlane.f32.xlu1 %v12544_v32 }
0x12c5   : > { %5126 = vmax.xlane.f32.xlu1 %v12546_v23 }
0x1303   : > { %v5105_v30 = vpop.xlane.xlu0 %5104 }
0x1304   : > { %v5134_v19 = vsub.f32 %v8845_v46, %v5105_v30 }
0x1306   : > { %v5152_v29 = vmul.f32 1.442695, %v5134_v19  ;;  %v5103_v36 = vpop.xlane.xlu1 %5102 }
0x1307   : > { %v5101_v7 = vpop.xlane.xlu0 %5100  ;;  %v5133_v60 = vsub.f32 %v5040_v57, %v5103_v36 }
0x1308   : > { %9664 = vpow2.f32 %v5152_v29  ;;  %v5132_v63 = vsub.f32 %v5037_v14, %v5101_v7 }
0x1309   : > { %v5150_v35 = vmul.f32 1.442695, %v5133_v60 }
0x130a   : > { %v5148_v40 = vmul.f32 1.442695, %v5132_v63 }
0x130b   : > { %v5107_v16 = vpop.xlane.xlu0 %5106 }
0x130c   : > { %9666 = vpow2.f32 %v5148_v40  ;;  %v5135_v41 = vsub.f32 %v8846_v61, %v5107_v16 }
0x130d   : > { %v5115_v51 = vpop.xlane.xlu1 %5114 }
0x130e   : > { %v5154_v13 = vmul.f32 1.442695, %v5135_v41  ;;  %v5139_v34 = vsub.f32 %v8850_v39, %v5115_v51 }
0x130f   : > { %v5113_v50 = vpop.xlane.xlu0 %5112 }
0x1310   : > { %9668 = vpow2.f32 %v5154_v13  ;;  %v5138_v10 = vsub.f32 %v8849_v47, %v5113_v50  ;;  %v5162_v46 = vmul.f32 1.442695, %v5139_v34 }
0x1311   : > { %v5111_v48 = vpop.xlane.xlu1 %5110  ;;  %9670 = vpow2.f32 %v5150_v35 }
0x1312   : > { %v12556_v24 = vpop.eup %9664  ;;  %v5160_v1 = vmul.f32 1.442695, %v5138_v10  ;;  %v5137_v57 = vsub.f32 %v5056_v17, %v5111_v48 }
0x1313   : > { %5184 = vadd.xlane.f32.xlu1 %v12556_v24  ;;  %v5109_v14 = vpop.xlane.xlu0 %5108 }
0x1314   : > { %9672 = vpow2.f32 %v5160_v1  ;;  %v5136_v30 = vsub.f32 %v5053_v26, %v5109_v14  ;;  %v5158_v47 = vmul.f32 1.442695, %v5137_v57 }
0x1315   : > { %9674 = vpow2.f32 %v5162_v46  ;;  %v5123_v63 = vpop.xlane.xlu1 %5122 }
0x1316   : > { %v12559_v61 = vpop.eup %9666  ;;  %v5156_v19 = vmul.f32 1.442695, %v5136_v30  ;;  %v5143_v50 = vsub.f32 %v12532_v21, %v5123_v63 }
0x1317   : > { %5180 = vadd.xlane.f32.xlu1 %v12559_v61  ;;  %v5121_v39 = vpop.xlane.xlu0 %5120 }
0x1318   : > { %9676 = vpow2.f32 %v5156_v19  ;;  %v5170_v1 = vmul.f32 1.442695, %v5143_v50  ;;  %v5142_v46 = vsub.f32 %v12528_v18, %v5121_v39  ;;  %v14521_v50 = vld [vmem:[#allocation14_spill] sm:$0xff] }
0x1319   : > { %9678 = vpow2.f32 %v5158_v47  ;;  %v5119_v16 = vpop.xlane.xlu1 %5118 }
0x131a   : > { %v12562_v29 = vpop.eup %9668  ;;  %v5141_v10 = vsub.f32 %v12535_v12, %v5119_v16  ;;  %v5168_v30 = vmul.f32 1.442695, %v5142_v46  ;;  %v14527_v46 = vld [vmem:[#allocation12_spill] sm:$0xff] }
0x131b   : > { %5186 = vadd.xlane.f32.xlu1 %v12562_v29  ;;  %v5117_v7 = vpop.xlane.xlu0 %5116  ;;  %v12565_v36 = vpop.eup %9670 }
0x131c   : > { %v5140_v34 = vsub.f32 %v12530_v58, %v5117_v7  ;;  %v5166_v14 = vmul.f32 1.442695, %v5141_v10  ;;  %v14524_v10 = vld [vmem:[#allocation29_spill] sm:$0xff] }
0x131d   : > { %v5263_v35 = vpop.permute.xlu1 %5262 }
0x131e   : > { %v12567_v17 = vpop.eup %9672  ;;  %v5164_v48 = vmul.f32 1.442695, %v5140_v34  ;;  %v14520_v34 = vld [vmem:[#allocation17_spill] sm:$0xff] }
0x131f   : > { %5182 = vadd.xlane.f32.xlu1 %v12565_v36  ;;  %5192 = vadd.xlane.f32.xlu0 %v12567_v17  ;;  %v5129_v26 = vpop.xlane.xlu0 %5128  ;;  %v12571_v40 = vpop.eup %9674 }
0x1320   : > { %9680 = vpow2.f32 %v5164_v48  ;;  %v5146_v21 = vsub.f32 %v12539_v38, %v5129_v26  ;;  %v14525_v48 = vld [vmem:[#allocation23_spill] sm:$0xff] }
0x1321   : > { %9682 = vpow2.f32 %v5170_v1  ;;  %v14526_v1 = vld [vmem:[#allocation27_spill] sm:$0xff] }
0x1322   : > { %v12573_v60 = vpop.eup %9676  ;;  %9684 = vpow2.f32 %v5166_v14  ;;  %v5176_v39 = vmul.f32 1.442695, %v5146_v21  ;;  %v14528_v14 = vld [vmem:[#allocation16_spill] sm:$0xff] }
0x1323   : > { %5194 = vadd.xlane.f32.xlu0 %v12571_v40  ;;  %5188 = vadd.xlane.f32.xlu1 %v12573_v60  ;;  %v5125_v41 = vpop.xlane.xlu0 %5124  ;;  %v12577_v51 = vpop.eup %9678  ;;  %9686 = vpow2.f32 %v5168_v30  ;;  %v14530_v30 = vld [vmem:[#allocation15_spill] sm:$0xff] }
0x1327   : > { %5190 = vadd.xlane.f32.xlu0 %v12577_v51  ;;  %v5261_v13 = vpop.permute.xlu0 %5260 }
0x1328   : > { %8867 = vmatprep.subr.bf16.mxu0 %v5261_v13 }
0x1329   : > { %8868 = vmatpush3.bf16.msra.mxu0 %v5261_v13  ;;  %v14518_v13 = vld [vmem:[#allocation13_spill] sm:$0xff] }
0x132a   : > { %8869 = vmatprep.subr.bf16.mxu0 %v5263_v35  ;;  %v12592_v7 = vpop.eup %9680 }
0x132b   : > { %v12595_v63 = vpop.eup %9682 }
0x132d   : > { %8870 = vmatpush3.bf16.msra.mxu0 %v5263_v35  ;;  %v14519_v35 = vld [vmem:[#allocation11_spill] sm:$0xff] }
0x1334   : > { %5266 = vrot.lane.b32.xlu1 %v14459_v25, %s10117_s22  ;;  %v5144_v25 = vsub.f32 %v12542_v15, %v5125_v41  ;;  %v12597_v15 = vpop.eup %9684  ;;  %v14517_v41 = vld [vmem:[#allocation8_spill] sm:$0xff] }
0x1335   : > { %v12601_v38 = vpop.eup %9686 }
0x1336   : > { %v5172_v12 = vmul.f32 1.442695, %v5144_v25  ;;  %v14531_v25 = vld [vmem:[#allocation21_spill] sm:$0xff] }
0x133d   : > { %5264 = vrot.lane.b32.xlu0 %v14458_v8, %s10117_s22 }
0x134e   : > { %v5131_v57 = vpop.xlane.xlu1 %5130 }
0x134f   : > { %v5147_v8 = vsub.f32 %v12544_v32, %v5131_v57  ;;  %v14529_v57 = vld [vmem:[#allocation10_spill] sm:$0xff] }
0x1351   : > { %v5178_v18 = vmul.f32 1.442695, %v5147_v8  ;;  %v14533_v8 = vld [vmem:[#allocation22_spill] sm:$0xff] }
0x1352   : > { %v5127_v19 = vpop.xlane.xlu1 %5126 }
0x1353   : > { %v5145_v58 = vsub.f32 %v12546_v23, %v5127_v19  ;;  %v14532_v19 = vld [vmem:[#allocation25_spill] sm:$0xff] }
0x1355   : > { %v5174_v47 = vmul.f32 1.442695, %v5145_v58  ;;  %v14534_v58 = vld [vmem:[#allocation26_spill] sm:$0xff] }
0x1357   : > { %9688 = vpow2.f32 %v5174_v47  ;;  %v14536_v47 = vld [vmem:[#allocation40_spill] sm:$0xff] }
0x1358   : > { %5196 = vadd.xlane.f32.xlu1 %v12592_v7  ;;  %9690 = vpow2.f32 %v5172_v12  ;;  %v14535_v12 = vld [vmem:[#allocation35_spill] sm:$0xff] }
0x1359   : > { %9692 = vpow2.f32 %v5178_v18 }
0x135a   : > { %9694 = vpow2.f32 %v5176_v39  ;;  %v14537_v39 = vld [vmem:[#allocation33_spill] sm:$0xff] }
0x135c   : > { %5198 = vadd.xlane.f32.xlu0 %v12597_v15  ;;  %5202 = vadd.xlane.f32.xlu1 %v12595_v63 }
0x1360   : > { %5200 = vadd.xlane.f32.xlu0 %v12601_v38 }
0x1361   : > { %v12604_v32 = vpop.eup %9688 }
0x1362   : > { %5206 = vadd.xlane.f32.xlu1 %v12604_v32  ;;  %v12607_v23 = vpop.eup %9690 }
0x1363   : > { %v12610_v26 = vpop.eup %9692 }
0x1364   : > { %5204 = vadd.xlane.f32.xlu0 %v12607_v23  ;;  %v12613_v16 = vpop.eup %9694 }
0x1366   : > { %5210 = vadd.xlane.f32.xlu1 %v12610_v26 }
0x1368   : > { %5208 = vadd.xlane.f32.xlu0 %v12613_v16 }
0x1377   : > { %2304 = vrot.lane.b32.xlu1 %v11377_v54, %s10117_s22  ;;  %v14522_v54 = vld [vmem:[#allocation18_spill] sm:$0xff] }
0x137b   : > { %2306 = vrot.lane.b32.xlu1 %v11371_v52, %s10117_s22  ;;  %v14523_v52 = vld [vmem:[#allocation19_spill] sm:$0xff] }
0x137e   : > { %2302 = vrot.lane.b32.xlu0 %v14517_v41, %s10117_s22  ;;  %v14538_v41 = vld [vmem:[#allocation37_spill] sm:$0xff] }
0x137f   : > { %2308 = vrot.lane.b32.xlu1 %v14518_v13, %s10117_s22 }
0x1382   : > { %2833 = vrot.lane.b32.xlu0 %v14519_v35, %s10116_s13  ;;  %v14539_v35 = vld [vmem:[#allocation7_spill] sm:$0xff] }
0x1383   : > { %2835 = vrot.lane.b32.xlu1 %v14520_v34, %s10116_s13  ;;  %v14540_v34 = vld [vmem:[#allocation44_spill] sm:$0xff] }
0x1386   : > { %2837 = vrot.lane.b32.xlu0 %v14521_v50, %s10116_s13 }
0x1387   : > { %2839 = vrot.lane.b32.xlu1 %v14522_v54, %s10116_s13 }
0x138a   : > { %3364 = vrot.lane.b32.xlu0 %v14523_v52, %s10115_s12  ;;  %v14541_v52 = vld [vmem:[#allocation9_spill] sm:$0xff] }
0x138b   : > { %3366 = vrot.lane.b32.xlu1 %v14524_v10, %s10115_s12  ;;  %v14542_v10 = vld [vmem:[#allocation43_spill] sm:$0xff] }
0x138e   : > { %3368 = vrot.lane.b32.xlu0 %v14525_v48, %s10115_s12 }
0x138f   : > { %3370 = vrot.lane.b32.xlu1 %v14526_v1, %s10115_s12 }
0x1392   : > { %2310 = vrot.lane.b32.xlu0 %v14527_v46, %s10117_s22  ;;  %v14543_v46 = vld [vmem:[#allocation31_spill] sm:$0xff] }
0x1393   : > { %2312 = vrot.lane.b32.xlu1 %v14528_v14, %s10117_s22  ;;  %v14544_v14 = vld [vmem:[#allocation39_spill] sm:$0xff] }
0x1396   : > { %2314 = vrot.lane.b32.xlu0 %v14529_v57, %s10117_s22 }
0x1397   : > { %2316 = vrot.lane.b32.xlu1 %v14530_v30, %s10117_s22 }
0x139a   : > { %2841 = vrot.lane.b32.xlu0 %v14531_v25, %s10116_s13  ;;  %v14545_v25 = vld [vmem:[#allocation32_spill] sm:$0xff] }
0x139b   : > { %2843 = vrot.lane.b32.xlu1 %v14532_v19, %s10116_s13 }
0x139e   : > { %2845 = vrot.lane.b32.xlu0 %v14533_v8, %s10116_s13  ;;  %v14546_v8 = vld [vmem:[#allocation41_spill] sm:$0xff] }
0x139f   : > { %2847 = vrot.lane.b32.xlu1 %v14534_v58, %s10116_s13 }
0x13a0   : > { %v5185_v21 = vpop.xlane.xlu1 %5184 }
0x13a2   : > { %3372 = vrot.lane.b32.xlu0 %v14535_v12, %s10115_s12 }
0x13a3   : > { %3374 = vrot.lane.b32.xlu1 %v14536_v47, %s10115_s12 }
0x13a4   : > { %v5181_v18 = vpop.xlane.xlu1 %5180 }
0x13a5   : > { %9696 = vrcp.f32 %v5181_v18 }
0x13a6   : > { %3376 = vrot.lane.b32.xlu0 %v14537_v39, %s10115_s12 }
0x13a7   : > { %3378 = vrot.lane.b32.xlu1 %v14538_v41, %s10115_s12  ;;  %v14547_v41 = vld [vmem:[#allocation24_spill] sm:$0xff] }
0x13a8   : > { %v5187_v13 = vpop.xlane.xlu1 %5186 }
0x13aa   : > { %2318 = vrot.lane.b32.xlu0 %v14539_v35, %s10117_s22 }
0x13ab   : > { %2320 = vrot.lane.b32.xlu1 %v14540_v34, %s10117_s22  ;;  %v14548_v34 = vld [vmem:[#allocation30_spill] sm:$0xff] }
0x13ac   : > { %v5183_v50 = vpop.xlane.xlu1 %5182  ;;  %v5193_v54 = vpop.xlane.xlu0 %5192 }
0x13ad   : > { %9698 = vrcp.f32 %v5183_v50 }
0x13ae   : > { %9700 = vrcp.f32 %v5187_v13  ;;  %2322 = vrot.lane.b32.xlu0 %v14541_v52, %s10117_s22 }
0x13af   : > { %2324 = vrot.lane.b32.xlu1 %v14542_v10, %s10117_s22  ;;  %9702 = vrcp.f32 %v5185_v21  ;;  %v9697_v30 = vpop.eup %9696  ;;  %v14550_v10 = vld [vmem:[#allocation28_spill] sm:$0xff] }
0x13b0   : > { %v5189_v48 = vpop.xlane.xlu1 %5188  ;;  %v5195_v1 = vpop.xlane.xlu0 %5194  ;;  %v5228_v12 = vmul.f32 %v9697_v30, %v12559_v61  ;;  %v9080_v61 = vld [vmem:[%s14304_s3] sm:$0xff]  }
0x13b1   : > { %9704 = vrcp.f32 %v5189_v48  ;;  %v9081_v48 = vld [vmem:[%s14304_s3 + $0x8] sm:$0xff]  }
0x13b2   : > { %2849 = vrot.lane.b32.xlu0 %v14543_v46, %s10116_s13 }
0x13b3   : > { %2851 = vrot.lane.b32.xlu1 %v14544_v14, %s10116_s13 }
0x13b4   : > { %v5191_v57 = vpop.xlane.xlu0 %5190  ;;  %v5267_v39 = vpop.permute.xlu1 %5266 }
0x13b5   : > { %9706 = vrcp.f32 %v5191_v57  ;;  %v14551_v57 = vld [vmem:[#allocation46_spill] sm:$0xff] }
0x13b6   : > { %9708 = vrcp.f32 %v5195_v1  ;;  %2853 = vrot.lane.b32.xlu0 %v14545_v25, %s10116_s13  ;;  %v14552_v25 = vld [vmem:[#allocation48_spill] sm:$0xff] }
0x13b7   : > { %v9699_v19 = vpop.eup %9698  ;;  %2855 = vrot.lane.b32.xlu1 %v14546_v8, %s10116_s13  ;;  %9710 = vrcp.f32 %v5193_v54  ;;  %v14549_v54 = vld [vmem:[#allocation20_spill] sm:$0xff] }
0x13b8   : > { %v9701_v58 = vpop.eup %9700  ;;  %v5265_v21 = vpop.permute.xlu0 %5264  ;;  %v5229_v47 = vmul.f32 %v9699_v19, %v12565_v36  ;;  %v9082_v8 = vld [vmem:[%s14304_s3 + $0x10] sm:$0xff]  }
0x13b9   : > { %8871 = vmatprep.subr.bf16.mxu0 %v5265_v21  ;;  %v9703_v18 = vpop.eup %9702  ;;  %v5231_v35 = vmul.f32 %v9701_v58, %v12562_v29  ;;  %v14554_v58 = vld [vmem:[#allocation47_spill] sm:$0xff] }
0x13ba   : > { %3380 = vrot.lane.b32.xlu0 %v14547_v41, %s10115_s12  ;;  %8872 = vmatpush3.bf16.msra.mxu0 %v5265_v21  ;;  %v5244_v13 = vpack.c.bf16 %v5229_v47, %v5228_v12  ;;  %v5230_v50 = vmul.f32 %v9703_v18, %v12556_v24  ;;  %v14555_v12 = vld [vmem:[#allocation50_spill] sm:$0xff]  ;;  %v14557_v18 = vld [vmem:[#allocation49_spill] sm:$0xff]  ;;  %v9085_v41 = vld [vmem:[%s14304_s3 + $0x28] sm:$0xff]  }
0x13bb   : > { %3382 = vrot.lane.b32.xlu1 %v14548_v34, %s10115_s12  ;;  %8873 = vmatprep.subr.bf16.mxu0 %v5267_v39  ;;  %v9705_v36 = vpop.eup %9704  ;;  %v9084_v47 = vld [vmem:[%s14304_s3 + $0x20] sm:$0xff]   ;;  %v9086_v34 = vld [vmem:[%s14304_s3 + $0x30] sm:$0xff]  }
0x13bc   : > { %8875 = vmatprep.mubr.bf16.mxu0 %v5244_v13  ;;  %v5245_v29 = vpack.c.bf16 %v5231_v35, %v5230_v50  ;;  %v5232_v46 = vmul.f32 %v9705_v36, %v12573_v60  ;;  %v14559_v13 = vld [vmem:[#allocation36_spill] sm:$0xff]  ;;  %v14560_v35 = vld [vmem:[#allocation42_spill] sm:$0xff]  ;;  %v9087_v50 = vld [vmem:[%s14304_s3 + $0x38] sm:$0xff]  }
0x13bd   : > { %v14562_v36 = vld [vmem:[#allocation38_spill] sm:$0xff] }
0x13be   : > { %3384 = vrot.lane.b32.xlu0 %v14549_v54, %s10115_s12  ;;  %8874 = vmatpush3.bf16.msra.mxu0 %v5267_v39  ;;  %v14558_v39 = vld [vmem:[#allocation51_spill] sm:$0xff] }
0x13bf   : > { %v9707_v52 = vpop.eup %9706  ;;  %3386 = vrot.lane.b32.xlu1 %v14550_v10, %s10115_s12  ;;  %8891 = vmatprep.subr.bf16.mxu0 %v9080_v61 }
0x13c0   : > { %v9709_v1 = vpop.eup %9708  ;;  %v5233_v14 = vmul.f32 %v9707_v52, %v12577_v51  ;;  %v14553_v51 = vld [vmem:[#allocation45_spill] sm:$0xff] }
0x13c1   : > { %8876 = vmatmul.mubr.bf16.vlgmr.msra.gmra.mrb[176].mxu0 %v5245_v29  ;;  %v9711_v24 = vpop.eup %9710  ;;  %v5235_v19 = vmul.f32 %v9709_v1, %v12571_v40  ;;  %v9083_v40 = vld [vmem:[%s14304_s3 + $0x18] sm:$0xff]  }
0x13c2   : > { %2326 = vrot.lane.b32.xlu0 %v14551_v57, %s10117_s22  ;;  %v5246_v30 = vpack.c.bf16 %v5233_v14, %v5232_v46  ;;  %8892 = vmatpush3.bf16.msra.mxu0 %v9080_v61  ;;  %v5234_v60 = vmul.f32 %v9711_v24, %v12567_v17  ;;  %v14556_v17 = vld [vmem:[#allocation52_spill] sm:$0xff]  ;;  %v14561_v61 = vld [vmem:[#allocation34_spill] sm:$0xff] }
0x13c3   : > { %2328 = vrot.lane.b32.xlu1 %v14552_v25, %s10117_s22  ;;  %8893 = vmatprep.subr.bf16.mxu0 %v9081_v48 }
0x13c4   : > { %8879 = vmatprep.mubr.bf16.mxu0 %v5246_v30  ;;  %v5247_v21 = vpack.c.bf16 %v5235_v19, %v5234_v60 }
0x13c6   : > { %2330 = vrot.lane.b32.xlu0 %v14553_v51, %s10117_s22  ;;  %8894 = vmatpush3.bf16.msra.mxu0 %v9081_v48 }
0x13c7   : > { %2332 = vrot.lane.b32.xlu1 %v14554_v58, %s10117_s22  ;;  %8895 = vmatprep.subr.bf16.mxu0 %v9082_v8 }
0x13c9   : > { %8880 = vmatmul.mubr.bf16.gmra.mrb[180].mxu0 %v5247_v21 }
0x13ca   : > { %2857 = vrot.lane.b32.xlu0 %v14555_v12, %s10116_s13  ;;  %8896 = vmatpush3.bf16.msra.mxu0 %v9082_v8 }
0x13cb   : > { %2859 = vrot.lane.b32.xlu1 %v14556_v17, %s10116_s13  ;;  %8897 = vmatprep.subr.bf16.mxu0 %v9083_v40 }
0x13ce   : > { %2861 = vrot.lane.b32.xlu0 %v14557_v18, %s10116_s13  ;;  %8898 = vmatpush3.bf16.msra.mxu0 %v9083_v40 }
0x13cf   : > { %2863 = vrot.lane.b32.xlu1 %v14558_v39, %s10116_s13  ;;  %8899 = vmatprep.subr.bf16.mxu0 %v9084_v47 }
0x13d2   : > { %3388 = vrot.lane.b32.xlu0 %v14559_v13, %s10115_s12  ;;  %8900 = vmatpush3.bf16.msra.mxu0 %v9084_v47 }
0x13d3   : > { %3390 = vrot.lane.b32.xlu1 %v14560_v35, %s10115_s12  ;;  %8901 = vmatprep.subr.bf16.mxu0 %v9085_v41 }
0x13d6   : > { %3392 = vrot.lane.b32.xlu0 %v14561_v61, %s10115_s12  ;;  %8902 = vmatpush3.bf16.msra.mxu0 %v9085_v41 }
0x13d7   : > { %3394 = vrot.lane.b32.xlu1 %v14562_v36, %s10115_s12  ;;  %8903 = vmatprep.subr.bf16.mxu0 %v9086_v34 }
0x13da   : > { %4329 = vrot.lane.b32.xlu0 %v12289_v49, %s10117_s22  ;;  %8904 = vmatpush3.bf16.msra.mxu0 %v9086_v34 }
0x13db   : > { %4331 = vrot.lane.b32.xlu1 %v12293_v53, %s10117_s22  ;;  %8905 = vmatprep.subr.bf16.mxu0 %v9087_v50 }
0x13de   : > { %4333 = vrot.lane.b32.xlu0 %v12287_v37, %s10117_s22  ;;  %8906 = vmatpush3.bf16.msra.mxu0 %v9087_v50 }
0x13df   : > { %4335 = vrot.lane.b32.xlu1 %v12291_v22, %s10117_s22 }
0x13e2   : > { %4859 = vrot.lane.b32.xlu0 %v12498_v55, %s10116_s13 }
0x13e3   : > { %4861 = vrot.lane.b32.xlu1 %v12502_v43, %s10116_s13 }
0x13e5   : > { %v5197_v54 = vpop.xlane.xlu1 %5196 }
0x13e6   : > { %4863 = vrot.lane.b32.xlu0 %v12496_v2, %s10116_s13  ;;  %9712 = vrcp.f32 %v5197_v54 }
0x13e7   : > { %4865 = vrot.lane.b32.xlu1 %v12500_v9, %s10116_s13 }
0x13e9   : > { %v5203_v49 = vpop.xlane.xlu1 %5202  ;;  %v5199_v37 = vpop.xlane.xlu0 %5198 }
0x13ea   : > { %4337 = vrot.lane.b32.xlu0 %v12297_v45, %s10117_s22  ;;  %9714 = vrcp.f32 %v5199_v37 }
0x13eb   : > { %4339 = vrot.lane.b32.xlu1 %v12301_v28, %s10117_s22  ;;  %9716 = vrcp.f32 %v5203_v49 }
0x13ed   : > { %v5201_v22 = vpop.xlane.xlu0 %5200 }
0x13ee   : > { %9718 = vrcp.f32 %v5201_v22  ;;  %4341 = vrot.lane.b32.xlu0 %v12295_v42, %s10117_s22 }
0x13ef   : > { %4343 = vrot.lane.b32.xlu1 %v12299_v3, %s10117_s22  ;;  %v5207_v53 = vpop.xlane.xlu1 %5206 }
0x13f0   : > { %9720 = vrcp.f32 %v5207_v53  ;;  %v9713_v45 = vpop.eup %9712 }
0x13f1   : > { %v5205_v2 = vpop.xlane.xlu0 %5204  ;;  %v5236_v3 = vmul.f32 %v9713_v45, %v12592_v7  ;;  %v14564_v7 = vld [vmem:[#allocation56_spill] sm:$0xff] }
0x13f2   : > { %9722 = vrcp.f32 %v5205_v2  ;;  %4867 = vrot.lane.b32.xlu0 %v12506_v27, %s10116_s13 }
0x13f3   : > { %4869 = vrot.lane.b32.xlu1 %v12510_v5, %s10116_s13  ;;  %v5211_v28 = vpop.xlane.xlu1 %5210 }
0x13f4   : > { %9724 = vrcp.f32 %v5211_v28  ;;  %v9715_v55 = vpop.eup %9714 }
0x13f5   : > { %v5209_v9 = vpop.xlane.xlu0 %5208  ;;  %v9717_v42 = vpop.eup %9716  ;;  %v5237_v43 = vmul.f32 %v9715_v55, %v12597_v15 }
0x13f6   : > { %9726 = vrcp.f32 %v5209_v9  ;;  %4871 = vrot.lane.b32.xlu0 %v12504_v20, %s10116_s13  ;;  %v5239_v48 = vmul.f32 %v9717_v42, %v12595_v63  ;;  %v14563_v20 = vld [vmem:[#allocation54_spill] sm:$0xff] }
0x13f7   : > { %4873 = vrot.lane.b32.xlu1 %v12508_v31, %s10116_s13  ;;  %v2305_v27 = vpop.permute.xlu1 %2304  ;;  %v5248_v5 = vpack.c.bf16 %v5237_v43, %v5236_v3 }
0x13f8   : > { %v9719_v52 = vpop.eup %9718  ;;  %2352 = vst.msk [vmem:[#allocation2 + $0x8] sm:$0xff] %vm2350_vm1, %v2305_v27 }
0x13f9   : > { %v2303_v10 = vpop.permute.xlu0 %2302  ;;  %v5238_v29 = vmul.f32 %v9719_v52, %v12601_v38  ;;  %8883 = vmatprep.mubr.bf16.mxu0 %v5248_v5 }
0x13fa   : > { %v9721_v1 = vpop.eup %9720  ;;  %2351 = vst.msk [vmem:[#allocation2] sm:$0xff] %vm2350_vm1, %v2303_v10  ;;  %4345 = vrot.lane.b32.xlu0 %v14563_v20, %s10117_s22 }
0x13fb   : > { %4347 = vrot.lane.b32.xlu1 %v14564_v7, %s10117_s22  ;;  %v2307_v31 = vpop.permute.xlu1 %2306  ;;  %v5249_v15 = vpack.c.bf16 %v5239_v48, %v5238_v29  ;;  %v5241_v14 = vmul.f32 %v9721_v1, %v12604_v32 }
0x13fc   : > { %v9723_v46 = vpop.eup %9722  ;;  %2353 = vst.msk [vmem:[#allocation2 + $0x10] sm:$0xff] %vm2350_vm1, %v2307_v31 }
0x13fd   : > { %8884 = vmatmul.mubr.bf16.gmra.mrb[184].mxu0 %v5249_v15  ;;  %v2834_v38 = vpop.permute.xlu0 %2833  ;;  %v5240_v63 = vmul.f32 %v9723_v46, %v12607_v23 }
0x13fe   : > { %v9725_v24 = vpop.eup %9724  ;;  %2882 = vst.msk [vmem:[#allocation2] sm:$0xff] %vm2881_vm2, %v2834_v38 }
0x13ff   : > { %v2309_v57 = vpop.permute.xlu1 %2308  ;;  %v5250_v30 = vpack.c.bf16 %v5241_v14, %v5240_v63  ;;  %v5243_v60 = vmul.f32 %v9725_v24, %v12610_v26 }
0x1400   : > { %v9727_v25 = vpop.eup %9726  ;;  %2354 = vst.msk [vmem:[#allocation2 + $0x18] sm:$0xff] %vm2350_vm1, %v2309_v57 }
0x1401   : > { %8887 = vmatprep.mubr.bf16.mxu0 %v5250_v30  ;;  %v2838_v19 = vpop.permute.xlu0 %2837  ;;  %v5242_v8 = vmul.f32 %v9727_v25, %v12613_v16 }
0x1402   : > { %2884 = vst.msk [vmem:[#allocation2 + $0x10] sm:$0xff] %vm2881_vm2, %v2838_v19 }
0x1403   : > { %v2836_v51 = vpop.permute.xlu1 %2835  ;;  %v5251_v23 = vpack.c.bf16 %v5243_v60, %v5242_v8 }
0x1404   : > { %2883 = vst.msk [vmem:[#allocation2 + $0x8] sm:$0xff] %vm2881_vm2, %v2836_v51 }
0x1405   : > { %8888 = vmatmul.mubr.bf16.gmra.mrb[188].mxu0 %v5251_v23  ;;  %v3365_v32 = vpop.permute.xlu0 %3364 }
0x1406   : > { %3413 = vst.msk [vmem:[#allocation2] sm:$0xff] %vm3412_vm3, %v3365_v32 }
0x1407   : > { %v2840_v58 = vpop.permute.xlu1 %2839 }
0x1408   : > { %2885 = vst.msk [vmem:[#allocation2 + $0x18] sm:$0xff] %vm2881_vm2, %v2840_v58 }
0x1409   : > { %v3369_v21 = vpop.permute.xlu0 %3368 }
0x140a   : > { %3415 = vst.msk [vmem:[#allocation2 + $0x10] sm:$0xff] %vm3412_vm3, %v3369_v21 }
0x140b   : > { %v3367_v16 = vpop.permute.xlu1 %3366 }
0x140c   : > { %3414 = vst.msk [vmem:[#allocation2 + $0x8] sm:$0xff] %vm3412_vm3, %v3367_v16 }
0x140d   : > { %v2311_v26 = vpop.permute.xlu0 %2310  ;;  %v5453_v47 = vld [vmem:[#allocation2] sm:$0xff] }
0x140e   : > { %2355 = vst.msk [vmem:[#allocation2 + $0x20] sm:$0xff] %vm2350_vm1, %v2311_v26 }
0x140f   : > { %v3371_v40 = vpop.permute.xlu1 %3370 }
0x1410   : > { %3416 = vst.msk [vmem:[#allocation2 + $0x18] sm:$0xff] %vm3412_vm3, %v3371_v40 }
0x1411   : > { %v2315_v12 = vpop.permute.xlu0 %2314  ;;  %v5455_v35 = vld [vmem:[#allocation2 + $0x10] sm:$0xff] }
0x1412   : > { %2357 = vst.msk [vmem:[#allocation2 + $0x30] sm:$0xff] %vm2350_vm1, %v2315_v12 }
0x1413   : > { %v2313_v17 = vpop.permute.xlu1 %2312  ;;  %v5454_v18 = vld [vmem:[#allocation2 + $0x8] sm:$0xff] }
0x1414   : > { %2356 = vst.msk [vmem:[#allocation2 + $0x28] sm:$0xff] %vm2350_vm1, %v2313_v17  ;;  %v5485_v39 = vpack.c.bf16 %v5454_v18, %v5453_v47 }
0x1415   : > { %v2842_v41 = vpop.permute.xlu0 %2841 }
0x1416   : > { %2886 = vst.msk [vmem:[#allocation2 + $0x20] sm:$0xff] %vm2881_vm2, %v2842_v41  ;;  %8907 = vmatprep.mubr.bf16.mxu0 %v5485_v39 }
0x1417   : > { %v2317_v13 = vpop.permute.xlu1 %2316  ;;  %v5456_v34 = vld [vmem:[#allocation2 + $0x18] sm:$0xff] }
0x1418   : > { %2358 = vst.msk [vmem:[#allocation2 + $0x38] sm:$0xff] %vm2350_vm1, %v2317_v13  ;;  %v5486_v61 = vpack.c.bf16 %v5456_v34, %v5455_v35 }
0x1419   : > { %v2846_v36 = vpop.permute.xlu0 %2845 }
0x141a   : > { %2888 = vst.msk [vmem:[#allocation2 + $0x30] sm:$0xff] %vm2881_vm2, %v2846_v36  ;;  %8908 = vmatmul.mubr.bf16.vlgmr.msra.gmra.mrb[192].mxu0 %v5486_v61 }
0x141b   : > { %v2844_v50 = vpop.permute.xlu1 %2843 }
0x141c   : > { %2887 = vst.msk [vmem:[#allocation2 + $0x28] sm:$0xff] %vm2881_vm2, %v2844_v50 }
0x141d   : > { %v3373_v54 = vpop.permute.xlu0 %3372 }
0x141e   : > { %3417 = vst.msk [vmem:[#allocation2 + $0x20] sm:$0xff] %vm3412_vm3, %v3373_v54 }
0x141f   : > { %v2848_v49 = vpop.permute.xlu1 %2847 }
0x1420   : > { %2889 = vst.msk [vmem:[#allocation2 + $0x38] sm:$0xff] %vm2881_vm2, %v2848_v49 }
0x1421   : > { %v3377_v37 = vpop.permute.xlu0 %3376 }
0x1422   : > { %3419 = vst.msk [vmem:[#allocation2 + $0x30] sm:$0xff] %vm3412_vm3, %v3377_v37 }
0x1423   : > { %v3375_v22 = vpop.permute.xlu1 %3374 }
0x1424   : > { %3418 = vst.msk [vmem:[#allocation2 + $0x28] sm:$0xff] %vm3412_vm3, %v3375_v22 }
0x1425   : > { %v2319_v53 = vpop.permute.xlu0 %2318  ;;  %v5457_v55 = vld [vmem:[#allocation2 + $0x20] sm:$0xff] }
0x1426   : > { %2359 = vst.msk [vmem:[#allocation2 + $0x40] sm:$0xff] %vm2350_vm1, %v2319_v53 }
0x1427   : > { %v3379_v2 = vpop.permute.xlu1 %3378 }
0x1428   : > { %3420 = vst.msk [vmem:[#allocation2 + $0x38] sm:$0xff] %vm3412_vm3, %v3379_v2 }
0x1429   : > { %v2323_v45 = vpop.permute.xlu0 %2322  ;;  %v5459_v27 = vld [vmem:[#allocation2 + $0x30] sm:$0xff] }
0x142a   : > { %2361 = vst.msk [vmem:[#allocation2 + $0x50] sm:$0xff] %vm2350_vm1, %v2323_v45 }
0x142b   : > { %v2321_v28 = vpop.permute.xlu1 %2320  ;;  %v5458_v9 = vld [vmem:[#allocation2 + $0x28] sm:$0xff] }
0x142c   : > { %2360 = vst.msk [vmem:[#allocation2 + $0x48] sm:$0xff] %vm2350_vm1, %v2321_v28  ;;  %v5487_v42 = vpack.c.bf16 %v5458_v9, %v5457_v55 }
0x142d   : > { %v2850_v3 = vpop.permute.xlu0 %2849 }
0x142e   : > { %2890 = vst.msk [vmem:[#allocation2 + $0x40] sm:$0xff] %vm2881_vm2, %v2850_v3  ;;  %8911 = vmatprep.mubr.bf16.mxu0 %v5487_v42 }
0x142f   : > { %v2325_v43 = vpop.permute.xlu1 %2324  ;;  %v5460_v52 = vld [vmem:[#allocation2 + $0x38] sm:$0xff] }
0x1430   : > { %2362 = vst.msk [vmem:[#allocation2 + $0x58] sm:$0xff] %vm2350_vm1, %v2325_v43  ;;  %v5488_v5 = vpack.c.bf16 %v5460_v52, %v5459_v27 }
0x1431   : > { %v2854_v10 = vpop.permute.xlu0 %2853 }
0x1432   : > { %2892 = vst.msk [vmem:[#allocation2 + $0x50] sm:$0xff] %vm2881_vm2, %v2854_v10  ;;  %8912 = vmatmul.mubr.bf16.gmra.mrb[196].mxu0 %v5488_v5  ;;  %v14565_v5 = vld [vmem:[#allocation53_spill] sm:$0xff] }
0x1433   : > { %v2852_v29 = vpop.permute.xlu1 %2851 }
0x1434   : > { %2891 = vst.msk [vmem:[#allocation2 + $0x48] sm:$0xff] %vm2881_vm2, %v2852_v29 }
0x1435   : > { %v3381_v48 = vpop.permute.xlu0 %3380 }
0x1436   : > { %3421 = vst.msk [vmem:[#allocation2 + $0x40] sm:$0xff] %vm3412_vm3, %v3381_v48  ;;  %v14566_v48 = vld [vmem:[#allocation55_spill] sm:$0xff] }
0x1437   : > { %v2856_v1 = vpop.permute.xlu1 %2855 }
0x1438   : > { %2893 = vst.msk [vmem:[#allocation2 + $0x58] sm:$0xff] %vm2881_vm2, %v2856_v1 }
0x1439   : > { %v3385_v20 = vpop.permute.xlu0 %3384 }
0x143a   : > { %3423 = vst.msk [vmem:[#allocation2 + $0x50] sm:$0xff] %vm3412_vm3, %v3385_v20  ;;  %v14567_v20 = vld [vmem:[#allocation58_spill] sm:$0xff] }
0x143b   : > { %v3383_v7 = vpop.permute.xlu1 %3382 }
0x143c   : > { %3422 = vst.msk [vmem:[#allocation2 + $0x48] sm:$0xff] %vm3412_vm3, %v3383_v7 }
0x143d   : > { %v2327_v31 = vpop.permute.xlu0 %2326  ;;  %v5461_v63 = vld [vmem:[#allocation2 + $0x40] sm:$0xff] }
0x143e   : > { %2363 = vst.msk [vmem:[#allocation2 + $0x60] sm:$0xff] %vm2350_vm1, %v2327_v31 }
0x143f   : > { %v3387_v15 = vpop.permute.xlu1 %3386 }
0x1440   : > { %3424 = vst.msk [vmem:[#allocation2 + $0x58] sm:$0xff] %vm3412_vm3, %v3387_v15 }
0x1441   : > { %v2331_v46 = vpop.permute.xlu0 %2330  ;;  %v5463_v25 = vld [vmem:[#allocation2 + $0x50] sm:$0xff] }
0x1442   : > { %2365 = vst.msk [vmem:[#allocation2 + $0x70] sm:$0xff] %vm2350_vm1, %v2331_v46 }
0x1443   : > { %v2329_v38 = vpop.permute.xlu1 %2328  ;;  %v5462_v14 = vld [vmem:[#allocation2 + $0x48] sm:$0xff] }
0x1444   : > { %2364 = vst.msk [vmem:[#allocation2 + $0x68] sm:$0xff] %vm2350_vm1, %v2329_v38  ;;  %v5489_v24 = vpack.c.bf16 %v5462_v14, %v5461_v63  ;;  %v14570_v63 = vld [vmem:[#allocation59_spill] sm:$0xff] }
0x1445   : > { %v2858_v57 = vpop.permute.xlu0 %2857 }
0x1446   : > { %2894 = vst.msk [vmem:[#allocation2 + $0x60] sm:$0xff] %vm2881_vm2, %v2858_v57  ;;  %8915 = vmatprep.mubr.bf16.mxu0 %v5489_v24 }
0x1447   : > { %v2333_v30 = vpop.permute.xlu1 %2332  ;;  %v5464_v19 = vld [vmem:[#allocation2 + $0x58] sm:$0xff] }
0x1448   : > { %2366 = vst.msk [vmem:[#allocation2 + $0x78] sm:$0xff] %vm2350_vm1, %v2333_v30  ;;  %v5490_v8 = vpack.c.bf16 %v5464_v19, %v5463_v25 }
0x1449   : > { %v2862_v60 = vpop.permute.xlu0 %2861 }
0x144a   : > { %2896 = vst.msk [vmem:[#allocation2 + $0x70] sm:$0xff] %vm2881_vm2, %v2862_v60  ;;  %8916 = vmatmul.mubr.bf16.gmra.mrb[200].mxu0 %v5490_v8 }
0x144b   : > { %v2860_v51 = vpop.permute.xlu1 %2859 }
0x144c   : > { %2895 = vst.msk [vmem:[#allocation2 + $0x68] sm:$0xff] %vm2881_vm2, %v2860_v51  ;;  %v5732_v51 = vld [vmem:[%s10218_s21 + $0x10] sm:$0xff] }
0x144d   : > { %v3389_v23 = vpop.permute.xlu0 %3388 }
0x144e   : > { %3425 = vst.msk [vmem:[#allocation2 + $0x60] sm:$0xff] %vm3412_vm3, %v3389_v23 }
0x144f   : > { %v2864_v32 = vpop.permute.xlu1 %2863 }
0x1450   : > { %2897 = vst.msk [vmem:[#allocation2 + $0x78] sm:$0xff] %vm2881_vm2, %v2864_v32 }
0x1451   : > { %v3393_v58 = vpop.permute.xlu0 %3392 }
0x1452   : > { %3427 = vst.msk [vmem:[#allocation2 + $0x70] sm:$0xff] %vm3412_vm3, %v3393_v58 }
0x1453   : > { %v3391_v21 = vpop.permute.xlu1 %3390 }
0x1454   : > { %3426 = vst.msk [vmem:[#allocation2 + $0x68] sm:$0xff] %vm3412_vm3, %v3391_v21 }
0x1455   : > { %v4330_v16 = vpop.permute.xlu0 %4329  ;;  %v5465_v17 = vld [vmem:[#allocation2 + $0x60] sm:$0xff] }
0x1456   : > { %4377 = vst.msk [vmem:[#allocation2 + $0x80] sm:$0xff] %vm2350_vm1, %v4330_v16 }
0x1457   : > { %v3395_v26 = vpop.permute.xlu1 %3394 }
0x1458   : > { %3428 = vst.msk [vmem:[#allocation2 + $0x78] sm:$0xff] %vm3412_vm3, %v3395_v26 }
0x1459   : > { %v4334_v40 = vpop.permute.xlu0 %4333  ;;  %v5467_v13 = vld [vmem:[#allocation2 + $0x70] sm:$0xff] }
0x145a   : > { %4379 = vst.msk [vmem:[#allocation2 + $0x90] sm:$0xff] %vm2350_vm1, %v4334_v40 }
0x145b   : > { %v4332_v12 = vpop.permute.xlu1 %4331  ;;  %v5466_v47 = vld [vmem:[#allocation2 + $0x68] sm:$0xff] }
0x145c   : > { %4378 = vst.msk [vmem:[#allocation2 + $0x88] sm:$0xff] %vm2350_vm1, %v4332_v12  ;;  %v5491_v18 = vpack.c.bf16 %v5466_v47, %v5465_v17  ;;  %v5731_v12 = vld [vmem:[%s10218_s21 + $0x8] sm:$0xff]  ;;  %v5733_v17 = vld [vmem:[%s10218_s21 + $0x18] sm:$0xff] }
0x145d   : > { %v4860_v39 = vpop.permute.xlu0 %4859 }
0x145e   : > { %4907 = vst.msk [vmem:[#allocation2 + $0x80] sm:$0xff] %vm2881_vm2, %v4860_v39  ;;  %8919 = vmatprep.mubr.bf16.mxu0 %v5491_v18 }
0x145f   : > { %v4336_v41 = vpop.permute.xlu1 %4335  ;;  %v5468_v35 = vld [vmem:[#allocation2 + $0x78] sm:$0xff] }
0x1460   : > { %4380 = vst.msk [vmem:[#allocation2 + $0x98] sm:$0xff] %vm2350_vm1, %v4336_v41  ;;  %v5492_v34 = vpack.c.bf16 %v5468_v35, %v5467_v13 }
0x1461   : > { %v4864_v61 = vpop.permute.xlu0 %4863 }
0x1462   : > { %4909 = vst.msk [vmem:[#allocation2 + $0x90] sm:$0xff] %vm2881_vm2, %v4864_v61  ;;  %8920 = vmatmul.mubr.bf16.gmra.mrb[204].mxu0 %v5492_v34  ;;  %v5735_v34 = vld [vmem:[%s10218_s21 + $0x28] sm:$0xff]  ;;  %v5734_v61 = vld [vmem:[%s10218_s21 + $0x20] sm:$0xff] }
0x1463   : > { %v4862_v36 = vpop.permute.xlu1 %4861 }
0x1464   : > { %4908 = vst.msk [vmem:[#allocation2 + $0x88] sm:$0xff] %vm2881_vm2, %v4862_v36 }
0x1465   : > { %v4338_v50 = vpop.permute.xlu0 %4337 }
0x1466   : > { %4381 = vst.msk [vmem:[#allocation2 + $0xa0] sm:$0xff] %vm2350_vm1, %v4338_v50 }
0x1467   : > { %v4866_v54 = vpop.permute.xlu1 %4865 }
0x1468   : > { %4910 = vst.msk [vmem:[#allocation2 + $0x98] sm:$0xff] %vm2881_vm2, %v4866_v54 }
0x1469   : > { %v4342_v49 = vpop.permute.xlu0 %4341 }
0x146a   : > { %4383 = vst.msk [vmem:[#allocation2 + $0xb0] sm:$0xff] %vm2350_vm1, %v4342_v49 }
0x146b   : > { %v4340_v37 = vpop.permute.xlu1 %4339 }
0x146c   : > { %4382 = vst.msk [vmem:[#allocation2 + $0xa8] sm:$0xff] %vm2350_vm1, %v4340_v37 }
0x146d   : > { %v4868_v22 = vpop.permute.xlu0 %4867 }
0x146e   : > { %4911 = vst.msk [vmem:[#allocation2 + $0xa0] sm:$0xff] %vm2881_vm2, %v4868_v22 }
0x146f   : > { %v4344_v53 = vpop.permute.xlu1 %4343 }
0x1470   : > { %4384 = vst.msk [vmem:[#allocation2 + $0xb8] sm:$0xff] %vm2350_vm1, %v4344_v53  ;;  %v5737_v53 = vld [vmem:[%s10218_s21 + $0x38] sm:$0xff] }
0x1471   : > { %v4872_v2 = vpop.permute.xlu0 %4871 }
0x1472   : > { %4913 = vst.msk [vmem:[#allocation2 + $0xb0] sm:$0xff] %vm2881_vm2, %v4872_v2  ;;  %v5736_v2 = vld [vmem:[%s10218_s21 + $0x30] sm:$0xff] }
0x1473   : > { %v4870_v45 = vpop.permute.xlu1 %4869 }
0x1474   : > { %4912 = vst.msk [vmem:[#allocation2 + $0xa8] sm:$0xff] %vm2881_vm2, %v4870_v45 }
0x1475   : > { %v4346_v28 = vpop.permute.xlu0 %4345 }
0x1476   : > { %4385 = vst.msk [vmem:[#allocation2 + $0xc0] sm:$0xff] %vm2350_vm1, %v4346_v28 }
0x1477   : > { %v4874_v55 = vpop.permute.xlu1 %4873 }
0x1478   : > { %4914 = vst.msk [vmem:[#allocation2 + $0xb8] sm:$0xff] %vm2881_vm2, %v4874_v55 }
0x147b   : > { %v4348_v9 = vpop.permute.xlu1 %4347 }
0x147c   : > { %4386 = vst.msk [vmem:[#allocation2 + $0xc8] sm:$0xff] %vm2350_vm1, %v4348_v9 }
0x1494   : > { %v8877_v42 = vpop.f32.mrb[176].mxu0 }
0x1495   : > { %5393 = vrot.lane.b32.xlu0 %v8877_v42, %s10115_s12  ;;  %v5310_v3 = vpop.f32.mrb[177].mxu0 }
0x1496   : > { %v8878_v43 = vpop.f32.mrb[178].mxu0 }
0x1497   : > { %5395 = vrot.lane.b32.xlu1 %v8878_v43, %s10115_s12  ;;  %v5313_v27 = vpop.f32.mrb[179].mxu0 }
0x1499   : > { %5389 = vrot.lane.b32.xlu0 %v5310_v3, %s10115_s12 }
0x149b   : > { %5391 = vrot.lane.b32.xlu1 %v5313_v27, %s10115_s12 }
0x149c   : > { %v8881_v52 = vpop.f32.mrb[180].mxu0 }
0x149d   : > { %4349 = vrot.lane.b32.xlu0 %v14565_v5, %s10117_s22  ;;  %v5326_v10 = vpop.f32.mrb[181].mxu0 }
0x149e   : > { %v8882_v29 = vpop.f32.mrb[182].mxu0 }
0x149f   : > { %4351 = vrot.lane.b32.xlu1 %v14566_v48, %s10117_s22  ;;  %v5329_v1 = vpop.f32.mrb[183].mxu0 }
0x14a1   : > { %4875 = vrot.lane.b32.xlu0 %v12514_v4, %s10116_s13  ;;  %v14568_v4 = vld [vmem:[#allocation60_spill] sm:$0xff] }
0x14a3   : > { %4877 = vrot.lane.b32.xlu1 %v12518_v6, %s10116_s13 }
0x14a5   : > { %5401 = vrot.lane.b32.xlu0 %v8881_v52, %s10115_s12 }
0x14a7   : > { %5403 = vrot.lane.b32.xlu1 %v8882_v29, %s10115_s12 }
0x14a9   : > { %5397 = vrot.lane.b32.xlu0 %v5326_v10, %s10115_s12 }
0x14ab   : > { %5399 = vrot.lane.b32.xlu1 %v5329_v1, %s10115_s12 }
0x14ad   : > { %4879 = vrot.lane.b32.xlu0 %v12512_v56, %s10116_s13 }
0x14af   : > { %4881 = vrot.lane.b32.xlu1 %v12516_v0, %s10116_s13  ;;  %v14569_v0 = vld [vmem:[#allocation57_spill] sm:$0xff] }
0x14b1   : > { %4353 = vrot.lane.b32.xlu0 %v14567_v20, %s10117_s22 }
0x14b3   : > { %4355 = vrot.lane.b32.xlu1 %v14568_v4, %s10117_s22 }
0x14d0   : > { %v8885_v6 = vpop.f32.mrb[184].mxu0 }
0x14d1   : > { %5409 = vrot.lane.b32.xlu0 %v8885_v6, %s10115_s12  ;;  %v5342_v7 = vpop.f32.mrb[185].mxu0  ;;  %v5738_v6 = vld [vmem:[%s10218_s21 + $0x40] sm:$0xff] }
0x14d2   : > { %v8886_v31 = vpop.f32.mrb[186].mxu0 }
0x14d3   : > { %5411 = vrot.lane.b32.xlu1 %v8886_v31, %s10115_s12  ;;  %v5345_v15 = vpop.f32.mrb[187].mxu0 }
0x14d5   : > { %5405 = vrot.lane.b32.xlu0 %v5342_v7, %s10115_s12 }
0x14d7   : > { %5407 = vrot.lane.b32.xlu1 %v5345_v15, %s10115_s12 }
0x14d8   : > { %v8889_v56 = vpop.f32.mrb[188].mxu0 }
0x14d9   : > { %4357 = vrot.lane.b32.xlu0 %v14569_v0, %s10117_s22  ;;  %v5358_v46 = vpop.f32.mrb[189].mxu0  ;;  %v5739_v0 = vld [vmem:[%s10218_s21 + $0x48] sm:$0xff] }
0x14da   : > { %v8890_v38 = vpop.f32.mrb[190].mxu0 }
0x14db   : > { %4359 = vrot.lane.b32.xlu1 %v14570_v63, %s10117_s22  ;;  %v5361_v14 = vpop.f32.mrb[191].mxu0 }
0x14dd   : > { %4883 = vrot.lane.b32.xlu0 %v12522_v44, %s10116_s13 }
0x14df   : > { %4885 = vrot.lane.b32.xlu1 %v12526_v33, %s10116_s13  ;;  %v5730_v33 = vld [vmem:[%s10218_s21] sm:$0xff] }
0x14e1   : > { %4887 = vrot.lane.b32.xlu0 %v12520_v59, %s10116_s13  ;;  %v12901_v59 = vld [vmem:[%s14308_s7] ss:$0 sm:$0xff] }
0x14e3   : > { %4889 = vrot.lane.b32.xlu1 %v12524_v62, %s10116_s13  ;;  %s10118_s13 = smov [#allocation3]  }
0x14e4   : > { %s10054_s20 = sshll.u32 %s10118_s13, 4  ;;  %s10055_s20 = int_to_ptr.vmem [resolvable:$false] %s10054_s20 }
0x14e5   : > { %5413 = vrot.lane.b32.xlu0 %v5358_v46, %s10115_s12  ;;  %p10057_p0 = scmp.lt.s32.totalorder %s14253_s17, %s10055_s20 }
0x14e7   : > { %5415 = vrot.lane.b32.xlu1 %v5361_v14, %s10115_s12 }
0x14e9   : > { %5417 = vrot.lane.b32.xlu0 %v8889_v56, %s10115_s12 }
0x14eb   : > { %5419 = vrot.lane.b32.xlu1 %v8890_v38, %s10115_s12  ;;  %s10050_s12 = scalar_lea.vmem %s14253_s17, 4096 }
0x14ec   : > { %p10051_p11 = scmp.ne.s32.totalorder %s14253_s17, %s10050_s12 }
0x14ed   : > { %v8909_v24 = vpop.f32.mrb[192].mxu0 }
0x14ee   : > { %v5603_v44 = vpop.f32.mrb[193].mxu0  ;;  %v5612_v19 = vadd.f32 %v8909_v24, %v12901_v59  ;;  %v5740_v24 = vld [vmem:[%s10218_s21 + $0x50] sm:$0xff]  ;;  %p10052_p12 = pnand %p10051_p11, %p10204_p5 }
0x14ef   : > { %v8910_v57 = vpop.f32.mrb[194].mxu0  ;;  %v5604_v62 = vadd.f32 %v12901_v59, %v5603_v44 }
0x14f0   : > { %v5606_v30 = vpop.f32.mrb[195].mxu0  ;;  %v12912_v26 = vadd.f32 %v5732_v51, %v5612_v19  ;;  %v5615_v40 = vadd.f32 %v8910_v57, %v12901_v59  ;;  %p10053_p13 = pneg %p10052_p12 }
0x14f1   : > { %v12906_v8 = vadd.f32 %v5730_v33, %v5604_v62  ;;  %v5607_v21 = vadd.f32 %v12901_v59, %v5606_v30  ;;  %v5741_v62 = vld [vmem:[%s10218_s21 + $0x58] sm:$0xff] }
0x14f2   : > { %v12923_v13 = vadd.f32 %v5733_v17, %v5615_v40 }
0x14f3   : > { %v12920_v18 = vadd.f32 %v5731_v12, %v5607_v21  ;;  %v5742_v12 = vld [vmem:[%s10218_s21 + $0x60] sm:$0xff] }
0x1505   : > { %v8913_v25 = vpop.f32.mrb[196].mxu0 }
0x1506   : > { %v5619_v60 = vpop.f32.mrb[197].mxu0  ;;  %v5628_v37 = vadd.f32 %v8913_v25, %v12901_v59 }
0x1507   : > { %v8914_v23 = vpop.f32.mrb[198].mxu0  ;;  %v5394_v32 = vpop.permute.xlu0 %5393  ;;  %v5620_v35 = vadd.f32 %v12901_v59, %v5619_v60 }
0x1508   : > { %5439 = vst.msk [vmem:[#allocation2 + $0x90] sm:$0xff] %vm3412_vm3, %v5394_v32  ;;  %5794 = vadd.xlane.f32.xlu0 %v12906_v8  ;;  %v5622_v58 = vpop.f32.mrb[199].mxu0  ;;  %v5631_v50 = vadd.f32 %v8914_v23, %v12901_v59  ;;  %v12946_v43 = vadd.f32 %v5736_v2, %v5628_v37  ;;  %v5745_v37 = vld [vmem:[%s10218_s21 + $0x78] sm:$0xff] }
0x1509   : > { %v5396_v16 = vpop.permute.xlu1 %5395  ;;  %v5623_v39 = vadd.f32 %v12901_v59, %v5622_v58  ;;  %v12936_v22 = vadd.f32 %v5734_v61, %v5620_v35 }
0x150a   : > { %5440 = vst.msk [vmem:[#allocation2 + $0x98] sm:$0xff] %vm3412_vm3, %v5396_v16  ;;  %v12944_v55 = vadd.f32 %v5737_v53, %v5631_v50  ;;  %14574 = vst [vmem:[#allocation17_spill] sm:$0xff] %v12946_v43 }
0x150b   : > { %v5390_v47 = vpop.permute.xlu0 %5389  ;;  %v12933_v54 = vadd.f32 %v5735_v34, %v5623_v39  ;;  %14572 = vst [vmem:[#allocation13_spill] sm:$0xff] %v12936_v22 }
0x150c   : > { %5437 = vst.msk [vmem:[#allocation2 + $0x80] sm:$0xff] %vm3412_vm3, %v5390_v47  ;;  %5798 = vadd.xlane.f32.xlu0 %v12912_v26  ;;  %14573 = vst [vmem:[#allocation11_spill] sm:$0xff] %v12944_v55 }
0x150d   : > { %v5392_v41 = vpop.permute.xlu1 %5391  ;;  %14571 = vst [vmem:[#allocation8_spill] sm:$0xff] %v12933_v54 }
0x150e   : > { %5438 = vst.msk [vmem:[#allocation2 + $0x88] sm:$0xff] %vm3412_vm3, %v5392_v41  ;;  %v5743_v41 = vld [vmem:[%s10218_s21 + $0x68] sm:$0xff] }
0x150f   : > { %5796 = vadd.xlane.f32.xlu1 %v12920_v18  ;;  %v4350_v36 = vpop.permute.xlu0 %4349  ;;  %v5471_v52 = vld [vmem:[#allocation2 + $0x90] sm:$0xff] }
0x1510   : > { %4387 = vst.msk [vmem:[#allocation2 + $0xd0] sm:$0xff] %vm2350_vm1, %v4350_v36  ;;  %5800 = vadd.xlane.f32.xlu0 %v12923_v13  ;;  %v5744_v36 = vld [vmem:[%s10218_s21 + $0x70] sm:$0xff] }
0x1511   : > { %v4352_v49 = vpop.permute.xlu1 %4351  ;;  %v5472_v28 = vld [vmem:[#allocation2 + $0x98] sm:$0xff] }
0x1512   : > { %4388 = vst.msk [vmem:[#allocation2 + $0xd8] sm:$0xff] %vm2350_vm1, %v4352_v49  ;;  %v5494_v10 = vpack.c.bf16 %v5472_v28, %v5471_v52 }
0x1513   : > { %5804 = vadd.xlane.f32.xlu1 %v12933_v54  ;;  %v4876_v45 = vpop.permute.xlu0 %4875  ;;  %v5469_v42 = vld [vmem:[#allocation2 + $0x80] sm:$0xff] }
0x1514   : > { %4915 = vst.msk [vmem:[#allocation2 + $0xc0] sm:$0xff] %vm2881_vm2, %v4876_v45  ;;  %5802 = vadd.xlane.f32.xlu0 %v12936_v22 }
0x1515   : > { %v4878_v9 = vpop.permute.xlu1 %4877  ;;  %v5470_v3 = vld [vmem:[#allocation2 + $0x88] sm:$0xff] }
0x1516   : > { %4916 = vst.msk [vmem:[#allocation2 + $0xc8] sm:$0xff] %vm2881_vm2, %v4878_v9  ;;  %v5493_v27 = vpack.c.bf16 %v5470_v3, %v5469_v42 }
0x1517   : > { %5808 = vadd.xlane.f32.xlu1 %v12944_v55  ;;  %v5402_v5 = vpop.permute.xlu0 %5401 }
0x1518   : > { %5443 = vst.msk [vmem:[#allocation2 + $0xb0] sm:$0xff] %vm3412_vm3, %v5402_v5  ;;  %5806 = vadd.xlane.f32.xlu0 %v12946_v43  ;;  %8923 = vmatprep.mubr.bf16.mxu0 %v5493_v27 }
0x1519   : > { %v5404_v29 = vpop.permute.xlu1 %5403  ;;  %8924 = vmatmul.mubr.bf16.gmra.mrb[208].mxu0 %v5494_v10 }
0x151a   : > { %5444 = vst.msk [vmem:[#allocation2 + $0xb8] sm:$0xff] %vm3412_vm3, %v5404_v29 }
0x151b   : > { %v5398_v48 = vpop.permute.xlu0 %5397 }
0x151c   : > { %5441 = vst.msk [vmem:[#allocation2 + $0xa0] sm:$0xff] %vm3412_vm3, %v5398_v48 }
0x151d   : > { %v5400_v1 = vpop.permute.xlu1 %5399  ;;  %v8917_v20 = vpop.f32.mrb[200].mxu0 }
0x151e   : > { %5442 = vst.msk [vmem:[#allocation2 + $0xa8] sm:$0xff] %vm3412_vm3, %v5400_v1  ;;  %v5635_v4 = vpop.f32.mrb[201].mxu0  ;;  %v5644_v46 = vadd.f32 %v8917_v20, %v12901_v59 }
0x151f   : > { %v5636_v7 = vadd.f32 %v12901_v59, %v5635_v4  ;;  %v8918_v31 = vpop.f32.mrb[202].mxu0  ;;  %v4880_v15 = vpop.permute.xlu0 %4879  ;;  %v5475_v32 = vld [vmem:[#allocation2 + $0xb0] sm:$0xff] }
0x1520   : > { %4917 = vst.msk [vmem:[#allocation2 + $0xd0] sm:$0xff] %vm2881_vm2, %v4880_v15  ;;  %v5638_v56 = vpop.f32.mrb[203].mxu0  ;;  %v5647_v44 = vadd.f32 %v8918_v31, %v12901_v59  ;;  %v12971_v25 = vadd.f32 %v5740_v24, %v5644_v46 }
0x1521   : > { %v12960_v38 = vadd.f32 %v5738_v6, %v5636_v7  ;;  %v5639_v63 = vadd.f32 %v12901_v59, %v5638_v56  ;;  %v4882_v14 = vpop.permute.xlu1 %4881  ;;  %v5476_v33 = vld [vmem:[#allocation2 + $0xb8] sm:$0xff] }
0x1522   : > { %4918 = vst.msk [vmem:[#allocation2 + $0xd8] sm:$0xff] %vm2881_vm2, %v4882_v14  ;;  %14577 = vst [vmem:[#allocation19_spill] sm:$0xff] %v12971_v25  ;;  %v12975_v58 = vadd.f32 %v5741_v62, %v5647_v44  ;;  %v5496_v21 = vpack.c.bf16 %v5476_v33, %v5475_v32 }
0x1523   : > { %14575 = vst [vmem:[#allocation14_spill] sm:$0xff] %v12960_v38  ;;  %v12966_v57 = vadd.f32 %v5739_v0, %v5639_v63  ;;  %5810 = vadd.xlane.f32.xlu0 %v12960_v38  ;;  %v4354_v30 = vpop.permute.xlu0 %4353  ;;  %v5473_v60 = vld [vmem:[#allocation2 + $0xa0] sm:$0xff] }
0x1524   : > { %4389 = vst.msk [vmem:[#allocation2 + $0xe0] sm:$0xff] %vm2350_vm1, %v4354_v30  ;;  %14578 = vst [vmem:[#allocation29_spill] sm:$0xff] %v12975_v58 }
0x1525   : > { %14576 = vst [vmem:[#allocation18_spill] sm:$0xff] %v12966_v57  ;;  %v4356_v19 = vpop.permute.xlu1 %4355  ;;  %5812 = vadd.xlane.f32.xlu1 %v12966_v57  ;;  %v5474_v51 = vld [vmem:[#allocation2 + $0xa8] sm:$0xff] }
0x1526   : > { %4390 = vst.msk [vmem:[#allocation2 + $0xe8] sm:$0xff] %vm2350_vm1, %v4356_v19  ;;  %v5495_v23 = vpack.c.bf16 %v5474_v51, %v5473_v60  ;;  %v5746_v60 = vld [vmem:[%s10218_s21 + $0x80] sm:$0xff] }
0x1527   : > { %5814 = vadd.xlane.f32.xlu0 %v12971_v25 }
0x1528   : > { %8927 = vmatprep.mubr.bf16.mxu0 %v5495_v23 }
0x1529   : > { %5816 = vadd.xlane.f32.xlu1 %v12975_v58  ;;  %8928 = vmatmul.mubr.bf16.gmra.mrb[212].mxu0 %v5496_v21 }
0x1535   : > { %v8921_v16 = vpop.f32.mrb[204].mxu0 }
0x1536   : > { %v5651_v40 = vpop.f32.mrb[205].mxu0  ;;  %v5660_v35 = vadd.f32 %v8921_v16, %v12901_v59  ;;  %v5747_v16 = vld [vmem:[%s10218_s21 + $0x88] sm:$0xff] }
0x1537   : > { %v5652_v17 = vadd.f32 %v12901_v59, %v5651_v40  ;;  %v8922_v47 = vpop.f32.mrb[206].mxu0 }
0x1538   : > { %v5654_v39 = vpop.f32.mrb[207].mxu0  ;;  %v5663_v50 = vadd.f32 %v8922_v47, %v12901_v59  ;;  %v12992_v53 = vadd.f32 %v5744_v36, %v5660_v35  ;;  %v5749_v36 = vld [vmem:[%s10218_s21 + $0x98] sm:$0xff] }
0x1539   : > { %v12983_v34 = vadd.f32 %v5742_v12, %v5652_v17  ;;  %v5655_v61 = vadd.f32 %v12901_v59, %v5654_v39  ;;  %v5748_v39 = vld [vmem:[%s10218_s21 + $0x90] sm:$0xff] }
0x153a   : > { %14581 = vst [vmem:[#allocation12_spill] sm:$0xff] %v12992_v53  ;;  %v12995_v2 = vadd.f32 %v5745_v37, %v5663_v50 }
0x153b   : > { %14579 = vst [vmem:[#allocation23_spill] sm:$0xff] %v12983_v34  ;;  %v12988_v49 = vadd.f32 %v5743_v41, %v5655_v61  ;;  %5818 = vadd.xlane.f32.xlu0 %v12983_v34 }
0x153c   : > { %14582 = vst [vmem:[#allocation16_spill] sm:$0xff] %v12995_v2 }
0x153d   : > { %14580 = vst [vmem:[#allocation27_spill] sm:$0xff] %v12988_v49  ;;  %5820 = vadd.xlane.f32.xlu1 %v12988_v49 }
0x153f   : > { %5822 = vadd.xlane.f32.xlu0 %v12992_v53 }
0x1541   : > { %5824 = vadd.xlane.f32.xlu1 %v12995_v2 }
0x1543   : > { %v5410_v45 = vpop.permute.xlu0 %5409 }
0x1544   : > { %5447 = vst.msk [vmem:[#allocation2 + $0xd0] sm:$0xff] %vm3412_vm3, %v5410_v45 }
0x1545   : > { %v5412_v28 = vpop.permute.xlu1 %5411 }
0x1546   : > { %5448 = vst.msk [vmem:[#allocation2 + $0xd8] sm:$0xff] %vm3412_vm3, %v5412_v28 }
0x1547   : > { %v5406_v9 = vpop.permute.xlu0 %5405 }
0x1548   : > { %5445 = vst.msk [vmem:[#allocation2 + $0xc0] sm:$0xff] %vm3412_vm3, %v5406_v9 }
0x1549   : > { %v5408_v42 = vpop.permute.xlu1 %5407 }
0x154a   : > { %5446 = vst.msk [vmem:[#allocation2 + $0xc8] sm:$0xff] %vm3412_vm3, %v5408_v42 }
0x154b   : > { %v4358_v3 = vpop.permute.xlu0 %4357  ;;  %v5479_v20 = vld [vmem:[#allocation2 + $0xd0] sm:$0xff] }
0x154c   : > { %4391 = vst.msk [vmem:[#allocation2 + $0xf0] sm:$0xff] %vm2350_vm1, %v4358_v3 }
0x154d   : > { %v4360_v27 = vpop.permute.xlu1 %4359  ;;  %v5480_v5 = vld [vmem:[#allocation2 + $0xd8] sm:$0xff] }
0x154e   : > { %4392 = vst.msk [vmem:[#allocation2 + $0xf8] sm:$0xff] %vm2350_vm1, %v4360_v27  ;;  %v5498_v6 = vpack.c.bf16 %v5480_v5, %v5479_v20 }
0x154f   : > { %v4884_v52 = vpop.permute.xlu0 %4883  ;;  %v5477_v29 = vld [vmem:[#allocation2 + $0xc0] sm:$0xff] }
0x1550   : > { %4919 = vst.msk [vmem:[#allocation2 + $0xe0] sm:$0xff] %vm2881_vm2, %v4884_v52 }
0x1551   : > { %v4886_v10 = vpop.permute.xlu1 %4885  ;;  %v5478_v48 = vld [vmem:[#allocation2 + $0xc8] sm:$0xff] }
0x1552   : > { %4920 = vst.msk [vmem:[#allocation2 + $0xe8] sm:$0xff] %vm2881_vm2, %v4886_v10  ;;  %v5497_v1 = vpack.c.bf16 %v5478_v48, %v5477_v29  ;;  %v5750_v29 = vld [vmem:[%s10218_s21 + $0xa0] sm:$0xff] }
0x1553   : > { %v4888_v4 = vpop.permute.xlu0 %4887 }
0x1554   : > { %4921 = vst.msk [vmem:[#allocation2 + $0xf0] sm:$0xff] %vm2881_vm2, %v4888_v4  ;;  %8931 = vmatprep.mubr.bf16.mxu0 %v5497_v1 }
0x1555   : > { %v4890_v7 = vpop.permute.xlu1 %4889  ;;  %8932 = vmatmul.mubr.bf16.gmra.mrb[216].mxu0 %v5498_v6  ;;  %v5751_v6 = vld [vmem:[%s10218_s21 + $0xa8] sm:$0xff] }
0x1556   : > { %4922 = vst.msk [vmem:[#allocation2 + $0xf8] sm:$0xff] %vm2881_vm2, %v4890_v7 }
0x1557   : > { %v5414_v31 = vpop.permute.xlu0 %5413 }
0x1558   : > { %5449 = vst.msk [vmem:[#allocation2 + $0xe0] sm:$0xff] %vm3412_vm3, %v5414_v31 }
0x1559   : > { %v5416_v15 = vpop.permute.xlu1 %5415 }
0x155a   : > { %5450 = vst.msk [vmem:[#allocation2 + $0xe8] sm:$0xff] %vm3412_vm3, %v5416_v15 }
0x155b   : > { %v5418_v56 = vpop.permute.xlu0 %5417 }
0x155c   : > { %5451 = vst.msk [vmem:[#allocation2 + $0xf0] sm:$0xff] %vm3412_vm3, %v5418_v56 }
0x155d   : > { %v5420_v0 = vpop.permute.xlu1 %5419 }
0x155e   : > { %5452 = vst.msk [vmem:[#allocation2 + $0xf8] sm:$0xff] %vm3412_vm3, %v5420_v0  ;;  %v9090_v0 = vld [vmem:[%s14305_s4 + $0x4] ss:$16 sps:$4 sm:$0xff]  }
0x155f   : > { %v5481_v46 = vld [vmem:[#allocation2 + $0xe0] sm:$0xff]  ;;  %6448 = vmatprep.subr.bf16.mxu1 %v9090_v0  ;;  %v9123_v0 = vld [vmem:[%s14305_s4 + $0xac] ss:$16 sps:$4 sm:$0xff]  }
0x1561   : > { %v5482_v63 = vld [vmem:[#allocation2 + $0xe8] sm:$0xff] }
0x1562   : > { %v5499_v14 = vpack.c.bf16 %v5482_v63, %v5481_v46  ;;  %v9093_v46 = vld [vmem:[%s14305_s4 + $0xc] ss:$16 sps:$4 sm:$0xff]  }
0x1563   : > { %v5483_v24 = vld [vmem:[#allocation2 + $0xf0] sm:$0xff]  ;;  %6641 = vmatprep.subr.bf16.mxu0 %v9093_v46 }
0x1564   : > { %8935 = vmatprep.mubr.bf16.mxu0 %v5499_v14  ;;  %v9118_v46 = vld [vmem:[%s14305_s4 + $0xa0] ss:$16 sps:$4 sm:$0xff]  }
0x1565   : > { %v5484_v44 = vld [vmem:[#allocation2 + $0xf8] sm:$0xff] }
0x1566   : > { %v5500_v30 = vpack.c.bf16 %v5484_v44, %v5483_v24  ;;  %v9088_v24 = vld [vmem:[%s14305_s4] ss:$16 sps:$4 sm:$0xff]   ;;  %v9091_v44 = vld [vmem:[%s14305_s4 + $0x8] ss:$16 sps:$4 sm:$0xff]  }
0x1567   : > { %6449 = vmatpush1.bf16.msra.mxu1 %v9088_v24  ;;  %6642 = vmatpush1.bf16.msra.mxu0 %v9091_v44  ;;  %v9121_v24 = vld [vmem:[%s14305_s4 + $0xa8] ss:$16 sps:$4 sm:$0xff]   ;;  %v9126_v44 = vld [vmem:[%s14305_s4 + $0xc4] ss:$16 sps:$4 sm:$0xff]  }
0x1568   : > { %8936 = vmatmul.mubr.bf16.gmra.mrb[220].mxu0 %v5500_v30 }
0x1569   : > { %6673 = vmatprep.mubr.bf16.mxu0 %v14516_v11 }
0x1595   : > { %v5795_v33 = vpop.xlane.xlu0 %5794 }
0x1596   : > { %v5858_v40 = vmul.f32 0.0078125, %v5795_v33 }
0x1598   : > { %v13028_v50 = vsub.f32 %v12906_v8, %v5858_v40  ;;  %v9094_v40 = vld [vmem:[%s14305_s4 + $0x20] ss:$16 sps:$4 sm:$0xff]  }
0x1599   : > { %v5799_v45 = vpop.xlane.xlu0 %5798 }
0x159a   : > { %v5922_v42 = vmul.f32 %v13028_v50, %v13028_v50  ;;  %v5860_v52 = vmul.f32 0.0078125, %v5799_v45 }
0x159c   : > { %v5797_v32 = vpop.xlane.xlu1 %5796  ;;  %v13048_v7 = vsub.f32 %v12912_v26, %v5860_v52 }
0x159d   : > { %v5859_v41 = vmul.f32 0.0078125, %v5797_v32  ;;  %v5801_v27 = vpop.xlane.xlu0 %5800 }
0x159e   : > { %v5861_v48 = vmul.f32 0.0078125, %v5801_v27  ;;  %v9103_v27 = vld [vmem:[%s14305_s4 + $0x48] ss:$16 sps:$4 sm:$0xff]  }
0x159f   : > { %v13034_v28 = vsub.f32 %v12920_v18, %v5859_v41 }
0x15a0   : > { %v13060_v63 = vsub.f32 %v12923_v13, %v5861_v48  ;;  %v5805_v30 = vpop.xlane.xlu1 %5804  ;;  %v9106_v48 = vld [vmem:[%s14305_s4 + $0x60] ss:$16 sps:$4 sm:$0xff]  }
0x15a1   : > { %v5923_v3 = vmul.f32 %v13034_v28, %v13034_v28  ;;  %v5803_v56 = vpop.xlane.xlu0 %5802  ;;  %v5863_v32 = vmul.f32 0.0078125, %v5805_v30  ;;  %v9129_v30 = vld [vmem:[%s14305_s4 + $0xcc] ss:$16 sps:$4 sm:$0xff]  }
0x15a3   : > { %v13104_v45 = vsub.f32 %v12933_v54, %v5863_v32 }
0x15a5   : > { %v5807_v32 = vpop.xlane.xlu0 %5806 }
0x15ec   : > { %v8925_v62 = vpop.f32.mrb[208].mxu0 }
0x15ed   : > { %v5667_v19 = vpop.f32.mrb[209].mxu0  ;;  %v5676_v12 = vadd.f32 %v8925_v62, %v12901_v59  ;;  %v5862_v62 = vmul.f32 0.0078125, %v5803_v56  ;;  %v9120_v56 = vld [vmem:[%s14305_s4 + $0xa4] ss:$16 sps:$4 sm:$0xff]  }
0x15ee   : > { %v5668_v51 = vadd.f32 %v12901_v59, %v5667_v19  ;;  %v8926_v23 = vpop.f32.mrb[210].mxu0  ;;  %v5924_v19 = vmul.f32 %v13048_v7, %v13048_v7 }
0x15ef   : > { %v5670_v21 = vpop.f32.mrb[211].mxu0  ;;  %v5679_v35 = vadd.f32 %v8926_v23, %v12901_v59  ;;  %v13030_v37 = vadd.f32 %v5748_v39, %v5676_v12  ;;  %v9099_v23 = vld [vmem:[%s14305_s4 + $0x2c] ss:$16 sps:$4 sm:$0xff]   ;;  %v9097_v12 = vld [vmem:[%s14305_s4 + $0x28] ss:$16 sps:$4 sm:$0xff]   ;;  %v13093_v39 = vsub.f32 %v12936_v22, %v5862_v62 }
0x15f0   : > { %v13018_v17 = vadd.f32 %v5746_v60, %v5668_v51  ;;  %v5671_v47 = vadd.f32 %v12901_v59, %v5670_v21  ;;  %v5752_v60 = vld [vmem:[%s10218_s21 + $0xb0] sm:$0xff]  ;;  %6643 = vmatprep.subr.bf16.mxu0 %v9099_v23  ;;  %v9133_v23 = vld [vmem:[%s14305_s4 + $0xe8] ss:$16 sps:$4 sm:$0xff]  }
0x15f1   : > { %14585 = vst [vmem:[#allocation21_spill] sm:$0xff] %v13030_v37  ;;  %v13036_v9 = vadd.f32 %v5749_v36, %v5679_v35  ;;  %v9096_v51 = vld [vmem:[%s14305_s4 + $0x24] ss:$16 sps:$4 sm:$0xff]   ;;  %6644 = vmatpush1.bf16.msra.mxu0 %v9097_v12  ;;  %v9105_v36 = vld [vmem:[%s14305_s4 + $0x4c] ss:$16 sps:$4 sm:$0xff]   ;;  %v5926_v52 = vmul.f32 %v13093_v39, %v13093_v39 }
0x15f2   : > { %14583 = vst [vmem:[#allocation10_spill] sm:$0xff] %v13018_v17  ;;  %v13023_v61 = vadd.f32 %v5747_v16, %v5671_v47  ;;  %5826 = vadd.xlane.f32.xlu0 %v13018_v17  ;;  %v5925_v16 = vmul.f32 %v13060_v63, %v13060_v63  ;;  %v5753_v47 = vld [vmem:[%s10218_s21 + $0xb8] sm:$0xff]  ;;  %6450 = vmatprep.subr.bf16.mxu1 %v9096_v51  ;;  %v9102_v35 = vld [vmem:[%s14305_s4 + $0x44] ss:$16 sps:$4 sm:$0xff]   ;;  %v9124_v62 = vld [vmem:[%s14305_s4 + $0xc0] ss:$16 sps:$4 sm:$0xff]  }
0x15f3   : > { %14586 = vst [vmem:[#allocation25_spill] sm:$0xff] %v13036_v9  ;;  %6451 = vmatpush1.bf16.msra.mxu1 %v9094_v40  ;;  %6645 = vmatprep.subr.bf16.mxu0 %v9105_v36  ;;  %v9130_v51 = vld [vmem:[%s14305_s4 + $0xe0] ss:$16 sps:$4 sm:$0xff]  }
0x15f4   : > { %14584 = vst [vmem:[#allocation15_spill] sm:$0xff] %v13023_v61  ;;  %5828 = vadd.xlane.f32.xlu1 %v13023_v61  ;;  %6452 = vmatprep.subr.bf16.mxu1 %v9102_v35 }
0x15f5   : > { %6646 = vmatpush1.bf16.msra.mxu0 %v9103_v27 }
0x15f6   : > { %5830 = vadd.xlane.f32.xlu0 %v13030_v37 }
0x15f8   : > { %5832 = vadd.xlane.f32.xlu1 %v13036_v9 }
0x15fa   : > { %5954 = vadd.xlane.f32.xlu0 %v5922_v42 }
0x15fc   : > { %5956 = vadd.xlane.f32.xlu1 %v5923_v3  ;;  %v8929_v5 = vpop.f32.mrb[212].mxu0  ;;  %v9100_v3 = vld [vmem:[%s14305_s4 + $0x40] ss:$16 sps:$4 sm:$0xff]  }
0x15fd   : > { %v5683_v10 = vpop.f32.mrb[213].mxu0  ;;  %v5692_v33 = vadd.f32 %v8929_v5, %v12901_v59  ;;  %6453 = vmatpush1.bf16.msra.mxu1 %v9100_v3  ;;  %v9108_v5 = vld [vmem:[%s14305_s4 + $0x64] ss:$16 sps:$4 sm:$0xff]  }
0x15fe   : > { %v5684_v1 = vadd.f32 %v12901_v59, %v5683_v10  ;;  %v8930_v20 = vpop.f32.mrb[214].mxu0  ;;  %v9111_v10 = vld [vmem:[%s14305_s4 + $0x6c] ss:$16 sps:$4 sm:$0xff]   ;;  %6454 = vmatprep.subr.bf16.mxu1 %v9108_v5 }
0x15ff   : > { %v5686_v4 = vpop.f32.mrb[215].mxu0  ;;  %v5695_v21 = vadd.f32 %v8930_v20, %v12901_v59  ;;  %v13095_v41 = vadd.f32 %v5752_v60, %v5692_v33  ;;  %6647 = vmatprep.subr.bf16.mxu0 %v9111_v10  ;;  %v9114_v20 = vld [vmem:[%s14305_s4 + $0x84] ss:$16 sps:$4 sm:$0xff]   ;;  %v9127_v33 = vld [vmem:[%s14305_s4 + $0xc8] ss:$16 sps:$4 sm:$0xff]  }
0x1600   : > { %v13050_v31 = vadd.f32 %v5750_v29, %v5684_v1  ;;  %v5687_v15 = vadd.f32 %v12901_v59, %v5686_v4  ;;  %v5927_v29 = vmul.f32 %v13104_v45, %v13104_v45  ;;  %v9109_v1 = vld [vmem:[%s14305_s4 + $0x68] ss:$16 sps:$4 sm:$0xff]   ;;  %v9117_v4 = vld [vmem:[%s14305_s4 + $0x8c] ss:$16 sps:$4 sm:$0xff]  }
0x1601   : > { %14589 = vst [vmem:[#allocation35_spill] sm:$0xff] %v13095_v41  ;;  %v13106_v42 = vadd.f32 %v5753_v47, %v5695_v21  ;;  %6455 = vmatpush1.bf16.msra.mxu1 %v9106_v48  ;;  %6648 = vmatpush1.bf16.msra.mxu0 %v9109_v1  ;;  %v9135_v60 = vld [vmem:[%s14305_s4 + $0xec] ss:$16 sps:$4 sm:$0xff]   ;;  %v5809_v21 = vpop.xlane.xlu1 %5808  ;;  %v5754_v47 = vld [vmem:[%s10218_s21 + $0xc0] sm:$0xff]  ;;  %v5811_v48 = vpop.xlane.xlu0 %5810 }
0x1602   : > { %14587 = vst [vmem:[#allocation22_spill] sm:$0xff] %v13050_v31  ;;  %v13062_v14 = vadd.f32 %v5751_v6, %v5687_v15  ;;  %5834 = vadd.xlane.f32.xlu0 %v13050_v31  ;;  %v9112_v6 = vld [vmem:[%s14305_s4 + $0x80] ss:$16 sps:$4 sm:$0xff]   ;;  %v9115_v15 = vld [vmem:[%s14305_s4 + $0x88] ss:$16 sps:$4 sm:$0xff]   ;;  %6456 = vmatprep.subr.bf16.mxu1 %v9114_v20  ;;  %v5865_v35 = vmul.f32 0.0078125, %v5809_v21 }
0x1603   : > { %14590 = vst [vmem:[#allocation40_spill] sm:$0xff] %v13106_v42  ;;  %6649 = vmatprep.subr.bf16.mxu0 %v9117_v4 }
0x1604   : > { %14588 = vst [vmem:[#allocation26_spill] sm:$0xff] %v13062_v14  ;;  %5836 = vadd.xlane.f32.xlu1 %v13062_v14  ;;  %v13190_v1 = vsub.f32 %v12944_v55, %v5865_v35 }
0x1605   : > { %6457 = vmatpush1.bf16.msra.mxu1 %v9112_v6  ;;  %6650 = vmatpush1.bf16.msra.mxu0 %v9115_v15  ;;  %v5813_v4 = vpop.xlane.xlu1 %5812  ;;  %v5866_v6 = vmul.f32 0.0078125, %v5811_v48 }
0x1606   : > { %5958 = vadd.xlane.f32.xlu0 %v5924_v19  ;;  %6458 = vmatprep.subr.bf16.mxu1 %v9120_v56  ;;  %v9132_v19 = vld [vmem:[%s14305_s4 + $0xe4] ss:$16 sps:$4 sm:$0xff]  }
0x1607   : > { %6651 = vmatprep.subr.bf16.mxu0 %v9123_v0  ;;  %v5756_v0 = vld [vmem:[%s10218_s21 + $0xd0] sm:$0xff] }
0x1608   : > { %5960 = vadd.xlane.f32.xlu1 %v5925_v16  ;;  %v5864_v16 = vmul.f32 0.0078125, %v5807_v32 }
0x1609   : > { %6459 = vmatpush1.bf16.msra.mxu1 %v9118_v46  ;;  %6652 = vmatpush1.bf16.msra.mxu0 %v9121_v24  ;;  %v5867_v46 = vmul.f32 0.0078125, %v5813_v4  ;;  %v5817_v32 = vpop.xlane.xlu1 %5816 }
0x160a   : > { %5838 = vadd.xlane.f32.xlu0 %v13095_v41  ;;  %6460 = vmatprep.subr.bf16.mxu1 %v9126_v44  ;;  %v13184_v5 = vsub.f32 %v12946_v43, %v5864_v16  ;;  %v5929_v44 = vmul.f32 %v13190_v1, %v13190_v1  ;;  %v5869_v35 = vmul.f32 0.0078125, %v5817_v32 }
0x160b   : > { %6653 = vmatprep.subr.bf16.mxu0 %v9129_v30  ;;  %v5757_v30 = vld [vmem:[%s10218_s21 + $0xd8] sm:$0xff] }
0x160c   : > { %5840 = vadd.xlane.f32.xlu1 %v13106_v42  ;;  %v5928_v56 = vmul.f32 %v13184_v5, %v13184_v5 }
0x160d   : > { %6461 = vmatpush1.bf16.msra.mxu1 %v9124_v62  ;;  %6654 = vmatpush1.bf16.msra.mxu0 %v9127_v33  ;;  %v13205_v62 = vsub.f32 %v12960_v38, %v5866_v6 }
0x160e   : > { %5962 = vadd.xlane.f32.xlu0 %v5926_v52  ;;  %6462 = vmatprep.subr.bf16.mxu1 %v9132_v19  ;;  %v5755_v52 = vld [vmem:[%s10218_s21 + $0xc8] sm:$0xff]  ;;  %v13210_v19 = vsub.f32 %v12966_v57, %v5867_v46 }
0x160f   : > { %6655 = vmatprep.subr.bf16.mxu0 %v9135_v60 }
0x1610   : > { %5964 = vadd.xlane.f32.xlu1 %v5927_v29  ;;  %v5931_v21 = vmul.f32 %v13210_v19, %v13210_v19 }
0x1611   : > { %6463 = vmatpush1.bf16.msra.mxu1 %v9130_v51  ;;  %6656 = vmatpush1.bf16.msra.mxu0 %v9133_v23  ;;  %v5815_v51 = vpop.xlane.xlu0 %5814  ;;  %v5930_v23 = vmul.f32 %v13205_v62, %v13205_v62 }
0x1612   : > { %v5868_v16 = vmul.f32 0.0078125, %v5815_v51  ;;  %v5760_v51 = vld [vmem:[%s10218_s21 + $0xf0] sm:$0xff] }
0x1614   : > { %v13224_v48 = vsub.f32 %v12971_v25, %v5868_v16 }
0x1628   : > { %v8933_v40 = vpop.f32.mrb[216].mxu0 }
0x1629   : > { %v5699_v12 = vpop.f32.mrb[217].mxu0  ;;  %v5708_v15 = vadd.f32 %v8933_v40, %v12901_v59 }
0x162a   : > { %v5700_v36 = vadd.f32 %v12901_v59, %v5699_v12  ;;  %v8934_v3 = vpop.f32.mrb[218].mxu0 }
0x162b   : > { %v5702_v27 = vpop.f32.mrb[219].mxu0  ;;  %v5711_v24 = vadd.f32 %v8934_v3, %v12901_v59  ;;  %v13207_v33 = vadd.f32 %v5756_v0, %v5708_v15  ;;  %v5821_v15 = vpop.xlane.xlu1 %5820 }
0x162c   : > { %v13186_v10 = vadd.f32 %v5754_v47, %v5700_v36  ;;  %v5703_v29 = vadd.f32 %v12901_v59, %v5702_v27  ;;  %v5758_v47 = vld [vmem:[%s10218_s21 + $0xe0] sm:$0xff]  ;;  %v5819_v27 = vpop.xlane.xlu0 %5818 }
0x162d   : > { %14593 = vst [vmem:[#allocation7_spill] sm:$0xff] %v13207_v33  ;;  %v13212_v60 = vadd.f32 %v5757_v30, %v5711_v24  ;;  %v5870_v46 = vmul.f32 0.0078125, %v5819_v27 }
0x162e   : > { %14591 = vst [vmem:[#allocation33_spill] sm:$0xff] %v13186_v10  ;;  %v13192_v20 = vadd.f32 %v5755_v52, %v5703_v29  ;;  %5842 = vadd.xlane.f32.xlu0 %v13186_v10  ;;  %v5759_v29 = vld [vmem:[%s10218_s21 + $0xe8] sm:$0xff] }
0x162f   : > { %14594 = vst [vmem:[#allocation44_spill] sm:$0xff] %v13212_v60  ;;  %v5825_v16 = vpop.xlane.xlu1 %5824 }
0x1630   : > { %14592 = vst [vmem:[#allocation37_spill] sm:$0xff] %v13192_v20  ;;  %5844 = vadd.xlane.f32.xlu1 %v13192_v20  ;;  %v5823_v30 = vpop.xlane.xlu0 %5822  ;;  %v5873_v27 = vmul.f32 0.0078125, %v5825_v16 }
0x1632   : > { %5966 = vadd.xlane.f32.xlu0 %v5928_v56  ;;  %v13230_v56 = vsub.f32 %v12975_v58, %v5869_v35 }
0x1634   : > { %5968 = vadd.xlane.f32.xlu1 %v5929_v44  ;;  %v5932_v44 = vmul.f32 %v13224_v48, %v13224_v48 }
0x1636   : > { %5846 = vadd.xlane.f32.xlu0 %v13207_v33 }
0x1638   : > { %5848 = vadd.xlane.f32.xlu1 %v13212_v60 }
0x163a   : > { %5970 = vadd.xlane.f32.xlu0 %v5930_v23  ;;  %v5871_v23 = vmul.f32 0.0078125, %v5821_v15 }
0x163b   : > { %v8937_v40 = vpop.f32.mrb[220].mxu0 }
0x163c   : > { %v5715_v12 = vpop.f32.mrb[221].mxu0  ;;  %5972 = vadd.xlane.f32.xlu1 %v5931_v21  ;;  %v5724_v24 = vadd.f32 %v8937_v40, %v12901_v59  ;;  %v5933_v21 = vmul.f32 %v13230_v56, %v13230_v56  ;;  %v5872_v40 = vmul.f32 0.0078125, %v5823_v30 }
0x163d   : > { %v5716_v36 = vadd.f32 %v12901_v59, %v5715_v12  ;;  %v8938_v3 = vpop.f32.mrb[222].mxu0  ;;  %v5761_v12 = vld [vmem:[%s10218_s21 + $0xf8] sm:$0xff]  ;;  %s10056_s21 = scalar_lea.vmem %s10055_s20, 8192 }
0x163e   : > { %v5718_v52 = vpop.f32.mrb[223].mxu0  ;;  %v5727_v32 = vadd.f32 %v8938_v3, %v12901_v59  ;;  %v13247_v35 = vadd.f32 %v5760_v51, %v5724_v24  ;;  %p10058_p1 = scmp.lt.s32.totalorder %s10056_s21, %s10050_s12 }
0x163f   : > { %v13226_v4 = vadd.f32 %v5758_v47, %v5716_v36  ;;  %v5719_v6 = vadd.f32 %v12901_v59, %v5718_v52  ;;  %v13245_v47 = vsub.f32 %v12983_v34, %v5870_v46  ;;  %v13250_v36 = vsub.f32 %v12988_v49, %v5871_v23 }
0x1640   : > { %14597 = vst [vmem:[#allocation31_spill] sm:$0xff] %v13247_v35  ;;  %v13252_v52 = vadd.f32 %v5761_v12, %v5727_v32  ;;  %v13256_v59 = vsub.f32 %v12992_v53, %v5872_v40  ;;  %p10059_p2 = por %p10058_p1, %p10057_p0 }
0x1641   : > { %14595 = vst [vmem:[#allocation9_spill] sm:$0xff] %v13226_v4  ;;  %v13232_v0 = vadd.f32 %v5759_v29, %v5719_v6  ;;  %5850 = vadd.xlane.f32.xlu0 %v13226_v4  ;;  %v5934_v3 = vmul.f32 %v13245_v47, %v13245_v47  ;;  %v13262_v29 = vsub.f32 %v12995_v2, %v5873_v27 }
0x1642   : > { %14598 = vst [vmem:[#allocation39_spill] sm:$0xff] %v13252_v52  ;;  %v5935_v6 = vmul.f32 %v13250_v36, %v13250_v36  ;;  %v5936_v15 = vmul.f32 %v13256_v59, %v13256_v59  ;;  %p10060_p3 = pnand %p10059_p2, %p10053_p13 }
0x1643   : > { %14596 = vst [vmem:[#allocation43_spill] sm:$0xff] %v13232_v0  ;;  %5852 = vadd.xlane.f32.xlu1 %v13232_v0  ;;  %v5937_v46 = vmul.f32 %v13262_v29, %v13262_v29 }
0x1645   : > { %5974 = vadd.xlane.f32.xlu0 %v5932_v44 }
0x1647   : > { %5976 = vadd.xlane.f32.xlu1 %v5933_v21 }
0x1649   : > { %5854 = vadd.xlane.f32.xlu0 %v13247_v35 }
0x164b   : > { %5856 = vadd.xlane.f32.xlu1 %v13252_v52 }
0x164d   : > { %5978 = vadd.xlane.f32.xlu0 %v5934_v3 }
0x164f   : > { %5980 = vadd.xlane.f32.xlu1 %v5935_v6 }
0x1651   : > { %5982 = vadd.xlane.f32.xlu0 %v5936_v15 }
0x1653   : > { %5984 = vadd.xlane.f32.xlu1 %v5937_v46 }
0x167f   : > { %v5827_v24 = vpop.xlane.xlu0 %5826 }
0x1680   : > { %v5874_v44 = vmul.f32 0.0078125, %v5827_v24 }
0x1681   : > { %v5829_v30 = vpop.xlane.xlu1 %5828 }
0x1682   : > { %v13271_v51 = vsub.f32 %v13018_v17, %v5874_v44  ;;  %v5875_v23 = vmul.f32 0.0078125, %v5829_v30 }
0x1683   : > { %v5831_v32 = vpop.xlane.xlu0 %5830 }
0x1684   : > { %v13274_v21 = vsub.f32 %v13023_v61, %v5875_v23  ;;  %v5876_v16 = vmul.f32 0.0078125, %v5831_v32  ;;  %v5938_v12 = vmul.f32 %v13271_v51, %v13271_v51 }
0x1685   : > { %v5833_v40 = vpop.xlane.xlu1 %5832 }
0x1686   : > { %v13279_v27 = vsub.f32 %v13030_v37, %v5876_v16  ;;  %v5877_v3 = vmul.f32 0.0078125, %v5833_v40  ;;  %5986 = vadd.xlane.f32.xlu0 %v5938_v12  ;;  %v5939_v6 = vmul.f32 %v13274_v21, %v13274_v21 }
0x1687   : > { %v5955_v15 = vpop.xlane.xlu0 %5954 }
0x1688   : > { %v13284_v46 = vsub.f32 %v13036_v9, %v5877_v3  ;;  %v6018_v24 = vmul.f32 0.0078125, %v5955_v15  ;;  %5988 = vadd.xlane.f32.xlu1 %v5939_v6  ;;  %v5940_v44 = vmul.f32 %v13279_v27, %v13279_v27 }
0x1689   : > { %v5957_v30 = vpop.xlane.xlu1 %5956 }
0x168a   : > { %v6050_v23 = vadd.f32 1e-05, %v6018_v24  ;;  %v6019_v32 = vmul.f32 0.0078125, %v5957_v30  ;;  %5990 = vadd.xlane.f32.xlu0 %v5940_v44  ;;  %v5941_v16 = vmul.f32 %v13284_v46, %v13284_v46 }
0x168c   : > { %9728 = vrsqrt.f32 %v6050_v23  ;;  %v6051_v12 = vadd.f32 1e-05, %v6019_v32  ;;  %5992 = vadd.xlane.f32.xlu1 %v5941_v16  ;;  %v13301_v32 = vld [vmem:[%s14308_s7 + $0x3] ss:$0 sm:$0xff] }
0x168e   : > { %9730 = vrsqrt.f32 %v6051_v12 }
0x168f   : > { %v5835_v40 = vpop.xlane.xlu0 %5834 }
0x1690   : > { %v5878_v37 = vmul.f32 0.0078125, %v5835_v40 }
0x1691   : > { %v5837_v3 = vpop.xlane.xlu1 %5836 }
0x1692   : > { %v13291_v15 = vsub.f32 %v13050_v31, %v5878_v37  ;;  %v5879_v6 = vmul.f32 0.0078125, %v5837_v3 }
0x1693   : > { %v5959_v9 = vpop.xlane.xlu0 %5958 }
0x1694   : > { %v13294_v61 = vsub.f32 %v13062_v14, %v5879_v6  ;;  %v6020_v24 = vmul.f32 0.0078125, %v5959_v9  ;;  %v5942_v44 = vmul.f32 %v13291_v15, %v13291_v15 }
0x1695   : > { %v5961_v30 = vpop.xlane.xlu1 %5960 }
0x1696   : > { %v9729_v23 = vpop.eup %9728  ;;  %v6052_v16 = vadd.f32 1e-05, %v6020_v24  ;;  %v6021_v12 = vmul.f32 0.0078125, %v5961_v30  ;;  %5994 = vadd.xlane.f32.xlu0 %v5942_v44  ;;  %v5943_v37 = vmul.f32 %v13294_v61, %v13294_v61 }
0x1697   : > { %v6114_v40 = vmul.f32 %v9729_v23, %v13028_v50  ;;  %v5839_v3 = vpop.xlane.xlu0 %5838  ;;  %v13314_v50 = vld [vmem:[%s14308_s7 + $0x4] ss:$0 sm:$0xff] }
0x1698   : > { %v9731_v9 = vpop.eup %9730  ;;  %9732 = vrsqrt.f32 %v6052_v16  ;;  %v6053_v6 = vadd.f32 1e-05, %v6021_v12  ;;  %v5880_v14 = vmul.f32 0.0078125, %v5839_v3  ;;  %5996 = vadd.xlane.f32.xlu1 %v5943_v37 }
0x1699   : > { %v6150_v31 = vmul.f32 %v13301_v32, %v6114_v40  ;;  %v6115_v17 = vmul.f32 %v9731_v9, %v13034_v28  ;;  %v5841_v2 = vpop.xlane.xlu1 %5840 }
0x169a   : > { %9734 = vrsqrt.f32 %v6053_v6  ;;  %v13309_v24 = vsub.f32 %v13095_v41, %v5880_v14  ;;  %v5881_v44 = vmul.f32 0.0078125, %v5841_v2 }
0x169b   : > { %v6151_v30 = vmul.f32 %v13301_v32, %v6115_v17  ;;  %v5963_v23 = vpop.xlane.xlu0 %5962  ;;  %v6186_v14 = vadd.f32 %v13314_v50, %v6150_v31 }
0x169c   : > { %v13318_v16 = vsub.f32 %v13106_v42, %v5881_v44  ;;  %v6022_v12 = vmul.f32 0.0078125, %v5963_v23  ;;  %v5944_v28 = vmul.f32 %v13309_v24, %v13309_v24 }
0x169d   : > { %v5965_v37 = vpop.xlane.xlu1 %5964  ;;  %v6187_v2 = vadd.f32 %v13314_v50, %v6151_v30 }
0x169e   : > { %v6054_v40 = vadd.f32 1e-05, %v6022_v12  ;;  %v6023_v3 = vmul.f32 0.0078125, %v5965_v37  ;;  %5998 = vadd.xlane.f32.xlu0 %v5944_v28  ;;  %v5945_v9 = vmul.f32 %v13318_v16, %v13318_v16 }
0x169f   : > { %v6218_v17 = vpack.c.bf16 %v6187_v2, %v6186_v14 }
0x16a0   : > { %9736 = vrsqrt.f32 %v6054_v40  ;;  %v6055_v6 = vadd.f32 1e-05, %v6023_v3  ;;  %6000 = vadd.xlane.f32.xlu1 %v5945_v9 }
0x16a1   : > { %6481 = vmatmul.mubr.bf16.vlgmr.msra.gmra.mrb[160].mxu1 %v6218_v17  ;;  %6674 = vmatmul.mubr.bf16.vlgmr.msra.gmra.mrb[224].mxu0 %v6218_v17 }
0x16a2   : > { %v9733_v44 = vpop.eup %9732  ;;  %9738 = vrsqrt.f32 %v6055_v6  ;;  %6490 = vmatprep.mubr.bf16.mxu1 %v14516_v11  ;;  %6683 = vmatprep.mubr.bf16.mxu0 %v14516_v11 }
0x16a3   : > { %v6116_v31 = vmul.f32 %v9733_v44, %v13048_v7 }
0x16a4   : > { %v9735_v30 = vpop.eup %9734 }
0x16a5   : > { %v6117_v23 = vmul.f32 %v9735_v30, %v13060_v63  ;;  %v6152_v12 = vmul.f32 %v13301_v32, %v6116_v31 }
0x16a7   : > { %v6153_v28 = vmul.f32 %v13301_v32, %v6117_v23  ;;  %v6188_v37 = vadd.f32 %v13314_v50, %v6152_v12 }
0x16a9   : > { %v6189_v14 = vadd.f32 %v13314_v50, %v6153_v28 }
0x16aa   : > { %v9737_v2 = vpop.eup %9736 }
0x16ab   : > { %v6219_v40 = vpack.c.bf16 %v6189_v14, %v6188_v37  ;;  %v6118_v3 = vmul.f32 %v9737_v2, %v13093_v39 }
0x16ac   : > { %v9739_v9 = vpop.eup %9738 }
0x16ad   : > { %6491 = vmatmul.mubr.bf16.gmra.mrb[164].mxu1 %v6219_v40  ;;  %6684 = vmatmul.mubr.bf16.gmra.mrb[228].mxu0 %v6219_v40  ;;  %v6119_v7 = vmul.f32 %v9739_v9, %v13104_v45  ;;  %v6154_v17 = vmul.f32 %v13301_v32, %v6118_v3 }
0x16ae   : > { %6500 = vmatprep.mubr.bf16.mxu1 %v14516_v11  ;;  %6693 = vmatprep.mubr.bf16.mxu0 %v14516_v11 }
0x16af   : > { %v6155_v63 = vmul.f32 %v13301_v32, %v6119_v7  ;;  %v6190_v6 = vadd.f32 %v13314_v50, %v6154_v17 }
0x16b1   : > { %v6191_v44 = vadd.f32 %v13314_v50, %v6155_v63 }
0x16b3   : > { %v6220_v31 = vpack.c.bf16 %v6191_v44, %v6190_v6 }
0x16b5   : > { %6501 = vmatmul.mubr.bf16.gmra.mrb[168].mxu1 %v6220_v31  ;;  %6694 = vmatmul.mubr.bf16.gmra.mrb[232].mxu0 %v6220_v31 }
0x16b6   : > { %6510 = vmatprep.mubr.bf16.mxu1 %v14516_v11  ;;  %6703 = vmatprep.mubr.bf16.mxu0 %v14516_v11 }
0x16bb   : > { %v5843_v39 = vpop.xlane.xlu0 %5842 }
0x16bc   : > { %v5882_v45 = vmul.f32 0.0078125, %v5843_v39 }
0x16bd   : > { %v5845_v30 = vpop.xlane.xlu1 %5844 }
0x16be   : > { %v13345_v23 = vsub.f32 %v13186_v10, %v5882_v45  ;;  %v5883_v12 = vmul.f32 0.0078125, %v5845_v30 }
0x16bf   : > { %v5967_v28 = vpop.xlane.xlu0 %5966 }
0x16c0   : > { %v13348_v37 = vsub.f32 %v13192_v20, %v5883_v12  ;;  %v6024_v14 = vmul.f32 0.0078125, %v5967_v28  ;;  %v5946_v2 = vmul.f32 %v13345_v23, %v13345_v23 }
0x16c1   : > { %v5969_v40 = vpop.xlane.xlu1 %5968 }
0x16c2   : > { %v6056_v3 = vadd.f32 1e-05, %v6024_v14  ;;  %v6025_v9 = vmul.f32 0.0078125, %v5969_v40  ;;  %6002 = vadd.xlane.f32.xlu0 %v5946_v2  ;;  %v5947_v7 = vmul.f32 %v13348_v37, %v13348_v37 }
0x16c3   : > { %v5847_v17 = vpop.xlane.xlu0 %5846 }
0x16c4   : > { %9740 = vrsqrt.f32 %v6056_v3  ;;  %v6057_v63 = vadd.f32 1e-05, %v6025_v9  ;;  %v5884_v6 = vmul.f32 0.0078125, %v5847_v17  ;;  %6004 = vadd.xlane.f32.xlu1 %v5947_v7 }
0x16c5   : > { %v5849_v44 = vpop.xlane.xlu1 %5848 }
0x16c6   : > { %9742 = vrsqrt.f32 %v6057_v63  ;;  %v13355_v31 = vsub.f32 %v13207_v33, %v5884_v6  ;;  %v5885_v39 = vmul.f32 0.0078125, %v5849_v44 }
0x16c7   : > { %v5971_v45 = vpop.xlane.xlu0 %5970 }
0x16c8   : > { %v13358_v30 = vsub.f32 %v13212_v60, %v5885_v39  ;;  %v6026_v12 = vmul.f32 0.0078125, %v5971_v45  ;;  %v5948_v28 = vmul.f32 %v13355_v31, %v13355_v31 }
0x16c9   : > { %v5973_v14 = vpop.xlane.xlu1 %5972 }
0x16ca   : > { %v6058_v2 = vadd.f32 1e-05, %v6026_v12  ;;  %v6027_v40 = vmul.f32 0.0078125, %v5973_v14  ;;  %6006 = vadd.xlane.f32.xlu0 %v5948_v28  ;;  %v5949_v3 = vmul.f32 %v13358_v30, %v13358_v30 }
0x16cc   : > { %9744 = vrsqrt.f32 %v6058_v2  ;;  %v6059_v9 = vadd.f32 1e-05, %v6027_v40  ;;  %6008 = vadd.xlane.f32.xlu1 %v5949_v3 }
0x16ce   : > { %v9741_v7 = vpop.eup %9740  ;;  %9746 = vrsqrt.f32 %v6059_v9  ;;  %v5851_v17 = vpop.xlane.xlu0 %5850 }
0x16cf   : > { %v5886_v63 = vmul.f32 0.0078125, %v5851_v17  ;;  %v6120_v6 = vmul.f32 %v9741_v7, %v13184_v5 }
0x16d0   : > { %v9743_v44 = vpop.eup %9742  ;;  %v5853_v39 = vpop.xlane.xlu1 %5852 }
0x16d1   : > { %v13366_v45 = vsub.f32 %v13226_v4, %v5886_v63  ;;  %v5887_v12 = vmul.f32 0.0078125, %v5853_v39  ;;  %v6121_v28 = vmul.f32 %v9743_v44, %v13190_v1  ;;  %v6156_v14 = vmul.f32 %v13301_v32, %v6120_v6 }
0x16d2   : > { %v5975_v60 = vpop.xlane.xlu0 %5974 }
0x16d3   : > { %v13371_v2 = vsub.f32 %v13232_v0, %v5887_v12  ;;  %v6028_v40 = vmul.f32 0.0078125, %v5975_v60  ;;  %v5950_v3 = vmul.f32 %v13366_v45, %v13366_v45  ;;  %v6157_v5 = vmul.f32 %v13301_v32, %v6121_v28 }
0x16d4   : > { %v5977_v9 = vpop.xlane.xlu1 %5976  ;;  %v6192_v7 = vadd.f32 %v13314_v50, %v6156_v14 }
0x16d5   : > { %v6060_v17 = vadd.f32 1e-05, %v6028_v40  ;;  %v6029_v63 = vmul.f32 0.0078125, %v5977_v9  ;;  %6010 = vadd.xlane.f32.xlu0 %v5950_v3  ;;  %v5951_v1 = vmul.f32 %v13371_v2, %v13371_v2  ;;  %v6193_v6 = vadd.f32 %v13314_v50, %v6157_v5 }
0x16d6   : > { %v9745_v44 = vpop.eup %9744  ;;  %v5855_v39 = vpop.xlane.xlu0 %5854 }
0x16d7   : > { %9748 = vrsqrt.f32 %v6060_v17  ;;  %v6061_v60 = vadd.f32 1e-05, %v6029_v63  ;;  %v5888_v12 = vmul.f32 0.0078125, %v5855_v39  ;;  %6012 = vadd.xlane.f32.xlu1 %v5951_v1  ;;  %v6221_v0 = vpack.c.bf16 %v6193_v6, %v6192_v7 }
0x16d8   : > { %v9747_v4 = vpop.eup %9746  ;;  %v5857_v28 = vpop.xlane.xlu1 %5856  ;;  %v6122_v33 = vmul.f32 %v9745_v44, %v13205_v62 }
0x16d9   : > { %9750 = vrsqrt.f32 %v6061_v60  ;;  %v13382_v14 = vsub.f32 %v13247_v35, %v5888_v12  ;;  %v5889_v40 = vmul.f32 0.0078125, %v5857_v28  ;;  %6511 = vmatmul.mubr.bf16.gmra.mrb[172].mxu1 %v6221_v0  ;;  %6704 = vmatmul.mubr.bf16.gmra.mrb[236].mxu0 %v6221_v0  ;;  %v6123_v3 = vmul.f32 %v9747_v4, %v13210_v19 }
0x16da   : > { %v5979_v5 = vpop.xlane.xlu0 %5978  ;;  %6520 = vmatprep.mubr.bf16.mxu1 %v14516_v11  ;;  %6713 = vmatprep.mubr.bf16.mxu0 %v14516_v11  ;;  %v6158_v9 = vmul.f32 %v13301_v32, %v6122_v33 }
0x16db   : > { %v13389_v7 = vsub.f32 %v13252_v52, %v5889_v40  ;;  %v6030_v62 = vmul.f32 0.0078125, %v5979_v5  ;;  %v5952_v17 = vmul.f32 %v13382_v14, %v13382_v14  ;;  %v6159_v63 = vmul.f32 %v13301_v32, %v6123_v3 }
0x16dc   : > { %v5981_v1 = vpop.xlane.xlu1 %5980  ;;  %v6194_v0 = vadd.f32 %v13314_v50, %v6158_v9 }
0x16dd   : > { %v6062_v19 = vadd.f32 1e-05, %v6030_v62  ;;  %v6031_v4 = vmul.f32 0.0078125, %v5981_v1  ;;  %6014 = vadd.xlane.f32.xlu0 %v5952_v17  ;;  %v5953_v6 = vmul.f32 %v13389_v7, %v13389_v7  ;;  %v6195_v33 = vadd.f32 %v13314_v50, %v6159_v63 }
0x16de   : > { %v5983_v44 = vpop.xlane.xlu0 %5982 }
0x16df   : > { %9752 = vrsqrt.f32 %v6062_v19  ;;  %v6063_v39 = vadd.f32 1e-05, %v6031_v4  ;;  %v6032_v60 = vmul.f32 0.0078125, %v5983_v44  ;;  %6016 = vadd.xlane.f32.xlu1 %v5953_v6  ;;  %v6222_v12 = vpack.c.bf16 %v6195_v33, %v6194_v0 }
0x16e0   : > { %v5985_v28 = vpop.xlane.xlu1 %5984 }
0x16e1   : > { %v9749_v40 = vpop.eup %9748  ;;  %9754 = vrsqrt.f32 %v6063_v39  ;;  %v6064_v3 = vadd.f32 1e-05, %v6032_v60  ;;  %v6033_v5 = vmul.f32 0.0078125, %v5985_v28  ;;  %6521 = vmatmul.mubr.bf16.gmra.mrb[176].mxu1 %v6222_v12  ;;  %6714 = vmatmul.mubr.bf16.gmra.mrb[240].mxu0 %v6222_v12 }
0x16e2   : > { %6530 = vmatprep.mubr.bf16.mxu1 %v14516_v11  ;;  %6723 = vmatprep.mubr.bf16.mxu0 %v14516_v11  ;;  %v6124_v9 = vmul.f32 %v9749_v40, %v13224_v48 }
0x16e3   : > { %v9751_v62 = vpop.eup %9750  ;;  %9756 = vrsqrt.f32 %v6064_v3  ;;  %v6065_v17 = vadd.f32 1e-05, %v6033_v5 }
0x16e4   : > { %v6125_v63 = vmul.f32 %v9751_v62, %v13230_v56  ;;  %v6160_v1 = vmul.f32 %v13301_v32, %v6124_v9 }
0x16e5   : > { %9758 = vrsqrt.f32 %v6065_v17 }
0x16e6   : > { %v6161_v0 = vmul.f32 %v13301_v32, %v6125_v63  ;;  %v6196_v19 = vadd.f32 %v13314_v50, %v6160_v1 }
0x16e8   : > { %v6197_v4 = vadd.f32 %v13314_v50, %v6161_v0  ;;  %v9138_v0 = vld [vmem:[%s14307_s6 + $0x48] sm:$0xff]  }
0x16e9   : > { %v9753_v6 = vpop.eup %9752 }
0x16ea   : > { %v6223_v33 = vpack.c.bf16 %v6197_v4, %v6196_v19  ;;  %v6126_v44 = vmul.f32 %v9753_v6, %v13245_v47  ;;  %v9139_v19 = vld [vmem:[%s14307_s6 + $0x8] sm:$0xff]   ;;  %v9140_v4 = vld [vmem:[%s14307_s6 + $0x50] sm:$0xff]  }
0x16eb   : > { %v9755_v39 = vpop.eup %9754  ;;  %v9141_v6 = vld [vmem:[%s14307_s6 + $0x10] sm:$0xff]  }
0x16ec   : > { %6531 = vmatmul.mubr.bf16.gmra.mrb[180].mxu1 %v6223_v33  ;;  %6724 = vmatmul.mubr.bf16.gmra.mrb[244].mxu0 %v6223_v33  ;;  %v6127_v48 = vmul.f32 %v9755_v39, %v13250_v36  ;;  %v6162_v56 = vmul.f32 %v13301_v32, %v6126_v44  ;;  %v9142_v33 = vld [vmem:[%s14307_s6 + $0x58] sm:$0xff]   ;;  %v9144_v39 = vld [vmem:[%s14307_s6 + $0x60] sm:$0xff]  }
0x16ed   : > { %v9757_v60 = vpop.eup %9756  ;;  %6540 = vmatprep.mubr.bf16.mxu1 %v14516_v11  ;;  %6733 = vmatprep.mubr.bf16.mxu0 %v14516_v11  ;;  %v9143_v44 = vld [vmem:[%s14307_s6 + $0x18] sm:$0xff]  }
0x16ee   : > { %v6163_v12 = vmul.f32 %v13301_v32, %v6127_v48  ;;  %v6198_v40 = vadd.f32 %v13314_v50, %v6162_v56  ;;  %v6128_v47 = vmul.f32 %v9757_v60, %v13256_v59  ;;  %v9136_v59 = vld [vmem:[%s14307_s6 + $0x40] sm:$0xff]   ;;  %v9146_v60 = vld [vmem:[%s14307_s6 + $0x68] sm:$0xff]  }
0x16ef   : > { %v9759_v28 = vpop.eup %9758  ;;  %8219 = vmatprep.subr.bf16.mxu1 %v9136_v59  ;;  %v9145_v48 = vld [vmem:[%s14307_s6 + $0x20] sm:$0xff]  }
0x16f0   : > { %v6199_v3 = vadd.f32 %v13314_v50, %v6163_v12  ;;  %v6129_v5 = vmul.f32 %v9759_v28, %v13262_v29  ;;  %v6164_v62 = vmul.f32 %v13301_v32, %v6128_v47  ;;  %v9137_v29 = vld [vmem:[%s14307_s6] sm:$0xff]   ;;  %v9147_v28 = vld [vmem:[%s14307_s6 + $0x28] sm:$0xff]  }
0x16f1   : > { %8220 = vmatpush3.bf16.msra.mxu1 %v9137_v29  ;;  %v9150_v29 = vld [vmem:[%s14307_s6 + $0x78] sm:$0xff]  }
0x16f2   : > { %v6224_v9 = vpack.c.bf16 %v6199_v3, %v6198_v40  ;;  %v6165_v36 = vmul.f32 %v13301_v32, %v6129_v5  ;;  %v6200_v63 = vadd.f32 %v13314_v50, %v6164_v62  ;;  %8221 = vmatprep.subr.bf16.mxu1 %v9138_v0 }
0x16f4   : > { %6541 = vmatmul.mubr.bf16.gmra.mrb[184].mxu1 %v6224_v9  ;;  %6734 = vmatmul.mubr.bf16.gmra.mrb[248].mxu0 %v6224_v9  ;;  %v6201_v17 = vadd.f32 %v13314_v50, %v6165_v36  ;;  %v9148_v9 = vld [vmem:[%s14307_s6 + $0x70] sm:$0xff]  }
0x16f5   : > { %6550 = vmatprep.mubr.bf16.mxu1 %v14516_v11  ;;  %6743 = vmatprep.mubr.bf16.mxu0 %v14516_v11 }
0x16f6   : > { %v6225_v1 = vpack.c.bf16 %v6201_v17, %v6200_v63  ;;  %8222 = vmatpush3.bf16.msra.mxu1 %v9139_v19  ;;  %v9149_v17 = vld [vmem:[%s14307_s6 + $0x30] sm:$0xff]   ;;  %v9151_v19 = vld [vmem:[%s14307_s6 + $0x38] sm:$0xff]  }
0x16f7   : > { %8223 = vmatprep.subr.bf16.mxu1 %v9140_v4 }
0x16fa   : > { %8224 = vmatpush3.bf16.msra.mxu1 %v9141_v6 }
0x16fb   : > { %8225 = vmatprep.subr.bf16.mxu1 %v9142_v33 }
0x16fc   : > { %6551 = vmatmul.mubr.bf16.gmra.mrb[188].mxu1 %v6225_v1  ;;  %6744 = vmatmul.mubr.bf16.gmra.mrb[252].mxu0 %v6225_v1 }
0x16fd   : > { %6560 = vmatprep.mubr.bf16.mxu1 %v14516_v11  ;;  %6753 = vmatprep.mubr.bf16.mxu0 %v14516_v11 }
0x16fe   : > { %8226 = vmatpush3.bf16.msra.mxu1 %v9143_v44 }
0x16ff   : > { %8227 = vmatprep.subr.bf16.mxu1 %v9144_v39 }
0x1702   : > { %8228 = vmatpush3.bf16.msra.mxu1 %v9145_v48 }
0x1703   : > { %8229 = vmatprep.subr.bf16.mxu1 %v9146_v60 }
0x1706   : > { %8230 = vmatpush3.bf16.msra.mxu1 %v9147_v28 }
0x1707   : > { %8231 = vmatprep.subr.bf16.mxu1 %v9148_v9 }
0x170a   : > { %8232 = vmatpush3.bf16.msra.mxu1 %v9149_v17 }
0x170b   : > { %8233 = vmatprep.subr.bf16.mxu1 %v9150_v29 }
0x170e   : > { %8234 = vmatpush3.bf16.msra.mxu1 %v9151_v19 }
0x1713   : > { %v5987_v56 = vpop.xlane.xlu0 %5986 }
0x1714   : > { %v6034_v12 = vmul.f32 0.0078125, %v5987_v56 }
0x1715   : > { %v5989_v40 = vpop.xlane.xlu1 %5988 }
0x1716   : > { %v6066_v3 = vadd.f32 1e-05, %v6034_v12  ;;  %v6035_v47 = vmul.f32 0.0078125, %v5989_v40 }
0x1717   : > { %v5991_v5 = vpop.xlane.xlu0 %5990 }
0x1718   : > { %9760 = vrsqrt.f32 %v6066_v3  ;;  %v6067_v36 = vadd.f32 1e-05, %v6035_v47  ;;  %v6036_v62 = vmul.f32 0.0078125, %v5991_v5 }
0x1719   : > { %v5993_v63 = vpop.xlane.xlu1 %5992 }
0x171a   : > { %9762 = vrsqrt.f32 %v6067_v36  ;;  %v6068_v1 = vadd.f32 1e-05, %v6036_v62  ;;  %v6037_v59 = vmul.f32 0.0078125, %v5993_v63 }
0x171c   : > { %9764 = vrsqrt.f32 %v6068_v1  ;;  %v6069_v0 = vadd.f32 1e-05, %v6037_v59 }
0x171e   : > { %9766 = vrsqrt.f32 %v6069_v0 }
0x1722   : > { %v9761_v4 = vpop.eup %9760 }
0x1723   : > { %v5995_v6 = vpop.xlane.xlu0 %5994  ;;  %v6130_v33 = vmul.f32 %v9761_v4, %v13271_v51 }
0x1724   : > { %v9763_v44 = vpop.eup %9762  ;;  %v6038_v39 = vmul.f32 0.0078125, %v5995_v6 }
0x1725   : > { %v5997_v48 = vpop.xlane.xlu1 %5996  ;;  %v6131_v56 = vmul.f32 %v9763_v44, %v13274_v21  ;;  %v6166_v60 = vmul.f32 %v13301_v32, %v6130_v33 }
0x1726   : > { %v9765_v12 = vpop.eup %9764  ;;  %v6070_v28 = vadd.f32 1e-05, %v6038_v39  ;;  %v6039_v40 = vmul.f32 0.0078125, %v5997_v48 }
0x1727   : > { %v6167_v3 = vmul.f32 %v13301_v32, %v6131_v56  ;;  %v6202_v9 = vadd.f32 %v13314_v50, %v6166_v60  ;;  %v6132_v51 = vmul.f32 %v9765_v12, %v13279_v27 }
0x1728   : > { %v9767_v47 = vpop.eup %9766  ;;  %9768 = vrsqrt.f32 %v6070_v28  ;;  %v6071_v5 = vadd.f32 1e-05, %v6039_v40 }
0x1729   : > { %v6203_v36 = vadd.f32 %v13314_v50, %v6167_v3  ;;  %v6133_v62 = vmul.f32 %v9767_v47, %v13284_v46  ;;  %v6168_v29 = vmul.f32 %v13301_v32, %v6132_v51 }
0x172a   : > { %9770 = vrsqrt.f32 %v6071_v5 }
0x172b   : > { %v5999_v21 = vpop.xlane.xlu0 %5998  ;;  %v6226_v17 = vpack.c.bf16 %v6203_v36, %v6202_v9  ;;  %v6169_v63 = vmul.f32 %v13301_v32, %v6133_v62  ;;  %v6204_v4 = vadd.f32 %v13314_v50, %v6168_v29 }
0x172c   : > { %v6040_v1 = vmul.f32 0.0078125, %v5999_v21 }
0x172d   : > { %v6001_v59 = vpop.xlane.xlu1 %6000  ;;  %6561 = vmatmul.mubr.bf16.gmra.mrb[192].mxu1 %v6226_v17  ;;  %6754 = vmatmul.mubr.bf16.gmra.mrb[0].mxu0 %v6226_v17  ;;  %v6205_v27 = vadd.f32 %v13314_v50, %v6169_v63 }
0x172e   : > { %v6072_v0 = vadd.f32 1e-05, %v6040_v1  ;;  %v6041_v19 = vmul.f32 0.0078125, %v6001_v59  ;;  %6570 = vmatprep.mubr.bf16.mxu1 %v14516_v11  ;;  %6763 = vmatprep.mubr.bf16.mxu0 %v14516_v11 }
0x172f   : > { %v6227_v33 = vpack.c.bf16 %v6205_v27, %v6204_v4 }
0x1730   : > { %9772 = vrsqrt.f32 %v6072_v0  ;;  %v6073_v46 = vadd.f32 1e-05, %v6041_v19 }
0x1732   : > { %v9769_v6 = vpop.eup %9768  ;;  %9774 = vrsqrt.f32 %v6073_v46 }
0x1733   : > { %v6134_v44 = vmul.f32 %v9769_v6, %v13291_v15 }
0x1734   : > { %v9771_v39 = vpop.eup %9770 }
0x1735   : > { %6571 = vmatmul.mubr.bf16.gmra.mrb[196].mxu1 %v6227_v33  ;;  %6764 = vmatmul.mubr.bf16.gmra.mrb[4].mxu0 %v6227_v33  ;;  %v6135_v48 = vmul.f32 %v9771_v39, %v13294_v61  ;;  %v6170_v56 = vmul.f32 %v13301_v32, %v6134_v44 }
0x1736   : > { %6580 = vmatprep.mubr.bf16.mxu1 %v14516_v11  ;;  %6773 = vmatprep.mubr.bf16.mxu0 %v14516_v11 }
0x1737   : > { %v6171_v60 = vmul.f32 %v13301_v32, %v6135_v48  ;;  %v6206_v12 = vadd.f32 %v13314_v50, %v6170_v56 }
0x1739   : > { %v6207_v28 = vadd.f32 %v13314_v50, %v6171_v60 }
0x173a   : > { %v9773_v40 = vpop.eup %9772 }
0x173b   : > { %v6228_v3 = vpack.c.bf16 %v6207_v28, %v6206_v12  ;;  %v6136_v15 = vmul.f32 %v9773_v40, %v13309_v24 }
0x173c   : > { %v9775_v47 = vpop.eup %9774 }
0x173d   : > { %6581 = vmatmul.mubr.bf16.gmra.mrb[200].mxu1 %v6228_v3  ;;  %6774 = vmatmul.mubr.bf16.gmra.mrb[8].mxu0 %v6228_v3  ;;  %v6137_v61 = vmul.f32 %v9775_v47, %v13318_v16  ;;  %v6172_v5 = vmul.f32 %v13301_v32, %v6136_v15 }
0x173e   : > { %6590 = vmatprep.mubr.bf16.mxu1 %v14516_v11  ;;  %6783 = vmatprep.mubr.bf16.mxu0 %v14516_v11 }
0x173f   : > { %v6173_v9 = vmul.f32 %v13301_v32, %v6137_v61  ;;  %v6208_v36 = vadd.f32 %v13314_v50, %v6172_v5 }
0x1741   : > { %v6209_v51 = vadd.f32 %v13314_v50, %v6173_v9 }
0x1743   : > { %v6229_v62 = vpack.c.bf16 %v6209_v51, %v6208_v36 }
0x1745   : > { %6591 = vmatmul.mubr.bf16.gmra.mrb[204].mxu1 %v6229_v62  ;;  %6784 = vmatmul.mubr.bf16.gmra.mrb[12].mxu0 %v6229_v62 }
0x1746   : > { %6600 = vmatprep.mubr.bf16.mxu1 %v14516_v11  ;;  %6793 = vmatprep.mubr.bf16.mxu0 %v14516_v11 }
0x174f   : > { %v6003_v24 = vpop.xlane.xlu0 %6002 }
0x1750   : > { %v6042_v16 = vmul.f32 0.0078125, %v6003_v24 }
0x1751   : > { %v6005_v21 = vpop.xlane.xlu1 %6004 }
0x1752   : > { %v6074_v17 = vadd.f32 1e-05, %v6042_v16  ;;  %v6043_v63 = vmul.f32 0.0078125, %v6005_v21 }
0x1754   : > { %9776 = vrsqrt.f32 %v6074_v17  ;;  %v6075_v1 = vadd.f32 1e-05, %v6043_v63 }
0x1756   : > { %9778 = vrsqrt.f32 %v6075_v1  ;;  %v14599_v1 = vld [vmem:[#allocation6_spill] sm:$0xff] }
0x1757   : > { %v6007_v59 = vpop.xlane.xlu0 %6006 }
0x1758   : > { %v6044_v29 = vmul.f32 0.0078125, %v6007_v59  ;;  %v6282_v59 = vsub.s32 3, %v14599_v1 }
0x1759   : > { %v6009_v0 = vpop.xlane.xlu1 %6008 }
0x175a   : > { %v6076_v19 = vadd.f32 1e-05, %v6044_v29  ;;  %v6045_v27 = vmul.f32 0.0078125, %v6009_v0 }
0x175c   : > { %9780 = vrsqrt.f32 %v6076_v19  ;;  %v6077_v46 = vadd.f32 1e-05, %v6045_v27  ;;  %v14600_v27 = vsub.s32 2, %v14599_v1 }
0x175e   : > { %v9777_v4 = vpop.eup %9776  ;;  %9782 = vrsqrt.f32 %v6077_v46 }
0x175f   : > { %v6138_v6 = vmul.f32 %v9777_v4, %v13345_v23 }
0x1760   : > { %v9779_v33 = vpop.eup %9778 }
0x1761   : > { %v6139_v44 = vmul.f32 %v9779_v33, %v13348_v37  ;;  %v6174_v39 = vmul.f32 %v13301_v32, %v6138_v6 }
0x1762   : > { %v6011_v48 = vpop.xlane.xlu0 %6010 }
0x1763   : > { %v6046_v56 = vmul.f32 0.0078125, %v6011_v48  ;;  %v6175_v60 = vmul.f32 %v13301_v32, %v6139_v44  ;;  %v6210_v3 = vadd.f32 %v13314_v50, %v6174_v39 }
0x1764   : > { %v6013_v12 = vpop.xlane.xlu1 %6012 }
0x1765   : > { %v6078_v28 = vadd.f32 1e-05, %v6046_v56  ;;  %v6047_v40 = vmul.f32 0.0078125, %v6013_v12  ;;  %v6211_v15 = vadd.f32 %v13314_v50, %v6175_v60 }
0x1766   : > { %v9781_v47 = vpop.eup %9780 }
0x1767   : > { %9784 = vrsqrt.f32 %v6078_v28  ;;  %v6079_v61 = vadd.f32 1e-05, %v6047_v40  ;;  %v6230_v23 = vpack.c.bf16 %v6211_v15, %v6210_v3  ;;  %v6140_v5 = vmul.f32 %v9781_v47, %v13355_v31 }
0x1768   : > { %v9783_v37 = vpop.eup %9782 }
0x1769   : > { %9786 = vrsqrt.f32 %v6079_v61  ;;  %6601 = vmatmul.mubr.bf16.gmra.mrb[208].mxu1 %v6230_v23  ;;  %6794 = vmatmul.mubr.bf16.gmra.mrb[16].mxu0 %v6230_v23  ;;  %v6141_v9 = vmul.f32 %v9783_v37, %v13358_v30  ;;  %v6176_v36 = vmul.f32 %v13301_v32, %v6140_v5  ;;  %v13521_v30 = vld [vmem:[%s14306_s5] sm:$0xf] }
0x176a   : > { %v6015_v51 = vpop.xlane.xlu0 %6014  ;;  %6610 = vmatprep.mubr.bf16.mxu1 %v14516_v11  ;;  %6803 = vmatprep.mubr.bf16.mxu0 %v14516_v11  ;;  %v13527_v46 = vrot.slane %v13521_v30, %v14600_v27  ;;  %v13530_v4 = vrot.slane %v13521_v30, %v6282_v59 }
0x176b   : > { %v6048_v62 = vmul.f32 0.0078125, %v6015_v51  ;;  %v6177_v24 = vmul.f32 %v13301_v32, %v6141_v9  ;;  %v6212_v31 = vadd.f32 %v13314_v50, %v6176_v36 }
0x176c   : > { %v6017_v16 = vpop.xlane.xlu1 %6016 }
0x176d   : > { %v6080_v21 = vadd.f32 1e-05, %v6048_v62  ;;  %v6049_v17 = vmul.f32 0.0078125, %v6017_v16  ;;  %v6213_v63 = vadd.f32 %v13314_v50, %v6177_v24 }
0x176f   : > { %9788 = vrsqrt.f32 %v6080_v21  ;;  %v6081_v29 = vadd.f32 1e-05, %v6049_v17  ;;  %v6231_v0 = vpack.c.bf16 %v6213_v63, %v6212_v31 }
0x1771   : > { %v9785_v19 = vpop.eup %9784  ;;  %9790 = vrsqrt.f32 %v6081_v29  ;;  %6611 = vmatmul.mubr.bf16.gmra.mrb[212].mxu1 %v6231_v0  ;;  %6804 = vmatmul.mubr.bf16.gmra.mrb[20].mxu0 %v6231_v0 }
0x1772   : > { %6620 = vmatprep.mubr.bf16.mxu1 %v14516_v11  ;;  %6813 = vmatprep.mubr.bf16.mxu0 %v14516_v11  ;;  %v6142_v6 = vmul.f32 %v9785_v19, %v13366_v45 }
0x1773   : > { %v9787_v33 = vpop.eup %9786 }
0x1774   : > { %v13535_v44 = vpop.f32.mrb[160].mxu1  ;;  %v6675_v39 = vpop.f32.mrb[224].mxu0  ;;  %v6143_v48 = vmul.f32 %v9787_v33, %v13371_v2  ;;  %v6178_v56 = vmul.f32 %v13301_v32, %v6142_v6 }
0x1775   : > { %v13540_v60 = vadd.f32 %v6675_v39, %v13527_v46  ;;  %v13542_v12 = vpop.f32.mrb[161].mxu1  ;;  %v6677_v28 = vpop.f32.mrb[225].mxu0 }
0x1776   : > { %v13545_v40 = vadd.f32 %v6677_v28, %v13530_v4  ;;  %v13547_v3 = vpop.f32.mrb[162].mxu1  ;;  %v6679_v45 = vpop.f32.mrb[226].mxu0  ;;  %v6179_v15 = vmul.f32 %v13301_v32, %v6143_v48  ;;  %v6214_v9 = vadd.f32 %v13314_v50, %v6178_v56 }
0x1777   : > { %v6834_v47 = vsub.f32 0.0, %v13540_v60  ;;  %v13552_v2 = vadd.f32 %v6679_v45, %v13527_v46  ;;  %v13554_v61 = vpop.f32.mrb[163].mxu1  ;;  %v6681_v23 = vpop.f32.mrb[227].mxu0 }
0x1778   : > { %v6835_v5 = vsub.f32 0.0, %v13545_v40  ;;  %v13558_v37 = vadd.f32 %v6681_v23, %v13530_v4  ;;  %v6215_v36 = vadd.f32 %v13314_v50, %v6179_v15 }
0x1779   : > { %v9789_v51 = vpop.eup %9788  ;;  %v6898_v62 = vmul.f32 1.442695, %v6834_v47  ;;  %v6836_v24 = vsub.f32 0.0, %v13552_v2 }
0x177a   : > { %v6900_v16 = vmul.f32 1.442695, %v6835_v5  ;;  %v6837_v21 = vsub.f32 0.0, %v13558_v37  ;;  %v6232_v17 = vpack.c.bf16 %v6215_v36, %v6214_v9  ;;  %v6144_v31 = vmul.f32 %v9789_v51, %v13382_v14 }
0x177b   : > { %v9791_v63 = vpop.eup %9790  ;;  %9792 = vpow2.f32 %v6898_v62  ;;  %v6902_v59 = vmul.f32 1.442695, %v6836_v24 }
0x177c   : > { %9794 = vpow2.f32 %v6900_v16  ;;  %v6904_v29 = vmul.f32 1.442695, %v6837_v21  ;;  %6621 = vmatmul.mubr.bf16.gmra.mrb[216].mxu1 %v6232_v17  ;;  %6814 = vmatmul.mubr.bf16.gmra.mrb[24].mxu0 %v6232_v17  ;;  %v6145_v0 = vmul.f32 %v9791_v63, %v13389_v7  ;;  %v6180_v19 = vmul.f32 %v13301_v32, %v6144_v31 }
0x177d   : > { %9796 = vpow2.f32 %v6902_v59  ;;  %6630 = vmatprep.mubr.bf16.mxu1 %v14516_v11  ;;  %6823 = vmatprep.mubr.bf16.mxu0 %v14516_v11 }
0x177e   : > { %9798 = vpow2.f32 %v6904_v29  ;;  %v6181_v27 = vmul.f32 %v13301_v32, %v6145_v0  ;;  %v6216_v33 = vadd.f32 %v13314_v50, %v6180_v19 }
0x1780   : > { %v13570_v14 = vpop.f32.mrb[164].mxu1  ;;  %v6685_v6 = vpop.f32.mrb[228].mxu0  ;;  %v6217_v39 = vadd.f32 %v13314_v50, %v6181_v27 }
0x1781   : > { %v13575_v48 = vadd.f32 %v6685_v6, %v13527_v46  ;;  %v13577_v7 = vpop.f32.mrb[165].mxu1  ;;  %v6687_v56 = vpop.f32.mrb[229].mxu0 }
0x1782   : > { %v13580_v28 = vadd.f32 %v6687_v56, %v13530_v4  ;;  %v13582_v11 = vpop.f32.mrb[166].mxu1  ;;  %v6689_v45 = vpop.f32.mrb[230].mxu0  ;;  %v6233_v32 = vpack.c.bf16 %v6217_v39, %v6216_v33 }
0x1783   : > { %v6838_v15 = vsub.f32 0.0, %v13575_v48  ;;  %v13586_v47 = vadd.f32 %v6689_v45, %v13527_v46  ;;  %v13588_v23 = vpop.f32.mrb[167].mxu1  ;;  %v6691_v50 = vpop.f32.mrb[231].mxu0 }
0x1784   : > { %v6839_v5 = vsub.f32 0.0, %v13580_v28  ;;  %v13592_v9 = vadd.f32 %v6691_v50, %v13530_v4  ;;  %6631 = vmatmul.mubr.bf16.gmra.mrb[220].mxu1 %v6233_v32  ;;  %6824 = vmatmul.mubr.bf16.gmra.mrb[28].mxu0 %v6233_v32 }
0x1785   : > { %v9793_v36 = vpop.eup %9792  ;;  %v6906_v51 = vmul.f32 1.442695, %v6838_v15  ;;  %v6840_v62 = vsub.f32 0.0, %v13586_v47 }
0x1786   : > { %v9795_v24 = vpop.eup %9794  ;;  %v7026_v16 = vadd.f32 1.0, %v9793_v36  ;;  %v6841_v21 = vsub.f32 0.0, %v13592_v9  ;;  %v6908_v29 = vmul.f32 1.442695, %v6839_v5 }
0x1787   : > { %v9797_v17 = vpop.eup %9796  ;;  %v7027_v31 = vadd.f32 1.0, %v9795_v24  ;;  %9800 = vpow2.f32 %v6906_v51  ;;  %v6910_v6 = vmul.f32 1.442695, %v6840_v62 }
0x1788   : > { %v9799_v63 = vpop.eup %9798  ;;  %9802 = vrcp.f32 %v7026_v16  ;;  %v7028_v59 = vadd.f32 1.0, %v9797_v17  ;;  %v13596_v0 = vpop.f32.mrb[168].mxu1  ;;  %v6912_v45 = vmul.f32 1.442695, %v6841_v21 }
0x1789   : > { %v6695_v19 = vpop.f32.mrb[232].mxu0  ;;  %9804 = vrcp.f32 %v7027_v31  ;;  %v7029_v27 = vadd.f32 1.0, %v9799_v63  ;;  %v13601_v39 = vpop.f32.mrb[169].mxu1 }
0x178a   : > { %v13599_v33 = vadd.f32 %v6695_v19, %v13527_v46  ;;  %v6697_v56 = vpop.f32.mrb[233].mxu0  ;;  %9806 = vrcp.f32 %v7028_v59  ;;  %v13606_v15 = vpop.f32.mrb[170].mxu1  ;;  %v14601_v59 = vsub.s32 0, %v14599_v1 }
0x178b   : > { %v13604_v32 = vadd.f32 %v6697_v56, %v13530_v4  ;;  %v6699_v50 = vpop.f32.mrb[234].mxu0  ;;  %9808 = vrcp.f32 %v7029_v27  ;;  %v13612_v51 = vpop.f32.mrb[171].mxu1  ;;  %v14602_v27 = vsub.s32 1, %v14599_v1 }
0x178c   : > { %v6842_v5 = vsub.f32 0.0, %v13599_v33  ;;  %v13610_v36 = vadd.f32 %v6699_v50, %v13527_v46  ;;  %v6701_v62 = vpop.f32.mrb[235].mxu0  ;;  %9810 = vpow2.f32 %v6908_v29  ;;  %v13623_v19 = vrot.slane %v13521_v30, %v14601_v59 }
0x178d   : > { %v6843_v24 = vsub.f32 0.0, %v13604_v32  ;;  %v13616_v16 = vadd.f32 %v6701_v62, %v13530_v4  ;;  %9812 = vpow2.f32 %v6910_v6  ;;  %v13628_v56 = vrot.slane %v13521_v30, %v14602_v27 }
0x178e   : > { %v6914_v21 = vmul.f32 1.442695, %v6842_v5  ;;  %v6844_v17 = vsub.f32 0.0, %v13610_v36  ;;  %9814 = vpow2.f32 %v6912_v45 }
0x178f   : > { %v6916_v31 = vmul.f32 1.442695, %v6843_v24  ;;  %v6845_v63 = vsub.f32 0.0, %v13616_v16  ;;  %v6483_v24 = vadd.f32 %v13535_v44, %v13623_v19  ;;  %v6485_v1 = vadd.f32 %v13542_v12, %v13628_v56 }
0x1790   : > { %9816 = vpow2.f32 %v6914_v21  ;;  %v6918_v29 = vmul.f32 1.442695, %v6844_v17  ;;  %v6489_v44 = vadd.f32 %v13554_v61, %v13628_v56 }
0x1791   : > { %9818 = vpow2.f32 %v6916_v31  ;;  %v6920_v6 = vmul.f32 1.442695, %v6845_v63  ;;  %v9801_v50 = vpop.eup %9800  ;;  %v6487_v63 = vadd.f32 %v13547_v3, %v13623_v19 }
0x1792   : > { %9820 = vpow2.f32 %v6918_v29  ;;  %v9803_v45 = vpop.eup %9802  ;;  %v7030_v5 = vadd.f32 1.0, %v9801_v50 }
0x1793   : > { %9822 = vpow2.f32 %v6920_v6  ;;  %v9805_v62 = vpop.eup %9804  ;;  %v7154_v59 = vmul.f32 %v9803_v45, %v13540_v60 }
0x1794   : > { %v9807_v21 = vpop.eup %9806  ;;  %v7155_v30 = vmul.f32 %v9805_v62, %v13545_v40  ;;  %9824 = vrcp.f32 %v7030_v5 }
0x1795   : > { %v9809_v17 = vpop.eup %9808  ;;  %v7218_v31 = vmul.f32 %v7154_v59, %v6483_v24  ;;  %v7156_v29 = vmul.f32 %v9807_v21, %v13552_v2 }
0x1796   : > { %v9811_v27 = vpop.eup %9810  ;;  %v7219_v6 = vmul.f32 %v7155_v30, %v6485_v1  ;;  %v7157_v60 = vmul.f32 %v9809_v17, %v13558_v37 }
0x1797   : > { %v9813_v50 = vpop.eup %9812  ;;  %v7220_v45 = vmul.f32 %v7156_v29, %v6487_v63  ;;  %v7031_v12 = vadd.f32 1.0, %v9811_v27 }
0x1798   : > { %v9815_v52 = vpop.eup %9814  ;;  %v7221_v40 = vmul.f32 %v7157_v60, %v6489_v44  ;;  %v7032_v5 = vadd.f32 1.0, %v9813_v50  ;;  %v6495_v44 = vadd.f32 %v13577_v7, %v13628_v56  ;;  %v6503_v7 = vadd.f32 %v13596_v0, %v13623_v19 }
0x1799   : > { %v7282_v24 = vpack.c.bf16 %v7220_v45, %v7218_v31  ;;  %9826 = vrcp.f32 %v7031_v12  ;;  %v7033_v59 = vadd.f32 1.0, %v9815_v52  ;;  %v6493_v31 = vadd.f32 %v13570_v14, %v13623_v19 }
0x179a   : > { %v9817_v62 = vpop.eup %9816  ;;  %9828 = vrcp.f32 %v7032_v5  ;;  %v7283_v21 = vpack.c.bf16 %v7221_v40, %v7219_v6  ;;  %v6497_v45 = vadd.f32 %v13582_v11, %v13623_v19  ;;  %v6499_v14 = vadd.f32 %v13588_v23, %v13628_v56 }
0x179b   : > { %v9819_v3 = vpop.eup %9818  ;;  %v7034_v2 = vadd.f32 1.0, %v9817_v62  ;;  %9830 = vrcp.f32 %v7033_v59  ;;  %v6505_v11 = vadd.f32 %v13601_v39, %v13628_v56  ;;  %v6507_v23 = vadd.f32 %v13606_v15, %v13623_v19 }
0x179c   : > { %v9821_v1 = vpop.eup %9820  ;;  %v7035_v30 = vadd.f32 1.0, %v9819_v3  ;;  %7478 = vmatprep.mubr.bf16.mxu1 %v7283_v21  ;;  %v6509_v0 = vadd.f32 %v13612_v51, %v13628_v56 }
0x179d   : > { %v9823_v61 = vpop.eup %9822  ;;  %9832 = vrcp.f32 %v7034_v2  ;;  %v7036_v37 = vadd.f32 1.0, %v9821_v1  ;;  %7479 = vmatmul.mubr.bf16.vlgmr.msra.gmra.mrb[224].mxu1 %v7282_v24 }
0x179e   : > { %9834 = vrcp.f32 %v7035_v30  ;;  %v7037_v17 = vadd.f32 1.0, %v9823_v61  ;;  %v9825_v63 = vpop.eup %9824 }
0x179f   : > { %9836 = vrcp.f32 %v7036_v37  ;;  %v7158_v52 = vmul.f32 %v9825_v63, %v13575_v48 }
0x17a0   : > { %9838 = vrcp.f32 %v7037_v17 }
0x17a1   : > { %v7222_v29 = vmul.f32 %v7158_v52, %v6493_v31 }
0x17a3   : > { %v9827_v27 = vpop.eup %9826 }
0x17a4   : > { %v9829_v6 = vpop.eup %9828  ;;  %v7159_v60 = vmul.f32 %v9827_v27, %v13580_v28 }
0x17a5   : > { %v9831_v50 = vpop.eup %9830  ;;  %v7160_v12 = vmul.f32 %v9829_v6, %v13586_v47 }
0x17a6   : > { %v7223_v5 = vmul.f32 %v7159_v60, %v6495_v44  ;;  %v7161_v48 = vmul.f32 %v9831_v50, %v13592_v9 }
0x17a7   : > { %v9833_v40 = vpop.eup %9832  ;;  %v7224_v24 = vmul.f32 %v7160_v12, %v6497_v45 }
0x17a8   : > { %v9835_v62 = vpop.eup %9834  ;;  %v7162_v28 = vmul.f32 %v9833_v40, %v13599_v33  ;;  %v7225_v3 = vmul.f32 %v7161_v48, %v6499_v14 }
0x17a9   : > { %v9837_v59 = vpop.eup %9836  ;;  %v7163_v47 = vmul.f32 %v9835_v62, %v13604_v32  ;;  %v7284_v1 = vpack.c.bf16 %v7224_v24, %v7222_v29 }
0x17aa   : > { %v9839_v2 = vpop.eup %9838  ;;  %v7226_v21 = vmul.f32 %v7162_v28, %v6503_v7  ;;  %v7164_v9 = vmul.f32 %v9837_v59, %v13610_v36  ;;  %v7285_v61 = vpack.c.bf16 %v7225_v3, %v7223_v5 }
0x17ab   : > { %v7227_v30 = vmul.f32 %v7163_v47, %v6505_v11  ;;  %v7165_v33 = vmul.f32 %v9839_v2, %v13616_v16 }
0x17ac   : > { %v7228_v37 = vmul.f32 %v7164_v9, %v6507_v23  ;;  %7486 = vmatprep.mubr.bf16.mxu1 %v7285_v61  ;;  %v13666_v39 = vpop.f32.mrb[172].mxu1  ;;  %v6705_v32 = vpop.f32.mrb[236].mxu0 }
0x17ad   : > { %v7229_v17 = vmul.f32 %v7165_v33, %v6509_v0  ;;  %7487 = vmatmul.mubr.bf16.gmra.mrb[228].mxu1 %v7284_v1  ;;  %v13669_v63 = vadd.f32 %v6705_v32, %v13527_v46  ;;  %v13671_v15 = vpop.f32.mrb[173].mxu1  ;;  %v6707_v36 = vpop.f32.mrb[237].mxu0 }
0x17ae   : > { %v7286_v31 = vpack.c.bf16 %v7228_v37, %v7226_v21  ;;  %v13674_v52 = vadd.f32 %v6707_v36, %v13530_v4  ;;  %v13676_v51 = vpop.f32.mrb[174].mxu1  ;;  %v6709_v16 = vpop.f32.mrb[238].mxu0 }
0x17af   : > { %v7287_v29 = vpack.c.bf16 %v7229_v17, %v7227_v30  ;;  %v6846_v27 = vsub.f32 0.0, %v13669_v63  ;;  %v13680_v6 = vadd.f32 %v6709_v16, %v13527_v46  ;;  %v13682_v44 = vpop.f32.mrb[175].mxu1  ;;  %v6711_v60 = vpop.f32.mrb[239].mxu0 }
0x17b0   : > { %v6847_v50 = vsub.f32 0.0, %v13674_v52  ;;  %v13686_v45 = vadd.f32 %v6711_v60, %v13530_v4 }
0x17b1   : > { %7494 = vmatprep.mubr.bf16.mxu1 %v7287_v29  ;;  %v6922_v12 = vmul.f32 1.442695, %v6846_v27  ;;  %v6848_v40 = vsub.f32 0.0, %v13680_v6 }
0x17b2   : > { %v6924_v5 = vmul.f32 1.442695, %v6847_v50  ;;  %v6849_v14 = vsub.f32 0.0, %v13686_v45 }
0x17b3   : > { %9840 = vpow2.f32 %v6922_v12  ;;  %v6926_v48 = vmul.f32 1.442695, %v6848_v40 }
0x17b4   : > { %9842 = vpow2.f32 %v6924_v5  ;;  %v6928_v62 = vmul.f32 1.442695, %v6849_v14  ;;  %v13690_v24 = vpop.f32.mrb[176].mxu1  ;;  %v6715_v7 = vpop.f32.mrb[240].mxu0 }
0x17b5   : > { %9844 = vpow2.f32 %v6926_v48  ;;  %7495 = vmatmul.mubr.bf16.gmra.mrb[232].mxu1 %v7286_v31  ;;  %v13693_v28 = vadd.f32 %v6715_v7, %v13527_v46  ;;  %v13695_v59 = vpop.f32.mrb[177].mxu1  ;;  %v6717_v3 = vpop.f32.mrb[241].mxu0 }
0x17b6   : > { %9846 = vpow2.f32 %v6928_v62  ;;  %v13698_v11 = vadd.f32 %v6717_v3, %v13530_v4  ;;  %v13700_v47 = vpop.f32.mrb[178].mxu1  ;;  %v6719_v2 = vpop.f32.mrb[242].mxu0 }
0x17b7   : > { %v6850_v21 = vsub.f32 0.0, %v13693_v28  ;;  %v13704_v23 = vadd.f32 %v6719_v2, %v13527_v46  ;;  %v13706_v9 = vpop.f32.mrb[179].mxu1  ;;  %v6721_v1 = vpop.f32.mrb[243].mxu0 }
0x17b8   : > { %v6851_v30 = vsub.f32 0.0, %v13698_v11  ;;  %v13710_v0 = vadd.f32 %v6721_v1, %v13530_v4 }
0x17b9   : > { %v6930_v33 = vmul.f32 1.442695, %v6850_v21  ;;  %v6852_v61 = vsub.f32 0.0, %v13704_v23 }
0x17ba   : > { %v6932_v37 = vmul.f32 1.442695, %v6851_v30  ;;  %v6853_v17 = vsub.f32 0.0, %v13710_v0 }
0x17bb   : > { %9848 = vpow2.f32 %v6930_v33  ;;  %v6934_v32 = vmul.f32 1.442695, %v6852_v61 }
0x17bc   : > { %9850 = vpow2.f32 %v6932_v37  ;;  %v6936_v36 = vmul.f32 1.442695, %v6853_v17 }
0x17bd   : > { %v9841_v31 = vpop.eup %9840  ;;  %9852 = vpow2.f32 %v6934_v32 }
0x17be   : > { %v9843_v16 = vpop.eup %9842  ;;  %v7038_v29 = vadd.f32 1.0, %v9841_v31  ;;  %9854 = vpow2.f32 %v6936_v36 }
0x17bf   : > { %v9845_v27 = vpop.eup %9844  ;;  %v7039_v60 = vadd.f32 1.0, %v9843_v16  ;;  %v13714_v50 = vpop.f32.mrb[180].mxu1 }
0x17c0   : > { %v6725_v12 = vpop.f32.mrb[244].mxu0  ;;  %v9847_v40 = vpop.eup %9846  ;;  %9856 = vrcp.f32 %v7038_v29  ;;  %v7040_v5 = vadd.f32 1.0, %v9845_v27 }
0x17c1   : > { %v13717_v14 = vadd.f32 %v6725_v12, %v13527_v46  ;;  %v13719_v48 = vpop.f32.mrb[181].mxu1  ;;  %v6727_v62 = vpop.f32.mrb[245].mxu0  ;;  %9858 = vrcp.f32 %v7039_v60  ;;  %v7041_v7 = vadd.f32 1.0, %v9847_v40  ;;  %v6513_v40 = vadd.f32 %v13666_v39, %v13623_v19 }
0x17c2   : > { %v13722_v3 = vadd.f32 %v6727_v62, %v13530_v4  ;;  %v13724_v2 = vpop.f32.mrb[182].mxu1  ;;  %v6729_v21 = vpop.f32.mrb[246].mxu0  ;;  %9860 = vrcp.f32 %v7040_v5  ;;  %v6515_v5 = vadd.f32 %v13671_v15, %v13628_v56 }
0x17c3   : > { %v6854_v1 = vsub.f32 0.0, %v13717_v14  ;;  %v13728_v30 = vadd.f32 %v6729_v21, %v13527_v46  ;;  %v13730_v33 = vpop.f32.mrb[183].mxu1  ;;  %v6731_v61 = vpop.f32.mrb[247].mxu0  ;;  %9862 = vrcp.f32 %v7041_v7 }
0x17c4   : > { %v6855_v37 = vsub.f32 0.0, %v13722_v3  ;;  %v13734_v17 = vadd.f32 %v6731_v61, %v13530_v4 }
0x17c5   : > { %v6938_v32 = vmul.f32 1.442695, %v6854_v1  ;;  %v6856_v36 = vsub.f32 0.0, %v13728_v30  ;;  %v9849_v31 = vpop.eup %9848 }
0x17c6   : > { %v6940_v16 = vmul.f32 1.442695, %v6855_v37  ;;  %v6857_v29 = vsub.f32 0.0, %v13734_v17  ;;  %v9851_v27 = vpop.eup %9850  ;;  %v7042_v60 = vadd.f32 1.0, %v9849_v31 }
0x17c7   : > { %9864 = vpow2.f32 %v6938_v32  ;;  %v9853_v12 = vpop.eup %9852  ;;  %v7043_v62 = vadd.f32 1.0, %v9851_v27  ;;  %v13742_v7 = vpop.f32.mrb[184].mxu1  ;;  %v6942_v37 = vmul.f32 1.442695, %v6856_v36 }
0x17c8   : > { %9866 = vpow2.f32 %v6940_v16  ;;  %v6735_v21 = vpop.f32.mrb[248].mxu0  ;;  %v9855_v1 = vpop.eup %9854  ;;  %v7044_v61 = vadd.f32 1.0, %v9853_v12  ;;  %v6944_v20 = vmul.f32 1.442695, %v6857_v29 }
0x17c9   : > { %9868 = vrcp.f32 %v7042_v60  ;;  %v13745_v35 = vadd.f32 %v6735_v21, %v13527_v46  ;;  %v13747_v32 = vpop.f32.mrb[185].mxu1  ;;  %v6737_v31 = vpop.f32.mrb[249].mxu0  ;;  %v7045_v39 = vadd.f32 1.0, %v9855_v1  ;;  %v6517_v60 = vadd.f32 %v13676_v51, %v13623_v19 }
0x17ca   : > { %9870 = vrcp.f32 %v7043_v62  ;;  %v13750_v15 = vadd.f32 %v6737_v31, %v13530_v4  ;;  %v13752_v16 = vpop.f32.mrb[186].mxu1  ;;  %v6739_v27 = vpop.f32.mrb[250].mxu0  ;;  %v6519_v31 = vadd.f32 %v13682_v44, %v13628_v56 }
0x17cb   : > { %v9857_v10 = vpop.eup %9856  ;;  %9872 = vrcp.f32 %v7044_v61  ;;  %v6858_v36 = vsub.f32 0.0, %v13745_v35  ;;  %v13758_v12 = vadd.f32 %v6739_v27, %v13527_v46  ;;  %v13760_v21 = vpop.f32.mrb[187].mxu1 }
0x17cc   : > { %v6741_v62 = vpop.f32.mrb[251].mxu0  ;;  %v9859_v29 = vpop.eup %9858  ;;  %v7166_v1 = vmul.f32 %v9857_v10, %v13669_v63  ;;  %9874 = vrcp.f32 %v7045_v39  ;;  %v6859_v42 = vsub.f32 0.0, %v13750_v15 }
0x17cd   : > { %v9861_v41 = vpop.eup %9860  ;;  %v7167_v51 = vmul.f32 %v9859_v29, %v13674_v52  ;;  %9876 = vpow2.f32 %v6942_v37  ;;  %v6946_v61 = vmul.f32 1.442695, %v6858_v36  ;;  %v6860_v27 = vsub.f32 0.0, %v13758_v12 }
0x17ce   : > { %v9863_v53 = vpop.eup %9862  ;;  %v13768_v49 = vmul.f32 %v7166_v1, %v6513_v40  ;;  %v7168_v34 = vmul.f32 %v9861_v41, %v13680_v6  ;;  %9878 = vpow2.f32 %v6944_v20  ;;  %v6948_v10 = vmul.f32 1.442695, %v6859_v42 }
0x17cf   : > { %v13771_v63 = vmul.f32 %v7167_v51, %v6515_v5  ;;  %v7169_v44 = vmul.f32 %v9863_v53, %v13686_v45  ;;  %9880 = vpow2.f32 %v6946_v61  ;;  %v6950_v39 = vmul.f32 1.442695, %v6860_v27  ;;  %v13781_v40 = vpop.f32.mrb[188].mxu1  ;;  %v6745_v41 = vpop.f32.mrb[252].mxu0 }
0x17d0   : > { %v13774_v58 = vmul.f32 %v7168_v34, %v6517_v60  ;;  %v6523_v52 = vadd.f32 %v13690_v24, %v13623_v19  ;;  %9882 = vpow2.f32 %v6948_v10  ;;  %v13779_v37 = vadd.f32 %v6741_v62, %v13530_v4  ;;  %v13788_v34 = vpop.f32.mrb[189].mxu1  ;;  %v6747_v45 = vpop.f32.mrb[253].mxu0 }
0x17d1   : > { %v9865_v20 = vpop.eup %9864  ;;  %v7233_v42 = vmul.f32 %v7169_v44, %v6519_v31  ;;  %v6525_v6 = vadd.f32 %v13695_v59, %v13628_v56  ;;  %9884 = vpow2.f32 %v6950_v39  ;;  %v13786_v53 = vadd.f32 %v6745_v41, %v13527_v46  ;;  %v13796_v29 = vpop.f32.mrb[190].mxu1 }
0x17d2   : > { %v9867_v24 = vpop.eup %9866  ;;  %v6527_v5 = vadd.f32 %v13700_v47, %v13623_v19  ;;  %v7046_v60 = vadd.f32 1.0, %v9865_v20  ;;  %v6861_v36 = vsub.f32 0.0, %v13779_v37  ;;  %v13794_v62 = vadd.f32 %v6747_v45, %v13530_v4  ;;  %v6749_v59 = vpop.f32.mrb[254].mxu0 }
0x17d3   : > { %v9869_v1 = vpop.eup %9868  ;;  %v6529_v31 = vadd.f32 %v13706_v9, %v13628_v56  ;;  %v7047_v51 = vadd.f32 1.0, %v9867_v24  ;;  %v6862_v61 = vsub.f32 0.0, %v13786_v53  ;;  %v13802_v27 = vadd.f32 %v6749_v59, %v13527_v46  ;;  %v13804_v47 = vpop.f32.mrb[191].mxu1 }
0x17d4   : > { %v6751_v10 = vpop.f32.mrb[255].mxu0  ;;  %v9871_v44 = vpop.eup %9870  ;;  %v7170_v39 = vmul.f32 %v9869_v1, %v13693_v28  ;;  %9886 = vrcp.f32 %v7046_v60  ;;  %v6952_v41 = vmul.f32 1.442695, %v6861_v36  ;;  %v6863_v20 = vsub.f32 0.0, %v13794_v62 }
0x17d5   : > { %v9873_v45 = vpop.eup %9872  ;;  %v7171_v25 = vmul.f32 %v9871_v44, %v13698_v11  ;;  %9888 = vrcp.f32 %v7047_v51  ;;  %v6954_v9 = vmul.f32 1.442695, %v6862_v61  ;;  %v6864_v24 = vsub.f32 0.0, %v13802_v27 }
0x17d6   : > { %v9875_v57 = vpop.eup %9874  ;;  %v7234_v59 = vmul.f32 %v7170_v39, %v6523_v52  ;;  %v7172_v38 = vmul.f32 %v9873_v45, %v13704_v23  ;;  %9890 = vpow2.f32 %v6952_v41  ;;  %v6956_v55 = vmul.f32 1.442695, %v6863_v20 }
0x17d7   : > { %v9877_v43 = vpop.eup %9876  ;;  %v7235_v54 = vmul.f32 %v7171_v25, %v6525_v6  ;;  %v7173_v28 = vmul.f32 %v9875_v57, %v13710_v0  ;;  %9892 = vpow2.f32 %v6954_v9  ;;  %v6958_v60 = vmul.f32 1.442695, %v6864_v24 }
0x17d8   : > { %v9879_v36 = vpop.eup %9878  ;;  %v7236_v1 = vmul.f32 %v7172_v38, %v6527_v5  ;;  %v7048_v22 = vadd.f32 1.0, %v9877_v43  ;;  %9894 = vpow2.f32 %v6956_v55  ;;  %v13813_v52 = vadd.f32 %v6751_v10, %v13530_v4 }
0x17d9   : > { %v9881_v11 = vpop.eup %9880  ;;  %v7237_v51 = vmul.f32 %v7173_v28, %v6529_v31  ;;  %v7049_v61 = vadd.f32 1.0, %v9879_v36  ;;  %9896 = vpow2.f32 %v6958_v60  ;;  %v7289_v25 = vpack.c.bf16 %v7233_v42, %v13771_v63 }
0x17da   : > { %v9883_v23 = vpop.eup %9882  ;;  %9898 = vrcp.f32 %v7048_v22  ;;  %v7050_v44 = vadd.f32 1.0, %v9881_v11  ;;  %v7288_v57 = vpack.c.bf16 %v13774_v58, %v13768_v49  ;;  %v6865_v55 = vsub.f32 0.0, %v13813_v52 }
0x17db   : > { %v9885_v0 = vpop.eup %9884  ;;  %9900 = vrcp.f32 %v7049_v61  ;;  %v7051_v38 = vadd.f32 1.0, %v9883_v23  ;;  %v7291_v43 = vpack.c.bf16 %v7237_v51, %v7235_v54  ;;  %7502 = vmatprep.mubr.bf16.mxu1 %v7289_v25  ;;  %v7290_v5 = vpack.c.bf16 %v7236_v1, %v7234_v59 }
0x17dc   : > { %9902 = vrcp.f32 %v7050_v44  ;;  %v7052_v6 = vadd.f32 1.0, %v9885_v0  ;;  %v6960_v31 = vmul.f32 1.442695, %v6865_v55  ;;  %7503 = vmatmul.mubr.bf16.gmra.mrb[236].mxu1 %v7288_v57  ;;  %v6533_v58 = vadd.f32 %v13714_v50, %v13623_v19 }
0x17dd   : > { %9904 = vrcp.f32 %v7051_v38  ;;  %7510 = vmatprep.mubr.bf16.mxu1 %v7291_v43  ;;  %v6535_v54 = vadd.f32 %v13719_v48, %v13628_v56  ;;  %v6537_v36 = vadd.f32 %v13724_v2, %v13623_v19  ;;  %v6539_v1 = vadd.f32 %v13730_v33, %v13628_v56 }
0x17de   : > { %v9887_v22 = vpop.eup %9886  ;;  %9906 = vrcp.f32 %v7052_v6  ;;  %v6543_v23 = vadd.f32 %v13742_v7, %v13623_v19  ;;  %v6547_v33 = vadd.f32 %v13752_v16, %v13623_v19  ;;  %v6553_v16 = vadd.f32 %v13781_v40, %v13623_v19 }
0x17df   : > { %v9889_v63 = vpop.eup %9888  ;;  %v7174_v49 = vmul.f32 %v9887_v22, %v13717_v14  ;;  %9908 = vpow2.f32 %v6960_v31 }
0x17e0   : > { %v9891_v42 = vpop.eup %9890  ;;  %v7175_v10 = vmul.f32 %v9889_v63, %v13722_v3 }
0x17e1   : > { %v9893_v39 = vpop.eup %9892  ;;  %v7238_v41 = vmul.f32 %v7174_v49, %v6533_v58  ;;  %v7053_v20 = vadd.f32 1.0, %v9891_v42  ;;  %v6555_v42 = vadd.f32 %v13788_v34, %v13628_v56 }
0x17e2   : > { %v9895_v45 = vpop.eup %9894  ;;  %v7239_v9 = vmul.f32 %v7175_v10, %v6535_v54  ;;  %v7054_v24 = vadd.f32 1.0, %v9893_v39  ;;  %v6557_v39 = vadd.f32 %v13796_v29, %v13623_v19 }
0x17e3   : > { %v9897_v59 = vpop.eup %9896  ;;  %9910 = vrcp.f32 %v7053_v20  ;;  %v7055_v28 = vadd.f32 1.0, %v9895_v45  ;;  %v6559_v45 = vadd.f32 %v13804_v47, %v13628_v56 }
0x17e4   : > { %v9899_v60 = vpop.eup %9898  ;;  %9912 = vrcp.f32 %v7054_v24  ;;  %v7056_v50 = vadd.f32 1.0, %v9897_v59  ;;  %7511 = vmatmul.mubr.bf16.gmra.mrb[240].mxu1 %v7290_v5 }
0x17e5   : > { %v9901_v14 = vpop.eup %9900  ;;  %v7176_v48 = vmul.f32 %v9899_v60, %v13728_v30  ;;  %9914 = vrcp.f32 %v7055_v28  ;;  %v6545_v30 = vadd.f32 %v13747_v32, %v13628_v56 }
0x17e6   : > { %v9903_v3 = vpop.eup %9902  ;;  %v7177_v11 = vmul.f32 %v9901_v14, %v13734_v17  ;;  %9916 = vrcp.f32 %v7056_v50 }
0x17e7   : > { %v9905_v51 = vpop.eup %9904  ;;  %v7240_v61 = vmul.f32 %v7176_v48, %v6537_v36  ;;  %v7178_v44 = vmul.f32 %v9903_v3, %v13745_v35 }
0x17e8   : > { %v9907_v25 = vpop.eup %9906  ;;  %v7241_v2 = vmul.f32 %v7177_v11, %v6539_v1  ;;  %v7179_v57 = vmul.f32 %v9905_v51, %v13750_v15  ;;  %v6549_v15 = vadd.f32 %v13760_v21, %v13628_v56 }
0x17e9   : > { %v9909_v0 = vpop.eup %9908  ;;  %v7242_v38 = vmul.f32 %v7178_v44, %v6543_v23  ;;  %v7180_v17 = vmul.f32 %v9907_v25, %v13758_v12  ;;  %v7292_v55 = vpack.c.bf16 %v7240_v61, %v7238_v41 }
0x17ea   : > { %v7243_v43 = vmul.f32 %v7179_v57, %v6545_v30  ;;  %v7057_v6 = vadd.f32 1.0, %v9909_v0  ;;  %v7293_v7 = vpack.c.bf16 %v7241_v2, %v7239_v9 }
0x17eb   : > { %v7244_v5 = vmul.f32 %v7180_v17, %v6547_v33 }
0x17ec   : > { %9918 = vrcp.f32 %v7057_v6  ;;  %7518 = vmatprep.mubr.bf16.mxu1 %v7293_v7 }
0x17ed   : > { %v9911_v35 = vpop.eup %9910  ;;  %7519 = vmatmul.mubr.bf16.gmra.mrb[244].mxu1 %v7292_v55  ;;  %v7294_v31 = vpack.c.bf16 %v7244_v5, %v7242_v38 }
0x17ee   : > { %v9913_v32 = vpop.eup %9912  ;;  %v7181_v22 = vmul.f32 %v9911_v35, %v13779_v37 }
0x17ef   : > { %v9915_v63 = vpop.eup %9914  ;;  %v7182_v12 = vmul.f32 %v9913_v32, %v13786_v53 }
0x17f0   : > { %v9917_v58 = vpop.eup %9916  ;;  %v7245_v49 = vmul.f32 %v7181_v22, %v6549_v15  ;;  %v7183_v54 = vmul.f32 %v9915_v63, %v13794_v62 }
0x17f1   : > { %v7246_v10 = vmul.f32 %v7182_v12, %v6553_v16  ;;  %v7184_v21 = vmul.f32 %v9917_v58, %v13802_v27 }
0x17f2   : > { %v7247_v37 = vmul.f32 %v7183_v54, %v6555_v42  ;;  %v7295_v41 = vpack.c.bf16 %v7245_v49, %v7243_v43 }
0x17f3   : > { %v7248_v20 = vmul.f32 %v7184_v21, %v6557_v39 }
0x17f4   : > { %7526 = vmatprep.mubr.bf16.mxu1 %v7295_v41 }
0x17f5   : > { %7527 = vmatmul.mubr.bf16.gmra.mrb[248].mxu1 %v7294_v31  ;;  %v7296_v40 = vpack.c.bf16 %v7248_v20, %v7246_v10 }
0x17f6   : > { %v9919_v53 = vpop.eup %9918 }
0x17f7   : > { %v7185_v34 = vmul.f32 %v9919_v53, %v13813_v52 }
0x17f9   : > { %v7249_v9 = vmul.f32 %v7185_v34, %v6559_v45 }
0x17fb   : > { %v7297_v62 = vpack.c.bf16 %v7249_v9, %v7247_v37 }
0x17fd   : > { %7534 = vmatprep.mubr.bf16.mxu1 %v7297_v62 }
0x17fe   : > { %7535 = vmatmul.mubr.bf16.gmra.mrb[252].mxu1 %v7296_v40 }
0x1800   : > { %v13855_v24 = vpop.f32.mrb[192].mxu1  ;;  %v6755_v29 = vpop.f32.mrb[0].mxu0 }
0x1801   : > { %v13858_v27 = vadd.f32 %v6755_v29, %v13527_v46  ;;  %v13860_v59 = vpop.f32.mrb[193].mxu1  ;;  %v6757_v28 = vpop.f32.mrb[1].mxu0 }
0x1802   : > { %v13863_v60 = vadd.f32 %v6757_v28, %v13530_v4  ;;  %v13865_v50 = vpop.f32.mrb[194].mxu1  ;;  %v6759_v47 = vpop.f32.mrb[2].mxu0 }
0x1803   : > { %v6866_v52 = vsub.f32 0.0, %v13858_v27  ;;  %v13869_v14 = vadd.f32 %v6759_v47, %v13527_v46  ;;  %v13871_v36 = vpop.f32.mrb[195].mxu1  ;;  %v6761_v48 = vpop.f32.mrb[3].mxu0 }
0x1804   : > { %v6867_v3 = vsub.f32 0.0, %v13863_v60  ;;  %v13875_v1 = vadd.f32 %v6761_v48, %v13530_v4 }
0x1805   : > { %v6962_v11 = vmul.f32 1.442695, %v6866_v52  ;;  %v6868_v51 = vsub.f32 0.0, %v13869_v14 }
0x1806   : > { %v6964_v61 = vmul.f32 1.442695, %v6867_v3  ;;  %v6869_v23 = vsub.f32 0.0, %v13875_v1 }
0x1807   : > { %9920 = vpow2.f32 %v6962_v11  ;;  %v6966_v44 = vmul.f32 1.442695, %v6868_v51 }
0x1808   : > { %9922 = vpow2.f32 %v6964_v61  ;;  %v6968_v25 = vmul.f32 1.442695, %v6869_v23  ;;  %v13879_v2 = vpop.f32.mrb[196].mxu1  ;;  %v6765_v30 = vpop.f32.mrb[4].mxu0 }
0x1809   : > { %9924 = vpow2.f32 %v6966_v44  ;;  %v13882_v57 = vadd.f32 %v6765_v30, %v13527_v46  ;;  %v13884_v0 = vpop.f32.mrb[197].mxu1  ;;  %v6767_v38 = vpop.f32.mrb[5].mxu0 }
0x180a   : > { %9926 = vpow2.f32 %v6968_v25  ;;  %v13887_v33 = vadd.f32 %v6767_v38, %v13530_v4  ;;  %v13889_v17 = vpop.f32.mrb[198].mxu1  ;;  %v6769_v55 = vpop.f32.mrb[6].mxu0 }
0x180b   : > { %v6870_v43 = vsub.f32 0.0, %v13882_v57  ;;  %v13893_v6 = vadd.f32 %v6769_v55, %v13527_v46  ;;  %v13895_v7 = vpop.f32.mrb[199].mxu1  ;;  %v6771_v5 = vpop.f32.mrb[7].mxu0 }
0x180c   : > { %v6871_v35 = vsub.f32 0.0, %v13887_v33  ;;  %v13899_v31 = vadd.f32 %v6771_v5, %v13530_v4 }
0x180d   : > { %v6970_v32 = vmul.f32 1.442695, %v6870_v43  ;;  %v6872_v15 = vsub.f32 0.0, %v13893_v6 }
0x180e   : > { %v6972_v22 = vmul.f32 1.442695, %v6871_v35  ;;  %v6873_v63 = vsub.f32 0.0, %v13899_v31 }
0x180f   : > { %9928 = vpow2.f32 %v6970_v32  ;;  %v6974_v16 = vmul.f32 1.442695, %v6872_v15 }
0x1810   : > { %9930 = vpow2.f32 %v6972_v22  ;;  %v6976_v12 = vmul.f32 1.442695, %v6873_v63  ;;  %v13903_v58 = vpop.f32.mrb[200].mxu1  ;;  %v6775_v49 = vpop.f32.mrb[8].mxu0 }
0x1811   : > { %v9921_v42 = vpop.eup %9920  ;;  %9932 = vpow2.f32 %v6974_v16  ;;  %v13906_v54 = vadd.f32 %v6775_v49, %v13527_v46  ;;  %v13908_v10 = vpop.f32.mrb[201].mxu1  ;;  %v6563_v16 = vadd.f32 %v13855_v24, %v13623_v19 }
0x1812   : > { %v6777_v39 = vpop.f32.mrb[9].mxu0  ;;  %v9923_v21 = vpop.eup %9922  ;;  %v7058_v37 = vadd.f32 1.0, %v9921_v42  ;;  %9934 = vpow2.f32 %v6976_v12 }
0x1813   : > { %v13911_v41 = vadd.f32 %v6777_v39, %v13530_v4  ;;  %v13913_v20 = vpop.f32.mrb[202].mxu1  ;;  %v6779_v40 = vpop.f32.mrb[10].mxu0  ;;  %v7059_v45 = vadd.f32 1.0, %v9923_v21  ;;  %v6874_v34 = vsub.f32 0.0, %v13906_v54 }
0x1814   : > { %v9925_v53 = vpop.eup %9924  ;;  %v13917_v9 = vadd.f32 %v6779_v40, %v13527_v46  ;;  %v13919_v62 = vpop.f32.mrb[203].mxu1  ;;  %9936 = vrcp.f32 %v7058_v37 }
0x1815   : > { %v6781_v29 = vpop.f32.mrb[11].mxu0  ;;  %v9927_v28 = vpop.eup %9926  ;;  %v7060_v47 = vadd.f32 1.0, %v9925_v53  ;;  %v6875_v52 = vsub.f32 0.0, %v13911_v41  ;;  %9938 = vrcp.f32 %v7059_v45  ;;  %v6978_v3 = vmul.f32 1.442695, %v6874_v34 }
0x1816   : > { %v7061_v48 = vadd.f32 1.0, %v9927_v28  ;;  %v6876_v11 = vsub.f32 0.0, %v13917_v9  ;;  %v13924_v61 = vadd.f32 %v6781_v29, %v13530_v4 }
0x1817   : > { %9940 = vrcp.f32 %v7060_v47  ;;  %v6980_v51 = vmul.f32 1.442695, %v6875_v52  ;;  %v6565_v47 = vadd.f32 %v13860_v59, %v13628_v56 }
0x1818   : > { %9942 = vrcp.f32 %v7061_v48  ;;  %v6982_v23 = vmul.f32 1.442695, %v6876_v11  ;;  %v6877_v44 = vsub.f32 0.0, %v13924_v61  ;;  %v13927_v25 = vpop.f32.mrb[204].mxu1  ;;  %v6785_v30 = vpop.f32.mrb[12].mxu0 }
0x1819   : > { %9944 = vpow2.f32 %v6978_v3  ;;  %v9929_v38 = vpop.eup %9928  ;;  %v13930_v55 = vadd.f32 %v6785_v30, %v13527_v46  ;;  %v13932_v43 = vpop.f32.mrb[205].mxu1 }
0x181a   : > { %9946 = vpow2.f32 %v6980_v51  ;;  %v6787_v5 = vpop.f32.mrb[13].mxu0  ;;  %v9931_v35 = vpop.eup %9930  ;;  %v7062_v32 = vadd.f32 1.0, %v9929_v38  ;;  %v6984_v53 = vmul.f32 1.442695, %v6877_v44  ;;  %v6567_v51 = vadd.f32 %v13865_v50, %v13623_v19 }
0x181b   : > { %9948 = vpow2.f32 %v6982_v23  ;;  %v13934_v15 = vpop.f32.mrb[206].mxu1  ;;  %v6789_v22 = vpop.f32.mrb[14].mxu0  ;;  %v7063_v12 = vadd.f32 1.0, %v9931_v35  ;;  %v6878_v49 = vsub.f32 0.0, %v13930_v55  ;;  %v13940_v42 = vadd.f32 %v6787_v5, %v13530_v4 }
0x181c   : > { %v9933_v63 = vpop.eup %9932  ;;  %v13942_v39 = vpop.f32.mrb[207].mxu1  ;;  %9950 = vrcp.f32 %v7062_v32  ;;  %v13945_v45 = vadd.f32 %v6789_v22, %v13527_v46  ;;  %v6569_v22 = vadd.f32 %v13871_v36, %v13628_v56 }
0x181d   : > { %v6791_v21 = vpop.f32.mrb[15].mxu0  ;;  %v9935_v37 = vpop.eup %9934  ;;  %v7064_v40 = vadd.f32 1.0, %v9933_v63  ;;  %9952 = vrcp.f32 %v7063_v12  ;;  %v6986_v29 = vmul.f32 1.442695, %v6878_v49  ;;  %v6879_v24 = vsub.f32 0.0, %v13940_v42 }
0x181e   : > { %v7065_v34 = vadd.f32 1.0, %v9935_v37  ;;  %v9937_v28 = vpop.eup %9936  ;;  %v6880_v52 = vsub.f32 0.0, %v13945_v45  ;;  %v13952_v48 = vadd.f32 %v6791_v21, %v13530_v4 }
0x181f   : > { %9954 = vrcp.f32 %v7064_v40  ;;  %v9939_v3 = vpop.eup %9938  ;;  %v7186_v11 = vmul.f32 %v9937_v28, %v13858_v27  ;;  %v6988_v23 = vmul.f32 1.442695, %v6879_v24 }
0x1820   : > { %9956 = vrcp.f32 %v7065_v34  ;;  %v7187_v30 = vmul.f32 %v9939_v3, %v13863_v60  ;;  %v6990_v38 = vmul.f32 1.442695, %v6880_v52  ;;  %v6881_v59 = vsub.f32 0.0, %v13952_v48 }
0x1821   : > { %v9941_v44 = vpop.eup %9940  ;;  %9958 = vpow2.f32 %v6984_v53  ;;  %v7250_v35 = vmul.f32 %v7186_v11, %v6563_v16 }
0x1822   : > { %v9943_v5 = vpop.eup %9942  ;;  %v7188_v32 = vmul.f32 %v9941_v44, %v13869_v14  ;;  %9960 = vpow2.f32 %v6986_v29  ;;  %v7251_v63 = vmul.f32 %v7187_v30, %v6565_v47  ;;  %v6992_v12 = vmul.f32 1.442695, %v6881_v59 }
0x1823   : > { %v9945_v27 = vpop.eup %9944  ;;  %v7189_v50 = vmul.f32 %v9943_v5, %v13875_v1  ;;  %9962 = vpow2.f32 %v6988_v23  ;;  %v6573_v1 = vadd.f32 %v13879_v2, %v13623_v19  ;;  %v6575_v47 = vadd.f32 %v13884_v0, %v13628_v56 }
0x1824   : > { %v9947_v49 = vpop.eup %9946  ;;  %v7252_v60 = vmul.f32 %v7188_v32, %v6567_v51  ;;  %v7066_v21 = vadd.f32 1.0, %v9945_v27  ;;  %9964 = vpow2.f32 %v6990_v38  ;;  %v6577_v51 = vadd.f32 %v13889_v17, %v13623_v19 }
0x1825   : > { %v9949_v37 = vpop.eup %9948  ;;  %v7253_v40 = vmul.f32 %v7189_v50, %v6569_v22  ;;  %v7067_v53 = vadd.f32 1.0, %v9947_v49  ;;  %9966 = vpow2.f32 %v6992_v12 }
0x1826   : > { %v7298_v16 = vpack.c.bf16 %v7252_v60, %v7250_v35  ;;  %9968 = vrcp.f32 %v7066_v21  ;;  %v7068_v14 = vadd.f32 1.0, %v9949_v37  ;;  %v9951_v34 = vpop.eup %9950  ;;  %v6585_v21 = vadd.f32 %v13908_v10, %v13628_v56 }
0x1827   : > { %9970 = vrcp.f32 %v7067_v53  ;;  %v7299_v36 = vpack.c.bf16 %v7253_v40, %v7251_v63  ;;  %v9953_v29 = vpop.eup %9952  ;;  %v7190_v24 = vmul.f32 %v9951_v34, %v13882_v57  ;;  %v6579_v57 = vadd.f32 %v13895_v7, %v13628_v56 }
0x1828   : > { %9972 = vrcp.f32 %v7068_v14  ;;  %v7191_v52 = vmul.f32 %v9953_v29, %v13887_v33  ;;  %v6587_v53 = vadd.f32 %v13913_v20, %v13623_v19  ;;  %v6589_v29 = vadd.f32 %v13919_v62, %v13628_v56 }
0x1829   : > { %v9955_v28 = vpop.eup %9954  ;;  %7542 = vmatprep.mubr.bf16.mxu1 %v7299_v36  ;;  %v7254_v11 = vmul.f32 %v7190_v24, %v6573_v1  ;;  %v6597_v62 = vadd.f32 %v13934_v15, %v13623_v19 }
0x182a   : > { %v9957_v3 = vpop.eup %9956  ;;  %v7192_v23 = vmul.f32 %v9955_v28, %v13893_v6  ;;  %7543 = vmatmul.mubr.bf16.gmra.mrb[0].mxu1 %v7298_v16  ;;  %v7255_v2 = vmul.f32 %v7191_v52, %v6575_v47 }
0x182b   : > { %v9959_v44 = vpop.eup %9958  ;;  %v7193_v30 = vmul.f32 %v9957_v3, %v13899_v31  ;;  %v6583_v31 = vadd.f32 %v13903_v58, %v13623_v19 }
0x182c   : > { %v9961_v38 = vpop.eup %9960  ;;  %v7256_v0 = vmul.f32 %v7192_v23, %v6577_v51  ;;  %v7069_v59 = vadd.f32 1.0, %v9959_v44 }
0x182d   : > { %v9963_v33 = vpop.eup %9962  ;;  %v7257_v5 = vmul.f32 %v7193_v30, %v6579_v57  ;;  %v7070_v35 = vadd.f32 1.0, %v9961_v38 }
0x182e   : > { %v9965_v32 = vpop.eup %9964  ;;  %v7300_v22 = vpack.c.bf16 %v7256_v0, %v7254_v11  ;;  %9974 = vrcp.f32 %v7069_v59  ;;  %v7071_v17 = vadd.f32 1.0, %v9963_v33 }
0x182f   : > { %v9967_v27 = vpop.eup %9966  ;;  %9976 = vrcp.f32 %v7070_v35  ;;  %v7072_v6 = vadd.f32 1.0, %v9965_v32  ;;  %v7301_v63 = vpack.c.bf16 %v7257_v5, %v7255_v2 }
0x1830   : > { %v9969_v50 = vpop.eup %9968  ;;  %9978 = vrcp.f32 %v7071_v17  ;;  %v7073_v12 = vadd.f32 1.0, %v9967_v27 }
0x1831   : > { %v9971_v7 = vpop.eup %9970  ;;  %v7194_v49 = vmul.f32 %v9969_v50, %v13906_v54  ;;  %9980 = vrcp.f32 %v7072_v6  ;;  %7550 = vmatprep.mubr.bf16.mxu1 %v7301_v63 }
0x1832   : > { %v9973_v60 = vpop.eup %9972  ;;  %v7195_v37 = vmul.f32 %v9971_v7, %v13911_v41  ;;  %9982 = vrcp.f32 %v7073_v12  ;;  %7551 = vmatmul.mubr.bf16.gmra.mrb[4].mxu1 %v7300_v22  ;;  %v6593_v41 = vadd.f32 %v13927_v25, %v13623_v19  ;;  %v6599_v25 = vadd.f32 %v13942_v39, %v13628_v56 }
0x1833   : > { %v7258_v40 = vmul.f32 %v7194_v49, %v6583_v31  ;;  %v7196_v16 = vmul.f32 %v9973_v60, %v13917_v9  ;;  %v6595_v9 = vadd.f32 %v13932_v43, %v13628_v56 }
0x1834   : > { %v7259_v14 = vmul.f32 %v7195_v37, %v6585_v21 }
0x1835   : > { %v7260_v58 = vmul.f32 %v7196_v16, %v6587_v53 }
0x1837   : > { %v7302_v34 = vpack.c.bf16 %v7260_v58, %v7258_v40 }
0x1838   : > { %v9975_v54 = vpop.eup %9974 }
0x1839   : > { %v9977_v36 = vpop.eup %9976  ;;  %v7197_v10 = vmul.f32 %v9975_v54, %v13924_v61 }
0x183a   : > { %v9979_v1 = vpop.eup %9978  ;;  %v7198_v24 = vmul.f32 %v9977_v36, %v13930_v55 }
0x183b   : > { %v9981_v28 = vpop.eup %9980  ;;  %v7261_v20 = vmul.f32 %v7197_v10, %v6589_v29  ;;  %v7199_v47 = vmul.f32 %v9979_v1, %v13940_v42 }
0x183c   : > { %v9983_v52 = vpop.eup %9982  ;;  %v7262_v3 = vmul.f32 %v7198_v24, %v6593_v41  ;;  %v7200_v61 = vmul.f32 %v9981_v28, %v13945_v45  ;;  %v13999_v23 = vpop.f32.mrb[208].mxu1 }
0x183d   : > { %v7263_v11 = vmul.f32 %v7199_v47, %v6595_v9  ;;  %v7201_v55 = vmul.f32 %v9983_v52, %v13952_v48  ;;  %v7303_v51 = vpack.c.bf16 %v7261_v20, %v7259_v14  ;;  %v6795_v44 = vpop.f32.mrb[16].mxu0  ;;  %v14004_v2 = vpop.f32.mrb[209].mxu1 }
0x183e   : > { %v7264_v43 = vmul.f32 %v7200_v61, %v6597_v62  ;;  %v14002_v42 = vadd.f32 %v6795_v44, %v13527_v46  ;;  %v6797_v57 = vpop.f32.mrb[17].mxu0  ;;  %v14009_v30 = vpop.f32.mrb[210].mxu1 }
0x183f   : > { %v7265_v15 = vmul.f32 %v7201_v55, %v6599_v25  ;;  %7558 = vmatprep.mubr.bf16.mxu1 %v7303_v51  ;;  %v14007_v45 = vadd.f32 %v6797_v57, %v13530_v4  ;;  %v6799_v39 = vpop.f32.mrb[18].mxu0  ;;  %v14015_v59 = vpop.f32.mrb[211].mxu1 }
0x1840   : > { %v7304_v48 = vpack.c.bf16 %v7264_v43, %v7262_v3  ;;  %7559 = vmatmul.mubr.bf16.gmra.mrb[8].mxu1 %v7302_v34  ;;  %v6882_v38 = vsub.f32 0.0, %v14002_v42  ;;  %v14013_v0 = vadd.f32 %v6799_v39, %v13527_v46  ;;  %v6801_v33 = vpop.f32.mrb[19].mxu0 }
0x1841   : > { %v6883_v5 = vsub.f32 0.0, %v14007_v45  ;;  %v14019_v35 = vadd.f32 %v6801_v33, %v13530_v4  ;;  %v7305_v32 = vpack.c.bf16 %v7265_v15, %v7263_v11 }
0x1842   : > { %v6994_v22 = vmul.f32 1.442695, %v6882_v38  ;;  %v6884_v17 = vsub.f32 0.0, %v14013_v0 }
0x1843   : > { %v6996_v27 = vmul.f32 1.442695, %v6883_v5  ;;  %v6885_v6 = vsub.f32 0.0, %v14019_v35  ;;  %7566 = vmatprep.mubr.bf16.mxu1 %v7305_v32 }
0x1844   : > { %9984 = vpow2.f32 %v6994_v22  ;;  %v6998_v63 = vmul.f32 1.442695, %v6884_v17  ;;  %v14023_v12 = vpop.f32.mrb[212].mxu1  ;;  %v6805_v7 = vpop.f32.mrb[20].mxu0 }
0x1845   : > { %9986 = vpow2.f32 %v6996_v27  ;;  %v7000_v50 = vmul.f32 1.442695, %v6885_v6  ;;  %v14026_v31 = vadd.f32 %v6805_v7, %v13527_v46  ;;  %v14028_v49 = vpop.f32.mrb[213].mxu1  ;;  %v6807_v60 = vpop.f32.mrb[21].mxu0 }
0x1846   : > { %9988 = vpow2.f32 %v6998_v63  ;;  %v14031_v21 = vadd.f32 %v6807_v60, %v13530_v4  ;;  %v14033_v37 = vpop.f32.mrb[214].mxu1  ;;  %v6809_v40 = vpop.f32.mrb[22].mxu0 }
0x1847   : > { %9990 = vpow2.f32 %v7000_v50  ;;  %v6886_v53 = vsub.f32 0.0, %v14026_v31  ;;  %v14037_v16 = vadd.f32 %v6809_v40, %v13527_v46  ;;  %v14039_v14 = vpop.f32.mrb[215].mxu1  ;;  %v6811_v58 = vpop.f32.mrb[23].mxu0  ;;  %v6603_v40 = vadd.f32 %v13999_v23, %v13623_v19 }
0x1848   : > { %7567 = vmatmul.mubr.bf16.gmra.mrb[12].mxu1 %v7304_v48  ;;  %v6887_v34 = vsub.f32 0.0, %v14031_v21  ;;  %v14043_v54 = vadd.f32 %v6811_v58, %v13530_v4 }
0x1849   : > { %v7002_v36 = vmul.f32 1.442695, %v6886_v53  ;;  %v6888_v29 = vsub.f32 0.0, %v14037_v16  ;;  %v6605_v53 = vadd.f32 %v14004_v2, %v13628_v56 }
0x184a   : > { %v7004_v10 = vmul.f32 1.442695, %v6887_v34  ;;  %v6889_v1 = vsub.f32 0.0, %v14043_v54 }
0x184b   : > { %9992 = vpow2.f32 %v7002_v36  ;;  %v7006_v41 = vmul.f32 1.442695, %v6888_v29 }
0x184c   : > { %9994 = vpow2.f32 %v7004_v10  ;;  %v7008_v24 = vmul.f32 1.442695, %v6889_v1 }
0x184d   : > { %9996 = vpow2.f32 %v7006_v41 }
0x184e   : > { %v9985_v28 = vpop.eup %9984  ;;  %9998 = vpow2.f32 %v7008_v24 }
0x184f   : > { %v9987_v20 = vpop.eup %9986  ;;  %v7074_v9 = vadd.f32 1.0, %v9985_v28  ;;  %v14047_v3 = vpop.f32.mrb[216].mxu1 }
0x1850   : > { %v9989_v47 = vpop.eup %9988  ;;  %v7075_v52 = vadd.f32 1.0, %v9987_v20  ;;  %v6815_v62 = vpop.f32.mrb[24].mxu0 }
0x1851   : > { %v9991_v61 = vpop.eup %9990  ;;  %10000 = vrcp.f32 %v7074_v9  ;;  %v7076_v11 = vadd.f32 1.0, %v9989_v47  ;;  %v14050_v25 = vadd.f32 %v6815_v62, %v13527_v46  ;;  %v14052_v55 = vpop.f32.mrb[217].mxu1  ;;  %v6607_v62 = vadd.f32 %v14009_v30, %v13623_v19 }
0x1852   : > { %v6817_v51 = vpop.f32.mrb[25].mxu0  ;;  %10002 = vrcp.f32 %v7075_v52  ;;  %v7077_v44 = vadd.f32 1.0, %v9991_v61  ;;  %v14057_v57 = vpop.f32.mrb[218].mxu1 }
0x1853   : > { %v14055_v43 = vadd.f32 %v6817_v51, %v13530_v4  ;;  %v6819_v15 = vpop.f32.mrb[26].mxu0  ;;  %10004 = vrcp.f32 %v7076_v11  ;;  %v6890_v39 = vsub.f32 0.0, %v14050_v25  ;;  %v14063_v38 = vpop.f32.mrb[219].mxu1 }
0x1854   : > { %v14061_v48 = vadd.f32 %v6819_v15, %v13527_v46  ;;  %v6821_v33 = vpop.f32.mrb[27].mxu0  ;;  %10006 = vrcp.f32 %v7077_v44 }
0x1855   : > { %v6891_v5 = vsub.f32 0.0, %v14055_v43  ;;  %v14067_v32 = vadd.f32 %v6821_v33, %v13530_v4  ;;  %v7010_v22 = vmul.f32 1.442695, %v6890_v39  ;;  %v9993_v27 = vpop.eup %9992  ;;  %v6609_v33 = vadd.f32 %v14015_v59, %v13628_v56 }
0x1856   : > { %v6892_v17 = vsub.f32 0.0, %v14061_v48  ;;  %v9995_v50 = vpop.eup %9994  ;;  %v7078_v7 = vadd.f32 1.0, %v9993_v27 }
0x1857   : > { %v7012_v6 = vmul.f32 1.442695, %v6891_v5  ;;  %v6893_v63 = vsub.f32 0.0, %v14067_v32  ;;  %10008 = vpow2.f32 %v7010_v22  ;;  %v9997_v60 = vpop.eup %9996  ;;  %v7079_v58 = vadd.f32 1.0, %v9995_v50  ;;  %v14075_v34 = vpop.f32.mrb[220].mxu1 }
0x1858   : > { %v6825_v36 = vpop.f32.mrb[28].mxu0  ;;  %v9999_v29 = vpop.eup %9998  ;;  %v7080_v10 = vadd.f32 1.0, %v9997_v60  ;;  %v7014_v1 = vmul.f32 1.442695, %v6892_v17 }
0x1859   : > { %10010 = vpow2.f32 %v7012_v6  ;;  %v14078_v41 = vadd.f32 %v6825_v36, %v13527_v46  ;;  %v14080_v24 = vpop.f32.mrb[221].mxu1  ;;  %v6827_v28 = vpop.f32.mrb[29].mxu0  ;;  %v7081_v23 = vadd.f32 1.0, %v9999_v29  ;;  %v7016_v20 = vmul.f32 1.442695, %v6893_v63 }
0x185a   : > { %10012 = vrcp.f32 %v7078_v7  ;;  %v14083_v2 = vadd.f32 %v6827_v28, %v13530_v4  ;;  %v14085_v9 = vpop.f32.mrb[222].mxu1  ;;  %v6829_v47 = vpop.f32.mrb[30].mxu0 }
0x185b   : > { %10014 = vrcp.f32 %v7079_v58  ;;  %v10001_v52 = vpop.eup %10000  ;;  %v6894_v61 = vsub.f32 0.0, %v14078_v41  ;;  %v14091_v11 = vadd.f32 %v6829_v47, %v13527_v46  ;;  %v14093_v51 = vpop.f32.mrb[223].mxu1 }
0x185c   : > { %10016 = vrcp.f32 %v7080_v10  ;;  %v6831_v44 = vpop.f32.mrb[31].mxu0  ;;  %v10003_v15 = vpop.eup %10002  ;;  %v7202_v39 = vmul.f32 %v10001_v52, %v14002_v42  ;;  %v6895_v5 = vsub.f32 0.0, %v14083_v2  ;;  %v6615_v52 = vadd.f32 %v14028_v49, %v13628_v56 }
0x185d   : > { %10018 = vrcp.f32 %v7081_v23  ;;  %v10005_v22 = vpop.eup %10004  ;;  %v7203_v30 = vmul.f32 %v10003_v15, %v14007_v45  ;;  %v7018_v17 = vmul.f32 1.442695, %v6894_v61  ;;  %v6896_v46 = vsub.f32 0.0, %v14091_v11 }
0x185e   : > { %10020 = vpow2.f32 %v7014_v1  ;;  %v10007_v27 = vpop.eup %10006  ;;  %v7266_v6 = vmul.f32 %v7202_v39, %v6603_v40  ;;  %v7204_v63 = vmul.f32 %v10005_v22, %v14013_v0  ;;  %v7020_v50 = vmul.f32 1.442695, %v6895_v5 }
0x185f   : > { %10022 = vpow2.f32 %v7016_v20  ;;  %v7267_v42 = vmul.f32 %v7203_v30, %v6605_v53  ;;  %v7205_v7 = vmul.f32 %v10007_v27, %v14019_v35  ;;  %v7022_v59 = vmul.f32 1.442695, %v6896_v46 }
0x1860   : > { %10024 = vpow2.f32 %v7018_v17  ;;  %v7268_v60 = vmul.f32 %v7204_v63, %v6607_v62  ;;  %v14104_v58 = vadd.f32 %v6831_v44, %v13530_v4  ;;  %v6613_v35 = vadd.f32 %v14023_v12, %v13623_v19 }
0x1861   : > { %10026 = vpow2.f32 %v7020_v50  ;;  %v10009_v45 = vpop.eup %10008  ;;  %v7269_v36 = vmul.f32 %v7205_v7, %v6609_v33  ;;  %v6617_v15 = vadd.f32 %v14033_v37, %v13623_v19  ;;  %v6619_v33 = vadd.f32 %v14039_v14, %v13628_v56 }
0x1862   : > { %10028 = vpow2.f32 %v7022_v59  ;;  %v7306_v10 = vpack.c.bf16 %v7268_v60, %v7266_v6  ;;  %v7082_v40 = vadd.f32 1.0, %v10009_v45  ;;  %v6897_v0 = vsub.f32 0.0, %v14104_v58 }
0x1863   : > { %v10011_v29 = vpop.eup %10010  ;;  %v7307_v53 = vpack.c.bf16 %v7269_v36, %v7267_v42  ;;  %v6623_v7 = vadd.f32 %v14047_v3, %v13623_v19  ;;  %v6625_v45 = vadd.f32 %v14052_v55, %v13628_v56 }
0x1864   : > { %v10013_v1 = vpop.eup %10012  ;;  %v7083_v28 = vadd.f32 1.0, %v10011_v29  ;;  %10030 = vrcp.f32 %v7082_v40  ;;  %v7024_v4 = vmul.f32 1.442695, %v6897_v0 }
0x1865   : > { %v10015_v23 = vpop.eup %10014  ;;  %v7206_v20 = vmul.f32 %v10013_v1, %v14026_v31  ;;  %7574 = vmatprep.mubr.bf16.mxu1 %v7307_v53  ;;  %v14129_v1 = vld [vmem:[%s14308_s7 + $0x5] ss:$0 sm:$0xff] }
0x1866   : > { %v10017_v47 = vpop.eup %10016  ;;  %v7207_v62 = vmul.f32 %v10015_v23, %v14031_v21  ;;  %10032 = vrcp.f32 %v7083_v28  ;;  %7575 = vmatmul.mubr.bf16.gmra.mrb[16].mxu1 %v7306_v10 }
0x1867   : > { %v10019_v61 = vpop.eup %10018  ;;  %v7270_v44 = vmul.f32 %v7206_v20, %v6613_v35  ;;  %v7208_v39 = vmul.f32 %v10017_v47, %v14037_v16  ;;  %10034 = vpow2.f32 %v7024_v4 }
0x1868   : > { %v10021_v12 = vpop.eup %10020  ;;  %v7271_v31 = vmul.f32 %v7207_v62, %v6615_v52  ;;  %v7209_v49 = vmul.f32 %v10019_v61, %v14043_v54  ;;  %v6629_v52 = vadd.f32 %v14063_v38, %v13628_v56  ;;  %v6633_v61 = vadd.f32 %v14075_v34, %v13623_v19 }
0x1869   : > { %v10023_v5 = vpop.eup %10022  ;;  %v7272_v21 = vmul.f32 %v7208_v39, %v6617_v15  ;;  %v7084_v22 = vadd.f32 1.0, %v10021_v12 }
0x186a   : > { %v10025_v30 = vpop.eup %10024  ;;  %v7273_v17 = vmul.f32 %v7209_v49, %v6619_v33  ;;  %v7085_v46 = vadd.f32 1.0, %v10023_v5  ;;  %v6635_v33 = vadd.f32 %v14080_v24, %v13628_v56 }
0x186b   : > { %v10027_v27 = vpop.eup %10026  ;;  %v7308_v6 = vpack.c.bf16 %v7272_v21, %v7270_v44  ;;  %10036 = vrcp.f32 %v7084_v22  ;;  %v7086_v37 = vadd.f32 1.0, %v10025_v30 }
0x186c   : > { %v10029_v16 = vpop.eup %10028  ;;  %10038 = vrcp.f32 %v7085_v46  ;;  %v7087_v63 = vadd.f32 1.0, %v10027_v27  ;;  %v7309_v50 = vpack.c.bf16 %v7273_v17, %v7271_v31 }
0x186d   : > { %10040 = vrcp.f32 %v7086_v37  ;;  %v7088_v42 = vadd.f32 1.0, %v10029_v16 }
0x186e   : > { %10042 = vrcp.f32 %v7087_v63  ;;  %7582 = vmatprep.mubr.bf16.mxu1 %v7309_v50  ;;  %v10031_v14 = vpop.eup %10030 }
0x186f   : > { %10044 = vrcp.f32 %v7088_v42  ;;  %7583 = vmatmul.mubr.bf16.gmra.mrb[20].mxu1 %v7308_v6  ;;  %v7210_v59 = vmul.f32 %v10031_v14, %v14050_v25 }
0x1870   : > { %v10033_v54 = vpop.eup %10032  ;;  %v8235_v40 = vpop.f32.mrb[224].mxu1 }
0x1871   : > { %v10035_v60 = vpop.eup %10034  ;;  %v7211_v36 = vmul.f32 %v10033_v54, %v14055_v43  ;;  %v7274_v29 = vmul.f32 %v7210_v59, %v6623_v7  ;;  %v8236_v28 = vpop.f32.mrb[225].mxu1  ;;  %v6627_v43 = vadd.f32 %v14057_v57, %v13623_v19 }
0x1872   : > { %v7089_v10 = vadd.f32 1.0, %v10035_v60  ;;  %v8237_v3 = vadd.f32 %v8236_v28, %v8235_v40  ;;  %v8238_v25 = vpop.f32.mrb[226].mxu1  ;;  %v14603_v60 = vld [vmem:[#allocation13_spill] sm:$0xff] }
0x1873   : > { %v7275_v0 = vmul.f32 %v7211_v36, %v6625_v45  ;;  %v8239_v55 = vpop.f32.mrb[227].mxu1  ;;  %v14604_v36 = vld [vmem:[#allocation8_spill] sm:$0xff] }
0x1874   : > { %10046 = vrcp.f32 %v7089_v10  ;;  %v7481_v20 = vadd.f32 %v8237_v3, %v14129_v1  ;;  %v8240_v4 = vadd.f32 %v8239_v55, %v8238_v25 }
0x1875   : > { %v10037_v53 = vpop.eup %10036 }
0x1876   : > { %v10039_v23 = vpop.eup %10038  ;;  %v7212_v35 = vmul.f32 %v10037_v53, %v14061_v48  ;;  %v7607_v57 = vadd.f32 %v7481_v20, %v12906_v8  ;;  %v7484_v48 = vadd.f32 %v8240_v4, %v14129_v1  ;;  %v14605_v53 = vld [vmem:[#allocation17_spill] sm:$0xff] }
0x1877   : > { %v10041_v47 = vpop.eup %10040  ;;  %v7213_v62 = vmul.f32 %v10039_v23, %v14067_v32  ;;  %v6637_v32 = vadd.f32 %v14085_v9, %v13623_v19  ;;  %v6639_v19 = vadd.f32 %v14093_v51, %v13628_v56 }
0x1878   : > { %v10043_v44 = vpop.eup %10042  ;;  %v7276_v15 = vmul.f32 %v7212_v35, %v6627_v43  ;;  %v7214_v39 = vmul.f32 %v10041_v47, %v14078_v41  ;;  %7639 = vst [vmem:[%s14151_s26] sm:$0xff] %v7607_v57  ;;  %v7608_v8 = vadd.f32 %v7484_v48, %v12920_v18  ;;  %v14606_v43 = vld [vmem:[#allocation11_spill] sm:$0xff]  ;;  %v14608_v48 = vld [vmem:[#allocation18_spill] sm:$0xff] }
0x1879   : > { %v10045_v12 = vpop.eup %10044  ;;  %v7277_v31 = vmul.f32 %v7213_v62, %v6629_v52  ;;  %v7215_v38 = vmul.f32 %v10043_v44, %v14083_v2 }
0x187a   : > { %v7310_v49 = vpack.c.bf16 %v7276_v15, %v7274_v29  ;;  %v7278_v34 = vmul.f32 %v7214_v39, %v6633_v61  ;;  %v7216_v5 = vmul.f32 %v10045_v12, %v14091_v11  ;;  %7640 = vst [vmem:[%s14151_s26 + $0x8] sm:$0xff] %v7608_v8  ;;  %v14607_v15 = vld [vmem:[#allocation14_spill] sm:$0xff]  ;;  %v14609_v8 = vld [vmem:[#allocation19_spill] sm:$0xff] }
0x187b   : > { %v7279_v41 = vmul.f32 %v7215_v38, %v6635_v33  ;;  %v7311_v21 = vpack.c.bf16 %v7277_v31, %v7275_v0 }
0x187c   : > { %v7280_v22 = vmul.f32 %v7216_v5, %v6637_v32 }
0x187d   : > { %7590 = vmatprep.mubr.bf16.mxu1 %v7311_v21 }
0x187e   : > { %v10047_v24 = vpop.eup %10046  ;;  %v7312_v2 = vpack.c.bf16 %v7280_v22, %v7278_v34  ;;  %7591 = vmatmul.mubr.bf16.gmra.mrb[24].mxu1 %v7310_v49  ;;  %v14610_v22 = vld [vmem:[#allocation29_spill] sm:$0xff] }
0x187f   : > { %v7217_v9 = vmul.f32 %v10047_v24, %v14104_v58 }
0x1880   : > { %v8241_v30 = vpop.f32.mrb[228].mxu1 }
0x1881   : > { %v7281_v11 = vmul.f32 %v7217_v9, %v6639_v19  ;;  %v8242_v17 = vpop.f32.mrb[229].mxu1 }
0x1882   : > { %v8243_v18 = vadd.f32 %v8242_v17, %v8241_v30  ;;  %v8244_v27 = vpop.f32.mrb[230].mxu1 }
0x1883   : > { %v7313_v46 = vpack.c.bf16 %v7281_v11, %v7279_v41  ;;  %v8245_v6 = vpop.f32.mrb[231].mxu1 }
0x1884   : > { %v7489_v37 = vadd.f32 %v8243_v18, %v14129_v1  ;;  %v8246_v16 = vadd.f32 %v8245_v6, %v8244_v27  ;;  %v14611_v18 = vld [vmem:[#allocation23_spill] sm:$0xff] }
0x1885   : > { %7598 = vmatprep.mubr.bf16.mxu1 %v7313_v46 }
0x1886   : > { %7599 = vmatmul.mubr.bf16.gmra.mrb[28].mxu1 %v7312_v2  ;;  %v7609_v63 = vadd.f32 %v7489_v37, %v12912_v26  ;;  %v7492_v56 = vadd.f32 %v8246_v16, %v14129_v1  ;;  %v14612_v37 = vld [vmem:[#allocation27_spill] sm:$0xff] }
0x1888   : > { %7641 = vst [vmem:[%s14151_s26 + $0x10] sm:$0xff] %v7609_v63  ;;  %v7610_v51 = vadd.f32 %v7492_v56, %v12923_v13  ;;  %v8247_v58 = vpop.f32.mrb[232].mxu1 }
0x1889   : > { %v8248_v50 = vpop.f32.mrb[233].mxu1 }
0x188a   : > { %7642 = vst [vmem:[%s14151_s26 + $0x18] sm:$0xff] %v7610_v51  ;;  %v8249_v42 = vadd.f32 %v8248_v50, %v8247_v58  ;;  %v8250_v14 = vpop.f32.mrb[234].mxu1 }
0x188b   : > { %v8251_v54 = vpop.f32.mrb[235].mxu1 }
0x188c   : > { %v7497_v7 = vadd.f32 %v8249_v42, %v14129_v1  ;;  %v8252_v59 = vadd.f32 %v8251_v54, %v8250_v14  ;;  %v14613_v54 = vld [vmem:[#allocation12_spill] sm:$0xff] }
0x188e   : > { %v7611_v45 = vadd.f32 %v7497_v7, %v14603_v60  ;;  %v7500_v26 = vadd.f32 %v8252_v59, %v14129_v1  ;;  %v14614_v60 = vld [vmem:[#allocation16_spill] sm:$0xff] }
0x1890   : > { %7643 = vst [vmem:[%s14151_s26 + $0x20] sm:$0xff] %v7611_v45  ;;  %v7612_v29 = vadd.f32 %v7500_v26, %v14604_v36 }
0x1892   : > { %7644 = vst [vmem:[%s14151_s26 + $0x28] sm:$0xff] %v7612_v29 }
0x18af   : > { %v8253_v13 = vpop.f32.mrb[236].mxu1 }
0x18b0   : > { %v8254_v10 = vpop.f32.mrb[237].mxu1 }
0x18b1   : > { %v8255_v40 = vadd.f32 %v8254_v10, %v8253_v13  ;;  %v8256_v0 = vpop.f32.mrb[238].mxu1 }
0x18b2   : > { %v8257_v28 = vpop.f32.mrb[239].mxu1 }
0x18b3   : > { %v7505_v3 = vadd.f32 %v8255_v40, %v14129_v1  ;;  %v8258_v25 = vadd.f32 %v8257_v28, %v8256_v0  ;;  %v14615_v28 = vld [vmem:[#allocation10_spill] sm:$0xff] }
0x18b5   : > { %v7613_v55 = vadd.f32 %v7505_v3, %v14605_v53  ;;  %v7508_v23 = vadd.f32 %v8258_v25, %v14129_v1  ;;  %v14616_v53 = vld [vmem:[#allocation15_spill] sm:$0xff] }
0x18b7   : > { %7645 = vst [vmem:[%s14151_s26 + $0x30] sm:$0xff] %v7613_v55  ;;  %v7614_v35 = vadd.f32 %v7508_v23, %v14606_v43  ;;  %v8259_v20 = vpop.f32.mrb[240].mxu1 }
0x18b8   : > { %v8260_v4 = vpop.f32.mrb[241].mxu1 }
0x18b9   : > { %7646 = vst [vmem:[%s14151_s26 + $0x38] sm:$0xff] %v7614_v35  ;;  %v8261_v47 = vadd.f32 %v8260_v4, %v8259_v20  ;;  %v8262_v52 = vpop.f32.mrb[242].mxu1 }
0x18ba   : > { %v8263_v62 = vpop.f32.mrb[243].mxu1 }
0x18bb   : > { %v7513_v61 = vadd.f32 %v8261_v47, %v14129_v1  ;;  %v8264_v44 = vadd.f32 %v8263_v62, %v8262_v52  ;;  %v14617_v62 = vld [vmem:[#allocation21_spill] sm:$0xff] }
0x18bd   : > { %v7615_v39 = vadd.f32 %v7513_v61, %v14607_v15  ;;  %v7516_v57 = vadd.f32 %v8264_v44, %v14129_v1  ;;  %v14618_v15 = vld [vmem:[#allocation25_spill] sm:$0xff] }
0x18bf   : > { %7647 = vst [vmem:[%s14151_s26 + $0x40] sm:$0xff] %v7615_v39  ;;  %v7616_v12 = vadd.f32 %v7516_v57, %v14608_v48 }
0x18c0   : > { %v8265_v31 = vpop.f32.mrb[244].mxu1 }
0x18c1   : > { %v8266_v33 = vpop.f32.mrb[245].mxu1  ;;  %7648 = vst [vmem:[%s14151_s26 + $0x48] sm:$0xff] %v7616_v12 }
0x18c2   : > { %v8267_v38 = vadd.f32 %v8266_v33, %v8265_v31  ;;  %v8268_v32 = vpop.f32.mrb[246].mxu1 }
0x18c3   : > { %v8269_v49 = vpop.f32.mrb[247].mxu1 }
0x18c4   : > { %v7521_v34 = vadd.f32 %v8267_v38, %v14129_v1  ;;  %v8270_v5 = vadd.f32 %v8269_v49, %v8268_v32  ;;  %v14619_v49 = vld [vmem:[#allocation22_spill] sm:$0xff] }
0x18c6   : > { %v7617_v41 = vadd.f32 %v7521_v34, %v14609_v8  ;;  %v7524_v21 = vadd.f32 %v8270_v5, %v14129_v1  ;;  %v14620_v8 = vld [vmem:[#allocation26_spill] sm:$0xff] }
0x18c8   : > { %7649 = vst [vmem:[%s14151_s26 + $0x50] sm:$0xff] %v7617_v41  ;;  %v7618_v24 = vadd.f32 %v7524_v21, %v14610_v22  ;;  %v8271_v2 = vpop.f32.mrb[248].mxu1 }
0x18c9   : > { %v8272_v19 = vpop.f32.mrb[249].mxu1 }
0x18ca   : > { %7650 = vst [vmem:[%s14151_s26 + $0x58] sm:$0xff] %v7618_v24  ;;  %v8273_v9 = vadd.f32 %v8272_v19, %v8271_v2  ;;  %v8274_v11 = vpop.f32.mrb[250].mxu1 }
0x18cb   : > { %v8275_v30 = vpop.f32.mrb[251].mxu1 }
0x18cc   : > { %v7529_v17 = vadd.f32 %v8273_v9, %v14129_v1  ;;  %v8276_v46 = vadd.f32 %v8275_v30, %v8274_v11  ;;  %v14621_v30 = vld [vmem:[#allocation35_spill] sm:$0xff] }
0x18ce   : > { %v7619_v27 = vadd.f32 %v7529_v17, %v14611_v18  ;;  %v7532_v6 = vadd.f32 %v8276_v46, %v14129_v1  ;;  %v14622_v18 = vld [vmem:[#allocation40_spill] sm:$0xff] }
0x18d0   : > { %7651 = vst [vmem:[%s14151_s26 + $0x60] sm:$0xff] %v7619_v27  ;;  %v7620_v16 = vadd.f32 %v7532_v6, %v14612_v37 }
0x18d1   : > { %v8277_v63 = vpop.f32.mrb[252].mxu1 }
0x18d2   : > { %7652 = vst [vmem:[%s14151_s26 + $0x68] sm:$0xff] %v7620_v16  ;;  %v8278_v56 = vpop.f32.mrb[253].mxu1 }
0x18d3   : > { %v8279_v51 = vadd.f32 %v8278_v56, %v8277_v63  ;;  %v8280_v58 = vpop.f32.mrb[254].mxu1 }
0x18d4   : > { %v8281_v50 = vpop.f32.mrb[255].mxu1 }
0x18d5   : > { %v7537_v42 = vadd.f32 %v8279_v51, %v14129_v1  ;;  %v8282_v14 = vadd.f32 %v8281_v50, %v8280_v58  ;;  %v14623_v50 = vld [vmem:[#allocation33_spill] sm:$0xff] }
0x18d7   : > { %v7621_v7 = vadd.f32 %v7537_v42, %v14613_v54  ;;  %v7540_v59 = vadd.f32 %v8282_v14, %v14129_v1  ;;  %v14624_v54 = vld [vmem:[#allocation37_spill] sm:$0xff] }
0x18d9   : > { %7653 = vst [vmem:[%s14151_s26 + $0x70] sm:$0xff] %v7621_v7  ;;  %v7622_v45 = vadd.f32 %v7540_v59, %v14614_v60 }
0x18db   : > { %7654 = vst [vmem:[%s14151_s26 + $0x78] sm:$0xff] %v7622_v45 }
0x18fd   : > { %v8283_v26 = vpop.f32.mrb[0].mxu1 }
0x18fe   : > { %v8284_v36 = vpop.f32.mrb[1].mxu1 }
0x18ff   : > { %v8285_v29 = vadd.f32 %v8284_v36, %v8283_v26  ;;  %v8286_v13 = vpop.f32.mrb[2].mxu1 }
0x1900   : > { %v8287_v10 = vpop.f32.mrb[3].mxu1 }
0x1901   : > { %v7545_v40 = vadd.f32 %v8285_v29, %v14129_v1  ;;  %v8288_v0 = vadd.f32 %v8287_v10, %v8286_v13  ;;  %v14625_v10 = vld [vmem:[#allocation7_spill] sm:$0xff] }
0x1903   : > { %v7623_v3 = vadd.f32 %v7545_v40, %v14615_v28  ;;  %v7548_v25 = vadd.f32 %v8288_v0, %v14129_v1  ;;  %v14626_v28 = vld [vmem:[#allocation44_spill] sm:$0xff] }
0x1905   : > { %7655 = vst [vmem:[%s14151_s26 + $0x80] sm:$0xff] %v7623_v3  ;;  %v7624_v55 = vadd.f32 %v7548_v25, %v14616_v53  ;;  %v8289_v23 = vpop.f32.mrb[4].mxu1 }
0x1906   : > { %v8290_v43 = vpop.f32.mrb[5].mxu1 }
0x1907   : > { %7656 = vst [vmem:[%s14151_s26 + $0x88] sm:$0xff] %v7624_v55  ;;  %v8291_v35 = vadd.f32 %v8290_v43, %v8289_v23  ;;  %v8292_v20 = vpop.f32.mrb[6].mxu1 }
0x1908   : > { %v8293_v4 = vpop.f32.mrb[7].mxu1 }
0x1909   : > { %v7553_v47 = vadd.f32 %v8291_v35, %v14129_v1  ;;  %v8294_v52 = vadd.f32 %v8293_v4, %v8292_v20  ;;  %v14627_v4 = vld [vmem:[#allocation9_spill] sm:$0xff] }
0x190b   : > { %v7625_v61 = vadd.f32 %v7553_v47, %v14617_v62  ;;  %v7556_v44 = vadd.f32 %v8294_v52, %v14129_v1  ;;  %v14628_v62 = vld [vmem:[#allocation43_spill] sm:$0xff] }
0x190d   : > { %7657 = vst [vmem:[%s14151_s26 + $0x90] sm:$0xff] %v7625_v61  ;;  %v7626_v39 = vadd.f32 %v7556_v44, %v14618_v15 }
0x190f   : > { %7658 = vst [vmem:[%s14151_s26 + $0x98] sm:$0xff] %v7626_v39 }
0x1913   : > { %v8295_v57 = vpop.f32.mrb[8].mxu1 }
0x1914   : > { %v8296_v48 = vpop.f32.mrb[9].mxu1 }
0x1915   : > { %v8297_v12 = vadd.f32 %v8296_v48, %v8295_v57  ;;  %v8298_v31 = vpop.f32.mrb[10].mxu1 }
0x1916   : > { %v8299_v33 = vpop.f32.mrb[11].mxu1 }
0x1917   : > { %v7561_v38 = vadd.f32 %v8297_v12, %v14129_v1  ;;  %v8300_v32 = vadd.f32 %v8299_v33, %v8298_v31  ;;  %v14629_v33 = vld [vmem:[#allocation31_spill] sm:$0xff] }
0x1919   : > { %v7627_v34 = vadd.f32 %v7561_v38, %v14619_v49  ;;  %v7564_v5 = vadd.f32 %v8300_v32, %v14129_v1  ;;  %v14630_v49 = vld [vmem:[#allocation39_spill] sm:$0xff] }
0x191b   : > { %7659 = vst [vmem:[%s14151_s26 + $0xa0] sm:$0xff] %v7627_v34  ;;  %v7628_v41 = vadd.f32 %v7564_v5, %v14620_v8  ;;  %v8301_v21 = vpop.f32.mrb[12].mxu1 }
0x191c   : > { %v8302_v22 = vpop.f32.mrb[13].mxu1 }
0x191d   : > { %7660 = vst [vmem:[%s14151_s26 + $0xa8] sm:$0xff] %v7628_v41  ;;  %v8303_v24 = vadd.f32 %v8302_v22, %v8301_v21  ;;  %v8304_v2 = vpop.f32.mrb[14].mxu1 }
0x191e   : > { %v8305_v19 = vpop.f32.mrb[15].mxu1 }
0x191f   : > { %v7569_v9 = vadd.f32 %v8303_v24, %v14129_v1  ;;  %v8306_v11 = vadd.f32 %v8305_v19, %v8304_v2 }
0x1921   : > { %v7629_v17 = vadd.f32 %v7569_v9, %v14621_v30  ;;  %v7572_v46 = vadd.f32 %v8306_v11, %v14129_v1 }
0x1923   : > { %7661 = vst [vmem:[%s14151_s26 + $0xb0] sm:$0xff] %v7629_v17  ;;  %v7630_v27 = vadd.f32 %v7572_v46, %v14622_v18 }
0x1925   : > { %7662 = vst [vmem:[%s14151_s26 + $0xb8] sm:$0xff] %v7630_v27 }
0x1939   : > { %v8307_v6 = vpop.f32.mrb[16].mxu1 }
0x193a   : > { %v8308_v37 = vpop.f32.mrb[17].mxu1 }
0x193b   : > { %v8309_v16 = vadd.f32 %v8308_v37, %v8307_v6  ;;  %v8310_v63 = vpop.f32.mrb[18].mxu1 }
0x193c   : > { %v8311_v56 = vpop.f32.mrb[19].mxu1 }
0x193d   : > { %v7577_v51 = vadd.f32 %v8309_v16, %v14129_v1  ;;  %v8312_v58 = vadd.f32 %v8311_v56, %v8310_v63 }
0x193f   : > { %v7631_v42 = vadd.f32 %v7577_v51, %v14623_v50  ;;  %v7580_v14 = vadd.f32 %v8312_v58, %v14129_v1 }
0x1941   : > { %7663 = vst [vmem:[%s14151_s26 + $0xc0] sm:$0xff] %v7631_v42  ;;  %v7632_v7 = vadd.f32 %v7580_v14, %v14624_v54 }
0x1942   : > { %v8313_v59 = vpop.f32.mrb[20].mxu1 }
0x1943   : > { %v8314_v60 = vpop.f32.mrb[21].mxu1  ;;  %7664 = vst [vmem:[%s14151_s26 + $0xc8] sm:$0xff] %v7632_v7 }
0x1944   : > { %v8315_v45 = vadd.f32 %v8314_v60, %v8313_v59  ;;  %v8316_v26 = vpop.f32.mrb[22].mxu1 }
0x1945   : > { %v8317_v36 = vpop.f32.mrb[23].mxu1 }
0x1946   : > { %v7585_v29 = vadd.f32 %v8315_v45, %v14129_v1  ;;  %v8318_v13 = vadd.f32 %v8317_v36, %v8316_v26 }
0x1948   : > { %v7633_v40 = vadd.f32 %v7585_v29, %v14625_v10  ;;  %v7588_v0 = vadd.f32 %v8318_v13, %v14129_v1 }
0x194a   : > { %7665 = vst [vmem:[%s14151_s26 + $0xd0] sm:$0xff] %v7633_v40  ;;  %v7634_v3 = vadd.f32 %v7588_v0, %v14626_v28 }
0x194c   : > { %7666 = vst [vmem:[%s14151_s26 + $0xd8] sm:$0xff] %v7634_v3 }
0x1951   : > { %v8319_v25 = vpop.f32.mrb[24].mxu1 }
0x1952   : > { %v8320_v53 = vpop.f32.mrb[25].mxu1 }
0x1953   : > { %v8321_v55 = vadd.f32 %v8320_v53, %v8319_v25  ;;  %v8322_v23 = vpop.f32.mrb[26].mxu1 }
0x1954   : > { %v8323_v43 = vpop.f32.mrb[27].mxu1 }
0x1955   : > { %v7593_v35 = vadd.f32 %v8321_v55, %v14129_v1  ;;  %v8324_v20 = vadd.f32 %v8323_v43, %v8322_v23 }
0x1957   : > { %v7635_v47 = vadd.f32 %v7593_v35, %v14627_v4  ;;  %v7596_v52 = vadd.f32 %v8324_v20, %v14129_v1 }
0x1959   : > { %7667 = vst [vmem:[%s14151_s26 + $0xe0] sm:$0xff] %v7635_v47  ;;  %v7636_v61 = vadd.f32 %v7596_v52, %v14628_v62  ;;  %v8325_v44 = vpop.f32.mrb[28].mxu1 }
0x195a   : > { %v8326_v15 = vpop.f32.mrb[29].mxu1 }
0x195b   : > { %7668 = vst [vmem:[%s14151_s26 + $0xe8] sm:$0xff] %v7636_v61  ;;  %v8327_v39 = vadd.f32 %v8326_v15, %v8325_v44  ;;  %v8328_v57 = vpop.f32.mrb[30].mxu1 }
0x195c   : > { %v8329_v48 = vpop.f32.mrb[31].mxu1 }
0x195d   : > { %v7601_v12 = vadd.f32 %v8327_v39, %v14129_v1  ;;  %v8330_v31 = vadd.f32 %v8329_v48, %v8328_v57 }
0x195f   : > { %v7637_v38 = vadd.f32 %v7601_v12, %v14629_v33  ;;  %v7604_v32 = vadd.f32 %v8330_v31, %v14129_v1 }
0x1961   : > { %7669 = vst [vmem:[%s14151_s26 + $0xf0] sm:$0xff] %v7637_v38  ;;  %v7638_v34 = vadd.f32 %v7604_v32, %v14630_v49 }
0x1963   : > { %7670 = vst [vmem:[%s14151_s26 + $0xf8] sm:$0xff] %v7638_v34 }
0x1964   : > { %10063 = shalt.err (!%p10060_p3)
}
0x1965   : > { %s10064_s23 = scalar_lea.hbm %s14251_s19, 4096  ;;  %s10068_s26 = scalar_lea.hbm %s14309_s8, 8192 }
0x1966   : > { %p10065_p4 = scmp.ne.s32.totalorder %s14251_s19, %s10064_s23  ;;  %p10069_p9 = scmp.lt.u32.totalorder %s14251_s19, %s14309_s8 }
0x1967   : > { %p10070_p10 = scmp.lt.u32.totalorder %s10068_s26, %s10064_s23  ;;  %p10072_p12 = scmp.lt.u32.totalorder %s10064_s23, %s14251_s19 }
0x1968   : > { %p10066_p7 = pnand %p10065_p4, %p10204_p5 }
0x1969   : > { %p10071_p11 = por %p10070_p10, %p10069_p9 }
0x196a   : > { %p10067_p8 = pneg %p10066_p7 }
0x196b   : > { %p10073_p13 = por %p10072_p12, %p10071_p11 }
0x196d   : > { %p10074_p0 = pnand %p10073_p13, %p10067_p8 }
0x196f   : > { %10077 = shalt.err (!%p10074_p0)
}
0x1970   : > { %s10119_s22 = smov 128   ;;  %s10120_s12 = smov 8  }
0x1971   : > { %9003 = dma.vmem_to_hbm [thread:$0]  (%p10204_p5), %s14253_s17, 4096, %s14251_s19, %s14260_s9, %s10119_s22, %s10119_s22, %s10120_s12  }
0x1972 PF: > { %p9009_p1 = scmp.ge.s32.totalorder %s10112_s30, 2  ;;  %s7701_s13 = sand.u32 1, %s10100_s27  }
0x1973   : > { %s7702_s20 = scalar_lea.sflag [#allocation4], %s7701_s13 }
0x1974   : > { %p9006_p2 = pnand %p9009_p1, %p10208_p6 }
0x1976   : > { %10095 = dma.done.wait (!%p9006_p2), %s7702_s20, 4096  }
0x1977   : > { %10097 = vsyncadd (!%p9006_p2), %s7702_s20, 4294963200  ;;  %p18_p3 = scmp.ge.s32.totalorder %s10191_s11, 4   ;;  %s14631_s27 = smov %s10104_s28 }
0x1978   : > { %s14632_s28 = smov %s10108_s29  ;;  %s14633_s29 = smov %s10202_s14 }
0x1979   : > { %s14634_s30 = smov %s10191_s11  ;;  %20 = sbr.rel (!%p18_p3) target bundleno = 3 (0x3), region = 87 }
0x1980   :  { %7707 = vsyncpa [#allocation4], 1 }
0x1981   :  { %7709 = vsyncpa [#allocation4 + $0x1], 1 }

</bundles_post_ra>
